<compile_context>
chip_gen: v7x
topology: tpu7x:2x2x1
jax: 0.10.0
libtpu: 0.0.40
codegen_flags: <defaults>
</compile_context>

<pallas_src>
import jax
import jax.numpy as jnp
from jax.experimental import pallas as pl
from jax.experimental.pallas import tpu as pltpu


# ----------------------------------------------------------------------------
# Model constants implied by the module (Linear in_features = 512 * 151)
# ----------------------------------------------------------------------------
D_MODEL = 512
T_ENC = 151
D_IN = D_MODEL * T_ENC          # 77312
H1 = 256
H2 = 128
TK = 128 * T_ENC                # 19328 -- divides D_IN exactly (4 K tiles), no padding
N_K = D_IN // TK                # 4
VMEM_LIMIT = 40 * 1024 * 1024   # bf16 W1 tile ~9.5 MiB double-buffered + misc < 24 MiB


def _num_tensorcores():
    """2 TensorCores per chip on v7x; 1 on v5e/v6e. Host-side, trace-time."""
    try:
        kind = jax.devices()[0].device_kind.lower()
    except Exception:
        return 1
    return 2 if "7" in kind else 1


# ----------------------------------------------------------------------------
# Kernel 1: stereo downmix  mixed = (speech[:, 0, :] + speech[:, 1, :]) / 2
# Tiled over L (lane-dense blocks) so it streams at HBM roofline for long
# waveforms instead of pulling the whole (B, 2, L) array into VMEM at once.
# ----------------------------------------------------------------------------
def _stereo_mix_kernel(x_ref, o_ref):
    x = x_ref[...]                                # (B, 2, TL) in VMEM
    o_ref[...] = (x[:, 0, :] + x[:, 1, :]) * 0.5


def stereo_mix_pallas(speech, tl=32768):
    B, C, L = speech.shape
    if L % 128 != 0:
        # Fallback: single full block (only hit for tiny / odd lengths).
        return pl.pallas_call(
            _stereo_mix_kernel,
            out_shape=jax.ShapeDtypeStruct((B, L), speech.dtype),
        )(speech)
    tl = max(128, (min(tl, L) // 128) * 128)
    grid = (pl.cdiv(L, tl),)
    return pl.pallas_call(
        _stereo_mix_kernel,
        out_shape=jax.ShapeDtypeStruct((B, L), speech.dtype),
        grid=grid,
        in_specs=[pl.BlockSpec((B, C, tl), lambda i: (0, 0, i))],
        out_specs=pl.BlockSpec((B, tl), lambda i: (0, i)),
        compiler_params=pltpu.CompilerParams(
            dimension_semantics=("parallel",),
        ),
    )(speech)


# ----------------------------------------------------------------------------
# Predictor param prep (one-time, init-time layout work; not in the hot path):
# transpose to (in, out), W1 stored bf16 (halves the dominant HBM stream),
# lane-dense biases. No padding: TK divides D_IN exactly.
# ----------------------------------------------------------------------------
def prepare_predictor_params(p):
    return {
        "w1": jnp.transpose(p["w1"]).astype(jnp.bfloat16),    # (D_IN, 256) bf16
        "b1": p["b1"].reshape(1, H1).astype(jnp.float32),
        "w2": jnp.transpose(p["w2"]).astype(jnp.float32),     # (256, 128)
        "b2": p["b2"].reshape(1, H2).astype(jnp.float32),
        "w3": p["w3"].reshape(1, H2).astype(jnp.float32),     # row vector
        "b3": p["b3"].reshape(1, 1).astype(jnp.float32),
    }


def _predictor_cost(B, with_tail):
    flops = 2 * B * D_IN * H1
    trans = 0
    byts = D_IN * H1 * 2 + B * D_IN * 2 + B * H1 * 4
    if with_tail:
        flops += 2 * B * H1 * H2 + 2 * B * H2
        trans += B
        byts += (H1 * H2 + H1 + 2 * H2 + 1) * 4 + B * 4
    return pl.CostEstimate(flops=flops, transcendentals=trans, bytes_accessed=byts)


# ----------------------------------------------------------------------------
# Fused predictor (single TensorCore): grid=(N_K,) over the Linear-1 reduction
# axis; acc_ref (VMEM, f32) accumulates; the last grid step applies bias+ReLU,
# Linear-2+ReLU, Linear-3 (row-vector dot), Sigmoid and writes (B, 1) once.
# ----------------------------------------------------------------------------
def _predictor_fused_kernel(x_ref, w1_ref, b1_ref, w2_ref, b2_ref, w3_ref,
                            b3_ref, o_ref, acc_ref):
    k = pl.program_id(0)

    @pl.when(k == 0)
    def _init():
        acc_ref[...] = jnp.zeros_like(acc_ref)

    # bf16 x bf16 -> f32 accumulation on the MXU.
    acc_ref[...] += jnp.dot(x_ref[...], w1_ref[...],
                            preferred_element_type=jnp.float32)

    @pl.when(k == pl.num_programs(0) - 1)
    def _finalize():
        h1 = jnp.maximum(acc_ref[...] + b1_ref[...], 0.0)               # (B, 256)
        h2 = jnp.maximum(
            jnp.dot(h1, w2_ref[...], preferred_element_type=jnp.float32)
            + b2_ref[...], 0.0)                                         # (B, 128)
        logit = jnp.sum(h2 * w3_ref[...], axis=-1, keepdims=True) + b3_ref[...]
        o_ref[...] = (1.0 / (1.0 + jnp.exp(-logit))).astype(o_ref.dtype)


def predictor_pallas_fused(x_flat, pp):
    B = x_flat.shape[0]
    x = x_flat.astype(jnp.bfloat16)
    return pl.pallas_call(
        _predictor_fused_kernel,
        out_shape=jax.ShapeDtypeStruct((B, 1), jnp.float32),
        grid=(N_K,),
        in_specs=[
            pl.BlockSpec((B, TK), lambda k: (0, k)),       # x tile (streamed)
            pl.BlockSpec((TK, H1), lambda k: (k, 0)),      # W1 tile (streamed, bf16)
            pl.BlockSpec((1, H1), lambda k: (0, 0)),       # b1 (resident)
            pl.BlockSpec((H1, H2), lambda k: (0, 0)),      # W2 (resident)
            pl.BlockSpec((1, H2), lambda k: (0, 0)),       # b2 (resident)
            pl.BlockSpec((1, H2), lambda k: (0, 0)),       # W3 row (resident)
            pl.BlockSpec((1, 1), lambda k: (0, 0)),        # b3 (resident)
        ],
        out_specs=pl.BlockSpec((B, 1), lambda k: (0, 0)),
        scratch_shapes=[pltpu.VMEM((B, H1), jnp.float32)],
        compiler_params=pltpu.CompilerParams(
            dimension_semantics=("arbitrary",),            # reduction axis
            vmem_limit_bytes=VMEM_LIMIT,
        ),
        cost_estimate=_predictor_cost(B, with_tail=True),
    )(x, pp["w1"], pp["b1"], pp["w2"], pp["b2"], pp["w3"], pp["b3"])


# ----------------------------------------------------------------------------
# Split predictor (v7x, 2 TensorCores): leading "parallel" grid axis shards the
# W1/x stream over cores; each core accumulates its own (1, B, 256) partial
# directly in the resident output block. A tiny tail kernel then sums the
# partials and applies the rest of the MLP.
# ----------------------------------------------------------------------------
def _linear1_partials_kernel(x_ref, w1_ref, part_ref):
    @pl.when(pl.program_id(1) == 0)
    def _init():
        part_ref[...] = jnp.zeros_like(part_ref)
    part_ref[...] += jnp.dot(x_ref[...], w1_ref[...],
                             preferred_element_type=jnp.float32)[None]


def _mlp_tail_kernel(part_ref, b1_ref, w2_ref, b2_ref, w3_ref, b3_ref, o_ref):
    h1 = jnp.maximum(jnp.sum(part_ref[...], axis=0) + b1_ref[...], 0.0)  # (B, 256)
    h2 = jnp.maximum(
        jnp.dot(h1, w2_ref[...], preferred_element_type=jnp.float32)
        + b2_ref[...], 0.0)                                              # (B, 128)
    logit = jnp.sum(h2 * w3_ref[...], axis=-1, keepdims=True) + b3_ref[...]
    o_ref[...] = (1.0 / (1.0 + jnp.exp(-logit))).astype(o_ref.dtype)


def predictor_pallas_split(x_flat, pp, num_cores=2):
    B = x_flat.shape[0]
    assert N_K % num_cores == 0
    kk = N_K // num_cores
    x = x_flat.astype(jnp.bfloat16)
    partials = pl.pallas_call(
        _linear1_partials_kernel,
        out_shape=jax.ShapeDtypeStruct((num_cores, B, H1), jnp.float32),
        grid=(num_cores, kk),
        in_specs=[
            pl.BlockSpec((B, TK), lambda c, k: (0, c * kk + k)),
            pl.BlockSpec((TK, H1), lambda c, k: (c * kk + k, 0)),
        ],
        out_specs=pl.BlockSpec((1, B, H1), lambda c, k: (c, 0, 0)),
        compiler_params=pltpu.CompilerParams(
            dimension_semantics=("parallel", "arbitrary"),
            vmem_limit_bytes=VMEM_LIMIT,
        ),
        cost_estimate=_predictor_cost(B, with_tail=False),
    )(x, pp["w1"])
    # Tiny epilogue (everything VMEM-resident, single program).
    return pl.pallas_call(
        _mlp_tail_kernel,
        out_shape=jax.ShapeDtypeStruct((B, 1), jnp.float32),
    )(partials, pp["b1"], pp["w2"], pp["b2"], pp["w3"], pp["b3"])


# ----------------------------------------------------------------------------
# Module forward (MelMonoModel.forward)
# ----------------------------------------------------------------------------
def mel_mono_forward(speech_input, encoder_out, pp, num_cores=None):
    # mixed_speech = (speech_input[:, 0, :] + speech_input[:, 1, :]) / 2
    mixed_speech = stereo_mix_pallas(speech_input)
    # TODO(synk): self.logmel (nemo AudioToMelSpectrogramPreprocessor DSP frontend)
    #             is not translated to Pallas.
    # TODO(synk): self.conformer_encoder (pretrained Conformer) is not translated;
    #             `encoder_out` is a caller-supplied stand-in for
    #             conformer_encoder(logmel(mixed_speech)) of shape (B, 512, 151).
    B = encoder_out.shape[0]
    x = encoder_out.reshape(B, D_IN)          # .contiguous().view(-1, 512*151)
    nc = _num_tensorcores() if num_cores is None else num_cores
    if nc >= 2:
        pred = predictor_pallas_split(x, pp, num_cores=2)   # v7x: both TCs stream W1
    else:
        pred = predictor_pallas_fused(x, pp)                # v5e/v6e: single fused call
    # mixed_speech is returned so the downmix kernel stays live/testable; in the
    # original module it feeds the untranslated logmel frontend.
    return pred, mixed_speech


# ----------------------------------------------------------------------------
# References for correctness checking
# ----------------------------------------------------------------------------
def _ref_forward_f32(speech_input, encoder_out, p):
    hp = jax.lax.Precision.HIGHEST
    mixed = (speech_input[:, 0, :] + speech_input[:, 1, :]) * 0.5
    B = encoder_out.shape[0]
    x = encoder_out.reshape(B, D_IN)
    h1 = jnp.maximum(jnp.dot(x, p["w1"].T, precision=hp) + p["b1"], 0.0)
    h2 = jnp.maximum(jnp.dot(h1, p["w2"].T, precision=hp) + p["b2"], 0.0)
    logit = jnp.dot(h2, p["w3"].T, precision=hp) + p["b3"]
    return 1.0 / (1.0 + jnp.exp(-logit)), mixed


def _ref_forward_bf16aware(speech_input, encoder_out, p, pp):
    """Quantization-aware reference: same bf16 x / bf16 W1 inputs, f32 accumulation."""
    hp = jax.lax.Precision.HIGHEST
    mixed = (speech_input[:, 0, :] + speech_input[:, 1, :]) * 0.5
    B = encoder_out.shape[0]
    xb = encoder_out.reshape(B, D_IN).astype(jnp.bfloat16)
    h1 = jnp.maximum(
        jnp.dot(xb, pp["w1"], preferred_element_type=jnp.float32) + p["b1"], 0.0)
    h2 = jnp.maximum(jnp.dot(h1, p["w2"].T, precision=hp) + p["b2"], 0.0)
    logit = jnp.dot(h2, p["w3"].T, precision=hp) + p["b3"]
    return 1.0 / (1.0 + jnp.exp(-logit)), mixed


if __name__ == "__main__":
    key = jax.random.PRNGKey(0)
    B = 2
    L = 4096                     # small stand-in waveform length (multiple of 128)

    ks = jax.random.split(key, 10)
    speech_input = jax.random.normal(ks[0], (B, 2, L), jnp.float32)
    # synthetic stand-in for the (untranslated) conformer encoder output
    encoder_out = jax.random.normal(ks[1], (B, D_MODEL, T_ENC), jnp.float32)

    # Predictor params in PyTorch nn.Linear layout: weight (out, in), bias (out,)
    params = {
        "w1": 0.01 * jax.random.normal(ks[2], (H1, D_IN), jnp.float32),
        "b1": 0.05 * jax.random.normal(ks[3], (H1,), jnp.float32),
        "w2": 0.05 * jax.random.normal(ks[4], (H2, H1), jnp.float32),
        "b2": 0.05 * jax.random.normal(ks[5], (H2,), jnp.float32),
        "w3": 0.05 * jax.random.normal(ks[6], (1, H2), jnp.float32),
        "b3": 0.05 * jax.random.normal(ks[7], (1,), jnp.float32),
    }
    prepped = prepare_predictor_params(params)   # one-time layout prep (bf16 W1)

    # Auto path (fused on 1-TC chips, core-split on v7x).
    fwd = jax.jit(mel_mono_forward)
    pred, mixed = jax.block_until_ready(fwd(speech_input, encoder_out, prepped))
    assert pred.shape == (B, 1), pred.shape
    assert mixed.shape == (B, L), mixed.shape

    ref_pred_bf16, ref_mixed = _ref_forward_bf16aware(
        speech_input, encoder_out, params, prepped)
    ref_pred_f32, _ = _ref_forward_f32(speech_input, encoder_out, params)

    assert jnp.allclose(mixed, ref_mixed, rtol=1e-5, atol=1e-5), (
        float(jnp.max(jnp.abs(mixed - ref_mixed))))
    assert jnp.allclose(pred, ref_pred_bf16, rtol=2e-3, atol=2e-3), (
        float(jnp.max(jnp.abs(pred - ref_pred_bf16))))
    assert jnp.allclose(pred, ref_pred_f32, rtol=2e-2, atol=2e-2), (
        float(jnp.max(jnp.abs(pred - ref_pred_f32))))

    # Exercise both predictor paths explicitly (both are valid on any TPU gen;
    # the split path is simply serialized on 1-TC chips).
    x_flat = encoder_out.reshape(B, D_IN)
    pred_fused = jax.block_until_ready(
        jax.jit(predictor_pallas_fused)(x_flat, prepped))
    pred_split = jax.block_until_ready(
        jax.jit(lambda a, b: predictor_pallas_split(a, b, num_cores=2))(
            x_flat, prepped))
    assert jnp.allclose(pred_fused, ref_pred_bf16, rtol=2e-3, atol=2e-3), (
        float(jnp.max(jnp.abs(pred_fused - ref_pred_bf16))))
    assert jnp.allclose(pred_split, ref_pred_bf16, rtol=2e-3, atol=2e-3), (
        float(jnp.max(jnp.abs(pred_split - ref_pred_bf16))))

    # Exercise the tiled stereo-mix kernel with a real grid (4 blocks of 1024).
    mixed_tiled = jax.block_until_ready(
        jax.jit(lambda s: stereo_mix_pallas(s, tl=1024))(speech_input))
    assert jnp.allclose(mixed_tiled, ref_mixed, rtol=1e-5, atol=1e-5)

    print("KERNEL_OK")
</pallas_src>

<mosaic_0001>
module attributes {stable_mosaic.version = 11 : i64} {
  func.func @_predictor_fused_kernel(%arg0: i32, %arg1: memref<2x19328xbf16, #tpu.memory_space<vmem>>, %arg2: memref<19328x256xbf16, #tpu.memory_space<vmem>>, %arg3: memref<1x256xf32, #tpu.memory_space<vmem>>, %arg4: memref<256x128xf32, #tpu.memory_space<vmem>>, %arg5: memref<1x128xf32, #tpu.memory_space<vmem>>, %arg6: memref<1x128xf32, #tpu.memory_space<vmem>>, %arg7: memref<1x1xf32, #tpu.memory_space<vmem>>, %arg8: memref<2x1xf32, #tpu.memory_space<vmem>>, %arg9: memref<2x256xf32, #tpu.memory_space<vmem>>) attributes {dimension_semantics = [#tpu.dimension_semantics<arbitrary>], iteration_bounds = array<i64: 4>, scalar_prefetch = 0 : i64, scratch_operands = 1 : i64, tpu.core_type = #tpu.core_type<tc>, window_params = [{transform_indices = @transform_0, window_bounds = array<i64: 2, 19328>}, {transform_indices = @transform_1, window_bounds = array<i64: 19328, 256>}, {pipeline_mode = #tpu.pipeline_mode<synchronous>, transform_indices = @transform_2, window_bounds = array<i64: 1, 256>}, {pipeline_mode = #tpu.pipeline_mode<synchronous>, transform_indices = @transform_3, window_bounds = array<i64: 256, 128>}, {pipeline_mode = #tpu.pipeline_mode<synchronous>, transform_indices = @transform_4, window_bounds = array<i64: 1, 128>}, {pipeline_mode = #tpu.pipeline_mode<synchronous>, transform_indices = @transform_5, window_bounds = array<i64: 1, 128>}, {pipeline_mode = #tpu.pipeline_mode<synchronous>, transform_indices = @transform_6, window_bounds = array<i64: 1, 1>}, {pipeline_mode = #tpu.pipeline_mode<synchronous>, transform_indices = @transform_7, window_bounds = array<i64: 2, 1>}]} {
    %c0_i32 = arith.constant 0 : i32
    %0 = arith.cmpi eq, %arg0, %c0_i32 : i32
    %1 = arith.extui %0 : i1 to i32
    %c0_i32_0 = arith.constant 0 : i32
    %2 = arith.cmpi ne, %1, %c0_i32_0 : i32
    scf.if %2 {
      %cst_9 = arith.constant 0.000000e+00 : f32
      %12 = vector.broadcast %cst_9 : f32 to vector<2x256xf32>
      %c0_10 = arith.constant 0 : index
      %c0_11 = arith.constant 0 : index
      %13 = vector.load %arg9[%c0_10, %c0_11] : memref<2x256xf32, #tpu.memory_space<vmem>>, vector<2x256xf32>
      tpu.vector_store %arg9[%c0_10, %c0_11], %12 {strides = array<i32>} : memref<2x256xf32, #tpu.memory_space<vmem>>, vector<2x256xf32>,
    } else {
    }
    %c0 = arith.constant 0 : index
    %c0_1 = arith.constant 0 : index
    %3 = vector.load %arg9[%c0, %c0_1] : memref<2x256xf32, #tpu.memory_space<vmem>>, vector<2x256xf32>
    %c0_2 = arith.constant 0 : index
    %c0_3 = arith.constant 0 : index
    %4 = vector.load %arg1[%c0_2, %c0_3] : memref<2x19328xbf16, #tpu.memory_space<vmem>>, vector<2x19328xbf16>
    %c0_4 = arith.constant 0 : index
    %c0_5 = arith.constant 0 : index
    %5 = vector.load %arg2[%c0_4, %c0_5] : memref<19328x256xbf16, #tpu.memory_space<vmem>>, vector<19328x256xbf16>
    %cst = arith.constant dense<0.000000e+00> : vector<2x256xf32>
    %6 = tpu.matmul %4, %5, %cst {dimension_numbers = #tpu.dot_dimension_numbers<[1], [0], [0], [1], [0, 0, 1, 1], [], []>} : vector<2x19328xbf16>, vector<19328x256xbf16>, vector<2x256xf32> -> vector<2x256xf32>
    %7 = arith.addf %3, %6 : vector<2x256xf32>
    %c0_6 = arith.constant 0 : index
    %c0_7 = arith.constant 0 : index
    %8 = vector.load %arg9[%c0_6, %c0_7] : memref<2x256xf32, #tpu.memory_space<vmem>>, vector<2x256xf32>
    tpu.vector_store %arg9[%c0_6, %c0_7], %7 {strides = array<i32>} : memref<2x256xf32, #tpu.memory_space<vmem>>, vector<2x256xf32>,
    %c3_i32 = arith.constant 3 : i32
    %9 = arith.cmpi eq, %arg0, %c3_i32 : i32
    %10 = arith.extui %9 : i1 to i32
    %c0_i32_8 = arith.constant 0 : i32
    %11 = arith.cmpi ne, %10, %c0_i32_8 : i32
    scf.if %11 {
      %c0_9 = arith.constant 0 : index
      %c0_10 = arith.constant 0 : index
      %12 = vector.load %arg9[%c0_9, %c0_10] : memref<2x256xf32, #tpu.memory_space<vmem>>, vector<2x256xf32>
      %c0_11 = arith.constant 0 : index
      %c0_12 = arith.constant 0 : index
      %13 = vector.load %arg3[%c0_11, %c0_12] : memref<1x256xf32, #tpu.memory_space<vmem>>, vector<1x256xf32>
      %14 = vector.broadcast %13 : vector<1x256xf32> to vector<2x256xf32>
      %15 = arith.addf %12, %14 : vector<2x256xf32>
      %cst_13 = arith.constant 0.000000e+00 : f32
      %16 = vector.broadcast %cst_13 : f32 to vector<2x256xf32>
      %17 = arith.maximumf %15, %16 : vector<2x256xf32>
      %c0_14 = arith.constant 0 : index
      %c0_15 = arith.constant 0 : index
      %18 = vector.load %arg4[%c0_14, %c0_15] : memref<256x128xf32, #tpu.memory_space<vmem>>, vector<256x128xf32>
      %cst_16 = arith.constant dense<0.000000e+00> : vector<2x128xf32>
      %19 = tpu.matmul %17, %18, %cst_16 {dimension_numbers = #tpu.dot_dimension_numbers<[1], [0], [0], [1], [0, 0, 1, 1], [], []>} : vector<2x256xf32>, vector<256x128xf32>, vector<2x128xf32> -> vector<2x128xf32>
      %c0_17 = arith.constant 0 : index
      %c0_18 = arith.constant 0 : index
      %20 = vector.load %arg5[%c0_17, %c0_18] : memref<1x128xf32, #tpu.memory_space<vmem>>, vector<1x128xf32>
      %21 = vector.broadcast %20 : vector<1x128xf32> to vector<2x128xf32>
      %22 = arith.addf %19, %21 : vector<2x128xf32>
      %cst_19 = arith.constant 0.000000e+00 : f32
      %23 = vector.broadcast %cst_19 : f32 to vector<2x128xf32>
      %24 = arith.maximumf %22, %23 : vector<2x128xf32>
      %c0_20 = arith.constant 0 : index
      %c0_21 = arith.constant 0 : index
      %25 = vector.load %arg6[%c0_20, %c0_21] : memref<1x128xf32, #tpu.memory_space<vmem>>, vector<1x128xf32>
      %26 = vector.broadcast %25 : vector<1x128xf32> to vector<2x128xf32>
      %27 = arith.mulf %24, %26 : vector<2x128xf32>
      %cst_22 = arith.constant dense<0.000000e+00> : vector<2xf32>
      %28 = vector.multi_reduction <add>, %27, %cst_22 [1] : vector<2x128xf32> to vector<2xf32>
      %29 = vector.shape_cast %28 : vector<2xf32> to vector<2x1xf32>
      %c0_23 = arith.constant 0 : index
      %c0_24 = arith.constant 0 : index
      %30 = vector.load %arg7[%c0_23, %c0_24] : memref<1x1xf32, #tpu.memory_space<vmem>>, vector<1x1xf32>
      %31 = vector.broadcast %30 : vector<1x1xf32> to vector<2x1xf32>
      %32 = arith.addf %29, %31 : vector<2x1xf32>
      %cst_25 = arith.constant 0.000000e+00 : f32
      %33 = vector.broadcast %cst_25 : f32 to vector<2x1xf32>
      %34 = arith.subf %33, %32 : vector<2x1xf32>
      %35 = math.exp %34 : vector<2x1xf32>
      %cst_26 = arith.constant 1.000000e+00 : f32
      %36 = vector.broadcast %cst_26 : f32 to vector<2x1xf32>
      %37 = arith.addf %36, %35 : vector<2x1xf32>
      %cst_27 = arith.constant 1.000000e+00 : f32
      %38 = vector.broadcast %cst_27 : f32 to vector<2x1xf32>
      %39 = arith.divf %38, %37 : vector<2x1xf32>
      %c0_28 = arith.constant 0 : index
      %c0_29 = arith.constant 0 : index
      %40 = vector.load %arg8[%c0_28, %c0_29] : memref<2x1xf32, #tpu.memory_space<vmem>>, vector<2x1xf32>
      tpu.vector_store %arg8[%c0_28, %c0_29], %39 {strides = array<i32>} : memref<2x1xf32, #tpu.memory_space<vmem>>, vector<2x1xf32>,
    } else {
    }
    return
  }
  func.func @transform_0(%arg0: i32) -> (i32, i32) {
    %c0_i32 = arith.constant 0 : i32
    %c0_i32_0 = arith.constant 0 : i32
    return %c0_i32, %arg0 : i32, i32
  }
  func.func @transform_1(%arg0: i32) -> (i32, i32) {
    %c0_i32 = arith.constant 0 : i32
    %c0_i32_0 = arith.constant 0 : i32
    return %arg0, %c0_i32 : i32, i32
  }
  func.func @transform_2(%arg0: i32) -> (i32, i32) {
    %c0_i32 = arith.constant 0 : i32
    %c0_i32_0 = arith.constant 0 : i32
    %c0_i32_1 = arith.constant 0 : i32
    return %c0_i32, %c0_i32_0 : i32, i32
  }
  func.func @transform_3(%arg0: i32) -> (i32, i32) {
    %c0_i32 = arith.constant 0 : i32
    %c0_i32_0 = arith.constant 0 : i32
    %c0_i32_1 = arith.constant 0 : i32
    return %c0_i32, %c0_i32_0 : i32, i32
  }
  func.func @transform_4(%arg0: i32) -> (i32, i32) {
    %c0_i32 = arith.constant 0 : i32
    %c0_i32_0 = arith.constant 0 : i32
    %c0_i32_1 = arith.constant 0 : i32
    return %c0_i32, %c0_i32_0 : i32, i32
  }
  func.func @transform_5(%arg0: i32) -> (i32, i32) {
    %c0_i32 = arith.constant 0 : i32
    %c0_i32_0 = arith.constant 0 : i32
    %c0_i32_1 = arith.constant 0 : i32
    return %c0_i32, %c0_i32_0 : i32, i32
  }
  func.func @transform_6(%arg0: i32) -> (i32, i32) {
    %c0_i32 = arith.constant 0 : i32
    %c0_i32_0 = arith.constant 0 : i32
    %c0_i32_1 = arith.constant 0 : i32
    return %c0_i32, %c0_i32_0 : i32, i32
  }
  func.func @transform_7(%arg0: i32) -> (i32, i32) {
    %c0_i32 = arith.constant 0 : i32
    %c0_i32_0 = arith.constant 0 : i32
    %c0_i32_1 = arith.constant 0 : i32
    return %c0_i32, %c0_i32_0 : i32, i32
  }
}

module attributes {stable_mosaic.version = 11 : i64} {
  func.func @_stereo_mix_kernel(%arg0: i32, %arg1: memref<2x2x4096xf32, #tpu.memory_space<vmem>>, %arg2: memref<2x4096xf32, #tpu.memory_space<vmem>>) attributes {dimension_semantics = [#tpu.dimension_semantics<parallel>], iteration_bounds = array<i64: 1>, scalar_prefetch = 0 : i64, scratch_operands = 0 : i64, tpu.core_type = #tpu.core_type<tc>, window_params = [{transform_indices = @transform_0, window_bounds = array<i64: 2, 2, 4096>}, {transform_indices = @transform_1, window_bounds = array<i64: 2, 4096>}]} {
    %c0 = arith.constant 0 : index
    %c0_0 = arith.constant 0 : index
    %c0_1 = arith.constant 0 : index
    %0 = vector.load %arg1[%c0, %c0_0, %c0_1] : memref<2x2x4096xf32, #tpu.memory_space<vmem>>, vector<2x2x4096xf32>
    %1 = vector.extract_strided_slice %0 {offsets = [0, 0, 0], sizes = [2, 1, 4096], strides = [1, 1, 1]} : vector<2x2x4096xf32> to vector<2x1x4096xf32>
    %2 = vector.shape_cast %1 : vector<2x1x4096xf32> to vector<2x4096xf32>
    %3 = vector.extract_strided_slice %0 {offsets = [0, 1, 0], sizes = [2, 1, 4096], strides = [1, 1, 1]} : vector<2x2x4096xf32> to vector<2x1x4096xf32>
    %4 = vector.shape_cast %3 : vector<2x1x4096xf32> to vector<2x4096xf32>
    %5 = arith.addf %2, %4 : vector<2x4096xf32>
    %cst = arith.constant 5.000000e-01 : f32
    %6 = vector.broadcast %cst : f32 to vector<2x4096xf32>
    %7 = arith.mulf %5, %6 : vector<2x4096xf32>
    %c0_2 = arith.constant 0 : index
    %c0_3 = arith.constant 0 : index
    %8 = vector.load %arg2[%c0_2, %c0_3] : memref<2x4096xf32, #tpu.memory_space<vmem>>, vector<2x4096xf32>
    tpu.vector_store %arg2[%c0_2, %c0_3], %7 {strides = array<i32>} : memref<2x4096xf32, #tpu.memory_space<vmem>>, vector<2x4096xf32>,
    return
  }
  func.func @transform_0(%arg0: i32) -> (i32, i32, i32) {
    %c0_i32 = arith.constant 0 : i32
    %c0_i32_0 = arith.constant 0 : i32
    %c0_i32_1 = arith.constant 0 : i32
    return %c0_i32, %c0_i32_0, %arg0 : i32, i32, i32
  }
  func.func @transform_1(%arg0: i32) -> (i32, i32) {
    %c0_i32 = arith.constant 0 : i32
    %c0_i32_0 = arith.constant 0 : i32
    return %c0_i32, %arg0 : i32, i32
  }
}

</mosaic_0001>

<bundles_post_ra>
// kernel: mel_mono_forward.2
= control target key start
LH: loop header
LB: loop body
LE: loop exit
PB: predicated region body
PF: predicated region fallthrough
CT: control target
= control target key end

     0   :  { %vm142_vm0 = vcmask 1041409   ;;  %vm144_vm1 = vcmask 1043459   ;;  %vm146_vm2 = vcmask 1045509   ;;  %vm148_vm3 = vcmask 1047559   ;;  %s373_s0 = inlined_call_operand.vmem [shape: f32[2,2,4096], index: 0, kind: input, shape index: {}]   ;;  %s374_s1 = inlined_call_operand.hbm [shape: f32[2,4096], index: 1, kind: output, shape index: {}]  }
   0x1   :  { %v9_v0 = vld [vmem:[%s373_s0] sm:$0xff]  ;;  %v10_v4 = vld [vmem:[%s373_s0 + $0x8] sm:$0xff]  ;;  %v11_v6 = vld [vmem:[%s373_s0 + $0x10] sm:$0xff] }
   0x2   :  { %v17_v1 = vld [vmem:[%s373_s0 + $0x40] sm:$0xff]  ;;  %v229_v2 = vrot.slane %v9_v0, 9  ;;  %v18_v5 = vld [vmem:[%s373_s0 + $0x48] sm:$0xff]  ;;  %v230_v7 = vrot.slane %v10_v4, 9  ;;  %v19_v9 = vld [vmem:[%s373_s0 + $0x50] sm:$0xff]  ;;  %v231_v10 = vrot.slane %v11_v6, 9 }
   0x3   :  { %v237_v3 = vrot.slane %v17_v1, 9  ;;  %v238_v8 = vrot.slane %v18_v5, 9  ;;  %v12_v11 = vld [vmem:[%s373_s0 + $0x18] sm:$0xff]  ;;  %v239_v15 = vrot.slane %v19_v9, 9  ;;  %v13_v21 = vld [vmem:[%s373_s0 + $0x20] sm:$0xff]  ;;  %v14_v27 = vld [vmem:[%s373_s0 + $0x28] sm:$0xff] }
   0x4   :  { %v20_v12 = vld [vmem:[%s373_s0 + $0x58] sm:$0xff]  ;;  %v89_v13 = vadd.f32 %v229_v2, %v9_v0  ;;  %v232_v16 = vrot.slane %v12_v11, 9  ;;  %v90_v17 = vadd.f32 %v230_v7, %v10_v4  ;;  %v91_v19 = vadd.f32 %v231_v10, %v11_v6  ;;  %v21_v26 = vld [vmem:[%s373_s0 + $0x60] sm:$0xff] }
   0x5   :  { %v97_v14 = vadd.f32 %v237_v3, %v17_v1  ;;  %v98_v18 = vadd.f32 %v238_v8, %v18_v5  ;;  %v240_v20 = vrot.slane %v20_v12, 9  ;;  %v99_v24 = vadd.f32 %v239_v15, %v19_v9 }
   0x6   :  { %v105_v22 = vmul.f32 0.5, %v89_v13  ;;  %v92_v25 = vadd.f32 %v232_v16, %v12_v11 }
   0x7   :  { %v113_v23 = vmul.f32 0.5, %v97_v14 }
   0x8   :  { %6 = vsyncpa [#allocation3], 0  ;;  %v106_v28 = vmul.f32 0.5, %v90_v17  ;;  %v114_v29 = vmul.f32 0.5, %v98_v18  ;;  %v107_v30 = vmul.f32 0.5, %v91_v19  ;;  %v100_v31 = vadd.f32 %v240_v20, %v20_v12  ;;  %v22_v32 = vld [vmem:[%s373_s0 + $0x68] sm:$0xff] }
   0x9   :  { %v141_v33 = vrot.slane %v113_v23, 7  ;;  %v115_v34 = vmul.f32 0.5, %v99_v24  ;;  %v108_v35 = vmul.f32 0.5, %v92_v25  ;;  %v233_v36 = vrot.slane %v13_v21, 9  ;;  %v15_v57 = vld [vmem:[%s373_s0 + $0x30] sm:$0xff]  ;;  %v16_v63 = vld [vmem:[%s373_s0 + $0x38] sm:$0xff] }
   0xa   :  { %v152_v37 = vrot.slane %v114_v29, 7  ;;  %v116_v38 = vmul.f32 0.5, %v100_v31  ;;  %v241_v39 = vrot.slane %v21_v26, 9  ;;  %v234_v40 = vrot.slane %v14_v27, 9  ;;  %v23_v58 = vld [vmem:[%s373_s0 + $0x70] sm:$0xff]  ;;  %v24_v0 = vld [vmem:[%s373_s0 + $0x78] sm:$0xff] }
   0xb   :  { %v143_v41 = vsel %vm142_vm0, %v141_v33, %v105_v22  ;;  %v159_v42 = vrot.slane %v115_v34, 7  ;;  %v93_v43 = vadd.f32 %v233_v36, %v13_v21  ;;  %v242_v44 = vrot.slane %v22_v32, 9  ;;  %s270_s0 = smov [#allocation2]  }
   0xc   :  { %v145_v45 = vsel %vm144_vm1, %v141_v33, %v143_v41  ;;  %v153_v46 = vsel %vm142_vm0, %v152_v37, %v106_v28  ;;  %v166_v47 = vrot.slane %v116_v38, 7  ;;  %v101_v48 = vadd.f32 %v241_v39, %v21_v26  ;;  %s221_s9 = sshll.u32 %s270_s0, 4  ;;  %s222_s9 = int_to_ptr.vmem [resolvable:$true] %s221_s9 }
   0xd   :  { %v147_v49 = vsel %vm146_vm2, %v141_v33, %v145_v45  ;;  %v154_v50 = vsel %vm144_vm1, %v152_v37, %v153_v46  ;;  %v160_v51 = vsel %vm142_vm0, %v159_v42, %v107_v30  ;;  %v109_v52 = vmul.f32 0.5, %v93_v43  ;;  %s246_s10 = scalar_lea.vmem %s222_s9, 1024  ;;  %p251_p1 = scmp.lt.s32.totalorder %s222_s9, %s222_s9 }
   0xe   :  { %v149_v53 = vsel %vm148_vm3, %v141_v33, %v147_v49  ;;  %v155_v54 = vsel %vm146_vm2, %v152_v37, %v154_v50  ;;  %v161_v55 = vsel %vm144_vm1, %v159_v42, %v160_v51  ;;  %v167_v56 = vsel %vm142_vm0, %v166_v47, %v108_v35  ;;  %p247_p0 = scmp.ne.s32.totalorder %s222_s9, %s246_s10  ;;  %p252_p2 = scmp.lt.s32.totalorder %s246_s10, %s246_s10 }
   0xf   :  { %207 = vst [vmem:[#allocation2] sm:$0xff] %v149_v53  ;;  %v156_v59 = vsel %vm148_vm3, %v152_v37, %v155_v54  ;;  %v162_v60 = vsel %vm146_vm2, %v159_v42, %v161_v55  ;;  %v168_v61 = vsel %vm144_vm1, %v166_v47, %v167_v56  ;;  %v117_v62 = vmul.f32 0.5, %v101_v48 }
  0x10   :  { %208 = vst [vmem:[#allocation2 + $0x8] sm:$0xff] %v156_v59  ;;  %v163_v1 = vsel %vm148_vm3, %v159_v42, %v162_v60  ;;  %v169_v2 = vsel %vm146_vm2, %v166_v47, %v168_v61  ;;  %v94_v3 = vadd.f32 %v234_v40, %v14_v27  ;;  %v102_v4 = vadd.f32 %v242_v44, %v22_v32  ;;  %p253_p3 = por %p252_p2, %p251_p1 }
  0x11   :  { %209 = vst [vmem:[#allocation2 + $0x10] sm:$0xff] %v163_v1  ;;  %v170_v5 = vsel %vm148_vm3, %v166_v47, %v169_v2  ;;  %v173_v6 = vrot.slane %v117_v62, 7  ;;  %v235_v7 = vrot.slane %v15_v57, 9  ;;  %v243_v8 = vrot.slane %v23_v58, 9 }
  0x12   :  { %210 = vst [vmem:[#allocation2 + $0x18] sm:$0xff] %v170_v5  ;;  %v110_v9 = vmul.f32 0.5, %v94_v3  ;;  %v118_v10 = vmul.f32 0.5, %v102_v4  ;;  %v236_v11 = vrot.slane %v16_v63, 9  ;;  %v244_v12 = vrot.slane %v24_v0, 9  ;;  %p254_p4 = pnand %p253_p3, %p247_p0 }
  0x13   :  { %v174_v13 = vsel %vm142_vm0, %v173_v6, %v109_v52  ;;  %v95_v14 = vadd.f32 %v235_v7, %v15_v57  ;;  %v103_v15 = vadd.f32 %v243_v8, %v23_v58 }
  0x14   :  { %v175_v16 = vsel %vm144_vm1, %v173_v6, %v174_v13  ;;  %v180_v17 = vrot.slane %v118_v10, 7  ;;  %v96_v18 = vadd.f32 %v236_v11, %v16_v63  ;;  %v104_v19 = vadd.f32 %v244_v12, %v24_v0 }
  0x15   :  { %v176_v20 = vsel %vm146_vm2, %v173_v6, %v175_v16  ;;  %v111_v21 = vmul.f32 0.5, %v95_v14  ;;  %v119_v22 = vmul.f32 0.5, %v103_v15 }
  0x16   :  { %v177_v23 = vsel %vm148_vm3, %v173_v6, %v176_v20  ;;  %v181_v24 = vsel %vm142_vm0, %v180_v17, %v110_v9  ;;  %v112_v25 = vmul.f32 0.5, %v96_v18  ;;  %v120_v26 = vmul.f32 0.5, %v104_v19 }
  0x17   :  { %211 = vst [vmem:[#allocation2 + $0x20] sm:$0xff] %v177_v23  ;;  %v182_v27 = vsel %vm144_vm1, %v180_v17, %v181_v24  ;;  %v187_v28 = vrot.slane %v119_v22, 7 }
  0x18   :  { %v183_v29 = vsel %vm146_vm2, %v180_v17, %v182_v27  ;;  %v194_v30 = vrot.slane %v120_v26, 7 }
  0x19   :  { %v184_v31 = vsel %vm148_vm3, %v180_v17, %v183_v29  ;;  %v188_v32 = vsel %vm142_vm0, %v187_v28, %v111_v21 }
  0x1a   :  { %212 = vst [vmem:[#allocation2 + $0x28] sm:$0xff] %v184_v31  ;;  %v189_v33 = vsel %vm144_vm1, %v187_v28, %v188_v32  ;;  %v195_v34 = vsel %vm142_vm0, %v194_v30, %v112_v25 }
  0x1b   :  { %v190_v35 = vsel %vm146_vm2, %v187_v28, %v189_v33  ;;  %v196_v36 = vsel %vm144_vm1, %v194_v30, %v195_v34 }
  0x1c   :  { %v191_v37 = vsel %vm148_vm3, %v187_v28, %v190_v35  ;;  %v197_v38 = vsel %vm146_vm2, %v194_v30, %v196_v36 }
  0x1d   :  { %213 = vst [vmem:[#allocation2 + $0x30] sm:$0xff] %v191_v37  ;;  %v198_v39 = vsel %vm148_vm3, %v194_v30, %v197_v38 }
  0x1e   :  { %214 = vst [vmem:[#allocation2 + $0x38] sm:$0xff] %v198_v39 }
  0x1f   :  { %257 = shalt.err (!%p254_p4)
}
  0x20   :  { %s258_s13 = scalar_lea.hbm %s374_s1, 1024 }
  0x21   :  { %p259_p5 = scmp.ne.s32.totalorder %s374_s1, %s258_s13  ;;  %p262_p6 = scmp.lt.u32.totalorder %s258_s13, %s374_s1 }
  0x23   :  { %p264_p7 = pnand %p262_p6, %p259_p5 }
  0x25   :  { %267 = shalt.err (!%p264_p7)
}
  0x26   :  { %224 = dma.vmem_to_hbm [thread:$0]  %s222_s9, 1024, %s374_s1, [#allocation3]  }
  0x27   :  { %268 = dma.done.wait [#allocation3], 1024  }
  0x28   :  { %269 = vsyncadd [#allocation3], 4294966272 }
  0x29   :  { %228 = vsyncpa [#allocation3], 1 }

// kernel: mel_mono_forward.3
= control target key start
LH: loop header
LB: loop body
LE: loop exit
PB: predicated region body
PF: predicated region fallthrough
CT: control target
= control target key end

     0   :  { %s29565_s0 = inlined_call_operand.vmem [shape: bf16[2,77312], index: 0, kind: input, shape index: {}]   ;;  %s29566_s1 = inlined_call_operand.hbm [shape: bf16[77312,256], index: 1, kind: input, shape index: {}]   ;;  %s29567_s2 = inlined_call_operand.hbm [shape: f32[1,256], index: 2, kind: input, shape index: {}]   ;;  %s29568_s3 = inlined_call_operand.hbm [shape: f32[256,128], index: 3, kind: input, shape index: {}]   ;;  %s29569_s4 = inlined_call_operand.hbm [shape: f32[1,128], index: 4, kind: input, shape index: {}]   ;;  %s29570_s5 = inlined_call_operand.hbm [shape: f32[1,128], index: 5, kind: input, shape index: {}]   ;;  %s29571_s6 = inlined_call_operand.<no memory space> [shape: f32[1,1], index: 6, kind: input, shape index: {}]   ;;  %s29572_s7 = inlined_call_operand.vmem [shape: f32[2,1], index: 7, kind: output, shape index: {}]  }
   0x1   :  { %v12_v0 = vstv %s29571_s6 }
   0x2   :  { %13 = vst [vmem:[#allocation3] sm:$0x1] %v12_v0 }
   0x3   :  { %14 = vsyncpa [#allocation5], 0 }
   0x4   :  { %16 = vsyncpa [#allocation5 + $0x1], 0 }
   0x5   :  { %17 = vsyncpa [#allocation7], 0 }
   0x6   :  { %18 = vsyncpa [#allocation10], 0  ;;  %s26169_s26 = smov 0   ;;  %s26171_s27 = smov 0  }
   0x7   :  { %s26173_s28 = smov 0   ;;  %s26175_s29 = smov 0  }
   0x8 LB: > { %s26188_s6 = sadd.s32 4294967295, %s26113_s29   ;;  %p70_p0 = scmp.ne.s32.totalorder %s26105_s27, %s26101_s26  ;;  %s26113_s29 = sphi %s26175_s29, %s29591_s29   ;;  %s26109_s28 = sphi %s26173_s28, %s29590_s28   ;;  %s26105_s27 = sphi %s26171_s27, %s29589_s27   ;;  %s26101_s26 = sphi %s26169_s26, %s29588_s26  }
   0x9   : > { %p29573_p1 = scmp.eq.s32.totalorder %s26188_s6, 0  ;;  %p19372_p2 = scmp.ge.s32.totalorder %s26113_s29, 1 }
   0xa   : > { %p207_p3 = scmp.lt.s32.totalorder %s26113_s29, 5  ;;  %s26115_s9 = smov [#allocation6]  }
   0xb   : > { %p26197_p5 = por %p29573_p1, %p70_p0  ;;  %s220_s10 = sshll.u32 %s26115_s9, 4  ;;  %s221_s10 = int_to_ptr.vmem [resolvable:$true] %s220_s10 }
   0xc   : > { %p26201_p6 = pnand %p19372_p2, %p207_p3  ;;  %s26116_s11 = smov [#allocation9]  }
   0xd   : > { %s29576_s30 = scalar_select %p26197_p5, 1, 0 }
   0xe   : > { %s29577_s8 = scalar_select %p26201_p6, 1, 0 }
   0xf   : > { %p22196_p7 = pneg %p26201_p6  ;;  %s244_s12 = sshll.u32 %s26116_s11, 4  ;;  %s26213_s12 = int_to_ptr.vmem [resolvable:$true] %s244_s12 }
  0x10   : > { %s26117_s14 = smov [#allocation8]   ;;  %s25929_s18 = scalar_lea.hbm %s29567_s2, 32 }
  0x11   : > { %p26209_p8 = pnand %p22196_p7, %p29573_p1  ;;  %s230_s15 = sshll.u32 %s26117_s14, 4  ;;  %s26215_s15 = int_to_ptr.vmem [resolvable:$true] %s230_s15 }
  0x12   : > { %p25930_p9 = scmp.ne.s32.totalorder %s29567_s2, %s25929_s18  ;;  %p25936_p13 = scmp.lt.u32.totalorder %s25929_s18, %s29567_s2 }
  0x13   : > { %p26225_p10 = pneg %p26209_p8 }
  0x15   : > { %p25932_p11 = pnand %p26225_p10, %p25930_p9 }
  0x17   : > { %p25933_p12 = pneg %p25932_p11 }
  0x19   : > { %p25938_p0 = pnand %p25936_p13, %p25933_p12 }
  0x1b   : > { %25941 = shalt.err (!%p25938_p0)
}
  0x1c   : > { %s25942_s24 = scalar_lea.vmem %s221_s10, 32  ;;  %p25950_p4 = scmp.lt.s32.totalorder %s221_s10, %s221_s10 }
  0x1d   : > { %p25943_p2 = scmp.ne.s32.totalorder %s221_s10, %s25942_s24  ;;  %p25951_p1 = scmp.lt.s32.totalorder %s25942_s24, %s25942_s24 }
  0x1f   : > { %p25945_p3 = pnand %p25943_p2, %p26225_p10  ;;  %p25952_p5 = por %p25951_p1, %p25950_p4 }
  0x21   : > { %p25946_p7 = pneg %p25945_p3 }
  0x23   : > { %p25953_p6 = pnand %p25952_p5, %p25946_p7 }
  0x25   : > { %25956 = shalt.err (!%p25953_p6)
}
  0x26   : > { %22199 = dma.hbm_to_vmem [thread:$0]  (!%p26209_p8), %s29567_s2, 32, %s221_s10, [#allocation7]  }
  0x27   : > { %s25957_s14 = scalar_lea.hbm %s29569_s4, 16 }
  0x28   : > { %p25958_p9 = scmp.ne.s32.totalorder %s29569_s4, %s25957_s14  ;;  %p25964_p4 = scmp.lt.u32.totalorder %s25957_s14, %s29569_s4 }
  0x2a   : > { %p25960_p11 = pnand %p25958_p9, %p26225_p10 }
  0x2c   : > { %p25961_p1 = pneg %p25960_p11 }
  0x2e   : > { %p25966_p5 = pnand %p25964_p4, %p25961_p1 }
  0x30   : > { %25969 = shalt.err (!%p25966_p5)
}
  0x31   : > { %s25970_s10 = scalar_lea.vmem %s26213_s12, 16  ;;  %s25977_s20 = scalar_lea.vmem %s26213_s12, 32 }
  0x32   : > { %p25971_p6 = scmp.ne.s32.totalorder %s26213_s12, %s25970_s10  ;;  %p25978_p0 = scmp.lt.s32.totalorder %s26213_s12, %s26213_s12 }
  0x33   : > { %p25979_p2 = scmp.lt.s32.totalorder %s25977_s20, %s25970_s10 }
  0x34   : > { %p25973_p12 = pnand %p25971_p6, %p26225_p10 }
  0x35   : > { %p25980_p3 = por %p25979_p2, %p25978_p0 }
  0x36   : > { %p25974_p13 = pneg %p25973_p12 }
  0x38   : > { %p25981_p7 = pnand %p25980_p3, %p25974_p13 }
  0x3a   : > { %25984 = shalt.err (!%p25981_p7)
}
  0x3b   : > { %22205 = dma.hbm_to_vmem [thread:$0]  (!%p26209_p8), %s29569_s4, 16, %s26213_s12, [#allocation10]  }
  0x3c   : > { %s25985_s26 = scalar_lea.hbm %s29568_s3, 4096 }
  0x3d   : > { %p25986_p9 = scmp.ne.s32.totalorder %s29568_s3, %s25985_s26  ;;  %p25992_p4 = scmp.lt.u32.totalorder %s25985_s26, %s29568_s3 }
  0x3f   : > { %p25988_p11 = pnand %p25986_p9, %p26225_p10 }
  0x41   : > { %p25989_p1 = pneg %p25988_p11 }
  0x43   : > { %p25994_p5 = pnand %p25992_p4, %p25989_p1 }
  0x45   : > { %25997 = shalt.err (!%p25994_p5)
}
  0x46   : > { %s25998_s12 = scalar_lea.vmem %s26215_s15, 4096  ;;  %p26006_p0 = scmp.lt.s32.totalorder %s26215_s15, %s26215_s15 }
  0x47   : > { %p25999_p6 = scmp.ne.s32.totalorder %s26215_s15, %s25998_s12  ;;  %p26007_p2 = scmp.lt.s32.totalorder %s25998_s12, %s25998_s12 }
  0x49   : > { %p26001_p12 = pnand %p25999_p6, %p26225_p10  ;;  %p26008_p3 = por %p26007_p2, %p26006_p0 }
  0x4b   : > { %p26002_p13 = pneg %p26001_p12 }
  0x4d   : > { %p26009_p7 = pnand %p26008_p3, %p26002_p13 }
  0x4f   : > { %26012 = shalt.err (!%p26009_p7)
}
  0x50   : > { %s26118_s17 = smov 128   ;;  %s26119_s18 = smov 8  }
  0x51   : > { %22202 = dma.hbm_to_vmem [thread:$0]  (!%p26209_p8), %s29568_s3, 4096, %s26215_s15, [#allocation7], %s26118_s17, %s26118_s17, %s26119_s18  }
  0x52   : > { %s26120_s20 = smov [#allocation11]   ;;  %s26013_s25 = scalar_lea.hbm %s29570_s5, 16 }
  0x53   : > { %s255_s22 = sshll.u32 %s26120_s20, 4  ;;  %p26014_p9 = scmp.ne.s32.totalorder %s29570_s5, %s26013_s25  ;;  %s256_s22 = int_to_ptr.vmem [resolvable:$true] %s255_s22 }
  0x54   : > { %p26020_p4 = scmp.lt.u32.totalorder %s26013_s25, %s29570_s5 }
  0x55   : > { %p26016_p11 = pnand %p26014_p9, %p26225_p10 }
  0x57   : > { %p26017_p1 = pneg %p26016_p11 }
  0x59   : > { %p26022_p5 = pnand %p26020_p4, %p26017_p1 }
  0x5b   : > { %26025 = shalt.err (!%p26022_p5)
}
  0x5c   : > { %s26026_s15 = scalar_lea.vmem %s256_s22, 16  ;;  %s26033_s16 = scalar_lea.vmem %s256_s22, 32 }
  0x5d   : > { %p26027_p6 = scmp.ne.s32.totalorder %s256_s22, %s26026_s15  ;;  %p26034_p0 = scmp.lt.s32.totalorder %s256_s22, %s256_s22 }
  0x5e   : > { %p26035_p2 = scmp.lt.s32.totalorder %s26033_s16, %s26026_s15 }
  0x5f   : > { %p26029_p12 = pnand %p26027_p6, %p26225_p10 }
  0x60   : > { %p26036_p3 = por %p26035_p2, %p26034_p0 }
  0x61   : > { %p26030_p13 = pneg %p26029_p12 }
  0x63   : > { %p26037_p7 = pnand %p26036_p3, %p26030_p13 }
  0x65   : > { %26040 = shalt.err (!%p26037_p7)
}
  0x66   : > { %22208 = dma.hbm_to_vmem [thread:$0]  (!%p26209_p8), %s29570_s5, 16, %s256_s22, [#allocation10]  }
  0x67   : > { %s26310_s21 = sadd.s32 1, %s26113_s29   ;;  %s57_s10 = sadd.s32 1, %s26109_s28 }
  0x68   : > { %s54_s20 = ssub.s32 %s26113_s29, %s26310_s21  ;;  %p64_p10 = scmp.ne.s32.totalorder %s26109_s28, %s26105_s27 }
  0x69   : > { %p55_p9 = scmp.eq.s32.totalorder %s54_s20, 0  ;;  %p65_p11 = scmp.eq.s32.totalorder %s26113_s29, 0 }
  0x6a   : > { %p22217_p1 = scmp.lt.s32.totalorder %s26113_s29, 4  ;;  %s277_s13 = sand.u32 1, %s26109_s28  }
  0x6b   : > { %s26321_s23 = scalar_select %p55_p9, %s26109_s28, %s57_s10  }
  0x6c   : > { %p66_p4 = por %p65_p11, %p64_p10  ;;  %s22176_s24 = smul.u32 19328, %s277_s13 }
  0x6d   : > { %s21810_s25 = smul.u32 309248, %s26113_s29  ;;  %s26335_s29 = scalar_lea.sflag [#allocation5], %s277_s13 }
  0x6e   : > { %p26324_p5 = pnand %p22217_p1, %p66_p4  ;;  %s281_s14 = scalar_lea.vmem [#allocation4], %s22176_s24 }
  0x6f   : > { %s26331_s11 = scalar_lea.hbm %s29566_s1, %s21810_s25  ;;  %s289_s15 = sshll.u32 %s281_s14, 4  ;;  %s26333_s15 = int_to_ptr.vmem [resolvable:$true] %s289_s15 }
  0x70   : > { %s26041_s16 = scalar_lea.hbm %s26331_s11, 309248  ;;  %p26043_p6 = pneg %p26324_p5 }
  0x71   : > { %p26042_p8 = scmp.ne.s32.totalorder %s26331_s11, %s26041_s16  ;;  %s26046_s10 = scalar_lea.hbm %s29566_s1, 1236992 }
  0x72   : > { %p26047_p0 = scmp.lt.u32.totalorder %s26331_s11, %s29566_s1  ;;  %p26048_p2 = scmp.lt.u32.totalorder %s26046_s10, %s26041_s16 }
  0x73   : > { %p26044_p12 = pnand %p26043_p6, %p26042_p8  ;;  %p26050_p7 = scmp.lt.u32.totalorder %s26041_s16, %s26331_s11 }
  0x74   : > { %p26049_p3 = por %p26048_p2, %p26047_p0 }
  0x75   : > { %p26045_p13 = pneg %p26044_p12 }
  0x76   : > { %p26051_p10 = por %p26050_p7, %p26049_p3 }
  0x78   : > { %p26052_p9 = pnand %p26051_p10, %p26045_p13 }
  0x7a   : > { %26055 = shalt.err (!%p26052_p9)
}
  0x7b   : > { %s26056_s13 = scalar_lea.vmem %s26333_s15, 309248  ;;  %s26121_s24 = smov [#allocation4]  }
  0x7c   : > { %p26057_p11 = scmp.ne.s32.totalorder %s26333_s15, %s26056_s13  ;;  %s26061_s22 = sshll.u32 %s26121_s24, 4  ;;  %s26062_s22 = int_to_ptr.vmem [resolvable:$false] %s26061_s22 }
  0x7d   : > { %s26063_s9 = scalar_lea.vmem %s26062_s22, 618496  ;;  %p26064_p8 = scmp.lt.s32.totalorder %s26333_s15, %s26062_s22 }
  0x7e   : > { %p26059_p1 = pnand %p26057_p11, %p26043_p6  ;;  %p26065_p12 = scmp.lt.s32.totalorder %s26063_s9, %s26056_s13 }
  0x80   : > { %p26060_p4 = pneg %p26059_p1  ;;  %p26066_p0 = por %p26065_p12, %p26064_p8 }
  0x82   : > { %p26067_p2 = pnand %p26066_p0, %p26060_p4 }
  0x84   : > { %26070 = shalt.err (!%p26067_p2)
}
  0x85   : > { %22212 = dma.hbm_to_vmem [thread:$0]  (!%p26324_p5), %s26331_s11, 309248, %s26333_s15, %s26335_s29, %s26118_s17, %s26118_s17, %s26119_s18  }
  0x86   : > { %p29581_p6 = scmp.ne.s32.totalorder %s29577_s8, 0 }
  0x87   : > { %s303_s14 = sand.u32 (!%p29581_p6), 1, %s26105_s27   ;;  %p29582_p13 = scmp.ne.s32.totalorder (!%p29581_p6), %s29576_s30, 0 }
  0x88   : > { %301 = sbr.rel (%p29581_p6) target bundleno = 3225 (0xc99), region = 48  ;;  %s304_s12 = scalar_lea.sflag (!%p29581_p6), [#allocation5], %s303_s14 }
  0x89   : > { %s22177_s16 = smul.u32 (!%p29581_p6), 19328, %s303_s14 }
  0x8b   : > { %s26369_s19 = scalar_lea.vmem (!%p29581_p6), [#allocation4], %s22177_s16 }
  0x8f   : > { %26088 = dma.done.wait (%p29582_p13), %s304_s12, 309248  }
  0x90   : > { %26090 = vsyncadd (%p29582_p13), %s304_s12, 4294658048  ;;  %p29583_p3 = scmp.eq.s32.totalorder %s26188_s6, 0 }
  0x92   : > { %26092 = dma.done.wait (%p29583_p3), [#allocation7], 4128   ;;  %p29584_p5 = pmov %p29583_p3 }
  0x93   : > { %p29585_p7 = pmov %p29583_p3 }
  0x94   : > { %26094 = vsyncadd (%p29584_p5), [#allocation7], 4294963168 }
  0x95   : > { %26096 = dma.done.wait (%p29585_p7), [#allocation10], 32   ;;  %p29586_p10 = pmov %p29583_p3 }
  0x96   : > { %s353_s8 = smul.u32 151, %s26188_s6  ;;  %p29587_p11 = scmp.ne.s32.totalorder %s26188_s6, 0 }
  0x97   : > { %26098 = vsyncadd (%p29586_p10), [#allocation10], 4294967264  ;;  %v26122_v1 = vmov (!%p29587_p11), 0.0  }
  0x98   : > { %p354_p9 = scmp.lt.s32.totalorder %s353_s8, 603  ;;  %363 = sbr.rel (%p29587_p11) target bundleno = 159 (0x9f), region = 72  ;;  %364 = vst [vmem:[#allocation2] sm:$0xf] (!%p29587_p11), %v26122_v1 }
  0x9a   : > { %s29593_s8 = smov (!%p354_p9, %s353_s8), 603 }
  0x9b   : > { %s26387_s30 = scalar_lea.vmem %s29565_s0, %s29593_s8 }
  0x9f PF: > { %v22264_v2 = vld [vmem:[%s26369_s19 + $0x4] ss:$8 sps:$4 sm:$0xff]   ;;  %v22268_v4 = vld [vmem:[%s26369_s19] ss:$8 sps:$4 sm:$0xff]   ;;  %v22270_v6 = vld [vmem:[%s26369_s19 + $0x14] ss:$8 sps:$4 sm:$0xff]   ;;  %v2824_v40 = vlaneseq }
  0xa0   : > { %v22266_v3 = vld [vmem:[%s26369_s19 + $0x2604] ss:$8 sps:$4 sm:$0xff]   ;;  %15981 = vmatprep.subr.bf16.mxu1 %v22264_v2  ;;  %v22269_v5 = vld [vmem:[%s26369_s19 + $0x2600] ss:$8 sps:$4 sm:$0xff]   ;;  %v22272_v7 = vld [vmem:[%s26369_s19 + $0x2614] ss:$8 sps:$4 sm:$0xff]  }
  0xa1   : > { %17539 = vmatprep.subr.bf16.mxu0 %v22266_v3  ;;  %15982 = vmatpush1.bf16.msra.mxu1 %v22268_v4  ;;  %v22274_v8 = vld [vmem:[%s26369_s19 + $0x10] ss:$8 sps:$4 sm:$0xff]   ;;  %v22276_v10 = vld [vmem:[%s26369_s19 + $0x24] ss:$8 sps:$4 sm:$0xff]   ;;  %v22280_v12 = vld [vmem:[%s26369_s19 + $0x20] ss:$8 sps:$4 sm:$0xff]  }
  0xa2   : > { %17540 = vmatpush1.bf16.msra.mxu0 %v22269_v5  ;;  %15983 = vmatprep.subr.bf16.mxu1 %v22270_v6  ;;  %v22275_v9 = vld [vmem:[%s26369_s19 + $0x2610] ss:$8 sps:$4 sm:$0xff]   ;;  %v22278_v11 = vld [vmem:[%s26369_s19 + $0x2624] ss:$8 sps:$4 sm:$0xff]   ;;  %v22281_v13 = vld [vmem:[%s26369_s19 + $0x2620] ss:$8 sps:$4 sm:$0xff]  }
  0xa3   : > { %17541 = vmatprep.subr.bf16.mxu0 %v22272_v7  ;;  %v22282_v14 = vld [vmem:[%s26369_s19 + $0x34] ss:$8 sps:$4 sm:$0xff]   ;;  %v22286_v16 = vld [vmem:[%s26369_s19 + $0x30] ss:$8 sps:$4 sm:$0xff]   ;;  %v22288_v18 = vld [vmem:[%s26369_s19 + $0x44] ss:$8 sps:$4 sm:$0xff]  }
  0xa4   : > { %v22284_v15 = vld [vmem:[%s26369_s19 + $0x2634] ss:$8 sps:$4 sm:$0xff]   ;;  %v22287_v17 = vld [vmem:[%s26369_s19 + $0x2630] ss:$8 sps:$4 sm:$0xff]   ;;  %v22290_v19 = vld [vmem:[%s26369_s19 + $0x2644] ss:$8 sps:$4 sm:$0xff]  }
  0xa5   : > { %15984 = vmatpush1.bf16.msra.mxu1 %v22274_v8  ;;  %v22292_v20 = vld [vmem:[%s26369_s19 + $0x40] ss:$8 sps:$4 sm:$0xff]   ;;  %v22294_v22 = vld [vmem:[%s26369_s19 + $0x54] ss:$8 sps:$4 sm:$0xff]   ;;  %v22298_v24 = vld [vmem:[%s26369_s19 + $0x50] ss:$8 sps:$4 sm:$0xff]  }
  0xa6   : > { %17542 = vmatpush1.bf16.msra.mxu0 %v22275_v9  ;;  %15985 = vmatprep.subr.bf16.mxu1 %v22276_v10  ;;  %v22293_v21 = vld [vmem:[%s26369_s19 + $0x2640] ss:$8 sps:$4 sm:$0xff]   ;;  %v22296_v23 = vld [vmem:[%s26369_s19 + $0x2654] ss:$8 sps:$4 sm:$0xff]   ;;  %v22299_v25 = vld [vmem:[%s26369_s19 + $0x2650] ss:$8 sps:$4 sm:$0xff]  }
  0xa7   : > { %17543 = vmatprep.subr.bf16.mxu0 %v22278_v11  ;;  %v22300_v26 = vld [vmem:[%s26369_s19 + $0x64] ss:$8 sps:$4 sm:$0xff]   ;;  %v22304_v28 = vld [vmem:[%s26369_s19 + $0x60] ss:$8 sps:$4 sm:$0xff]   ;;  %v22306_v30 = vld [vmem:[%s26369_s19 + $0x74] ss:$8 sps:$4 sm:$0xff]  }
  0xa8   : > { %v22302_v27 = vld [vmem:[%s26369_s19 + $0x2664] ss:$8 sps:$4 sm:$0xff]   ;;  %v22305_v29 = vld [vmem:[%s26369_s19 + $0x2660] ss:$8 sps:$4 sm:$0xff]   ;;  %v22308_v31 = vld [vmem:[%s26369_s19 + $0x2674] ss:$8 sps:$4 sm:$0xff]  }
  0xa9   : > { %15986 = vmatpush1.bf16.msra.mxu1 %v22280_v12  ;;  %v22310_v32 = vld [vmem:[%s26369_s19 + $0x70] ss:$8 sps:$4 sm:$0xff]   ;;  %v22312_v34 = vld [vmem:[%s26369_s19 + $0x84] ss:$8 sps:$4 sm:$0xff]   ;;  %v22316_v36 = vld [vmem:[%s26369_s19 + $0x80] ss:$8 sps:$4 sm:$0xff]  }
  0xaa   : > { %17544 = vmatpush1.bf16.msra.mxu0 %v22281_v13  ;;  %15987 = vmatprep.subr.bf16.mxu1 %v22282_v14  ;;  %v22311_v33 = vld [vmem:[%s26369_s19 + $0x2670] ss:$8 sps:$4 sm:$0xff]   ;;  %v22314_v35 = vld [vmem:[%s26369_s19 + $0x2684] ss:$8 sps:$4 sm:$0xff]   ;;  %v22317_v37 = vld [vmem:[%s26369_s19 + $0x2680] ss:$8 sps:$4 sm:$0xff]  }
  0xab   : > { %17545 = vmatprep.subr.bf16.mxu0 %v22284_v15  ;;  %v26123_v38 = vmov 1966171168   ;;  %v22318_v41 = vld [vmem:[%s26369_s19 + $0x94] ss:$8 sps:$4 sm:$0xff]   ;;  %v22322_v43 = vld [vmem:[%s26369_s19 + $0x90] ss:$8 sps:$4 sm:$0xff]  }
  0xac   : > { %v2822_v39 = vunpack.c.l.s4 %v26123_v38  ;;  %v22320_v42 = vld [vmem:[%s26369_s19 + $0x2694] ss:$8 sps:$4 sm:$0xff]   ;;  %v26430_v45 = vshrl.u32 %v2824_v40, 7  ;;  %v22323_v46 = vld [vmem:[%s26369_s19 + $0x2690] ss:$8 sps:$4 sm:$0xff]   ;;  %v375_v58 = vld [vmem:[%s26387_s30 + $0x48] sm:$0xff] }
  0xad   : > { %15988 = vmatpush1.bf16.msra.mxu1 %v22286_v16  ;;  %v22324_v47 = vld [vmem:[%s26369_s19 + $0xa4] ss:$8 sps:$4 sm:$0xff]   ;;  %v22328_v49 = vld [vmem:[%s26369_s19 + $0xa0] ss:$8 sps:$4 sm:$0xff]   ;;  %v22330_v52 = vld [vmem:[%s26369_s19 + $0xb4] ss:$8 sps:$4 sm:$0xff]   ;;  %v3261_v62 = vcombine.high %v375_v58, %v375_v58 }
  0xae   : > { %17546 = vmatpush1.bf16.msra.mxu0 %v22287_v17  ;;  %15989 = vmatprep.subr.bf16.mxu1 %v22288_v18  ;;  %v2823_v44 = vunpack.c.0.s8 %v2822_v39  ;;  %v22326_v48 = vld [vmem:[%s26369_s19 + $0x26a4] ss:$8 sps:$4 sm:$0xff]   ;;  %v22329_v50 = vld [vmem:[%s26369_s19 + $0x26a0] ss:$8 sps:$4 sm:$0xff]   ;;  %v22332_v53 = vld [vmem:[%s26369_s19 + $0x26b4] ss:$8 sps:$4 sm:$0xff]  }
  0xaf   : > { %17547 = vmatprep.subr.bf16.mxu0 %v22290_v19  ;;  %v26443_v54 = vld [vmem:[%s26387_s30] sm:$0xff]  ;;  %v22336_v59 = vld [vmem:[%s26369_s19 + $0xc4] ss:$8 sps:$4 sm:$0xff]   ;;  %p21802_p1 = scmp.ne.s32.totalorder %s26188_s6, 3 }
  0xb0   : > { %v26438_v51 = vsub.s32 %v2823_v44, %v26430_v45  ;;  %v22334_v55 = vld [vmem:[%s26369_s19 + $0xb0] ss:$8 sps:$4 sm:$0xff]   ;;  %v22338_v60 = vld [vmem:[%s26369_s19 + $0x26c4] ss:$8 sps:$4 sm:$0xff]   ;;  %v22340_v1 = vld [vmem:[%s26369_s19 + $0xc0] ss:$8 sps:$4 sm:$0xff]  }
  0xb1   : > { %15990 = vmatpush1.bf16.msra.mxu1 %v22292_v20  ;;  %v22335_v57 = vld [vmem:[%s26369_s19 + $0x26b0] ss:$8 sps:$4 sm:$0xff]   ;;  %v22341_v2 = vld [vmem:[%s26369_s19 + $0x26c0] ss:$8 sps:$4 sm:$0xff]   ;;  %v22342_v3 = vld [vmem:[%s26369_s19 + $0xd4] ss:$8 sps:$4 sm:$0xff]  }
  0xb2   : > { %17548 = vmatpush1.bf16.msra.mxu0 %v22293_v21  ;;  %15991 = vmatprep.subr.bf16.mxu1 %v22294_v22  ;;  %v2827_v56 = vrot.slane %v26443_v54, %v26438_v51  ;;  %v3275_v0 = vrot.slane %v3261_v62, %v26438_v51  ;;  %v22344_v4 = vld [vmem:[%s26369_s19 + $0x26d4] ss:$8 sps:$4 sm:$0xff]   ;;  %v22346_v7 = vld [vmem:[%s26369_s19 + $0xd0] ss:$8 sps:$4 sm:$0xff]   ;;  %v22348_v9 = vld [vmem:[%s26369_s19 + $0xe4] ss:$8 sps:$4 sm:$0xff]  }
  0xb3   : > { %17549 = vmatprep.subr.bf16.mxu0 %v22296_v23  ;;  %v22347_v8 = vld [vmem:[%s26369_s19 + $0x26d0] ss:$8 sps:$4 sm:$0xff]   ;;  %v22350_v10 = vld [vmem:[%s26369_s19 + $0x26e4] ss:$8 sps:$4 sm:$0xff]   ;;  %v22352_v11 = vld [vmem:[%s26369_s19 + $0xe0] ss:$8 sps:$4 sm:$0xff]  }
  0xb4   : > { %v2835_v61 = vcombine.high %v2827_v56, %v2827_v56  ;;  %v3277_v5 = vcombine.high %v3275_v0, %v3275_v0  ;;  %v22353_v12 = vld [vmem:[%s26369_s19 + $0x26e0] ss:$8 sps:$4 sm:$0xff]   ;;  %v22354_v13 = vld [vmem:[%s26369_s19 + $0xf4] ss:$8 sps:$4 sm:$0xff]   ;;  %v22358_v15 = vld [vmem:[%s26369_s19 + $0xf0] ss:$8 sps:$4 sm:$0xff]   ;;  %v26472_v19 = vrot.slane %v2827_v56, %v26438_v51  ;;  %v26475_v20 = vrot.slane %v3275_v0, %v26438_v51 }
  0xb5   : > { %15992 = vmatpush1.bf16.msra.mxu1 %v22298_v24  ;;  %v22356_v14 = vld [vmem:[%s26369_s19 + $0x26f4] ss:$8 sps:$4 sm:$0xff]   ;;  %v22359_v16 = vld [vmem:[%s26369_s19 + $0x26f0] ss:$8 sps:$4 sm:$0xff]   ;;  %v22363_v17 = vld [vmem:[%s26369_s19 + $0x104] ss:$8 sps:$4 sm:$0xff]  }
  0xb6   : > { %17550 = vmatpush1.bf16.msra.mxu0 %v22299_v25  ;;  %15993 = vmatprep.subr.bf16.mxu1 %v22300_v26  ;;  %v2857_v63 = vrot.slane %v2835_v61, %v26438_v51  ;;  %v3305_v6 = vrot.slane %v3277_v5, %v26438_v51  ;;  %v22367_v18 = vld [vmem:[%s26369_s19 + $0x2704] ss:$8 sps:$4 sm:$0xff]   ;;  %v22361_v21 = vld [vmem:[%s26369_s19 + $0x100] ss:$8 sps:$4 sm:$0xff]   ;;  %v22370_v23 = vld [vmem:[%s26369_s19 + $0x114] ss:$8 sps:$4 sm:$0xff]  }
  0xb7   : > { %17551 = vmatprep.subr.bf16.mxu0 %v22302_v27  ;;  %v22365_v22 = vld [vmem:[%s26369_s19 + $0x2700] ss:$8 sps:$4 sm:$0xff]   ;;  %v22373_v24 = vld [vmem:[%s26369_s19 + $0x2714] ss:$8 sps:$4 sm:$0xff]   ;;  %v22368_v27 = vld [vmem:[%s26369_s19 + $0x110] ss:$8 sps:$4 sm:$0xff]  }
  0xb8   : > { %16013 = vmatprep.mubr.bf16.mxu1 %v2857_v63  ;;  %17571 = vmatprep.mubr.bf16.mxu0 %v3305_v6  ;;  %v2867_v25 = vcombine.high %v2857_v63, %v2857_v63  ;;  %v3309_v26 = vcombine.high %v3305_v6, %v3305_v6  ;;  %v22391_v38 = vld [vmem:[%s26369_s19 + $0x2744] ss:$8 sps:$4 sm:$0xff]   ;;  %v22386_v39 = vld [vmem:[%s26369_s19 + $0x140] ss:$8 sps:$4 sm:$0xff]   ;;  %v22395_v44 = vld [vmem:[%s26369_s19 + $0x2750] ss:$8 sps:$4 sm:$0xff]  }
  0xb9   : > { %15994 = vmatpush1.bf16.msra.mxu1 %v22304_v28  ;;  %v22371_v28 = vld [vmem:[%s26369_s19 + $0x2710] ss:$8 sps:$4 sm:$0xff]   ;;  %v22389_v40 = vld [vmem:[%s26369_s19 + $0x2740] ss:$8 sps:$4 sm:$0xff]   ;;  %v22412_v56 = vld [vmem:[%s26369_s19 + $0x184] ss:$8 sps:$4 sm:$0xff]  }
  0xba   : > { %17552 = vmatpush1.bf16.msra.mxu0 %v22305_v29  ;;  %15995 = vmatprep.subr.bf16.mxu1 %v22306_v30  ;;  %v22376_v29 = vld [vmem:[%s26369_s19 + $0x124] ss:$8 sps:$4 sm:$0xff]   ;;  %v22410_v58 = vld [vmem:[%s26369_s19 + $0x180] ss:$8 sps:$4 sm:$0xff]   ;;  %v22421_v61 = vld [vmem:[%s26369_s19 + $0x2794] ss:$8 sps:$4 sm:$0xff]  }
  0xbb   : > { %17553 = vmatprep.subr.bf16.mxu0 %v22308_v31  ;;  %v22379_v30 = vld [vmem:[%s26369_s19 + $0x2724] ss:$8 sps:$4 sm:$0xff]   ;;  %v22374_v31 = vld [vmem:[%s26369_s19 + $0x120] ss:$8 sps:$4 sm:$0xff]   ;;  %v22416_v62 = vld [vmem:[%s26369_s19 + $0x190] ss:$8 sps:$4 sm:$0xff]  }
  0xbc   : > { %v22419_v63 = vld [vmem:[%s26369_s19 + $0x2790] ss:$8 sps:$4 sm:$0xff]   ;;  %v22424_v0 = vld [vmem:[%s26369_s19 + $0x1a4] ss:$8 sps:$4 sm:$0xff]   ;;  %v22433_v5 = vld [vmem:[%s26369_s19 + $0x27b4] ss:$8 sps:$4 sm:$0xff]  }
  0xbd   : > { %15996 = vmatpush1.bf16.msra.mxu1 %v22310_v32  ;;  %v22377_v32 = vld [vmem:[%s26369_s19 + $0x2720] ss:$8 sps:$4 sm:$0xff]   ;;  %v22428_v6 = vld [vmem:[%s26369_s19 + $0x1b0] ss:$8 sps:$4 sm:$0xff]   ;;  %vm19265_vm0 = vcmask (!%p21802_p1), 1041408   ;;  %vm19283_vm1 = vcmask (!%p21802_p1), 1024  }
  0xbe   : > { %17554 = vmatpush1.bf16.msra.mxu0 %v22311_v33  ;;  %15997 = vmatprep.subr.bf16.mxu1 %v22312_v34  ;;  %v22382_v33 = vld [vmem:[%s26369_s19 + $0x134] ss:$8 sps:$4 sm:$0xff]  }
  0xbf   : > { %17555 = vmatprep.subr.bf16.mxu0 %v22314_v35  ;;  %v22385_v34 = vld [vmem:[%s26369_s19 + $0x2734] ss:$8 sps:$4 sm:$0xff]   ;;  %v22380_v35 = vld [vmem:[%s26369_s19 + $0x130] ss:$8 sps:$4 sm:$0xff]  }
  0xc1   : > { %15998 = vmatpush1.bf16.msra.mxu1 %v22316_v36  ;;  %v22383_v36 = vld [vmem:[%s26369_s19 + $0x2730] ss:$8 sps:$4 sm:$0xff]  }
  0xc2   : > { %17556 = vmatpush1.bf16.msra.mxu0 %v22317_v37  ;;  %15999 = vmatprep.subr.bf16.mxu1 %v22318_v41  ;;  %v22388_v37 = vld [vmem:[%s26369_s19 + $0x144] ss:$8 sps:$4 sm:$0xff]   ;;  %v22394_v41 = vld [vmem:[%s26369_s19 + $0x154] ss:$8 sps:$4 sm:$0xff]  }
  0xc3   : > { %17557 = vmatprep.subr.bf16.mxu0 %v22320_v42  ;;  %v22397_v42 = vld [vmem:[%s26369_s19 + $0x2754] ss:$8 sps:$4 sm:$0xff]  }
  0xc5   : > { %16000 = vmatpush1.bf16.msra.mxu1 %v22322_v43  ;;  %v22392_v43 = vld [vmem:[%s26369_s19 + $0x150] ss:$8 sps:$4 sm:$0xff]  }
  0xc6   : > { %17558 = vmatpush1.bf16.msra.mxu0 %v22323_v46  ;;  %16001 = vmatprep.subr.bf16.mxu1 %v22324_v47  ;;  %v22400_v46 = vld [vmem:[%s26369_s19 + $0x164] ss:$8 sps:$4 sm:$0xff]  }
  0xc7   : > { %17559 = vmatprep.subr.bf16.mxu0 %v22326_v48  ;;  %v22403_v47 = vld [vmem:[%s26369_s19 + $0x2764] ss:$8 sps:$4 sm:$0xff]   ;;  %v22398_v48 = vld [vmem:[%s26369_s19 + $0x160] ss:$8 sps:$4 sm:$0xff]  }
  0xc9   : > { %16002 = vmatpush1.bf16.msra.mxu1 %v22328_v49  ;;  %v22401_v49 = vld [vmem:[%s26369_s19 + $0x2760] ss:$8 sps:$4 sm:$0xff]  }
  0xca   : > { %17560 = vmatpush1.bf16.msra.mxu0 %v22329_v50  ;;  %16003 = vmatprep.subr.bf16.mxu1 %v22330_v52  ;;  %v22406_v50 = vld [vmem:[%s26369_s19 + $0x174] ss:$8 sps:$4 sm:$0xff]  }
  0xcb   : > { %17561 = vmatprep.subr.bf16.mxu0 %v22332_v53  ;;  %v22409_v52 = vld [vmem:[%s26369_s19 + $0x2774] ss:$8 sps:$4 sm:$0xff]   ;;  %v22404_v53 = vld [vmem:[%s26369_s19 + $0x170] ss:$8 sps:$4 sm:$0xff]  }
  0xcd   : > { %16004 = vmatpush1.bf16.msra.mxu1 %v22334_v55  ;;  %v22407_v55 = vld [vmem:[%s26369_s19 + $0x2770] ss:$8 sps:$4 sm:$0xff]  }
  0xce   : > { %17562 = vmatpush1.bf16.msra.mxu0 %v22335_v57  ;;  %16005 = vmatprep.subr.bf16.mxu1 %v22336_v59  ;;  %v22415_v57 = vld [vmem:[%s26369_s19 + $0x2784] ss:$8 sps:$4 sm:$0xff]   ;;  %v22413_v59 = vld [vmem:[%s26369_s19 + $0x2780] ss:$8 sps:$4 sm:$0xff]  }
  0xcf   : > { %17563 = vmatprep.subr.bf16.mxu0 %v22338_v60  ;;  %v22418_v60 = vld [vmem:[%s26369_s19 + $0x194] ss:$8 sps:$4 sm:$0xff]  }
  0xd1   : > { %16006 = vmatpush1.bf16.msra.mxu1 %v22340_v1  ;;  %v22427_v1 = vld [vmem:[%s26369_s19 + $0x27a4] ss:$8 sps:$4 sm:$0xff]  }
  0xd2   : > { %17564 = vmatpush1.bf16.msra.mxu0 %v22341_v2  ;;  %16007 = vmatprep.subr.bf16.mxu1 %v22342_v3  ;;  %v22422_v2 = vld [vmem:[%s26369_s19 + $0x1a0] ss:$8 sps:$4 sm:$0xff]  }
  0xd3   : > { %17565 = vmatprep.subr.bf16.mxu0 %v22344_v4  ;;  %v22425_v3 = vld [vmem:[%s26369_s19 + $0x27a0] ss:$8 sps:$4 sm:$0xff]   ;;  %v22430_v4 = vld [vmem:[%s26369_s19 + $0x1b4] ss:$8 sps:$4 sm:$0xff]  }
  0xd5   : > { %16008 = vmatpush1.bf16.msra.mxu1 %v22346_v7  ;;  %v22431_v7 = vld [vmem:[%s26369_s19 + $0x27b0] ss:$8 sps:$4 sm:$0xff]  }
  0xd6   : > { %17566 = vmatpush1.bf16.msra.mxu0 %v22347_v8  ;;  %16009 = vmatprep.subr.bf16.mxu1 %v22348_v9  ;;  %v22436_v8 = vld [vmem:[%s26369_s19 + $0x1c4] ss:$8 sps:$4 sm:$0xff]  }
  0xd7   : > { %17567 = vmatprep.subr.bf16.mxu0 %v22350_v10  ;;  %v22439_v9 = vld [vmem:[%s26369_s19 + $0x27c4] ss:$8 sps:$4 sm:$0xff]   ;;  %v22434_v10 = vld [vmem:[%s26369_s19 + $0x1c0] ss:$8 sps:$4 sm:$0xff]  }
  0xd9   : > { %16010 = vmatpush1.bf16.msra.mxu1 %v22352_v11  ;;  %v22437_v11 = vld [vmem:[%s26369_s19 + $0x27c0] ss:$8 sps:$4 sm:$0xff]  }
  0xda   : > { %17568 = vmatpush1.bf16.msra.mxu0 %v22353_v12  ;;  %16011 = vmatprep.subr.bf16.mxu1 %v22354_v13  ;;  %v22442_v12 = vld [vmem:[%s26369_s19 + $0x1d4] ss:$8 sps:$4 sm:$0xff]  }
  0xdb   : > { %17569 = vmatprep.subr.bf16.mxu0 %v22356_v14  ;;  %v22445_v13 = vld [vmem:[%s26369_s19 + $0x27d4] ss:$8 sps:$4 sm:$0xff]   ;;  %v22440_v14 = vld [vmem:[%s26369_s19 + $0x1d0] ss:$8 sps:$4 sm:$0xff]  }
  0xdd   : > { %16012 = vmatpush1.bf16.msra.mxu1 %v22358_v15  ;;  %v22443_v15 = vld [vmem:[%s26369_s19 + $0x27d0] ss:$8 sps:$4 sm:$0xff]  }
  0xde   : > { %17570 = vmatpush1.bf16.msra.mxu0 %v22359_v16  ;;  %16022 = vmatprep.subr.bf16.mxu1 %v22363_v17  ;;  %v22448_v16 = vld [vmem:[%s26369_s19 + $0x1e4] ss:$8 sps:$4 sm:$0xff]  }
  0xdf   : > { %17580 = vmatprep.subr.bf16.mxu0 %v22367_v18  ;;  %v22451_v17 = vld [vmem:[%s26369_s19 + $0x27e4] ss:$8 sps:$4 sm:$0xff]   ;;  %v2820_v18 = vcombine.high %v26443_v54, %v26443_v54  ;;  %v22455_v54 = vld [vmem:[%s26369_s19 + $0x27f0] ss:$8 sps:$4 sm:$0xff]  }
  0xe0   : > { %16014 = vmatmul.mubr.bf16.vlgmr.msra.gmra.mrb[0].mxu1 %v26472_v19 }
  0xe1   : > { %17572 = vmatmul.mubr.bf16.vlgmr.msra.gmra.mrb[0].mxu0 %v26475_v20  ;;  %16023 = vmatpush1.bf16.msra.mxu1 %v22361_v21  ;;  %v22446_v21 = vld [vmem:[%s26369_s19 + $0x1e0] ss:$8 sps:$4 sm:$0xff]  }
  0xe2   : > { %17581 = vmatpush1.bf16.msra.mxu0 %v22365_v22  ;;  %16024 = vmatprep.subr.bf16.mxu1 %v22370_v23  ;;  %v22449_v22 = vld [vmem:[%s26369_s19 + $0x27e0] ss:$8 sps:$4 sm:$0xff]   ;;  %v22454_v23 = vld [vmem:[%s26369_s19 + $0x1f4] ss:$8 sps:$4 sm:$0xff]  }
  0xe3   : > { %17582 = vmatprep.subr.bf16.mxu0 %v22373_v24  ;;  %16054 = vmatprep.mubr.bf16.mxu1 %v2867_v25  ;;  %v22457_v24 = vld [vmem:[%s26369_s19 + $0x27f4] ss:$8 sps:$4 sm:$0xff]   ;;  %v26542_v25 = vrot.slane %v2820_v18, %v26438_v51  ;;  %v22524_v18 = vld [vmem:[%s26369_s19 + $0x2b0] ss:$8 sps:$4 sm:$0xff]  }
  0xe4   : > { %17612 = vmatprep.mubr.bf16.mxu0 %v3309_v26  ;;  %v22452_v26 = vld [vmem:[%s26369_s19 + $0x1f0] ss:$8 sps:$4 sm:$0xff]  }
  0xe5   : > { %16025 = vmatpush1.bf16.msra.mxu1 %v22368_v27  ;;  %v22460_v27 = vld [vmem:[%s26369_s19 + $0x204] ss:$8 sps:$4 sm:$0xff]  }
  0xe6   : > { %17583 = vmatpush1.bf16.msra.mxu0 %v22371_v28  ;;  %16026 = vmatprep.subr.bf16.mxu1 %v22376_v29  ;;  %v22463_v28 = vld [vmem:[%s26369_s19 + $0x2804] ss:$8 sps:$4 sm:$0xff]   ;;  %v2836_v29 = vcombine.high %v26542_v25, %v26542_v25 }
  0xe7   : > { %17584 = vmatprep.subr.bf16.mxu0 %v22379_v30  ;;  %v2865_v30 = vcombine.high %v26472_v19, %v26472_v19  ;;  %v22464_v19 = vld [vmem:[%s26369_s19 + $0x210] ss:$8 sps:$4 sm:$0xff]  }
  0xe9   : > { %16027 = vmatpush1.bf16.msra.mxu1 %v22374_v31  ;;  %v3307_v31 = vcombine.high %v26475_v20, %v26475_v20 }
  0xea   : > { %17585 = vmatpush1.bf16.msra.mxu0 %v22377_v32  ;;  %16028 = vmatprep.subr.bf16.mxu1 %v22382_v33  ;;  %v22458_v32 = vld [vmem:[%s26369_s19 + $0x200] ss:$8 sps:$4 sm:$0xff]  }
  0xeb   : > { %17586 = vmatprep.subr.bf16.mxu0 %v22385_v34  ;;  %v22461_v33 = vld [vmem:[%s26369_s19 + $0x2800] ss:$8 sps:$4 sm:$0xff]   ;;  %v22466_v34 = vld [vmem:[%s26369_s19 + $0x214] ss:$8 sps:$4 sm:$0xff]  }
  0xed   : > { %16029 = vmatpush1.bf16.msra.mxu1 %v22380_v35  ;;  %v22469_v35 = vld [vmem:[%s26369_s19 + $0x2814] ss:$8 sps:$4 sm:$0xff]  }
  0xee   : > { %17587 = vmatpush1.bf16.msra.mxu0 %v22383_v36  ;;  %16030 = vmatprep.subr.bf16.mxu1 %v22388_v37  ;;  %v26559_v36 = vrot.slane %v2836_v29, %v26438_v51  ;;  %v26562_v37 = vld [vmem:[%s26387_s30 + $0x50] sm:$0xff] }
  0xef   : > { %17588 = vmatprep.subr.bf16.mxu0 %v22391_v38  ;;  %v26567_v20 = vrot.slane %v26562_v37, %v26438_v51  ;;  %v22467_v38 = vld [vmem:[%s26369_s19 + $0x2810] ss:$8 sps:$4 sm:$0xff]  }
  0xf0   : > { %v22539_v29 = vld [vmem:[%s26369_s19 + $0x28d0] ss:$8 sps:$4 sm:$0xff]  }
  0xf1   : > { %16031 = vmatpush1.bf16.msra.mxu1 %v22386_v39  ;;  %v22472_v39 = vld [vmem:[%s26369_s19 + $0x224] ss:$8 sps:$4 sm:$0xff]  }
  0xf2   : > { %17589 = vmatpush1.bf16.msra.mxu0 %v22389_v40  ;;  %16032 = vmatprep.subr.bf16.mxu1 %v22394_v41  ;;  %v22475_v40 = vld [vmem:[%s26369_s19 + $0x2824] ss:$8 sps:$4 sm:$0xff]   ;;  %v3325_v41 = vcombine.high %v26567_v20, %v26567_v20 }
  0xf3   : > { %17590 = vmatprep.subr.bf16.mxu0 %v22397_v42  ;;  %v22470_v42 = vld [vmem:[%s26369_s19 + $0x220] ss:$8 sps:$4 sm:$0xff]  }
  0xf5   : > { %16033 = vmatpush1.bf16.msra.mxu1 %v22392_v43  ;;  %v26577_v43 = vrot.slane %v3325_v41, %v26438_v51  ;;  %v22554_v41 = vld [vmem:[%s26369_s19 + $0x300] ss:$8 sps:$4 sm:$0xff]  }
  0xf6   : > { %17591 = vmatpush1.bf16.msra.mxu0 %v22395_v44  ;;  %16034 = vmatprep.subr.bf16.mxu1 %v22400_v46  ;;  %v22473_v44 = vld [vmem:[%s26369_s19 + $0x2820] ss:$8 sps:$4 sm:$0xff]   ;;  %v22478_v46 = vld [vmem:[%s26369_s19 + $0x234] ss:$8 sps:$4 sm:$0xff]  }
  0xf7   : > { %17592 = vmatprep.subr.bf16.mxu0 %v22403_v47  ;;  %v22481_v47 = vld [vmem:[%s26369_s19 + $0x2834] ss:$8 sps:$4 sm:$0xff]  }
  0xf9   : > { %16035 = vmatpush1.bf16.msra.mxu1 %v22398_v48  ;;  %v22476_v48 = vld [vmem:[%s26369_s19 + $0x230] ss:$8 sps:$4 sm:$0xff]  }
  0xfa   : > { %17593 = vmatpush1.bf16.msra.mxu0 %v22401_v49  ;;  %16036 = vmatprep.subr.bf16.mxu1 %v22406_v50  ;;  %v22479_v49 = vld [vmem:[%s26369_s19 + $0x2830] ss:$8 sps:$4 sm:$0xff]   ;;  %v22484_v50 = vld [vmem:[%s26369_s19 + $0x244] ss:$8 sps:$4 sm:$0xff]  }
  0xfb   : > { %17594 = vmatprep.subr.bf16.mxu0 %v22409_v52  ;;  %v22487_v52 = vld [vmem:[%s26369_s19 + $0x2844] ss:$8 sps:$4 sm:$0xff]  }
  0xfd   : > { %16037 = vmatpush1.bf16.msra.mxu1 %v22404_v53  ;;  %v22482_v53 = vld [vmem:[%s26369_s19 + $0x240] ss:$8 sps:$4 sm:$0xff]  }
  0xfe   : > { %17595 = vmatpush1.bf16.msra.mxu0 %v22407_v55  ;;  %16038 = vmatprep.subr.bf16.mxu1 %v22412_v56  ;;  %v22485_v55 = vld [vmem:[%s26369_s19 + $0x2840] ss:$8 sps:$4 sm:$0xff]   ;;  %v22490_v56 = vld [vmem:[%s26369_s19 + $0x254] ss:$8 sps:$4 sm:$0xff]  }
  0xff   : > { %17596 = vmatprep.subr.bf16.mxu0 %v22415_v57  ;;  %v22493_v57 = vld [vmem:[%s26369_s19 + $0x2854] ss:$8 sps:$4 sm:$0xff]  }
 0x101   : > { %16039 = vmatpush1.bf16.msra.mxu1 %v22410_v58  ;;  %v22488_v58 = vld [vmem:[%s26369_s19 + $0x250] ss:$8 sps:$4 sm:$0xff]  }
 0x102   : > { %17597 = vmatpush1.bf16.msra.mxu0 %v22413_v59  ;;  %16040 = vmatprep.subr.bf16.mxu1 %v22418_v60  ;;  %v22491_v59 = vld [vmem:[%s26369_s19 + $0x2850] ss:$8 sps:$4 sm:$0xff]   ;;  %v22496_v60 = vld [vmem:[%s26369_s19 + $0x264] ss:$8 sps:$4 sm:$0xff]  }
 0x103   : > { %17598 = vmatprep.subr.bf16.mxu0 %v22421_v61  ;;  %v22499_v61 = vld [vmem:[%s26369_s19 + $0x2864] ss:$8 sps:$4 sm:$0xff]  }
 0x105   : > { %16041 = vmatpush1.bf16.msra.mxu1 %v22416_v62  ;;  %v22494_v62 = vld [vmem:[%s26369_s19 + $0x260] ss:$8 sps:$4 sm:$0xff]  }
 0x106   : > { %17599 = vmatpush1.bf16.msra.mxu0 %v22419_v63  ;;  %16042 = vmatprep.subr.bf16.mxu1 %v22424_v0  ;;  %v22497_v63 = vld [vmem:[%s26369_s19 + $0x2860] ss:$8 sps:$4 sm:$0xff]   ;;  %v22502_v0 = vld [vmem:[%s26369_s19 + $0x274] ss:$8 sps:$4 sm:$0xff]  }
 0x107   : > { %17600 = vmatprep.subr.bf16.mxu0 %v22427_v1  ;;  %v22505_v1 = vld [vmem:[%s26369_s19 + $0x2874] ss:$8 sps:$4 sm:$0xff]  }
 0x109   : > { %16043 = vmatpush1.bf16.msra.mxu1 %v22422_v2  ;;  %v22500_v2 = vld [vmem:[%s26369_s19 + $0x270] ss:$8 sps:$4 sm:$0xff]  }
 0x10a   : > { %17601 = vmatpush1.bf16.msra.mxu0 %v22425_v3  ;;  %16044 = vmatprep.subr.bf16.mxu1 %v22430_v4  ;;  %v22503_v3 = vld [vmem:[%s26369_s19 + $0x2870] ss:$8 sps:$4 sm:$0xff]   ;;  %v22508_v4 = vld [vmem:[%s26369_s19 + $0x284] ss:$8 sps:$4 sm:$0xff]  }
 0x10b   : > { %17602 = vmatprep.subr.bf16.mxu0 %v22433_v5  ;;  %v22511_v5 = vld [vmem:[%s26369_s19 + $0x2884] ss:$8 sps:$4 sm:$0xff]  }
 0x10d   : > { %16045 = vmatpush1.bf16.msra.mxu1 %v22428_v6  ;;  %v22506_v6 = vld [vmem:[%s26369_s19 + $0x280] ss:$8 sps:$4 sm:$0xff]  }
 0x10e   : > { %17603 = vmatpush1.bf16.msra.mxu0 %v22431_v7  ;;  %16046 = vmatprep.subr.bf16.mxu1 %v22436_v8  ;;  %v22509_v7 = vld [vmem:[%s26369_s19 + $0x2880] ss:$8 sps:$4 sm:$0xff]   ;;  %v22514_v8 = vld [vmem:[%s26369_s19 + $0x294] ss:$8 sps:$4 sm:$0xff]  }
 0x10f   : > { %17604 = vmatprep.subr.bf16.mxu0 %v22439_v9  ;;  %v22517_v9 = vld [vmem:[%s26369_s19 + $0x2894] ss:$8 sps:$4 sm:$0xff]  }
 0x111   : > { %16047 = vmatpush1.bf16.msra.mxu1 %v22434_v10  ;;  %v22512_v10 = vld [vmem:[%s26369_s19 + $0x290] ss:$8 sps:$4 sm:$0xff]  }
 0x112   : > { %17605 = vmatpush1.bf16.msra.mxu0 %v22437_v11  ;;  %16048 = vmatprep.subr.bf16.mxu1 %v22442_v12  ;;  %v22515_v11 = vld [vmem:[%s26369_s19 + $0x2890] ss:$8 sps:$4 sm:$0xff]   ;;  %v22520_v12 = vld [vmem:[%s26369_s19 + $0x2a4] ss:$8 sps:$4 sm:$0xff]  }
 0x113   : > { %17606 = vmatprep.subr.bf16.mxu0 %v22445_v13  ;;  %v22523_v13 = vld [vmem:[%s26369_s19 + $0x28a4] ss:$8 sps:$4 sm:$0xff]  }
 0x115   : > { %16049 = vmatpush1.bf16.msra.mxu1 %v22440_v14  ;;  %v22518_v14 = vld [vmem:[%s26369_s19 + $0x2a0] ss:$8 sps:$4 sm:$0xff]  }
 0x116   : > { %17607 = vmatpush1.bf16.msra.mxu0 %v22443_v15  ;;  %16050 = vmatprep.subr.bf16.mxu1 %v22448_v16  ;;  %v22521_v15 = vld [vmem:[%s26369_s19 + $0x28a0] ss:$8 sps:$4 sm:$0xff]   ;;  %v22526_v16 = vld [vmem:[%s26369_s19 + $0x2b4] ss:$8 sps:$4 sm:$0xff]  }
 0x117   : > { %17608 = vmatprep.subr.bf16.mxu0 %v22451_v17  ;;  %v22529_v17 = vld [vmem:[%s26369_s19 + $0x28b4] ss:$8 sps:$4 sm:$0xff]  }
 0x119   : > { %16051 = vmatpush1.bf16.msra.mxu1 %v22446_v21  ;;  %v22527_v21 = vld [vmem:[%s26369_s19 + $0x28b0] ss:$8 sps:$4 sm:$0xff]  }
 0x11a   : > { %17609 = vmatpush1.bf16.msra.mxu0 %v22449_v22  ;;  %16052 = vmatprep.subr.bf16.mxu1 %v22454_v23  ;;  %v22532_v22 = vld [vmem:[%s26369_s19 + $0x2c4] ss:$8 sps:$4 sm:$0xff]  }
 0x11b   : > { %17610 = vmatprep.subr.bf16.mxu0 %v22457_v24  ;;  %v22535_v23 = vld [vmem:[%s26369_s19 + $0x28c4] ss:$8 sps:$4 sm:$0xff]   ;;  %v22530_v24 = vld [vmem:[%s26369_s19 + $0x2c0] ss:$8 sps:$4 sm:$0xff]  }
 0x11d   : > { %16053 = vmatpush1.bf16.msra.mxu1 %v22452_v26  ;;  %v22533_v26 = vld [vmem:[%s26369_s19 + $0x28c0] ss:$8 sps:$4 sm:$0xff]  }
 0x11e   : > { %17611 = vmatpush1.bf16.msra.mxu0 %v22455_v54  ;;  %16063 = vmatprep.subr.bf16.mxu1 %v22460_v27  ;;  %v22538_v54 = vld [vmem:[%s26369_s19 + $0x2d4] ss:$8 sps:$4 sm:$0xff]  }
 0x11f   : > { %17621 = vmatprep.subr.bf16.mxu0 %v22463_v28  ;;  %v22541_v27 = vld [vmem:[%s26369_s19 + $0x28d4] ss:$8 sps:$4 sm:$0xff]   ;;  %v22536_v28 = vld [vmem:[%s26369_s19 + $0x2d0] ss:$8 sps:$4 sm:$0xff]  }
 0x120   : > { %16055 = vmatmul.mubr.bf16.vlgmr.msra.gmra.mrb[0].mxu1 %v2865_v30  ;;  %v22544_v30 = vld [vmem:[%s26369_s19 + $0x2e4] ss:$8 sps:$4 sm:$0xff]  }
 0x121   : > { %17613 = vmatmul.mubr.bf16.vlgmr.msra.gmra.mrb[0].mxu0 %v3307_v31  ;;  %16064 = vmatpush1.bf16.msra.mxu1 %v22458_v32  ;;  %v22547_v31 = vld [vmem:[%s26369_s19 + $0x28e4] ss:$8 sps:$4 sm:$0xff]   ;;  %v22542_v32 = vld [vmem:[%s26369_s19 + $0x2e0] ss:$8 sps:$4 sm:$0xff]  }
 0x122   : > { %17622 = vmatpush1.bf16.msra.mxu0 %v22461_v33  ;;  %16065 = vmatprep.subr.bf16.mxu1 %v22466_v34  ;;  %v22545_v33 = vld [vmem:[%s26369_s19 + $0x28e0] ss:$8 sps:$4 sm:$0xff]   ;;  %v22550_v34 = vld [vmem:[%s26369_s19 + $0x2f4] ss:$8 sps:$4 sm:$0xff]  }
 0x123   : > { %17623 = vmatprep.subr.bf16.mxu0 %v22469_v35  ;;  %16095 = vmatprep.mubr.bf16.mxu1 %v26559_v36  ;;  %v22553_v35 = vld [vmem:[%s26369_s19 + $0x28f4] ss:$8 sps:$4 sm:$0xff]  }
 0x124   : > { %17653 = vmatprep.mubr.bf16.mxu0 %v26577_v43 }
 0x125   : > { %16066 = vmatpush1.bf16.msra.mxu1 %v22464_v19  ;;  %v22548_v19 = vld [vmem:[%s26369_s19 + $0x2f0] ss:$8 sps:$4 sm:$0xff]  }
 0x126   : > { %17624 = vmatpush1.bf16.msra.mxu0 %v22467_v38  ;;  %16067 = vmatprep.subr.bf16.mxu1 %v22472_v39  ;;  %v22551_v38 = vld [vmem:[%s26369_s19 + $0x28f0] ss:$8 sps:$4 sm:$0xff]   ;;  %v22556_v39 = vld [vmem:[%s26369_s19 + $0x304] ss:$8 sps:$4 sm:$0xff]  }
 0x127   : > { %17625 = vmatprep.subr.bf16.mxu0 %v22475_v40  ;;  %v22559_v40 = vld [vmem:[%s26369_s19 + $0x2904] ss:$8 sps:$4 sm:$0xff]  }
 0x129   : > { %16068 = vmatpush1.bf16.msra.mxu1 %v22470_v42  ;;  %v26638_v42 = vrot.slane %v26542_v25, %v26438_v51  ;;  %v3357_v25 = vcombine.high %v26577_v43, %v26577_v43  ;;  %v22566_v43 = vld [vmem:[%s26369_s19 + $0x320] ss:$8 sps:$4 sm:$0xff]  }
 0x12a   : > { %17626 = vmatpush1.bf16.msra.mxu0 %v22473_v44  ;;  %16069 = vmatprep.subr.bf16.mxu1 %v22478_v46  ;;  %v26642_v44 = vrot.slane %v26567_v20, %v26438_v51  ;;  %v22557_v46 = vld [vmem:[%s26369_s19 + $0x2900] ss:$8 sps:$4 sm:$0xff]   ;;  %v22560_v20 = vld [vmem:[%s26369_s19 + $0x310] ss:$8 sps:$4 sm:$0xff]  }
 0x12b   : > { %17627 = vmatprep.subr.bf16.mxu0 %v22481_v47  ;;  %v22562_v47 = vld [vmem:[%s26369_s19 + $0x314] ss:$8 sps:$4 sm:$0xff]  }
 0x12d   : > { %16070 = vmatpush1.bf16.msra.mxu1 %v22476_v48  ;;  %v22565_v48 = vld [vmem:[%s26369_s19 + $0x2914] ss:$8 sps:$4 sm:$0xff]  }
 0x12e   : > { %17628 = vmatpush1.bf16.msra.mxu0 %v22479_v49  ;;  %16071 = vmatprep.subr.bf16.mxu1 %v22484_v50  ;;  %v2868_v49 = vcombine.high %v26559_v36, %v26559_v36  ;;  %v22563_v50 = vld [vmem:[%s26369_s19 + $0x2910] ss:$8 sps:$4 sm:$0xff]   ;;  %v22571_v36 = vld [vmem:[%s26369_s19 + $0x2924] ss:$8 sps:$4 sm:$0xff]  }
 0x12f   : > { %17629 = vmatprep.subr.bf16.mxu0 %v22487_v52  ;;  %v22568_v52 = vld [vmem:[%s26369_s19 + $0x324] ss:$8 sps:$4 sm:$0xff]  }
 0x131   : > { %16072 = vmatpush1.bf16.msra.mxu1 %v22482_v53  ;;  %v22569_v53 = vld [vmem:[%s26369_s19 + $0x2920] ss:$8 sps:$4 sm:$0xff]  }
 0x132   : > { %17630 = vmatpush1.bf16.msra.mxu0 %v22485_v55  ;;  %16073 = vmatprep.subr.bf16.mxu1 %v22490_v56  ;;  %v22574_v55 = vld [vmem:[%s26369_s19 + $0x334] ss:$8 sps:$4 sm:$0xff]  }
 0x133   : > { %17631 = vmatprep.subr.bf16.mxu0 %v22493_v57  ;;  %v22577_v56 = vld [vmem:[%s26369_s19 + $0x2934] ss:$8 sps:$4 sm:$0xff]   ;;  %v22572_v57 = vld [vmem:[%s26369_s19 + $0x330] ss:$8 sps:$4 sm:$0xff]  }
 0x135   : > { %16074 = vmatpush1.bf16.msra.mxu1 %v22488_v58  ;;  %v22575_v58 = vld [vmem:[%s26369_s19 + $0x2930] ss:$8 sps:$4 sm:$0xff]  }
 0x136   : > { %17632 = vmatpush1.bf16.msra.mxu0 %v22491_v59  ;;  %16075 = vmatprep.subr.bf16.mxu1 %v22496_v60  ;;  %v22580_v59 = vld [vmem:[%s26369_s19 + $0x344] ss:$8 sps:$4 sm:$0xff]  }
 0x137   : > { %17633 = vmatprep.subr.bf16.mxu0 %v22499_v61  ;;  %v22583_v60 = vld [vmem:[%s26369_s19 + $0x2944] ss:$8 sps:$4 sm:$0xff]   ;;  %v22578_v61 = vld [vmem:[%s26369_s19 + $0x340] ss:$8 sps:$4 sm:$0xff]  }
 0x139   : > { %16076 = vmatpush1.bf16.msra.mxu1 %v22494_v62  ;;  %v22581_v62 = vld [vmem:[%s26369_s19 + $0x2940] ss:$8 sps:$4 sm:$0xff]  }
 0x13a   : > { %17634 = vmatpush1.bf16.msra.mxu0 %v22497_v63  ;;  %16077 = vmatprep.subr.bf16.mxu1 %v22502_v0  ;;  %v22586_v63 = vld [vmem:[%s26369_s19 + $0x354] ss:$8 sps:$4 sm:$0xff]  }
 0x13b   : > { %17635 = vmatprep.subr.bf16.mxu0 %v22505_v1  ;;  %v22589_v0 = vld [vmem:[%s26369_s19 + $0x2954] ss:$8 sps:$4 sm:$0xff]   ;;  %v22584_v1 = vld [vmem:[%s26369_s19 + $0x350] ss:$8 sps:$4 sm:$0xff]  }
 0x13d   : > { %16078 = vmatpush1.bf16.msra.mxu1 %v22500_v2  ;;  %v22587_v2 = vld [vmem:[%s26369_s19 + $0x2950] ss:$8 sps:$4 sm:$0xff]  }
 0x13e   : > { %17636 = vmatpush1.bf16.msra.mxu0 %v22503_v3  ;;  %16079 = vmatprep.subr.bf16.mxu1 %v22508_v4  ;;  %v22592_v3 = vld [vmem:[%s26369_s19 + $0x364] ss:$8 sps:$4 sm:$0xff]  }
 0x13f   : > { %17637 = vmatprep.subr.bf16.mxu0 %v22511_v5  ;;  %v22595_v4 = vld [vmem:[%s26369_s19 + $0x2964] ss:$8 sps:$4 sm:$0xff]   ;;  %v22590_v5 = vld [vmem:[%s26369_s19 + $0x360] ss:$8 sps:$4 sm:$0xff]  }
 0x141   : > { %16080 = vmatpush1.bf16.msra.mxu1 %v22506_v6  ;;  %v22593_v6 = vld [vmem:[%s26369_s19 + $0x2960] ss:$8 sps:$4 sm:$0xff]  }
 0x142   : > { %17638 = vmatpush1.bf16.msra.mxu0 %v22509_v7  ;;  %16081 = vmatprep.subr.bf16.mxu1 %v22514_v8  ;;  %v22598_v7 = vld [vmem:[%s26369_s19 + $0x374] ss:$8 sps:$4 sm:$0xff]  }
 0x143   : > { %17639 = vmatprep.subr.bf16.mxu0 %v22517_v9  ;;  %v22601_v8 = vld [vmem:[%s26369_s19 + $0x2974] ss:$8 sps:$4 sm:$0xff]   ;;  %v22596_v9 = vld [vmem:[%s26369_s19 + $0x370] ss:$8 sps:$4 sm:$0xff]  }
 0x145   : > { %16082 = vmatpush1.bf16.msra.mxu1 %v22512_v10  ;;  %v22599_v10 = vld [vmem:[%s26369_s19 + $0x2970] ss:$8 sps:$4 sm:$0xff]  }
 0x146   : > { %17640 = vmatpush1.bf16.msra.mxu0 %v22515_v11  ;;  %16083 = vmatprep.subr.bf16.mxu1 %v22520_v12  ;;  %v22604_v11 = vld [vmem:[%s26369_s19 + $0x384] ss:$8 sps:$4 sm:$0xff]  }
 0x147   : > { %17641 = vmatprep.subr.bf16.mxu0 %v22523_v13  ;;  %v22607_v12 = vld [vmem:[%s26369_s19 + $0x2984] ss:$8 sps:$4 sm:$0xff]   ;;  %v22602_v13 = vld [vmem:[%s26369_s19 + $0x380] ss:$8 sps:$4 sm:$0xff]  }
 0x149   : > { %16084 = vmatpush1.bf16.msra.mxu1 %v22518_v14  ;;  %v22605_v14 = vld [vmem:[%s26369_s19 + $0x2980] ss:$8 sps:$4 sm:$0xff]  }
 0x14a   : > { %17642 = vmatpush1.bf16.msra.mxu0 %v22521_v15  ;;  %16085 = vmatprep.subr.bf16.mxu1 %v22526_v16  ;;  %v22610_v15 = vld [vmem:[%s26369_s19 + $0x394] ss:$8 sps:$4 sm:$0xff]  }
 0x14b   : > { %17643 = vmatprep.subr.bf16.mxu0 %v22529_v17  ;;  %v22613_v16 = vld [vmem:[%s26369_s19 + $0x2994] ss:$8 sps:$4 sm:$0xff]   ;;  %v22608_v17 = vld [vmem:[%s26369_s19 + $0x390] ss:$8 sps:$4 sm:$0xff]  }
 0x14d   : > { %16086 = vmatpush1.bf16.msra.mxu1 %v22524_v18  ;;  %v22611_v18 = vld [vmem:[%s26369_s19 + $0x2990] ss:$8 sps:$4 sm:$0xff]  }
 0x14e   : > { %17644 = vmatpush1.bf16.msra.mxu0 %v22527_v21  ;;  %16087 = vmatprep.subr.bf16.mxu1 %v22532_v22  ;;  %v22616_v21 = vld [vmem:[%s26369_s19 + $0x3a4] ss:$8 sps:$4 sm:$0xff]  }
 0x14f   : > { %17645 = vmatprep.subr.bf16.mxu0 %v22535_v23  ;;  %v22619_v22 = vld [vmem:[%s26369_s19 + $0x29a4] ss:$8 sps:$4 sm:$0xff]   ;;  %v22614_v23 = vld [vmem:[%s26369_s19 + $0x3a0] ss:$8 sps:$4 sm:$0xff]  }
 0x151   : > { %16088 = vmatpush1.bf16.msra.mxu1 %v22530_v24  ;;  %v22617_v24 = vld [vmem:[%s26369_s19 + $0x29a0] ss:$8 sps:$4 sm:$0xff]  }
 0x152   : > { %17646 = vmatpush1.bf16.msra.mxu0 %v22533_v26  ;;  %16089 = vmatprep.subr.bf16.mxu1 %v22538_v54  ;;  %v22622_v26 = vld [vmem:[%s26369_s19 + $0x3b4] ss:$8 sps:$4 sm:$0xff]  }
 0x153   : > { %17647 = vmatprep.subr.bf16.mxu0 %v22541_v27  ;;  %v22625_v54 = vld [vmem:[%s26369_s19 + $0x29b4] ss:$8 sps:$4 sm:$0xff]   ;;  %v22620_v27 = vld [vmem:[%s26369_s19 + $0x3b0] ss:$8 sps:$4 sm:$0xff]  }
 0x155   : > { %16090 = vmatpush1.bf16.msra.mxu1 %v22536_v28  ;;  %v22623_v28 = vld [vmem:[%s26369_s19 + $0x29b0] ss:$8 sps:$4 sm:$0xff]  }
 0x156   : > { %17648 = vmatpush1.bf16.msra.mxu0 %v22539_v29  ;;  %16091 = vmatprep.subr.bf16.mxu1 %v22544_v30  ;;  %v22628_v29 = vld [vmem:[%s26369_s19 + $0x3c4] ss:$8 sps:$4 sm:$0xff]  }
 0x157   : > { %17649 = vmatprep.subr.bf16.mxu0 %v22547_v31  ;;  %v22631_v30 = vld [vmem:[%s26369_s19 + $0x29c4] ss:$8 sps:$4 sm:$0xff]   ;;  %v22626_v31 = vld [vmem:[%s26369_s19 + $0x3c0] ss:$8 sps:$4 sm:$0xff]  }
 0x159   : > { %16092 = vmatpush1.bf16.msra.mxu1 %v22542_v32  ;;  %v22629_v32 = vld [vmem:[%s26369_s19 + $0x29c0] ss:$8 sps:$4 sm:$0xff]  }
 0x15a   : > { %17650 = vmatpush1.bf16.msra.mxu0 %v22545_v33  ;;  %16093 = vmatprep.subr.bf16.mxu1 %v22550_v34  ;;  %v22634_v33 = vld [vmem:[%s26369_s19 + $0x3d4] ss:$8 sps:$4 sm:$0xff]  }
 0x15b   : > { %17651 = vmatprep.subr.bf16.mxu0 %v22553_v35  ;;  %v22637_v34 = vld [vmem:[%s26369_s19 + $0x29d4] ss:$8 sps:$4 sm:$0xff]   ;;  %v22632_v35 = vld [vmem:[%s26369_s19 + $0x3d0] ss:$8 sps:$4 sm:$0xff]  }
 0x15d   : > { %16094 = vmatpush1.bf16.msra.mxu1 %v22548_v19  ;;  %v22635_v19 = vld [vmem:[%s26369_s19 + $0x29d0] ss:$8 sps:$4 sm:$0xff]  }
 0x15e   : > { %17652 = vmatpush1.bf16.msra.mxu0 %v22551_v38  ;;  %16104 = vmatprep.subr.bf16.mxu1 %v22556_v39  ;;  %v22640_v38 = vld [vmem:[%s26369_s19 + $0x3e4] ss:$8 sps:$4 sm:$0xff]  }
 0x15f   : > { %17662 = vmatprep.subr.bf16.mxu0 %v22559_v40  ;;  %v22643_v39 = vld [vmem:[%s26369_s19 + $0x29e4] ss:$8 sps:$4 sm:$0xff]   ;;  %v22638_v40 = vld [vmem:[%s26369_s19 + $0x3e0] ss:$8 sps:$4 sm:$0xff]  }
 0x160   : > { %16096 = vmatmul.mubr.bf16.vlgmr.msra.gmra.mrb[0].mxu1 %v26638_v42 }
 0x161   : > { %17654 = vmatmul.mubr.bf16.vlgmr.msra.gmra.mrb[0].mxu0 %v26642_v44  ;;  %16105 = vmatpush1.bf16.msra.mxu1 %v22554_v41  ;;  %v3310_v41 = vcombine.high %v26562_v37, %v26562_v37  ;;  %v22652_v37 = vld [vmem:[%s26369_s19 + $0x404] ss:$8 sps:$4 sm:$0xff]  }
 0x162   : > { %17663 = vmatpush1.bf16.msra.mxu0 %v22557_v46  ;;  %16106 = vmatprep.subr.bf16.mxu1 %v22562_v47  ;;  %v22641_v46 = vld [vmem:[%s26369_s19 + $0x29e0] ss:$8 sps:$4 sm:$0xff]  }
 0x163   : > { %17664 = vmatprep.subr.bf16.mxu0 %v22565_v48  ;;  %16136 = vmatprep.mubr.bf16.mxu1 %v2868_v49  ;;  %v26710_v47 = vld.sshfl [vmem:[%s26387_s30 + $0x8] sm:$0xff pattern:$0x75316420]  ;;  %v22646_v48 = vld [vmem:[%s26369_s19 + $0x3f4] ss:$8 sps:$4 sm:$0xff]  }
 0x164   : > { %17694 = vmatprep.mubr.bf16.mxu0 %v3357_v25  ;;  %v22649_v49 = vld [vmem:[%s26369_s19 + $0x29f4] ss:$8 sps:$4 sm:$0xff]   ;;  %v26715_v25 = vrot.slane %v3310_v41, %v26438_v51  ;;  %v22724_v41 = vld [vmem:[%s26369_s19 + $0x4c4] ss:$8 sps:$4 sm:$0xff]  }
 0x165   : > { %16107 = vmatpush1.bf16.msra.mxu1 %v22560_v20  ;;  %v22644_v20 = vld [vmem:[%s26369_s19 + $0x3f0] ss:$8 sps:$4 sm:$0xff]  }
 0x166   : > { %17665 = vmatpush1.bf16.msra.mxu0 %v22563_v50  ;;  %16108 = vmatprep.subr.bf16.mxu1 %v22568_v52  ;;  %v22647_v50 = vld [vmem:[%s26369_s19 + $0x29f0] ss:$8 sps:$4 sm:$0xff]   ;;  %v22655_v52 = vld [vmem:[%s26369_s19 + $0x2a04] ss:$8 sps:$4 sm:$0xff]  }
 0x167   : > { %17666 = vmatprep.subr.bf16.mxu0 %v22571_v36  ;;  %v2884_v36 = vcombine.high %v26710_v47, %v26710_v47 }
 0x169   : > { %16109 = vmatpush1.bf16.msra.mxu1 %v22566_v43  ;;  %v3326_v43 = vcombine.high %v26715_v25, %v26715_v25 }
 0x16a   : > { %17667 = vmatpush1.bf16.msra.mxu0 %v22569_v53  ;;  %16110 = vmatprep.subr.bf16.mxu1 %v22574_v55  ;;  %v22650_v53 = vld [vmem:[%s26369_s19 + $0x400] ss:$8 sps:$4 sm:$0xff]  }
 0x16b   : > { %17668 = vmatprep.subr.bf16.mxu0 %v22577_v56  ;;  %v22653_v55 = vld [vmem:[%s26369_s19 + $0x2a00] ss:$8 sps:$4 sm:$0xff]   ;;  %v2866_v56 = vcombine.high %v26638_v42, %v26638_v42  ;;  %v22656_v42 = vld [vmem:[%s26369_s19 + $0x410] ss:$8 sps:$4 sm:$0xff]  }
 0x16d   : > { %16111 = vmatpush1.bf16.msra.mxu1 %v22572_v57  ;;  %v3355_v57 = vcombine.high %v26642_v44, %v26642_v44  ;;  %v22659_v44 = vld [vmem:[%s26369_s19 + $0x2a10] ss:$8 sps:$4 sm:$0xff]  }
 0x16e   : > { %17669 = vmatpush1.bf16.msra.mxu0 %v22575_v58  ;;  %16112 = vmatprep.subr.bf16.mxu1 %v22580_v59  ;;  %v22658_v58 = vld [vmem:[%s26369_s19 + $0x414] ss:$8 sps:$4 sm:$0xff]  }
 0x16f   : > { %17670 = vmatprep.subr.bf16.mxu0 %v22583_v60  ;;  %v22661_v59 = vld [vmem:[%s26369_s19 + $0x2a14] ss:$8 sps:$4 sm:$0xff]   ;;  %v26734_v60 = vrot.slane %v2884_v36, %v26438_v51  ;;  %v22736_v36 = vld [vmem:[%s26369_s19 + $0x4e4] ss:$8 sps:$4 sm:$0xff]  }
 0x171   : > { %16113 = vmatpush1.bf16.msra.mxu1 %v22578_v61  ;;  %v26737_v61 = vrot.slane %v3326_v43, %v26438_v51  ;;  %v22739_v43 = vld [vmem:[%s26369_s19 + $0x2ae4] ss:$8 sps:$4 sm:$0xff]  }
 0x172   : > { %17671 = vmatpush1.bf16.msra.mxu0 %v22581_v62  ;;  %16114 = vmatprep.subr.bf16.mxu1 %v22586_v63  ;;  %v22664_v62 = vld [vmem:[%s26369_s19 + $0x424] ss:$8 sps:$4 sm:$0xff]  }
 0x173   : > { %17672 = vmatprep.subr.bf16.mxu0 %v22589_v0  ;;  %v22667_v63 = vld [vmem:[%s26369_s19 + $0x2a24] ss:$8 sps:$4 sm:$0xff]   ;;  %v22662_v0 = vld [vmem:[%s26369_s19 + $0x420] ss:$8 sps:$4 sm:$0xff]  }
 0x175   : > { %16115 = vmatpush1.bf16.msra.mxu1 %v22584_v1  ;;  %v22665_v1 = vld [vmem:[%s26369_s19 + $0x2a20] ss:$8 sps:$4 sm:$0xff]  }
 0x176   : > { %17673 = vmatpush1.bf16.msra.mxu0 %v22587_v2  ;;  %16116 = vmatprep.subr.bf16.mxu1 %v22592_v3  ;;  %v22670_v2 = vld [vmem:[%s26369_s19 + $0x434] ss:$8 sps:$4 sm:$0xff]  }
 0x177   : > { %17674 = vmatprep.subr.bf16.mxu0 %v22595_v4  ;;  %v22673_v3 = vld [vmem:[%s26369_s19 + $0x2a34] ss:$8 sps:$4 sm:$0xff]   ;;  %v22668_v4 = vld [vmem:[%s26369_s19 + $0x430] ss:$8 sps:$4 sm:$0xff]  }
 0x179   : > { %16117 = vmatpush1.bf16.msra.mxu1 %v22590_v5  ;;  %v22671_v5 = vld [vmem:[%s26369_s19 + $0x2a30] ss:$8 sps:$4 sm:$0xff]  }
 0x17a   : > { %17675 = vmatpush1.bf16.msra.mxu0 %v22593_v6  ;;  %16118 = vmatprep.subr.bf16.mxu1 %v22598_v7  ;;  %v22676_v6 = vld [vmem:[%s26369_s19 + $0x444] ss:$8 sps:$4 sm:$0xff]  }
 0x17b   : > { %17676 = vmatprep.subr.bf16.mxu0 %v22601_v8  ;;  %v22679_v7 = vld [vmem:[%s26369_s19 + $0x2a44] ss:$8 sps:$4 sm:$0xff]   ;;  %v22674_v8 = vld [vmem:[%s26369_s19 + $0x440] ss:$8 sps:$4 sm:$0xff]  }
 0x17d   : > { %16119 = vmatpush1.bf16.msra.mxu1 %v22596_v9  ;;  %v22677_v9 = vld [vmem:[%s26369_s19 + $0x2a40] ss:$8 sps:$4 sm:$0xff]  }
 0x17e   : > { %17677 = vmatpush1.bf16.msra.mxu0 %v22599_v10  ;;  %16120 = vmatprep.subr.bf16.mxu1 %v22604_v11  ;;  %v22682_v10 = vld [vmem:[%s26369_s19 + $0x454] ss:$8 sps:$4 sm:$0xff]  }
 0x17f   : > { %17678 = vmatprep.subr.bf16.mxu0 %v22607_v12  ;;  %v22685_v11 = vld [vmem:[%s26369_s19 + $0x2a54] ss:$8 sps:$4 sm:$0xff]   ;;  %v22680_v12 = vld [vmem:[%s26369_s19 + $0x450] ss:$8 sps:$4 sm:$0xff]  }
 0x181   : > { %16121 = vmatpush1.bf16.msra.mxu1 %v22602_v13  ;;  %v22683_v13 = vld [vmem:[%s26369_s19 + $0x2a50] ss:$8 sps:$4 sm:$0xff]  }
 0x182   : > { %17679 = vmatpush1.bf16.msra.mxu0 %v22605_v14  ;;  %16122 = vmatprep.subr.bf16.mxu1 %v22610_v15  ;;  %v22688_v14 = vld [vmem:[%s26369_s19 + $0x464] ss:$8 sps:$4 sm:$0xff]  }
 0x183   : > { %17680 = vmatprep.subr.bf16.mxu0 %v22613_v16  ;;  %v22691_v15 = vld [vmem:[%s26369_s19 + $0x2a64] ss:$8 sps:$4 sm:$0xff]   ;;  %v22686_v16 = vld [vmem:[%s26369_s19 + $0x460] ss:$8 sps:$4 sm:$0xff]  }
 0x185   : > { %16123 = vmatpush1.bf16.msra.mxu1 %v22608_v17  ;;  %v22689_v17 = vld [vmem:[%s26369_s19 + $0x2a60] ss:$8 sps:$4 sm:$0xff]  }
 0x186   : > { %17681 = vmatpush1.bf16.msra.mxu0 %v22611_v18  ;;  %16124 = vmatprep.subr.bf16.mxu1 %v22616_v21  ;;  %v22694_v18 = vld [vmem:[%s26369_s19 + $0x474] ss:$8 sps:$4 sm:$0xff]  }
 0x187   : > { %17682 = vmatprep.subr.bf16.mxu0 %v22619_v22  ;;  %v22697_v21 = vld [vmem:[%s26369_s19 + $0x2a74] ss:$8 sps:$4 sm:$0xff]   ;;  %v22692_v22 = vld [vmem:[%s26369_s19 + $0x470] ss:$8 sps:$4 sm:$0xff]  }
 0x189   : > { %16125 = vmatpush1.bf16.msra.mxu1 %v22614_v23  ;;  %v22695_v23 = vld [vmem:[%s26369_s19 + $0x2a70] ss:$8 sps:$4 sm:$0xff]  }
 0x18a   : > { %17683 = vmatpush1.bf16.msra.mxu0 %v22617_v24  ;;  %16126 = vmatprep.subr.bf16.mxu1 %v22622_v26  ;;  %v22700_v24 = vld [vmem:[%s26369_s19 + $0x484] ss:$8 sps:$4 sm:$0xff]  }
 0x18b   : > { %17684 = vmatprep.subr.bf16.mxu0 %v22625_v54  ;;  %v22703_v26 = vld [vmem:[%s26369_s19 + $0x2a84] ss:$8 sps:$4 sm:$0xff]   ;;  %v22698_v54 = vld [vmem:[%s26369_s19 + $0x480] ss:$8 sps:$4 sm:$0xff]  }
 0x18d   : > { %16127 = vmatpush1.bf16.msra.mxu1 %v22620_v27  ;;  %v22701_v27 = vld [vmem:[%s26369_s19 + $0x2a80] ss:$8 sps:$4 sm:$0xff]  }
 0x18e   : > { %17685 = vmatpush1.bf16.msra.mxu0 %v22623_v28  ;;  %16128 = vmatprep.subr.bf16.mxu1 %v22628_v29  ;;  %v22706_v28 = vld [vmem:[%s26369_s19 + $0x494] ss:$8 sps:$4 sm:$0xff]  }
 0x18f   : > { %17686 = vmatprep.subr.bf16.mxu0 %v22631_v30  ;;  %v22709_v29 = vld [vmem:[%s26369_s19 + $0x2a94] ss:$8 sps:$4 sm:$0xff]   ;;  %v22704_v30 = vld [vmem:[%s26369_s19 + $0x490] ss:$8 sps:$4 sm:$0xff]  }
 0x191   : > { %16129 = vmatpush1.bf16.msra.mxu1 %v22626_v31  ;;  %v22707_v31 = vld [vmem:[%s26369_s19 + $0x2a90] ss:$8 sps:$4 sm:$0xff]  }
 0x192   : > { %17687 = vmatpush1.bf16.msra.mxu0 %v22629_v32  ;;  %16130 = vmatprep.subr.bf16.mxu1 %v22634_v33  ;;  %v22712_v32 = vld [vmem:[%s26369_s19 + $0x4a4] ss:$8 sps:$4 sm:$0xff]  }
 0x193   : > { %17688 = vmatprep.subr.bf16.mxu0 %v22637_v34  ;;  %v22715_v33 = vld [vmem:[%s26369_s19 + $0x2aa4] ss:$8 sps:$4 sm:$0xff]   ;;  %v22710_v34 = vld [vmem:[%s26369_s19 + $0x4a0] ss:$8 sps:$4 sm:$0xff]  }
 0x195   : > { %16131 = vmatpush1.bf16.msra.mxu1 %v22632_v35  ;;  %v22713_v35 = vld [vmem:[%s26369_s19 + $0x2aa0] ss:$8 sps:$4 sm:$0xff]  }
 0x196   : > { %17689 = vmatpush1.bf16.msra.mxu0 %v22635_v19  ;;  %16132 = vmatprep.subr.bf16.mxu1 %v22640_v38  ;;  %v22718_v19 = vld [vmem:[%s26369_s19 + $0x4b4] ss:$8 sps:$4 sm:$0xff]  }
 0x197   : > { %17690 = vmatprep.subr.bf16.mxu0 %v22643_v39  ;;  %v22721_v38 = vld [vmem:[%s26369_s19 + $0x2ab4] ss:$8 sps:$4 sm:$0xff]   ;;  %v22716_v39 = vld [vmem:[%s26369_s19 + $0x4b0] ss:$8 sps:$4 sm:$0xff]  }
 0x199   : > { %16133 = vmatpush1.bf16.msra.mxu1 %v22638_v40  ;;  %v22719_v40 = vld [vmem:[%s26369_s19 + $0x2ab0] ss:$8 sps:$4 sm:$0xff]  }
 0x19a   : > { %17691 = vmatpush1.bf16.msra.mxu0 %v22641_v46  ;;  %16134 = vmatprep.subr.bf16.mxu1 %v22646_v48  ;;  %v22727_v46 = vld [vmem:[%s26369_s19 + $0x2ac4] ss:$8 sps:$4 sm:$0xff]   ;;  %v22722_v48 = vld [vmem:[%s26369_s19 + $0x4c0] ss:$8 sps:$4 sm:$0xff]  }
 0x19b   : > { %17692 = vmatprep.subr.bf16.mxu0 %v22649_v49  ;;  %v22725_v49 = vld [vmem:[%s26369_s19 + $0x2ac0] ss:$8 sps:$4 sm:$0xff]  }
 0x19d   : > { %16135 = vmatpush1.bf16.msra.mxu1 %v22644_v20  ;;  %v22730_v20 = vld [vmem:[%s26369_s19 + $0x4d4] ss:$8 sps:$4 sm:$0xff]  }
 0x19e   : > { %17693 = vmatpush1.bf16.msra.mxu0 %v22647_v50  ;;  %16145 = vmatprep.subr.bf16.mxu1 %v22652_v37  ;;  %v22733_v50 = vld [vmem:[%s26369_s19 + $0x2ad4] ss:$8 sps:$4 sm:$0xff]   ;;  %v22728_v37 = vld [vmem:[%s26369_s19 + $0x4d0] ss:$8 sps:$4 sm:$0xff]  }
 0x19f   : > { %17703 = vmatprep.subr.bf16.mxu0 %v22655_v52  ;;  %v22731_v52 = vld [vmem:[%s26369_s19 + $0x2ad0] ss:$8 sps:$4 sm:$0xff]  }
 0x1a0   : > { %16137 = vmatmul.mubr.bf16.vlgmr.msra.gmra.mrb[0].mxu1 %v2866_v56  ;;  %v22742_v56 = vld [vmem:[%s26369_s19 + $0x4f4] ss:$8 sps:$4 sm:$0xff]  }
 0x1a1   : > { %17695 = vmatmul.mubr.bf16.vlgmr.msra.gmra.mrb[0].mxu0 %v3355_v57  ;;  %16146 = vmatpush1.bf16.msra.mxu1 %v22650_v53  ;;  %v22734_v53 = vld [vmem:[%s26369_s19 + $0x4e0] ss:$8 sps:$4 sm:$0xff]   ;;  %v22745_v57 = vld [vmem:[%s26369_s19 + $0x2af4] ss:$8 sps:$4 sm:$0xff]  }
 0x1a2   : > { %17704 = vmatpush1.bf16.msra.mxu0 %v22653_v55  ;;  %16147 = vmatprep.subr.bf16.mxu1 %v22658_v58  ;;  %v22737_v55 = vld [vmem:[%s26369_s19 + $0x2ae0] ss:$8 sps:$4 sm:$0xff]   ;;  %v22740_v58 = vld [vmem:[%s26369_s19 + $0x4f0] ss:$8 sps:$4 sm:$0xff]  }
 0x1a3   : > { %17705 = vmatprep.subr.bf16.mxu0 %v22661_v59  ;;  %16177 = vmatprep.mubr.bf16.mxu1 %v26734_v60  ;;  %v22743_v59 = vld [vmem:[%s26369_s19 + $0x2af0] ss:$8 sps:$4 sm:$0xff]  }
 0x1a4   : > { %17735 = vmatprep.mubr.bf16.mxu0 %v26737_v61 }
 0x1a5   : > { %16148 = vmatpush1.bf16.msra.mxu1 %v22656_v42  ;;  %v22748_v42 = vld [vmem:[%s26369_s19 + $0x504] ss:$8 sps:$4 sm:$0xff]  }
 0x1a6   : > { %17706 = vmatpush1.bf16.msra.mxu0 %v22659_v44  ;;  %16149 = vmatprep.subr.bf16.mxu1 %v22664_v62  ;;  %v22752_v44 = vld [vmem:[%s26369_s19 + $0x2b04] ss:$8 sps:$4 sm:$0xff]   ;;  %v26803_v62 = vrot.slane %v26710_v47, %v26438_v51  ;;  %v2916_v47 = vcombine.high %v26734_v60, %v26734_v60 }
 0x1a7   : > { %17707 = vmatprep.subr.bf16.mxu0 %v22667_v63  ;;  %v26807_v63 = vrot.slane %v26715_v25, %v26438_v51  ;;  %v22753_v25 = vld [vmem:[%s26369_s19 + $0x510] ss:$8 sps:$4 sm:$0xff]   ;;  %v22761_v60 = vld [vmem:[%s26369_s19 + $0x524] ss:$8 sps:$4 sm:$0xff]  }
 0x1a9   : > { %16150 = vmatpush1.bf16.msra.mxu1 %v22662_v0  ;;  %v22746_v0 = vld [vmem:[%s26369_s19 + $0x500] ss:$8 sps:$4 sm:$0xff]  }
 0x1aa   : > { %17708 = vmatpush1.bf16.msra.mxu0 %v22665_v1  ;;  %16151 = vmatprep.subr.bf16.mxu1 %v22670_v2  ;;  %v22750_v1 = vld [vmem:[%s26369_s19 + $0x2b00] ss:$8 sps:$4 sm:$0xff]   ;;  %v22755_v2 = vld [vmem:[%s26369_s19 + $0x514] ss:$8 sps:$4 sm:$0xff]  }
 0x1ab   : > { %17709 = vmatprep.subr.bf16.mxu0 %v22673_v3  ;;  %v22758_v3 = vld [vmem:[%s26369_s19 + $0x2b14] ss:$8 sps:$4 sm:$0xff]  }
 0x1ad   : > { %16152 = vmatpush1.bf16.msra.mxu1 %v22668_v4  ;;  %v3358_v4 = vcombine.high %v26737_v61, %v26737_v61  ;;  %v22759_v61 = vld [vmem:[%s26369_s19 + $0x520] ss:$8 sps:$4 sm:$0xff]  }
 0x1ae   : > { %17710 = vmatpush1.bf16.msra.mxu0 %v22671_v5  ;;  %16153 = vmatprep.subr.bf16.mxu1 %v22676_v6  ;;  %v22756_v5 = vld [vmem:[%s26369_s19 + $0x2b10] ss:$8 sps:$4 sm:$0xff]   ;;  %v22764_v6 = vld [vmem:[%s26369_s19 + $0x2b24] ss:$8 sps:$4 sm:$0xff]  }
 0x1af   : > { %17711 = vmatprep.subr.bf16.mxu0 %v22679_v7  ;;  %v22762_v7 = vld [vmem:[%s26369_s19 + $0x2b20] ss:$8 sps:$4 sm:$0xff]  }
 0x1b1   : > { %16154 = vmatpush1.bf16.msra.mxu1 %v22674_v8  ;;  %v22767_v8 = vld [vmem:[%s26369_s19 + $0x534] ss:$8 sps:$4 sm:$0xff]  }
 0x1b2   : > { %17712 = vmatpush1.bf16.msra.mxu0 %v22677_v9  ;;  %16155 = vmatprep.subr.bf16.mxu1 %v22682_v10  ;;  %v22770_v9 = vld [vmem:[%s26369_s19 + $0x2b34] ss:$8 sps:$4 sm:$0xff]   ;;  %v22765_v10 = vld [vmem:[%s26369_s19 + $0x530] ss:$8 sps:$4 sm:$0xff]  }
 0x1b3   : > { %17713 = vmatprep.subr.bf16.mxu0 %v22685_v11  ;;  %v22768_v11 = vld [vmem:[%s26369_s19 + $0x2b30] ss:$8 sps:$4 sm:$0xff]  }
 0x1b5   : > { %16156 = vmatpush1.bf16.msra.mxu1 %v22680_v12  ;;  %v22773_v12 = vld [vmem:[%s26369_s19 + $0x544] ss:$8 sps:$4 sm:$0xff]  }
 0x1b6   : > { %17714 = vmatpush1.bf16.msra.mxu0 %v22683_v13  ;;  %16157 = vmatprep.subr.bf16.mxu1 %v22688_v14  ;;  %v22776_v13 = vld [vmem:[%s26369_s19 + $0x2b44] ss:$8 sps:$4 sm:$0xff]   ;;  %v22771_v14 = vld [vmem:[%s26369_s19 + $0x540] ss:$8 sps:$4 sm:$0xff]  }
 0x1b7   : > { %17715 = vmatprep.subr.bf16.mxu0 %v22691_v15  ;;  %v22774_v15 = vld [vmem:[%s26369_s19 + $0x2b40] ss:$8 sps:$4 sm:$0xff]  }
 0x1b9   : > { %16158 = vmatpush1.bf16.msra.mxu1 %v22686_v16  ;;  %v22779_v16 = vld [vmem:[%s26369_s19 + $0x554] ss:$8 sps:$4 sm:$0xff]  }
 0x1ba   : > { %17716 = vmatpush1.bf16.msra.mxu0 %v22689_v17  ;;  %16159 = vmatprep.subr.bf16.mxu1 %v22694_v18  ;;  %v22782_v17 = vld [vmem:[%s26369_s19 + $0x2b54] ss:$8 sps:$4 sm:$0xff]   ;;  %v22777_v18 = vld [vmem:[%s26369_s19 + $0x550] ss:$8 sps:$4 sm:$0xff]  }
 0x1bb   : > { %17717 = vmatprep.subr.bf16.mxu0 %v22697_v21  ;;  %v22780_v21 = vld [vmem:[%s26369_s19 + $0x2b50] ss:$8 sps:$4 sm:$0xff]  }
 0x1bd   : > { %16160 = vmatpush1.bf16.msra.mxu1 %v22692_v22  ;;  %v22785_v22 = vld [vmem:[%s26369_s19 + $0x564] ss:$8 sps:$4 sm:$0xff]  }
 0x1be   : > { %17718 = vmatpush1.bf16.msra.mxu0 %v22695_v23  ;;  %16161 = vmatprep.subr.bf16.mxu1 %v22700_v24  ;;  %v22788_v23 = vld [vmem:[%s26369_s19 + $0x2b64] ss:$8 sps:$4 sm:$0xff]   ;;  %v22783_v24 = vld [vmem:[%s26369_s19 + $0x560] ss:$8 sps:$4 sm:$0xff]  }
 0x1bf   : > { %17719 = vmatprep.subr.bf16.mxu0 %v22703_v26  ;;  %v22786_v26 = vld [vmem:[%s26369_s19 + $0x2b60] ss:$8 sps:$4 sm:$0xff]  }
 0x1c1   : > { %16162 = vmatpush1.bf16.msra.mxu1 %v22698_v54  ;;  %v22791_v54 = vld [vmem:[%s26369_s19 + $0x574] ss:$8 sps:$4 sm:$0xff]  }
 0x1c2   : > { %17720 = vmatpush1.bf16.msra.mxu0 %v22701_v27  ;;  %16163 = vmatprep.subr.bf16.mxu1 %v22706_v28  ;;  %v22794_v27 = vld [vmem:[%s26369_s19 + $0x2b74] ss:$8 sps:$4 sm:$0xff]   ;;  %v22789_v28 = vld [vmem:[%s26369_s19 + $0x570] ss:$8 sps:$4 sm:$0xff]  }
 0x1c3   : > { %17721 = vmatprep.subr.bf16.mxu0 %v22709_v29  ;;  %v22792_v29 = vld [vmem:[%s26369_s19 + $0x2b70] ss:$8 sps:$4 sm:$0xff]  }
 0x1c5   : > { %16164 = vmatpush1.bf16.msra.mxu1 %v22704_v30  ;;  %v22797_v30 = vld [vmem:[%s26369_s19 + $0x584] ss:$8 sps:$4 sm:$0xff]  }
 0x1c6   : > { %17722 = vmatpush1.bf16.msra.mxu0 %v22707_v31  ;;  %16165 = vmatprep.subr.bf16.mxu1 %v22712_v32  ;;  %v22800_v31 = vld [vmem:[%s26369_s19 + $0x2b84] ss:$8 sps:$4 sm:$0xff]   ;;  %v22795_v32 = vld [vmem:[%s26369_s19 + $0x580] ss:$8 sps:$4 sm:$0xff]  }
 0x1c7   : > { %17723 = vmatprep.subr.bf16.mxu0 %v22715_v33  ;;  %v22798_v33 = vld [vmem:[%s26369_s19 + $0x2b80] ss:$8 sps:$4 sm:$0xff]  }
 0x1c9   : > { %16166 = vmatpush1.bf16.msra.mxu1 %v22710_v34  ;;  %v22803_v34 = vld [vmem:[%s26369_s19 + $0x594] ss:$8 sps:$4 sm:$0xff]  }
 0x1ca   : > { %17724 = vmatpush1.bf16.msra.mxu0 %v22713_v35  ;;  %16167 = vmatprep.subr.bf16.mxu1 %v22718_v19  ;;  %v22806_v35 = vld [vmem:[%s26369_s19 + $0x2b94] ss:$8 sps:$4 sm:$0xff]   ;;  %v22801_v19 = vld [vmem:[%s26369_s19 + $0x590] ss:$8 sps:$4 sm:$0xff]  }
 0x1cb   : > { %17725 = vmatprep.subr.bf16.mxu0 %v22721_v38  ;;  %v22804_v38 = vld [vmem:[%s26369_s19 + $0x2b90] ss:$8 sps:$4 sm:$0xff]  }
 0x1cd   : > { %16168 = vmatpush1.bf16.msra.mxu1 %v22716_v39  ;;  %v22809_v39 = vld [vmem:[%s26369_s19 + $0x5a4] ss:$8 sps:$4 sm:$0xff]  }
 0x1ce   : > { %17726 = vmatpush1.bf16.msra.mxu0 %v22719_v40  ;;  %16169 = vmatprep.subr.bf16.mxu1 %v22724_v41  ;;  %v22812_v40 = vld [vmem:[%s26369_s19 + $0x2ba4] ss:$8 sps:$4 sm:$0xff]   ;;  %v22807_v41 = vld [vmem:[%s26369_s19 + $0x5a0] ss:$8 sps:$4 sm:$0xff]  }
 0x1cf   : > { %17727 = vmatprep.subr.bf16.mxu0 %v22727_v46  ;;  %v22810_v46 = vld [vmem:[%s26369_s19 + $0x2ba0] ss:$8 sps:$4 sm:$0xff]  }
 0x1d1   : > { %16170 = vmatpush1.bf16.msra.mxu1 %v22722_v48  ;;  %v22815_v48 = vld [vmem:[%s26369_s19 + $0x5b4] ss:$8 sps:$4 sm:$0xff]  }
 0x1d2   : > { %17728 = vmatpush1.bf16.msra.mxu0 %v22725_v49  ;;  %16171 = vmatprep.subr.bf16.mxu1 %v22730_v20  ;;  %v22818_v49 = vld [vmem:[%s26369_s19 + $0x2bb4] ss:$8 sps:$4 sm:$0xff]   ;;  %v22813_v20 = vld [vmem:[%s26369_s19 + $0x5b0] ss:$8 sps:$4 sm:$0xff]  }
 0x1d3   : > { %17729 = vmatprep.subr.bf16.mxu0 %v22733_v50  ;;  %v22816_v50 = vld [vmem:[%s26369_s19 + $0x2bb0] ss:$8 sps:$4 sm:$0xff]  }
 0x1d5   : > { %16172 = vmatpush1.bf16.msra.mxu1 %v22728_v37  ;;  %v22821_v37 = vld [vmem:[%s26369_s19 + $0x5c4] ss:$8 sps:$4 sm:$0xff]  }
 0x1d6   : > { %17730 = vmatpush1.bf16.msra.mxu0 %v22731_v52  ;;  %16173 = vmatprep.subr.bf16.mxu1 %v22736_v36  ;;  %v22824_v52 = vld [vmem:[%s26369_s19 + $0x2bc4] ss:$8 sps:$4 sm:$0xff]   ;;  %v22819_v36 = vld [vmem:[%s26369_s19 + $0x5c0] ss:$8 sps:$4 sm:$0xff]  }
 0x1d7   : > { %17731 = vmatprep.subr.bf16.mxu0 %v22739_v43  ;;  %v22822_v43 = vld [vmem:[%s26369_s19 + $0x2bc0] ss:$8 sps:$4 sm:$0xff]  }
 0x1d9   : > { %16174 = vmatpush1.bf16.msra.mxu1 %v22734_v53  ;;  %v22827_v53 = vld [vmem:[%s26369_s19 + $0x5d4] ss:$8 sps:$4 sm:$0xff]  }
 0x1da   : > { %17732 = vmatpush1.bf16.msra.mxu0 %v22737_v55  ;;  %16175 = vmatprep.subr.bf16.mxu1 %v22742_v56  ;;  %v22830_v55 = vld [vmem:[%s26369_s19 + $0x2bd4] ss:$8 sps:$4 sm:$0xff]   ;;  %v22825_v56 = vld [vmem:[%s26369_s19 + $0x5d0] ss:$8 sps:$4 sm:$0xff]  }
 0x1db   : > { %17733 = vmatprep.subr.bf16.mxu0 %v22745_v57  ;;  %v22828_v57 = vld [vmem:[%s26369_s19 + $0x2bd0] ss:$8 sps:$4 sm:$0xff]  }
 0x1dd   : > { %16176 = vmatpush1.bf16.msra.mxu1 %v22740_v58  ;;  %v22833_v58 = vld [vmem:[%s26369_s19 + $0x5e4] ss:$8 sps:$4 sm:$0xff]  }
 0x1de   : > { %17734 = vmatpush1.bf16.msra.mxu0 %v22743_v59  ;;  %16186 = vmatprep.subr.bf16.mxu1 %v22748_v42  ;;  %v22836_v59 = vld [vmem:[%s26369_s19 + $0x2be4] ss:$8 sps:$4 sm:$0xff]   ;;  %v26872_v42 = vld.sshfl [vmem:[%s26387_s30 + $0x58] sm:$0xff pattern:$0x75316420] }
 0x1df   : > { %17744 = vmatprep.subr.bf16.mxu0 %v22752_v44  ;;  %v25907_v44 = vld [vmem:[%s26387_s30 + $0x8] sm:$0xff] }
 0x1e0   : > { %16178 = vmatmul.mubr.bf16.vlgmr.msra.gmra.mrb[0].mxu1 %v26803_v62 }
 0x1e1   : > { %17736 = vmatmul.mubr.bf16.vlgmr.msra.gmra.mrb[0].mxu0 %v26807_v63  ;;  %16187 = vmatpush1.bf16.msra.mxu1 %v22746_v0  ;;  %v2869_v0 = vcombine.high %v25907_v44, %v25907_v44  ;;  %v22909_v44 = vld [vmem:[%s26369_s19 + $0x6b0] ss:$8 sps:$4 sm:$0xff]  }
 0x1e2   : > { %17745 = vmatpush1.bf16.msra.mxu0 %v22750_v1  ;;  %16188 = vmatprep.subr.bf16.mxu1 %v22755_v2  ;;  %v22831_v1 = vld [vmem:[%s26369_s19 + $0x5e0] ss:$8 sps:$4 sm:$0xff]  }
 0x1e3   : > { %17746 = vmatprep.subr.bf16.mxu0 %v22758_v3  ;;  %16218 = vmatprep.mubr.bf16.mxu1 %v2916_v47  ;;  %v22834_v2 = vld [vmem:[%s26369_s19 + $0x2be0] ss:$8 sps:$4 sm:$0xff]   ;;  %v22839_v3 = vld [vmem:[%s26369_s19 + $0x5f4] ss:$8 sps:$4 sm:$0xff]  }
 0x1e4   : > { %17776 = vmatprep.mubr.bf16.mxu0 %v3358_v4  ;;  %v22842_v47 = vld [vmem:[%s26369_s19 + $0x2bf4] ss:$8 sps:$4 sm:$0xff]   ;;  %v26880_v4 = vrot.slane %v2869_v0, %v26438_v51  ;;  %v22912_v0 = vld [vmem:[%s26369_s19 + $0x2cb0] ss:$8 sps:$4 sm:$0xff]  }
 0x1e5   : > { %16189 = vmatpush1.bf16.msra.mxu1 %v22753_v25  ;;  %v22837_v25 = vld [vmem:[%s26369_s19 + $0x5f0] ss:$8 sps:$4 sm:$0xff]  }
 0x1e6   : > { %17747 = vmatpush1.bf16.msra.mxu0 %v22756_v5  ;;  %16190 = vmatprep.subr.bf16.mxu1 %v22761_v60  ;;  %v22840_v5 = vld [vmem:[%s26369_s19 + $0x2bf0] ss:$8 sps:$4 sm:$0xff]   ;;  %v22845_v60 = vld [vmem:[%s26369_s19 + $0x604] ss:$8 sps:$4 sm:$0xff]  }
 0x1e7   : > { %17748 = vmatprep.subr.bf16.mxu0 %v22764_v6  ;;  %v22848_v6 = vld [vmem:[%s26369_s19 + $0x2c04] ss:$8 sps:$4 sm:$0xff]  }
 0x1e9   : > { %16191 = vmatpush1.bf16.msra.mxu1 %v22759_v61  ;;  %v2885_v61 = vcombine.high %v26880_v4, %v26880_v4 }
 0x1ea   : > { %17749 = vmatpush1.bf16.msra.mxu0 %v22762_v7  ;;  %16192 = vmatprep.subr.bf16.mxu1 %v22767_v8  ;;  %v3374_v7 = vcombine.high %v26872_v42, %v26872_v42  ;;  %v2914_v8 = vcombine.high %v26803_v62, %v26803_v62 }
 0x1eb   : > { %17750 = vmatprep.subr.bf16.mxu0 %v22770_v9  ;;  %v3356_v9 = vcombine.high %v26807_v63, %v26807_v63  ;;  %v22849_v63 = vld [vmem:[%s26369_s19 + $0x610] ss:$8 sps:$4 sm:$0xff]  }
 0x1ec   : > { %v26902_v62 = vrot.slane %v3374_v7, %v26438_v51  ;;  %v22932_v7 = vld [vmem:[%s26369_s19 + $0x2ce4] ss:$8 sps:$4 sm:$0xff]  }
 0x1ed   : > { %16193 = vmatpush1.bf16.msra.mxu1 %v22765_v10  ;;  %v22843_v10 = vld [vmem:[%s26369_s19 + $0x600] ss:$8 sps:$4 sm:$0xff]  }
 0x1ee   : > { %17751 = vmatpush1.bf16.msra.mxu0 %v22768_v11  ;;  %16194 = vmatprep.subr.bf16.mxu1 %v22773_v12  ;;  %v22846_v11 = vld [vmem:[%s26369_s19 + $0x2c00] ss:$8 sps:$4 sm:$0xff]   ;;  %v22851_v12 = vld [vmem:[%s26369_s19 + $0x614] ss:$8 sps:$4 sm:$0xff]  }
 0x1ef   : > { %17752 = vmatprep.subr.bf16.mxu0 %v22776_v13  ;;  %v22854_v13 = vld [vmem:[%s26369_s19 + $0x2c14] ss:$8 sps:$4 sm:$0xff]  }
 0x1f1   : > { %16195 = vmatpush1.bf16.msra.mxu1 %v22771_v14  ;;  %v26899_v14 = vrot.slane %v2885_v61, %v26438_v51  ;;  %v22929_v61 = vld [vmem:[%s26369_s19 + $0x6e4] ss:$8 sps:$4 sm:$0xff]  }
 0x1f2   : > { %17753 = vmatpush1.bf16.msra.mxu0 %v22774_v15  ;;  %16196 = vmatprep.subr.bf16.mxu1 %v22779_v16  ;;  %v22852_v15 = vld [vmem:[%s26369_s19 + $0x2c10] ss:$8 sps:$4 sm:$0xff]   ;;  %v22857_v16 = vld [vmem:[%s26369_s19 + $0x624] ss:$8 sps:$4 sm:$0xff]  }
 0x1f3   : > { %17754 = vmatprep.subr.bf16.mxu0 %v22782_v17  ;;  %v22860_v17 = vld [vmem:[%s26369_s19 + $0x2c24] ss:$8 sps:$4 sm:$0xff]  }
 0x1f5   : > { %16197 = vmatpush1.bf16.msra.mxu1 %v22777_v18  ;;  %v22855_v18 = vld [vmem:[%s26369_s19 + $0x620] ss:$8 sps:$4 sm:$0xff]  }
 0x1f6   : > { %17755 = vmatpush1.bf16.msra.mxu0 %v22780_v21  ;;  %16198 = vmatprep.subr.bf16.mxu1 %v22785_v22  ;;  %v22858_v21 = vld [vmem:[%s26369_s19 + $0x2c20] ss:$8 sps:$4 sm:$0xff]   ;;  %v22863_v22 = vld [vmem:[%s26369_s19 + $0x634] ss:$8 sps:$4 sm:$0xff]  }
 0x1f7   : > { %17756 = vmatprep.subr.bf16.mxu0 %v22788_v23  ;;  %v22866_v23 = vld [vmem:[%s26369_s19 + $0x2c34] ss:$8 sps:$4 sm:$0xff]  }
 0x1f9   : > { %16199 = vmatpush1.bf16.msra.mxu1 %v22783_v24  ;;  %v22861_v24 = vld [vmem:[%s26369_s19 + $0x630] ss:$8 sps:$4 sm:$0xff]  }
 0x1fa   : > { %17757 = vmatpush1.bf16.msra.mxu0 %v22786_v26  ;;  %16200 = vmatprep.subr.bf16.mxu1 %v22791_v54  ;;  %v22864_v26 = vld [vmem:[%s26369_s19 + $0x2c30] ss:$8 sps:$4 sm:$0xff]   ;;  %v22869_v54 = vld [vmem:[%s26369_s19 + $0x644] ss:$8 sps:$4 sm:$0xff]  }
 0x1fb   : > { %17758 = vmatprep.subr.bf16.mxu0 %v22794_v27  ;;  %v22872_v27 = vld [vmem:[%s26369_s19 + $0x2c44] ss:$8 sps:$4 sm:$0xff]  }
 0x1fd   : > { %16201 = vmatpush1.bf16.msra.mxu1 %v22789_v28  ;;  %v22867_v28 = vld [vmem:[%s26369_s19 + $0x640] ss:$8 sps:$4 sm:$0xff]  }
 0x1fe   : > { %17759 = vmatpush1.bf16.msra.mxu0 %v22792_v29  ;;  %16202 = vmatprep.subr.bf16.mxu1 %v22797_v30  ;;  %v22870_v29 = vld [vmem:[%s26369_s19 + $0x2c40] ss:$8 sps:$4 sm:$0xff]   ;;  %v22875_v30 = vld [vmem:[%s26369_s19 + $0x654] ss:$8 sps:$4 sm:$0xff]  }
 0x1ff   : > { %17760 = vmatprep.subr.bf16.mxu0 %v22800_v31  ;;  %v22878_v31 = vld [vmem:[%s26369_s19 + $0x2c54] ss:$8 sps:$4 sm:$0xff]  }
 0x201   : > { %16203 = vmatpush1.bf16.msra.mxu1 %v22795_v32  ;;  %v22873_v32 = vld [vmem:[%s26369_s19 + $0x650] ss:$8 sps:$4 sm:$0xff]  }
 0x202   : > { %17761 = vmatpush1.bf16.msra.mxu0 %v22798_v33  ;;  %16204 = vmatprep.subr.bf16.mxu1 %v22803_v34  ;;  %v22876_v33 = vld [vmem:[%s26369_s19 + $0x2c50] ss:$8 sps:$4 sm:$0xff]   ;;  %v22881_v34 = vld [vmem:[%s26369_s19 + $0x664] ss:$8 sps:$4 sm:$0xff]  }
 0x203   : > { %17762 = vmatprep.subr.bf16.mxu0 %v22806_v35  ;;  %v22884_v35 = vld [vmem:[%s26369_s19 + $0x2c64] ss:$8 sps:$4 sm:$0xff]  }
 0x205   : > { %16205 = vmatpush1.bf16.msra.mxu1 %v22801_v19  ;;  %v22879_v19 = vld [vmem:[%s26369_s19 + $0x660] ss:$8 sps:$4 sm:$0xff]  }
 0x206   : > { %17763 = vmatpush1.bf16.msra.mxu0 %v22804_v38  ;;  %16206 = vmatprep.subr.bf16.mxu1 %v22809_v39  ;;  %v22882_v38 = vld [vmem:[%s26369_s19 + $0x2c60] ss:$8 sps:$4 sm:$0xff]   ;;  %v22887_v39 = vld [vmem:[%s26369_s19 + $0x674] ss:$8 sps:$4 sm:$0xff]  }
 0x207   : > { %17764 = vmatprep.subr.bf16.mxu0 %v22812_v40  ;;  %v22890_v40 = vld [vmem:[%s26369_s19 + $0x2c74] ss:$8 sps:$4 sm:$0xff]  }
 0x209   : > { %16207 = vmatpush1.bf16.msra.mxu1 %v22807_v41  ;;  %v22885_v41 = vld [vmem:[%s26369_s19 + $0x670] ss:$8 sps:$4 sm:$0xff]  }
 0x20a   : > { %17765 = vmatpush1.bf16.msra.mxu0 %v22810_v46  ;;  %16208 = vmatprep.subr.bf16.mxu1 %v22815_v48  ;;  %v22888_v46 = vld [vmem:[%s26369_s19 + $0x2c70] ss:$8 sps:$4 sm:$0xff]   ;;  %v22893_v48 = vld [vmem:[%s26369_s19 + $0x684] ss:$8 sps:$4 sm:$0xff]  }
 0x20b   : > { %17766 = vmatprep.subr.bf16.mxu0 %v22818_v49  ;;  %v22896_v49 = vld [vmem:[%s26369_s19 + $0x2c84] ss:$8 sps:$4 sm:$0xff]  }
 0x20d   : > { %16209 = vmatpush1.bf16.msra.mxu1 %v22813_v20  ;;  %v22891_v20 = vld [vmem:[%s26369_s19 + $0x680] ss:$8 sps:$4 sm:$0xff]  }
 0x20e   : > { %17767 = vmatpush1.bf16.msra.mxu0 %v22816_v50  ;;  %16210 = vmatprep.subr.bf16.mxu1 %v22821_v37  ;;  %v22894_v50 = vld [vmem:[%s26369_s19 + $0x2c80] ss:$8 sps:$4 sm:$0xff]   ;;  %v22899_v37 = vld [vmem:[%s26369_s19 + $0x694] ss:$8 sps:$4 sm:$0xff]  }
 0x20f   : > { %17768 = vmatprep.subr.bf16.mxu0 %v22824_v52  ;;  %v22902_v52 = vld [vmem:[%s26369_s19 + $0x2c94] ss:$8 sps:$4 sm:$0xff]  }
 0x211   : > { %16211 = vmatpush1.bf16.msra.mxu1 %v22819_v36  ;;  %v22897_v36 = vld [vmem:[%s26369_s19 + $0x690] ss:$8 sps:$4 sm:$0xff]  }
 0x212   : > { %17769 = vmatpush1.bf16.msra.mxu0 %v22822_v43  ;;  %16212 = vmatprep.subr.bf16.mxu1 %v22827_v53  ;;  %v22900_v43 = vld [vmem:[%s26369_s19 + $0x2c90] ss:$8 sps:$4 sm:$0xff]   ;;  %v22905_v53 = vld [vmem:[%s26369_s19 + $0x6a4] ss:$8 sps:$4 sm:$0xff]  }
 0x213   : > { %17770 = vmatprep.subr.bf16.mxu0 %v22830_v55  ;;  %v22908_v55 = vld [vmem:[%s26369_s19 + $0x2ca4] ss:$8 sps:$4 sm:$0xff]  }
 0x215   : > { %16213 = vmatpush1.bf16.msra.mxu1 %v22825_v56  ;;  %v22903_v56 = vld [vmem:[%s26369_s19 + $0x6a0] ss:$8 sps:$4 sm:$0xff]  }
 0x216   : > { %17771 = vmatpush1.bf16.msra.mxu0 %v22828_v57  ;;  %16214 = vmatprep.subr.bf16.mxu1 %v22833_v58  ;;  %v22906_v57 = vld [vmem:[%s26369_s19 + $0x2ca0] ss:$8 sps:$4 sm:$0xff]   ;;  %v22911_v58 = vld [vmem:[%s26369_s19 + $0x6b4] ss:$8 sps:$4 sm:$0xff]  }
 0x217   : > { %17772 = vmatprep.subr.bf16.mxu0 %v22836_v59  ;;  %v22914_v59 = vld [vmem:[%s26369_s19 + $0x2cb4] ss:$8 sps:$4 sm:$0xff]  }
 0x219   : > { %16215 = vmatpush1.bf16.msra.mxu1 %v22831_v1  ;;  %v22917_v1 = vld [vmem:[%s26369_s19 + $0x6c4] ss:$8 sps:$4 sm:$0xff]  }
 0x21a   : > { %17773 = vmatpush1.bf16.msra.mxu0 %v22834_v2  ;;  %16216 = vmatprep.subr.bf16.mxu1 %v22839_v3  ;;  %v22920_v2 = vld [vmem:[%s26369_s19 + $0x2cc4] ss:$8 sps:$4 sm:$0xff]   ;;  %v22915_v3 = vld [vmem:[%s26369_s19 + $0x6c0] ss:$8 sps:$4 sm:$0xff]  }
 0x21b   : > { %17774 = vmatprep.subr.bf16.mxu0 %v22842_v47  ;;  %v22918_v47 = vld [vmem:[%s26369_s19 + $0x2cc0] ss:$8 sps:$4 sm:$0xff]  }
 0x21d   : > { %16217 = vmatpush1.bf16.msra.mxu1 %v22837_v25  ;;  %v22923_v25 = vld [vmem:[%s26369_s19 + $0x6d4] ss:$8 sps:$4 sm:$0xff]  }
 0x21e   : > { %17775 = vmatpush1.bf16.msra.mxu0 %v22840_v5  ;;  %16227 = vmatprep.subr.bf16.mxu1 %v22845_v60  ;;  %v22926_v5 = vld [vmem:[%s26369_s19 + $0x2cd4] ss:$8 sps:$4 sm:$0xff]   ;;  %v22921_v60 = vld [vmem:[%s26369_s19 + $0x6d0] ss:$8 sps:$4 sm:$0xff]  }
 0x21f   : > { %17785 = vmatprep.subr.bf16.mxu0 %v22848_v6  ;;  %v22924_v6 = vld [vmem:[%s26369_s19 + $0x2cd0] ss:$8 sps:$4 sm:$0xff]  }
 0x220   : > { %16219 = vmatmul.mubr.bf16.vlgmr.msra.gmra.mrb[0].mxu1 %v2914_v8  ;;  %v22927_v8 = vld [vmem:[%s26369_s19 + $0x6e0] ss:$8 sps:$4 sm:$0xff]  }
 0x221   : > { %17777 = vmatmul.mubr.bf16.vlgmr.msra.gmra.mrb[0].mxu0 %v3356_v9  ;;  %16228 = vmatpush1.bf16.msra.mxu1 %v22843_v10  ;;  %v22930_v9 = vld [vmem:[%s26369_s19 + $0x2ce0] ss:$8 sps:$4 sm:$0xff]   ;;  %v22935_v10 = vld [vmem:[%s26369_s19 + $0x6f4] ss:$8 sps:$4 sm:$0xff]  }
 0x222   : > { %17786 = vmatpush1.bf16.msra.mxu0 %v22846_v11  ;;  %16229 = vmatprep.subr.bf16.mxu1 %v22851_v12  ;;  %v22938_v11 = vld [vmem:[%s26369_s19 + $0x2cf4] ss:$8 sps:$4 sm:$0xff]   ;;  %v22933_v12 = vld [vmem:[%s26369_s19 + $0x6f0] ss:$8 sps:$4 sm:$0xff]  }
 0x223   : > { %17787 = vmatprep.subr.bf16.mxu0 %v22854_v13  ;;  %16259 = vmatprep.mubr.bf16.mxu1 %v26899_v14  ;;  %v22936_v13 = vld [vmem:[%s26369_s19 + $0x2cf0] ss:$8 sps:$4 sm:$0xff]  }
 0x224   : > { %17817 = vmatprep.mubr.bf16.mxu0 %v26902_v62 }
 0x225   : > { %16230 = vmatpush1.bf16.msra.mxu1 %v22849_v63  ;;  %v22942_v63 = vld [vmem:[%s26369_s19 + $0x704] ss:$8 sps:$4 sm:$0xff]  }
 0x226   : > { %17788 = vmatpush1.bf16.msra.mxu0 %v22852_v15  ;;  %16231 = vmatprep.subr.bf16.mxu1 %v22857_v16  ;;  %v22945_v15 = vld [vmem:[%s26369_s19 + $0x2d04] ss:$8 sps:$4 sm:$0xff]   ;;  %v26968_v16 = vrot.slane %v26880_v4, %v26438_v51  ;;  %v2917_v4 = vcombine.high %v26899_v14, %v26899_v14 }
 0x227   : > { %17789 = vmatprep.subr.bf16.mxu0 %v22860_v17  ;;  %v26972_v17 = vrot.slane %v26872_v42, %v26438_v51  ;;  %v22946_v42 = vld [vmem:[%s26369_s19 + $0x710] ss:$8 sps:$4 sm:$0xff]   ;;  %v22954_v14 = vld [vmem:[%s26369_s19 + $0x724] ss:$8 sps:$4 sm:$0xff]  }
 0x229   : > { %16232 = vmatpush1.bf16.msra.mxu1 %v22855_v18  ;;  %v22940_v18 = vld [vmem:[%s26369_s19 + $0x700] ss:$8 sps:$4 sm:$0xff]  }
 0x22a   : > { %17790 = vmatpush1.bf16.msra.mxu0 %v22858_v21  ;;  %16233 = vmatprep.subr.bf16.mxu1 %v22863_v22  ;;  %v22943_v21 = vld [vmem:[%s26369_s19 + $0x2d00] ss:$8 sps:$4 sm:$0xff]   ;;  %v22948_v22 = vld [vmem:[%s26369_s19 + $0x714] ss:$8 sps:$4 sm:$0xff]  }
 0x22b   : > { %17791 = vmatprep.subr.bf16.mxu0 %v22866_v23  ;;  %v22951_v23 = vld [vmem:[%s26369_s19 + $0x2d14] ss:$8 sps:$4 sm:$0xff]  }
 0x22d   : > { %16234 = vmatpush1.bf16.msra.mxu1 %v22861_v24  ;;  %v3406_v24 = vcombine.high %v26902_v62, %v26902_v62  ;;  %v22952_v62 = vld [vmem:[%s26369_s19 + $0x720] ss:$8 sps:$4 sm:$0xff]  }
 0x22e   : > { %17792 = vmatpush1.bf16.msra.mxu0 %v22864_v26  ;;  %16235 = vmatprep.subr.bf16.mxu1 %v22869_v54  ;;  %v22949_v26 = vld [vmem:[%s26369_s19 + $0x2d10] ss:$8 sps:$4 sm:$0xff]   ;;  %v22957_v54 = vld [vmem:[%s26369_s19 + $0x2d24] ss:$8 sps:$4 sm:$0xff]  }
 0x22f   : > { %17793 = vmatprep.subr.bf16.mxu0 %v22872_v27  ;;  %v22955_v27 = vld [vmem:[%s26369_s19 + $0x2d20] ss:$8 sps:$4 sm:$0xff]  }
 0x231   : > { %16236 = vmatpush1.bf16.msra.mxu1 %v22867_v28  ;;  %v22960_v28 = vld [vmem:[%s26369_s19 + $0x734] ss:$8 sps:$4 sm:$0xff]  }
 0x232   : > { %17794 = vmatpush1.bf16.msra.mxu0 %v22870_v29  ;;  %16237 = vmatprep.subr.bf16.mxu1 %v22875_v30  ;;  %v22963_v29 = vld [vmem:[%s26369_s19 + $0x2d34] ss:$8 sps:$4 sm:$0xff]   ;;  %v22958_v30 = vld [vmem:[%s26369_s19 + $0x730] ss:$8 sps:$4 sm:$0xff]  }
 0x233   : > { %17795 = vmatprep.subr.bf16.mxu0 %v22878_v31  ;;  %v22961_v31 = vld [vmem:[%s26369_s19 + $0x2d30] ss:$8 sps:$4 sm:$0xff]  }
 0x235   : > { %16238 = vmatpush1.bf16.msra.mxu1 %v22873_v32  ;;  %v22966_v32 = vld [vmem:[%s26369_s19 + $0x744] ss:$8 sps:$4 sm:$0xff]  }
 0x236   : > { %17796 = vmatpush1.bf16.msra.mxu0 %v22876_v33  ;;  %16239 = vmatprep.subr.bf16.mxu1 %v22881_v34  ;;  %v22969_v33 = vld [vmem:[%s26369_s19 + $0x2d44] ss:$8 sps:$4 sm:$0xff]   ;;  %v22964_v34 = vld [vmem:[%s26369_s19 + $0x740] ss:$8 sps:$4 sm:$0xff]  }
 0x237   : > { %17797 = vmatprep.subr.bf16.mxu0 %v22884_v35  ;;  %v22967_v35 = vld [vmem:[%s26369_s19 + $0x2d40] ss:$8 sps:$4 sm:$0xff]  }
 0x239   : > { %16240 = vmatpush1.bf16.msra.mxu1 %v22879_v19  ;;  %v22972_v19 = vld [vmem:[%s26369_s19 + $0x754] ss:$8 sps:$4 sm:$0xff]  }
 0x23a   : > { %17798 = vmatpush1.bf16.msra.mxu0 %v22882_v38  ;;  %16241 = vmatprep.subr.bf16.mxu1 %v22887_v39  ;;  %v22975_v38 = vld [vmem:[%s26369_s19 + $0x2d54] ss:$8 sps:$4 sm:$0xff]   ;;  %v22970_v39 = vld [vmem:[%s26369_s19 + $0x750] ss:$8 sps:$4 sm:$0xff]  }
 0x23b   : > { %17799 = vmatprep.subr.bf16.mxu0 %v22890_v40  ;;  %v22973_v40 = vld [vmem:[%s26369_s19 + $0x2d50] ss:$8 sps:$4 sm:$0xff]  }
 0x23d   : > { %16242 = vmatpush1.bf16.msra.mxu1 %v22885_v41  ;;  %v22978_v41 = vld [vmem:[%s26369_s19 + $0x764] ss:$8 sps:$4 sm:$0xff]  }
 0x23e   : > { %17800 = vmatpush1.bf16.msra.mxu0 %v22888_v46  ;;  %16243 = vmatprep.subr.bf16.mxu1 %v22893_v48  ;;  %v22981_v46 = vld [vmem:[%s26369_s19 + $0x2d64] ss:$8 sps:$4 sm:$0xff]   ;;  %v22976_v48 = vld [vmem:[%s26369_s19 + $0x760] ss:$8 sps:$4 sm:$0xff]  }
 0x23f   : > { %17801 = vmatprep.subr.bf16.mxu0 %v22896_v49  ;;  %v22979_v49 = vld [vmem:[%s26369_s19 + $0x2d60] ss:$8 sps:$4 sm:$0xff]  }
 0x241   : > { %16244 = vmatpush1.bf16.msra.mxu1 %v22891_v20  ;;  %v22984_v20 = vld [vmem:[%s26369_s19 + $0x774] ss:$8 sps:$4 sm:$0xff]  }
 0x242   : > { %17802 = vmatpush1.bf16.msra.mxu0 %v22894_v50  ;;  %16245 = vmatprep.subr.bf16.mxu1 %v22899_v37  ;;  %v22987_v50 = vld [vmem:[%s26369_s19 + $0x2d74] ss:$8 sps:$4 sm:$0xff]   ;;  %v22982_v37 = vld [vmem:[%s26369_s19 + $0x770] ss:$8 sps:$4 sm:$0xff]  }
 0x243   : > { %17803 = vmatprep.subr.bf16.mxu0 %v22902_v52  ;;  %v22985_v52 = vld [vmem:[%s26369_s19 + $0x2d70] ss:$8 sps:$4 sm:$0xff]  }
 0x245   : > { %16246 = vmatpush1.bf16.msra.mxu1 %v22897_v36  ;;  %v22990_v36 = vld [vmem:[%s26369_s19 + $0x784] ss:$8 sps:$4 sm:$0xff]  }
 0x246   : > { %17804 = vmatpush1.bf16.msra.mxu0 %v22900_v43  ;;  %16247 = vmatprep.subr.bf16.mxu1 %v22905_v53  ;;  %v22993_v43 = vld [vmem:[%s26369_s19 + $0x2d84] ss:$8 sps:$4 sm:$0xff]   ;;  %v22988_v53 = vld [vmem:[%s26369_s19 + $0x780] ss:$8 sps:$4 sm:$0xff]  }
 0x247   : > { %17805 = vmatprep.subr.bf16.mxu0 %v22908_v55  ;;  %v22991_v55 = vld [vmem:[%s26369_s19 + $0x2d80] ss:$8 sps:$4 sm:$0xff]  }
 0x249   : > { %16248 = vmatpush1.bf16.msra.mxu1 %v22903_v56  ;;  %v22996_v56 = vld [vmem:[%s26369_s19 + $0x794] ss:$8 sps:$4 sm:$0xff]  }
 0x24a   : > { %17806 = vmatpush1.bf16.msra.mxu0 %v22906_v57  ;;  %16249 = vmatprep.subr.bf16.mxu1 %v22911_v58  ;;  %v22999_v57 = vld [vmem:[%s26369_s19 + $0x2d94] ss:$8 sps:$4 sm:$0xff]   ;;  %v22994_v58 = vld [vmem:[%s26369_s19 + $0x790] ss:$8 sps:$4 sm:$0xff]  }
 0x24b   : > { %17807 = vmatprep.subr.bf16.mxu0 %v22914_v59  ;;  %v22997_v59 = vld [vmem:[%s26369_s19 + $0x2d90] ss:$8 sps:$4 sm:$0xff]  }
 0x24d   : > { %16250 = vmatpush1.bf16.msra.mxu1 %v22909_v44  ;;  %v23002_v44 = vld [vmem:[%s26369_s19 + $0x7a4] ss:$8 sps:$4 sm:$0xff]  }
 0x24e   : > { %17808 = vmatpush1.bf16.msra.mxu0 %v22912_v0  ;;  %16251 = vmatprep.subr.bf16.mxu1 %v22917_v1  ;;  %v23005_v0 = vld [vmem:[%s26369_s19 + $0x2da4] ss:$8 sps:$4 sm:$0xff]   ;;  %v23000_v1 = vld [vmem:[%s26369_s19 + $0x7a0] ss:$8 sps:$4 sm:$0xff]  }
 0x24f   : > { %17809 = vmatprep.subr.bf16.mxu0 %v22920_v2  ;;  %v23003_v2 = vld [vmem:[%s26369_s19 + $0x2da0] ss:$8 sps:$4 sm:$0xff]  }
 0x251   : > { %16252 = vmatpush1.bf16.msra.mxu1 %v22915_v3  ;;  %v23008_v3 = vld [vmem:[%s26369_s19 + $0x7b4] ss:$8 sps:$4 sm:$0xff]  }
 0x252   : > { %17810 = vmatpush1.bf16.msra.mxu0 %v22918_v47  ;;  %16253 = vmatprep.subr.bf16.mxu1 %v22923_v25  ;;  %v23011_v47 = vld [vmem:[%s26369_s19 + $0x2db4] ss:$8 sps:$4 sm:$0xff]   ;;  %v23006_v25 = vld [vmem:[%s26369_s19 + $0x7b0] ss:$8 sps:$4 sm:$0xff]  }
 0x253   : > { %17811 = vmatprep.subr.bf16.mxu0 %v22926_v5  ;;  %v23009_v5 = vld [vmem:[%s26369_s19 + $0x2db0] ss:$8 sps:$4 sm:$0xff]  }
 0x255   : > { %16254 = vmatpush1.bf16.msra.mxu1 %v22921_v60  ;;  %v23014_v60 = vld [vmem:[%s26369_s19 + $0x7c4] ss:$8 sps:$4 sm:$0xff]  }
 0x256   : > { %17812 = vmatpush1.bf16.msra.mxu0 %v22924_v6  ;;  %16255 = vmatprep.subr.bf16.mxu1 %v22929_v61  ;;  %v23017_v6 = vld [vmem:[%s26369_s19 + $0x2dc4] ss:$8 sps:$4 sm:$0xff]   ;;  %v23012_v61 = vld [vmem:[%s26369_s19 + $0x7c0] ss:$8 sps:$4 sm:$0xff]  }
 0x257   : > { %17813 = vmatprep.subr.bf16.mxu0 %v22932_v7  ;;  %v23015_v7 = vld [vmem:[%s26369_s19 + $0x2dc0] ss:$8 sps:$4 sm:$0xff]  }
 0x259   : > { %16256 = vmatpush1.bf16.msra.mxu1 %v22927_v8  ;;  %v23020_v8 = vld [vmem:[%s26369_s19 + $0x7d4] ss:$8 sps:$4 sm:$0xff]  }
 0x25a   : > { %17814 = vmatpush1.bf16.msra.mxu0 %v22930_v9  ;;  %16257 = vmatprep.subr.bf16.mxu1 %v22935_v10  ;;  %v23023_v9 = vld [vmem:[%s26369_s19 + $0x2dd4] ss:$8 sps:$4 sm:$0xff]   ;;  %v23018_v10 = vld [vmem:[%s26369_s19 + $0x7d0] ss:$8 sps:$4 sm:$0xff]  }
 0x25b   : > { %17815 = vmatprep.subr.bf16.mxu0 %v22938_v11  ;;  %v23021_v11 = vld [vmem:[%s26369_s19 + $0x2dd0] ss:$8 sps:$4 sm:$0xff]  }
 0x25d   : > { %16258 = vmatpush1.bf16.msra.mxu1 %v22933_v12  ;;  %v23026_v12 = vld [vmem:[%s26369_s19 + $0x7e4] ss:$8 sps:$4 sm:$0xff]  }
 0x25e   : > { %17816 = vmatpush1.bf16.msra.mxu0 %v22936_v13  ;;  %16268 = vmatprep.subr.bf16.mxu1 %v22942_v63  ;;  %v23029_v13 = vld [vmem:[%s26369_s19 + $0x2de4] ss:$8 sps:$4 sm:$0xff]  }
 0x25f   : > { %17826 = vmatprep.subr.bf16.mxu0 %v22945_v15  ;;  %v27037_v63 = vld.sshfl [vmem:[%s26387_s30 + $0x10] sm:$0xff pattern:$0x75316420]  ;;  %v25908_v15 = vld [vmem:[%s26387_s30 + $0x58] sm:$0xff] }
 0x260   : > { %16260 = vmatmul.mubr.bf16.vlgmr.msra.gmra.mrb[0].mxu1 %v26968_v16 }
 0x261   : > { %17818 = vmatmul.mubr.bf16.vlgmr.msra.gmra.mrb[0].mxu0 %v26972_v17  ;;  %16269 = vmatpush1.bf16.msra.mxu1 %v22940_v18  ;;  %v3359_v18 = vcombine.high %v25908_v15, %v25908_v15  ;;  %v23102_v15 = vld [vmem:[%s26369_s19 + $0x8b0] ss:$8 sps:$4 sm:$0xff]  }
 0x262   : > { %17827 = vmatpush1.bf16.msra.mxu0 %v22943_v21  ;;  %16270 = vmatprep.subr.bf16.mxu1 %v22948_v22  ;;  %v23024_v21 = vld [vmem:[%s26369_s19 + $0x7e0] ss:$8 sps:$4 sm:$0xff]  }
 0x263   : > { %17828 = vmatprep.subr.bf16.mxu0 %v22951_v23  ;;  %16300 = vmatprep.mubr.bf16.mxu1 %v2917_v4  ;;  %v23027_v22 = vld [vmem:[%s26369_s19 + $0x2de0] ss:$8 sps:$4 sm:$0xff]   ;;  %v23032_v23 = vld [vmem:[%s26369_s19 + $0x7f4] ss:$8 sps:$4 sm:$0xff]  }
 0x264   : > { %17858 = vmatprep.mubr.bf16.mxu0 %v3406_v24  ;;  %v23035_v4 = vld [vmem:[%s26369_s19 + $0x2df4] ss:$8 sps:$4 sm:$0xff]   ;;  %v27045_v24 = vrot.slane %v3359_v18, %v26438_v51  ;;  %v23105_v18 = vld [vmem:[%s26369_s19 + $0x2eb0] ss:$8 sps:$4 sm:$0xff]  }
 0x265   : > { %16271 = vmatpush1.bf16.msra.mxu1 %v22946_v42  ;;  %v23030_v42 = vld [vmem:[%s26369_s19 + $0x7f0] ss:$8 sps:$4 sm:$0xff]  }
 0x266   : > { %17829 = vmatpush1.bf16.msra.mxu0 %v22949_v26  ;;  %16272 = vmatprep.subr.bf16.mxu1 %v22954_v14  ;;  %v23033_v26 = vld [vmem:[%s26369_s19 + $0x2df0] ss:$8 sps:$4 sm:$0xff]   ;;  %v23038_v14 = vld [vmem:[%s26369_s19 + $0x804] ss:$8 sps:$4 sm:$0xff]  }
 0x267   : > { %17830 = vmatprep.subr.bf16.mxu0 %v22957_v54  ;;  %v23041_v54 = vld [vmem:[%s26369_s19 + $0x2e04] ss:$8 sps:$4 sm:$0xff]  }
 0x269   : > { %16273 = vmatpush1.bf16.msra.mxu1 %v22952_v62  ;;  %v2933_v62 = vcombine.high %v27037_v63, %v27037_v63 }
 0x26a   : > { %17831 = vmatpush1.bf16.msra.mxu0 %v22955_v27  ;;  %16274 = vmatprep.subr.bf16.mxu1 %v22960_v28  ;;  %v3375_v27 = vcombine.high %v27045_v24, %v27045_v24  ;;  %v2915_v28 = vcombine.high %v26968_v16, %v26968_v16 }
 0x26b   : > { %17832 = vmatprep.subr.bf16.mxu0 %v22963_v29  ;;  %v3404_v29 = vcombine.high %v26972_v17, %v26972_v17  ;;  %v23042_v17 = vld [vmem:[%s26369_s19 + $0x810] ss:$8 sps:$4 sm:$0xff]  }
 0x26c   : > { %v27067_v16 = vrot.slane %v3375_v27, %v26438_v51  ;;  %v23125_v27 = vld [vmem:[%s26369_s19 + $0x2ee4] ss:$8 sps:$4 sm:$0xff]  }
 0x26d   : > { %16275 = vmatpush1.bf16.msra.mxu1 %v22958_v30  ;;  %v23036_v30 = vld [vmem:[%s26369_s19 + $0x800] ss:$8 sps:$4 sm:$0xff]  }
 0x26e   : > { %17833 = vmatpush1.bf16.msra.mxu0 %v22961_v31  ;;  %16276 = vmatprep.subr.bf16.mxu1 %v22966_v32  ;;  %v23039_v31 = vld [vmem:[%s26369_s19 + $0x2e00] ss:$8 sps:$4 sm:$0xff]   ;;  %v23044_v32 = vld [vmem:[%s26369_s19 + $0x814] ss:$8 sps:$4 sm:$0xff]  }
 0x26f   : > { %17834 = vmatprep.subr.bf16.mxu0 %v22969_v33  ;;  %v23047_v33 = vld [vmem:[%s26369_s19 + $0x2e14] ss:$8 sps:$4 sm:$0xff]  }
 0x271   : > { %16277 = vmatpush1.bf16.msra.mxu1 %v22964_v34  ;;  %v27064_v34 = vrot.slane %v2933_v62, %v26438_v51  ;;  %v23122_v62 = vld [vmem:[%s26369_s19 + $0x8e4] ss:$8 sps:$4 sm:$0xff]  }
 0x272   : > { %17835 = vmatpush1.bf16.msra.mxu0 %v22967_v35  ;;  %16278 = vmatprep.subr.bf16.mxu1 %v22972_v19  ;;  %v23045_v35 = vld [vmem:[%s26369_s19 + $0x2e10] ss:$8 sps:$4 sm:$0xff]   ;;  %v23050_v19 = vld [vmem:[%s26369_s19 + $0x824] ss:$8 sps:$4 sm:$0xff]  }
 0x273   : > { %17836 = vmatprep.subr.bf16.mxu0 %v22975_v38  ;;  %v23053_v38 = vld [vmem:[%s26369_s19 + $0x2e24] ss:$8 sps:$4 sm:$0xff]  }
 0x275   : > { %16279 = vmatpush1.bf16.msra.mxu1 %v22970_v39  ;;  %v23048_v39 = vld [vmem:[%s26369_s19 + $0x820] ss:$8 sps:$4 sm:$0xff]  }
 0x276   : > { %17837 = vmatpush1.bf16.msra.mxu0 %v22973_v40  ;;  %16280 = vmatprep.subr.bf16.mxu1 %v22978_v41  ;;  %v23051_v40 = vld [vmem:[%s26369_s19 + $0x2e20] ss:$8 sps:$4 sm:$0xff]   ;;  %v23056_v41 = vld [vmem:[%s26369_s19 + $0x834] ss:$8 sps:$4 sm:$0xff]  }
 0x277   : > { %17838 = vmatprep.subr.bf16.mxu0 %v22981_v46  ;;  %v23059_v46 = vld [vmem:[%s26369_s19 + $0x2e34] ss:$8 sps:$4 sm:$0xff]  }
 0x279   : > { %16281 = vmatpush1.bf16.msra.mxu1 %v22976_v48  ;;  %v23054_v48 = vld [vmem:[%s26369_s19 + $0x830] ss:$8 sps:$4 sm:$0xff]  }
 0x27a   : > { %17839 = vmatpush1.bf16.msra.mxu0 %v22979_v49  ;;  %16282 = vmatprep.subr.bf16.mxu1 %v22984_v20  ;;  %v23057_v49 = vld [vmem:[%s26369_s19 + $0x2e30] ss:$8 sps:$4 sm:$0xff]   ;;  %v23062_v20 = vld [vmem:[%s26369_s19 + $0x844] ss:$8 sps:$4 sm:$0xff]  }
 0x27b   : > { %17840 = vmatprep.subr.bf16.mxu0 %v22987_v50  ;;  %v23065_v50 = vld [vmem:[%s26369_s19 + $0x2e44] ss:$8 sps:$4 sm:$0xff]  }
 0x27d   : > { %16283 = vmatpush1.bf16.msra.mxu1 %v22982_v37  ;;  %v23060_v37 = vld [vmem:[%s26369_s19 + $0x840] ss:$8 sps:$4 sm:$0xff]  }
 0x27e   : > { %17841 = vmatpush1.bf16.msra.mxu0 %v22985_v52  ;;  %16284 = vmatprep.subr.bf16.mxu1 %v22990_v36  ;;  %v23063_v52 = vld [vmem:[%s26369_s19 + $0x2e40] ss:$8 sps:$4 sm:$0xff]   ;;  %v23068_v36 = vld [vmem:[%s26369_s19 + $0x854] ss:$8 sps:$4 sm:$0xff]  }
 0x27f   : > { %17842 = vmatprep.subr.bf16.mxu0 %v22993_v43  ;;  %v23071_v43 = vld [vmem:[%s26369_s19 + $0x2e54] ss:$8 sps:$4 sm:$0xff]  }
 0x281   : > { %16285 = vmatpush1.bf16.msra.mxu1 %v22988_v53  ;;  %v23066_v53 = vld [vmem:[%s26369_s19 + $0x850] ss:$8 sps:$4 sm:$0xff]  }
 0x282   : > { %17843 = vmatpush1.bf16.msra.mxu0 %v22991_v55  ;;  %16286 = vmatprep.subr.bf16.mxu1 %v22996_v56  ;;  %v23069_v55 = vld [vmem:[%s26369_s19 + $0x2e50] ss:$8 sps:$4 sm:$0xff]   ;;  %v23074_v56 = vld [vmem:[%s26369_s19 + $0x864] ss:$8 sps:$4 sm:$0xff]  }
 0x283   : > { %17844 = vmatprep.subr.bf16.mxu0 %v22999_v57  ;;  %v23077_v57 = vld [vmem:[%s26369_s19 + $0x2e64] ss:$8 sps:$4 sm:$0xff]  }
 0x285   : > { %16287 = vmatpush1.bf16.msra.mxu1 %v22994_v58  ;;  %v23072_v58 = vld [vmem:[%s26369_s19 + $0x860] ss:$8 sps:$4 sm:$0xff]  }
 0x286   : > { %17845 = vmatpush1.bf16.msra.mxu0 %v22997_v59  ;;  %16288 = vmatprep.subr.bf16.mxu1 %v23002_v44  ;;  %v23075_v59 = vld [vmem:[%s26369_s19 + $0x2e60] ss:$8 sps:$4 sm:$0xff]   ;;  %v23080_v44 = vld [vmem:[%s26369_s19 + $0x874] ss:$8 sps:$4 sm:$0xff]  }
 0x287   : > { %17846 = vmatprep.subr.bf16.mxu0 %v23005_v0  ;;  %v23083_v0 = vld [vmem:[%s26369_s19 + $0x2e74] ss:$8 sps:$4 sm:$0xff]  }
 0x289   : > { %16289 = vmatpush1.bf16.msra.mxu1 %v23000_v1  ;;  %v23078_v1 = vld [vmem:[%s26369_s19 + $0x870] ss:$8 sps:$4 sm:$0xff]  }
 0x28a   : > { %17847 = vmatpush1.bf16.msra.mxu0 %v23003_v2  ;;  %16290 = vmatprep.subr.bf16.mxu1 %v23008_v3  ;;  %v23081_v2 = vld [vmem:[%s26369_s19 + $0x2e70] ss:$8 sps:$4 sm:$0xff]   ;;  %v23086_v3 = vld [vmem:[%s26369_s19 + $0x884] ss:$8 sps:$4 sm:$0xff]  }
 0x28b   : > { %17848 = vmatprep.subr.bf16.mxu0 %v23011_v47  ;;  %v23089_v47 = vld [vmem:[%s26369_s19 + $0x2e84] ss:$8 sps:$4 sm:$0xff]  }
 0x28d   : > { %16291 = vmatpush1.bf16.msra.mxu1 %v23006_v25  ;;  %v23084_v25 = vld [vmem:[%s26369_s19 + $0x880] ss:$8 sps:$4 sm:$0xff]  }
 0x28e   : > { %17849 = vmatpush1.bf16.msra.mxu0 %v23009_v5  ;;  %16292 = vmatprep.subr.bf16.mxu1 %v23014_v60  ;;  %v23087_v5 = vld [vmem:[%s26369_s19 + $0x2e80] ss:$8 sps:$4 sm:$0xff]   ;;  %v23092_v60 = vld [vmem:[%s26369_s19 + $0x894] ss:$8 sps:$4 sm:$0xff]  }
 0x28f   : > { %17850 = vmatprep.subr.bf16.mxu0 %v23017_v6  ;;  %v23095_v6 = vld [vmem:[%s26369_s19 + $0x2e94] ss:$8 sps:$4 sm:$0xff]  }
 0x291   : > { %16293 = vmatpush1.bf16.msra.mxu1 %v23012_v61  ;;  %v23090_v61 = vld [vmem:[%s26369_s19 + $0x890] ss:$8 sps:$4 sm:$0xff]  }
 0x292   : > { %17851 = vmatpush1.bf16.msra.mxu0 %v23015_v7  ;;  %16294 = vmatprep.subr.bf16.mxu1 %v23020_v8  ;;  %v23093_v7 = vld [vmem:[%s26369_s19 + $0x2e90] ss:$8 sps:$4 sm:$0xff]   ;;  %v23098_v8 = vld [vmem:[%s26369_s19 + $0x8a4] ss:$8 sps:$4 sm:$0xff]  }
 0x293   : > { %17852 = vmatprep.subr.bf16.mxu0 %v23023_v9  ;;  %v23101_v9 = vld [vmem:[%s26369_s19 + $0x2ea4] ss:$8 sps:$4 sm:$0xff]  }
 0x295   : > { %16295 = vmatpush1.bf16.msra.mxu1 %v23018_v10  ;;  %v23096_v10 = vld [vmem:[%s26369_s19 + $0x8a0] ss:$8 sps:$4 sm:$0xff]  }
 0x296   : > { %17853 = vmatpush1.bf16.msra.mxu0 %v23021_v11  ;;  %16296 = vmatprep.subr.bf16.mxu1 %v23026_v12  ;;  %v23099_v11 = vld [vmem:[%s26369_s19 + $0x2ea0] ss:$8 sps:$4 sm:$0xff]   ;;  %v23104_v12 = vld [vmem:[%s26369_s19 + $0x8b4] ss:$8 sps:$4 sm:$0xff]  }
 0x297   : > { %17854 = vmatprep.subr.bf16.mxu0 %v23029_v13  ;;  %v23107_v13 = vld [vmem:[%s26369_s19 + $0x2eb4] ss:$8 sps:$4 sm:$0xff]  }
 0x299   : > { %16297 = vmatpush1.bf16.msra.mxu1 %v23024_v21  ;;  %v23110_v21 = vld [vmem:[%s26369_s19 + $0x8c4] ss:$8 sps:$4 sm:$0xff]  }
 0x29a   : > { %17855 = vmatpush1.bf16.msra.mxu0 %v23027_v22  ;;  %16298 = vmatprep.subr.bf16.mxu1 %v23032_v23  ;;  %v23113_v22 = vld [vmem:[%s26369_s19 + $0x2ec4] ss:$8 sps:$4 sm:$0xff]   ;;  %v23108_v23 = vld [vmem:[%s26369_s19 + $0x8c0] ss:$8 sps:$4 sm:$0xff]  }
 0x29b   : > { %17856 = vmatprep.subr.bf16.mxu0 %v23035_v4  ;;  %v23111_v4 = vld [vmem:[%s26369_s19 + $0x2ec0] ss:$8 sps:$4 sm:$0xff]  }
 0x29d   : > { %16299 = vmatpush1.bf16.msra.mxu1 %v23030_v42  ;;  %v23116_v42 = vld [vmem:[%s26369_s19 + $0x8d4] ss:$8 sps:$4 sm:$0xff]  }
 0x29e   : > { %17857 = vmatpush1.bf16.msra.mxu0 %v23033_v26  ;;  %16309 = vmatprep.subr.bf16.mxu1 %v23038_v14  ;;  %v23119_v26 = vld [vmem:[%s26369_s19 + $0x2ed4] ss:$8 sps:$4 sm:$0xff]   ;;  %v23114_v14 = vld [vmem:[%s26369_s19 + $0x8d0] ss:$8 sps:$4 sm:$0xff]  }
 0x29f   : > { %17867 = vmatprep.subr.bf16.mxu0 %v23041_v54  ;;  %v23117_v54 = vld [vmem:[%s26369_s19 + $0x2ed0] ss:$8 sps:$4 sm:$0xff]  }
 0x2a0   : > { %16301 = vmatmul.mubr.bf16.vlgmr.msra.gmra.mrb[0].mxu1 %v2915_v28  ;;  %v23120_v28 = vld [vmem:[%s26369_s19 + $0x8e0] ss:$8 sps:$4 sm:$0xff]  }
 0x2a1   : > { %17859 = vmatmul.mubr.bf16.vlgmr.msra.gmra.mrb[0].mxu0 %v3404_v29  ;;  %16310 = vmatpush1.bf16.msra.mxu1 %v23036_v30  ;;  %v23123_v29 = vld [vmem:[%s26369_s19 + $0x2ee0] ss:$8 sps:$4 sm:$0xff]   ;;  %v23128_v30 = vld [vmem:[%s26369_s19 + $0x8f4] ss:$8 sps:$4 sm:$0xff]  }
 0x2a2   : > { %17868 = vmatpush1.bf16.msra.mxu0 %v23039_v31  ;;  %16311 = vmatprep.subr.bf16.mxu1 %v23044_v32  ;;  %v23131_v31 = vld [vmem:[%s26369_s19 + $0x2ef4] ss:$8 sps:$4 sm:$0xff]   ;;  %v23126_v32 = vld [vmem:[%s26369_s19 + $0x8f0] ss:$8 sps:$4 sm:$0xff]  }
 0x2a3   : > { %17869 = vmatprep.subr.bf16.mxu0 %v23047_v33  ;;  %16341 = vmatprep.mubr.bf16.mxu1 %v27064_v34  ;;  %v23129_v33 = vld [vmem:[%s26369_s19 + $0x2ef0] ss:$8 sps:$4 sm:$0xff]  }
 0x2a4   : > { %17899 = vmatprep.mubr.bf16.mxu0 %v27067_v16 }
 0x2a5   : > { %16312 = vmatpush1.bf16.msra.mxu1 %v23042_v17  ;;  %v23134_v17 = vld [vmem:[%s26369_s19 + $0x904] ss:$8 sps:$4 sm:$0xff]  }
 0x2a6   : > { %17870 = vmatpush1.bf16.msra.mxu0 %v23045_v35  ;;  %16313 = vmatprep.subr.bf16.mxu1 %v23050_v19  ;;  %v23138_v35 = vld [vmem:[%s26369_s19 + $0x2f04] ss:$8 sps:$4 sm:$0xff]   ;;  %v27133_v19 = vrot.slane %v27037_v63, %v26438_v51  ;;  %v2965_v63 = vcombine.high %v27064_v34, %v27064_v34 }
 0x2a7   : > { %17871 = vmatprep.subr.bf16.mxu0 %v23053_v38  ;;  %v27137_v38 = vrot.slane %v27045_v24, %v26438_v51  ;;  %v23139_v24 = vld [vmem:[%s26369_s19 + $0x910] ss:$8 sps:$4 sm:$0xff]   ;;  %v23147_v34 = vld [vmem:[%s26369_s19 + $0x924] ss:$8 sps:$4 sm:$0xff]  }
 0x2a9   : > { %16314 = vmatpush1.bf16.msra.mxu1 %v23048_v39  ;;  %v23132_v39 = vld [vmem:[%s26369_s19 + $0x900] ss:$8 sps:$4 sm:$0xff]  }
 0x2aa   : > { %17872 = vmatpush1.bf16.msra.mxu0 %v23051_v40  ;;  %16315 = vmatprep.subr.bf16.mxu1 %v23056_v41  ;;  %v23136_v40 = vld [vmem:[%s26369_s19 + $0x2f00] ss:$8 sps:$4 sm:$0xff]   ;;  %v23141_v41 = vld [vmem:[%s26369_s19 + $0x914] ss:$8 sps:$4 sm:$0xff]  }
 0x2ab   : > { %17873 = vmatprep.subr.bf16.mxu0 %v23059_v46  ;;  %v23144_v46 = vld [vmem:[%s26369_s19 + $0x2f14] ss:$8 sps:$4 sm:$0xff]  }
 0x2ad   : > { %16316 = vmatpush1.bf16.msra.mxu1 %v23054_v48  ;;  %v3407_v48 = vcombine.high %v27067_v16, %v27067_v16  ;;  %v23145_v16 = vld [vmem:[%s26369_s19 + $0x920] ss:$8 sps:$4 sm:$0xff]  }
 0x2ae   : > { %17874 = vmatpush1.bf16.msra.mxu0 %v23057_v49  ;;  %16317 = vmatprep.subr.bf16.mxu1 %v23062_v20  ;;  %v23142_v49 = vld [vmem:[%s26369_s19 + $0x2f10] ss:$8 sps:$4 sm:$0xff]   ;;  %v23150_v20 = vld [vmem:[%s26369_s19 + $0x2f24] ss:$8 sps:$4 sm:$0xff]  }
 0x2af   : > { %17875 = vmatprep.subr.bf16.mxu0 %v23065_v50  ;;  %v23148_v50 = vld [vmem:[%s26369_s19 + $0x2f20] ss:$8 sps:$4 sm:$0xff]  }
 0x2b1   : > { %16318 = vmatpush1.bf16.msra.mxu1 %v23060_v37  ;;  %v23153_v37 = vld [vmem:[%s26369_s19 + $0x934] ss:$8 sps:$4 sm:$0xff]  }
 0x2b2   : > { %17876 = vmatpush1.bf16.msra.mxu0 %v23063_v52  ;;  %16319 = vmatprep.subr.bf16.mxu1 %v23068_v36  ;;  %v23156_v52 = vld [vmem:[%s26369_s19 + $0x2f34] ss:$8 sps:$4 sm:$0xff]   ;;  %v23151_v36 = vld [vmem:[%s26369_s19 + $0x930] ss:$8 sps:$4 sm:$0xff]  }
 0x2b3   : > { %17877 = vmatprep.subr.bf16.mxu0 %v23071_v43  ;;  %v23154_v43 = vld [vmem:[%s26369_s19 + $0x2f30] ss:$8 sps:$4 sm:$0xff]  }
 0x2b5   : > { %16320 = vmatpush1.bf16.msra.mxu1 %v23066_v53  ;;  %v23159_v53 = vld [vmem:[%s26369_s19 + $0x944] ss:$8 sps:$4 sm:$0xff]  }
 0x2b6   : > { %17878 = vmatpush1.bf16.msra.mxu0 %v23069_v55  ;;  %16321 = vmatprep.subr.bf16.mxu1 %v23074_v56  ;;  %v23162_v55 = vld [vmem:[%s26369_s19 + $0x2f44] ss:$8 sps:$4 sm:$0xff]   ;;  %v23157_v56 = vld [vmem:[%s26369_s19 + $0x940] ss:$8 sps:$4 sm:$0xff]  }
 0x2b7   : > { %17879 = vmatprep.subr.bf16.mxu0 %v23077_v57  ;;  %v23160_v57 = vld [vmem:[%s26369_s19 + $0x2f40] ss:$8 sps:$4 sm:$0xff]  }
 0x2b9   : > { %16322 = vmatpush1.bf16.msra.mxu1 %v23072_v58  ;;  %v23165_v58 = vld [vmem:[%s26369_s19 + $0x954] ss:$8 sps:$4 sm:$0xff]  }
 0x2ba   : > { %17880 = vmatpush1.bf16.msra.mxu0 %v23075_v59  ;;  %16323 = vmatprep.subr.bf16.mxu1 %v23080_v44  ;;  %v23168_v59 = vld [vmem:[%s26369_s19 + $0x2f54] ss:$8 sps:$4 sm:$0xff]   ;;  %v23163_v44 = vld [vmem:[%s26369_s19 + $0x950] ss:$8 sps:$4 sm:$0xff]  }
 0x2bb   : > { %17881 = vmatprep.subr.bf16.mxu0 %v23083_v0  ;;  %v23166_v0 = vld [vmem:[%s26369_s19 + $0x2f50] ss:$8 sps:$4 sm:$0xff]  }
 0x2bd   : > { %16324 = vmatpush1.bf16.msra.mxu1 %v23078_v1  ;;  %v23171_v1 = vld [vmem:[%s26369_s19 + $0x964] ss:$8 sps:$4 sm:$0xff]  }
 0x2be   : > { %17882 = vmatpush1.bf16.msra.mxu0 %v23081_v2  ;;  %16325 = vmatprep.subr.bf16.mxu1 %v23086_v3  ;;  %v23174_v2 = vld [vmem:[%s26369_s19 + $0x2f64] ss:$8 sps:$4 sm:$0xff]   ;;  %v23169_v3 = vld [vmem:[%s26369_s19 + $0x960] ss:$8 sps:$4 sm:$0xff]  }
 0x2bf   : > { %17883 = vmatprep.subr.bf16.mxu0 %v23089_v47  ;;  %v23172_v47 = vld [vmem:[%s26369_s19 + $0x2f60] ss:$8 sps:$4 sm:$0xff]  }
 0x2c1   : > { %16326 = vmatpush1.bf16.msra.mxu1 %v23084_v25  ;;  %v23177_v25 = vld [vmem:[%s26369_s19 + $0x974] ss:$8 sps:$4 sm:$0xff]  }
 0x2c2   : > { %17884 = vmatpush1.bf16.msra.mxu0 %v23087_v5  ;;  %16327 = vmatprep.subr.bf16.mxu1 %v23092_v60  ;;  %v23180_v5 = vld [vmem:[%s26369_s19 + $0x2f74] ss:$8 sps:$4 sm:$0xff]   ;;  %v23175_v60 = vld [vmem:[%s26369_s19 + $0x970] ss:$8 sps:$4 sm:$0xff]  }
 0x2c3   : > { %17885 = vmatprep.subr.bf16.mxu0 %v23095_v6  ;;  %v23178_v6 = vld [vmem:[%s26369_s19 + $0x2f70] ss:$8 sps:$4 sm:$0xff]  }
 0x2c5   : > { %16328 = vmatpush1.bf16.msra.mxu1 %v23090_v61  ;;  %v23183_v61 = vld [vmem:[%s26369_s19 + $0x984] ss:$8 sps:$4 sm:$0xff]  }
 0x2c6   : > { %17886 = vmatpush1.bf16.msra.mxu0 %v23093_v7  ;;  %16329 = vmatprep.subr.bf16.mxu1 %v23098_v8  ;;  %v23186_v7 = vld [vmem:[%s26369_s19 + $0x2f84] ss:$8 sps:$4 sm:$0xff]   ;;  %v23181_v8 = vld [vmem:[%s26369_s19 + $0x980] ss:$8 sps:$4 sm:$0xff]  }
 0x2c7   : > { %17887 = vmatprep.subr.bf16.mxu0 %v23101_v9  ;;  %v23184_v9 = vld [vmem:[%s26369_s19 + $0x2f80] ss:$8 sps:$4 sm:$0xff]  }
 0x2c9   : > { %16330 = vmatpush1.bf16.msra.mxu1 %v23096_v10  ;;  %v23189_v10 = vld [vmem:[%s26369_s19 + $0x994] ss:$8 sps:$4 sm:$0xff]  }
 0x2ca   : > { %17888 = vmatpush1.bf16.msra.mxu0 %v23099_v11  ;;  %16331 = vmatprep.subr.bf16.mxu1 %v23104_v12  ;;  %v23192_v11 = vld [vmem:[%s26369_s19 + $0x2f94] ss:$8 sps:$4 sm:$0xff]   ;;  %v23187_v12 = vld [vmem:[%s26369_s19 + $0x990] ss:$8 sps:$4 sm:$0xff]  }
 0x2cb   : > { %17889 = vmatprep.subr.bf16.mxu0 %v23107_v13  ;;  %v23190_v13 = vld [vmem:[%s26369_s19 + $0x2f90] ss:$8 sps:$4 sm:$0xff]  }
 0x2cd   : > { %16332 = vmatpush1.bf16.msra.mxu1 %v23102_v15  ;;  %v23195_v15 = vld [vmem:[%s26369_s19 + $0x9a4] ss:$8 sps:$4 sm:$0xff]  }
 0x2ce   : > { %17890 = vmatpush1.bf16.msra.mxu0 %v23105_v18  ;;  %16333 = vmatprep.subr.bf16.mxu1 %v23110_v21  ;;  %v23198_v18 = vld [vmem:[%s26369_s19 + $0x2fa4] ss:$8 sps:$4 sm:$0xff]   ;;  %v23193_v21 = vld [vmem:[%s26369_s19 + $0x9a0] ss:$8 sps:$4 sm:$0xff]  }
 0x2cf   : > { %17891 = vmatprep.subr.bf16.mxu0 %v23113_v22  ;;  %v23196_v22 = vld [vmem:[%s26369_s19 + $0x2fa0] ss:$8 sps:$4 sm:$0xff]  }
 0x2d1   : > { %16334 = vmatpush1.bf16.msra.mxu1 %v23108_v23  ;;  %v23201_v23 = vld [vmem:[%s26369_s19 + $0x9b4] ss:$8 sps:$4 sm:$0xff]  }
 0x2d2   : > { %17892 = vmatpush1.bf16.msra.mxu0 %v23111_v4  ;;  %16335 = vmatprep.subr.bf16.mxu1 %v23116_v42  ;;  %v23204_v4 = vld [vmem:[%s26369_s19 + $0x2fb4] ss:$8 sps:$4 sm:$0xff]   ;;  %v23199_v42 = vld [vmem:[%s26369_s19 + $0x9b0] ss:$8 sps:$4 sm:$0xff]  }
 0x2d3   : > { %17893 = vmatprep.subr.bf16.mxu0 %v23119_v26  ;;  %v23202_v26 = vld [vmem:[%s26369_s19 + $0x2fb0] ss:$8 sps:$4 sm:$0xff]  }
 0x2d5   : > { %16336 = vmatpush1.bf16.msra.mxu1 %v23114_v14  ;;  %v23207_v14 = vld [vmem:[%s26369_s19 + $0x9c4] ss:$8 sps:$4 sm:$0xff]  }
 0x2d6   : > { %17894 = vmatpush1.bf16.msra.mxu0 %v23117_v54  ;;  %16337 = vmatprep.subr.bf16.mxu1 %v23122_v62  ;;  %v23210_v54 = vld [vmem:[%s26369_s19 + $0x2fc4] ss:$8 sps:$4 sm:$0xff]   ;;  %v23205_v62 = vld [vmem:[%s26369_s19 + $0x9c0] ss:$8 sps:$4 sm:$0xff]  }
 0x2d7   : > { %17895 = vmatprep.subr.bf16.mxu0 %v23125_v27  ;;  %v23208_v27 = vld [vmem:[%s26369_s19 + $0x2fc0] ss:$8 sps:$4 sm:$0xff]  }
 0x2d9   : > { %16338 = vmatpush1.bf16.msra.mxu1 %v23120_v28  ;;  %v23213_v28 = vld [vmem:[%s26369_s19 + $0x9d4] ss:$8 sps:$4 sm:$0xff]  }
 0x2da   : > { %17896 = vmatpush1.bf16.msra.mxu0 %v23123_v29  ;;  %16339 = vmatprep.subr.bf16.mxu1 %v23128_v30  ;;  %v23216_v29 = vld [vmem:[%s26369_s19 + $0x2fd4] ss:$8 sps:$4 sm:$0xff]   ;;  %v23211_v30 = vld [vmem:[%s26369_s19 + $0x9d0] ss:$8 sps:$4 sm:$0xff]  }
 0x2db   : > { %17897 = vmatprep.subr.bf16.mxu0 %v23131_v31  ;;  %v23214_v31 = vld [vmem:[%s26369_s19 + $0x2fd0] ss:$8 sps:$4 sm:$0xff]  }
 0x2dd   : > { %16340 = vmatpush1.bf16.msra.mxu1 %v23126_v32  ;;  %v23219_v32 = vld [vmem:[%s26369_s19 + $0x9e4] ss:$8 sps:$4 sm:$0xff]  }
 0x2de   : > { %17898 = vmatpush1.bf16.msra.mxu0 %v23129_v33  ;;  %16350 = vmatprep.subr.bf16.mxu1 %v23134_v17  ;;  %v23222_v33 = vld [vmem:[%s26369_s19 + $0x2fe4] ss:$8 sps:$4 sm:$0xff]   ;;  %v27202_v17 = vld.sshfl [vmem:[%s26387_s30 + $0x60] sm:$0xff pattern:$0x75316420] }
 0x2df   : > { %17908 = vmatprep.subr.bf16.mxu0 %v23138_v35  ;;  %v25909_v35 = vld [vmem:[%s26387_s30 + $0x10] sm:$0xff] }
 0x2e0   : > { %16342 = vmatmul.mubr.bf16.vlgmr.msra.gmra.mrb[0].mxu1 %v27133_v19 }
 0x2e1   : > { %17900 = vmatmul.mubr.bf16.vlgmr.msra.gmra.mrb[0].mxu0 %v27137_v38  ;;  %16351 = vmatpush1.bf16.msra.mxu1 %v23132_v39  ;;  %v2918_v39 = vcombine.high %v25909_v35, %v25909_v35  ;;  %v23295_v35 = vld [vmem:[%s26369_s19 + $0xab0] ss:$8 sps:$4 sm:$0xff]  }
 0x2e2   : > { %17909 = vmatpush1.bf16.msra.mxu0 %v23136_v40  ;;  %16352 = vmatprep.subr.bf16.mxu1 %v23141_v41  ;;  %v23217_v40 = vld [vmem:[%s26369_s19 + $0x9e0] ss:$8 sps:$4 sm:$0xff]  }
 0x2e3   : > { %17910 = vmatprep.subr.bf16.mxu0 %v23144_v46  ;;  %16382 = vmatprep.mubr.bf16.mxu1 %v2965_v63  ;;  %v23220_v41 = vld [vmem:[%s26369_s19 + $0x2fe0] ss:$8 sps:$4 sm:$0xff]   ;;  %v23225_v46 = vld [vmem:[%s26369_s19 + $0x9f4] ss:$8 sps:$4 sm:$0xff]  }
 0x2e4   : > { %17940 = vmatprep.mubr.bf16.mxu0 %v3407_v48  ;;  %v23228_v63 = vld [vmem:[%s26369_s19 + $0x2ff4] ss:$8 sps:$4 sm:$0xff]   ;;  %v27210_v48 = vrot.slane %v2918_v39, %v26438_v51  ;;  %v23298_v39 = vld [vmem:[%s26369_s19 + $0x30b0] ss:$8 sps:$4 sm:$0xff]  }
 0x2e5   : > { %16353 = vmatpush1.bf16.msra.mxu1 %v23139_v24  ;;  %v23223_v24 = vld [vmem:[%s26369_s19 + $0x9f0] ss:$8 sps:$4 sm:$0xff]  }
 0x2e6   : > { %17911 = vmatpush1.bf16.msra.mxu0 %v23142_v49  ;;  %16354 = vmatprep.subr.bf16.mxu1 %v23147_v34  ;;  %v23226_v49 = vld [vmem:[%s26369_s19 + $0x2ff0] ss:$8 sps:$4 sm:$0xff]   ;;  %v23231_v34 = vld [vmem:[%s26369_s19 + $0xa04] ss:$8 sps:$4 sm:$0xff]  }
 0x2e7   : > { %17912 = vmatprep.subr.bf16.mxu0 %v23150_v20  ;;  %v23234_v20 = vld [vmem:[%s26369_s19 + $0x3004] ss:$8 sps:$4 sm:$0xff]  }
 0x2e9   : > { %16355 = vmatpush1.bf16.msra.mxu1 %v23145_v16  ;;  %v2934_v16 = vcombine.high %v27210_v48, %v27210_v48 }
 0x2ea   : > { %17913 = vmatpush1.bf16.msra.mxu0 %v23148_v50  ;;  %16356 = vmatprep.subr.bf16.mxu1 %v23153_v37  ;;  %v3423_v50 = vcombine.high %v27202_v17, %v27202_v17  ;;  %v2963_v37 = vcombine.high %v27133_v19, %v27133_v19 }
 0x2eb   : > { %17914 = vmatprep.subr.bf16.mxu0 %v23156_v52  ;;  %v3405_v52 = vcombine.high %v27137_v38, %v27137_v38  ;;  %v23235_v38 = vld [vmem:[%s26369_s19 + $0xa10] ss:$8 sps:$4 sm:$0xff]  }
 0x2ec   : > { %v27232_v19 = vrot.slane %v3423_v50, %v26438_v51  ;;  %v23318_v50 = vld [vmem:[%s26369_s19 + $0x30e4] ss:$8 sps:$4 sm:$0xff]  }
 0x2ed   : > { %16357 = vmatpush1.bf16.msra.mxu1 %v23151_v36  ;;  %v23229_v36 = vld [vmem:[%s26369_s19 + $0xa00] ss:$8 sps:$4 sm:$0xff]  }
 0x2ee   : > { %17915 = vmatpush1.bf16.msra.mxu0 %v23154_v43  ;;  %16358 = vmatprep.subr.bf16.mxu1 %v23159_v53  ;;  %v23232_v43 = vld [vmem:[%s26369_s19 + $0x3000] ss:$8 sps:$4 sm:$0xff]   ;;  %v23237_v53 = vld [vmem:[%s26369_s19 + $0xa14] ss:$8 sps:$4 sm:$0xff]  }
 0x2ef   : > { %17916 = vmatprep.subr.bf16.mxu0 %v23162_v55  ;;  %v23240_v55 = vld [vmem:[%s26369_s19 + $0x3014] ss:$8 sps:$4 sm:$0xff]  }
 0x2f1   : > { %16359 = vmatpush1.bf16.msra.mxu1 %v23157_v56  ;;  %v27229_v56 = vrot.slane %v2934_v16, %v26438_v51  ;;  %v23315_v16 = vld [vmem:[%s26369_s19 + $0xae4] ss:$8 sps:$4 sm:$0xff]  }
 0x2f2   : > { %17917 = vmatpush1.bf16.msra.mxu0 %v23160_v57  ;;  %16360 = vmatprep.subr.bf16.mxu1 %v23165_v58  ;;  %v23238_v57 = vld [vmem:[%s26369_s19 + $0x3010] ss:$8 sps:$4 sm:$0xff]   ;;  %v23243_v58 = vld [vmem:[%s26369_s19 + $0xa24] ss:$8 sps:$4 sm:$0xff]  }
 0x2f3   : > { %17918 = vmatprep.subr.bf16.mxu0 %v23168_v59  ;;  %v23246_v59 = vld [vmem:[%s26369_s19 + $0x3024] ss:$8 sps:$4 sm:$0xff]  }
 0x2f5   : > { %16361 = vmatpush1.bf16.msra.mxu1 %v23163_v44  ;;  %v23241_v44 = vld [vmem:[%s26369_s19 + $0xa20] ss:$8 sps:$4 sm:$0xff]  }
 0x2f6   : > { %17919 = vmatpush1.bf16.msra.mxu0 %v23166_v0  ;;  %16362 = vmatprep.subr.bf16.mxu1 %v23171_v1  ;;  %v23244_v0 = vld [vmem:[%s26369_s19 + $0x3020] ss:$8 sps:$4 sm:$0xff]   ;;  %v23249_v1 = vld [vmem:[%s26369_s19 + $0xa34] ss:$8 sps:$4 sm:$0xff]  }
 0x2f7   : > { %17920 = vmatprep.subr.bf16.mxu0 %v23174_v2  ;;  %v23252_v2 = vld [vmem:[%s26369_s19 + $0x3034] ss:$8 sps:$4 sm:$0xff]  }
 0x2f9   : > { %16363 = vmatpush1.bf16.msra.mxu1 %v23169_v3  ;;  %v23247_v3 = vld [vmem:[%s26369_s19 + $0xa30] ss:$8 sps:$4 sm:$0xff]  }
 0x2fa   : > { %17921 = vmatpush1.bf16.msra.mxu0 %v23172_v47  ;;  %16364 = vmatprep.subr.bf16.mxu1 %v23177_v25  ;;  %v23250_v47 = vld [vmem:[%s26369_s19 + $0x3030] ss:$8 sps:$4 sm:$0xff]   ;;  %v23255_v25 = vld [vmem:[%s26369_s19 + $0xa44] ss:$8 sps:$4 sm:$0xff]  }
 0x2fb   : > { %17922 = vmatprep.subr.bf16.mxu0 %v23180_v5  ;;  %v23258_v5 = vld [vmem:[%s26369_s19 + $0x3044] ss:$8 sps:$4 sm:$0xff]  }
 0x2fd   : > { %16365 = vmatpush1.bf16.msra.mxu1 %v23175_v60  ;;  %v23253_v60 = vld [vmem:[%s26369_s19 + $0xa40] ss:$8 sps:$4 sm:$0xff]  }
 0x2fe   : > { %17923 = vmatpush1.bf16.msra.mxu0 %v23178_v6  ;;  %16366 = vmatprep.subr.bf16.mxu1 %v23183_v61  ;;  %v23256_v6 = vld [vmem:[%s26369_s19 + $0x3040] ss:$8 sps:$4 sm:$0xff]   ;;  %v23261_v61 = vld [vmem:[%s26369_s19 + $0xa54] ss:$8 sps:$4 sm:$0xff]  }
 0x2ff   : > { %17924 = vmatprep.subr.bf16.mxu0 %v23186_v7  ;;  %v23264_v7 = vld [vmem:[%s26369_s19 + $0x3054] ss:$8 sps:$4 sm:$0xff]  }
 0x301   : > { %16367 = vmatpush1.bf16.msra.mxu1 %v23181_v8  ;;  %v23259_v8 = vld [vmem:[%s26369_s19 + $0xa50] ss:$8 sps:$4 sm:$0xff]  }
 0x302   : > { %17925 = vmatpush1.bf16.msra.mxu0 %v23184_v9  ;;  %16368 = vmatprep.subr.bf16.mxu1 %v23189_v10  ;;  %v23262_v9 = vld [vmem:[%s26369_s19 + $0x3050] ss:$8 sps:$4 sm:$0xff]   ;;  %v23267_v10 = vld [vmem:[%s26369_s19 + $0xa64] ss:$8 sps:$4 sm:$0xff]  }
 0x303   : > { %17926 = vmatprep.subr.bf16.mxu0 %v23192_v11  ;;  %v23270_v11 = vld [vmem:[%s26369_s19 + $0x3064] ss:$8 sps:$4 sm:$0xff]  }
 0x305   : > { %16369 = vmatpush1.bf16.msra.mxu1 %v23187_v12  ;;  %v23265_v12 = vld [vmem:[%s26369_s19 + $0xa60] ss:$8 sps:$4 sm:$0xff]  }
 0x306   : > { %17927 = vmatpush1.bf16.msra.mxu0 %v23190_v13  ;;  %16370 = vmatprep.subr.bf16.mxu1 %v23195_v15  ;;  %v23268_v13 = vld [vmem:[%s26369_s19 + $0x3060] ss:$8 sps:$4 sm:$0xff]   ;;  %v23273_v15 = vld [vmem:[%s26369_s19 + $0xa74] ss:$8 sps:$4 sm:$0xff]  }
 0x307   : > { %17928 = vmatprep.subr.bf16.mxu0 %v23198_v18  ;;  %v23276_v18 = vld [vmem:[%s26369_s19 + $0x3074] ss:$8 sps:$4 sm:$0xff]  }
 0x309   : > { %16371 = vmatpush1.bf16.msra.mxu1 %v23193_v21  ;;  %v23271_v21 = vld [vmem:[%s26369_s19 + $0xa70] ss:$8 sps:$4 sm:$0xff]  }
 0x30a   : > { %17929 = vmatpush1.bf16.msra.mxu0 %v23196_v22  ;;  %16372 = vmatprep.subr.bf16.mxu1 %v23201_v23  ;;  %v23274_v22 = vld [vmem:[%s26369_s19 + $0x3070] ss:$8 sps:$4 sm:$0xff]   ;;  %v23279_v23 = vld [vmem:[%s26369_s19 + $0xa84] ss:$8 sps:$4 sm:$0xff]  }
 0x30b   : > { %17930 = vmatprep.subr.bf16.mxu0 %v23204_v4  ;;  %v23282_v4 = vld [vmem:[%s26369_s19 + $0x3084] ss:$8 sps:$4 sm:$0xff]  }
 0x30d   : > { %16373 = vmatpush1.bf16.msra.mxu1 %v23199_v42  ;;  %v23277_v42 = vld [vmem:[%s26369_s19 + $0xa80] ss:$8 sps:$4 sm:$0xff]  }
 0x30e   : > { %17931 = vmatpush1.bf16.msra.mxu0 %v23202_v26  ;;  %16374 = vmatprep.subr.bf16.mxu1 %v23207_v14  ;;  %v23280_v26 = vld [vmem:[%s26369_s19 + $0x3080] ss:$8 sps:$4 sm:$0xff]   ;;  %v23285_v14 = vld [vmem:[%s26369_s19 + $0xa94] ss:$8 sps:$4 sm:$0xff]  }
 0x30f   : > { %17932 = vmatprep.subr.bf16.mxu0 %v23210_v54  ;;  %v23288_v54 = vld [vmem:[%s26369_s19 + $0x3094] ss:$8 sps:$4 sm:$0xff]  }
 0x311   : > { %16375 = vmatpush1.bf16.msra.mxu1 %v23205_v62  ;;  %v23283_v62 = vld [vmem:[%s26369_s19 + $0xa90] ss:$8 sps:$4 sm:$0xff]  }
 0x312   : > { %17933 = vmatpush1.bf16.msra.mxu0 %v23208_v27  ;;  %16376 = vmatprep.subr.bf16.mxu1 %v23213_v28  ;;  %v23286_v27 = vld [vmem:[%s26369_s19 + $0x3090] ss:$8 sps:$4 sm:$0xff]   ;;  %v23291_v28 = vld [vmem:[%s26369_s19 + $0xaa4] ss:$8 sps:$4 sm:$0xff]  }
 0x313   : > { %17934 = vmatprep.subr.bf16.mxu0 %v23216_v29  ;;  %v23294_v29 = vld [vmem:[%s26369_s19 + $0x30a4] ss:$8 sps:$4 sm:$0xff]  }
 0x315   : > { %16377 = vmatpush1.bf16.msra.mxu1 %v23211_v30  ;;  %v23289_v30 = vld [vmem:[%s26369_s19 + $0xaa0] ss:$8 sps:$4 sm:$0xff]  }
 0x316   : > { %17935 = vmatpush1.bf16.msra.mxu0 %v23214_v31  ;;  %16378 = vmatprep.subr.bf16.mxu1 %v23219_v32  ;;  %v23292_v31 = vld [vmem:[%s26369_s19 + $0x30a0] ss:$8 sps:$4 sm:$0xff]   ;;  %v23297_v32 = vld [vmem:[%s26369_s19 + $0xab4] ss:$8 sps:$4 sm:$0xff]  }
 0x317   : > { %17936 = vmatprep.subr.bf16.mxu0 %v23222_v33  ;;  %v23300_v33 = vld [vmem:[%s26369_s19 + $0x30b4] ss:$8 sps:$4 sm:$0xff]  }
 0x319   : > { %16379 = vmatpush1.bf16.msra.mxu1 %v23217_v40  ;;  %v23303_v40 = vld [vmem:[%s26369_s19 + $0xac4] ss:$8 sps:$4 sm:$0xff]  }
 0x31a   : > { %17937 = vmatpush1.bf16.msra.mxu0 %v23220_v41  ;;  %16380 = vmatprep.subr.bf16.mxu1 %v23225_v46  ;;  %v23306_v41 = vld [vmem:[%s26369_s19 + $0x30c4] ss:$8 sps:$4 sm:$0xff]   ;;  %v23301_v46 = vld [vmem:[%s26369_s19 + $0xac0] ss:$8 sps:$4 sm:$0xff]  }
 0x31b   : > { %17938 = vmatprep.subr.bf16.mxu0 %v23228_v63  ;;  %v23304_v63 = vld [vmem:[%s26369_s19 + $0x30c0] ss:$8 sps:$4 sm:$0xff]  }
 0x31d   : > { %16381 = vmatpush1.bf16.msra.mxu1 %v23223_v24  ;;  %v23309_v24 = vld [vmem:[%s26369_s19 + $0xad4] ss:$8 sps:$4 sm:$0xff]  }
 0x31e   : > { %17939 = vmatpush1.bf16.msra.mxu0 %v23226_v49  ;;  %16391 = vmatprep.subr.bf16.mxu1 %v23231_v34  ;;  %v23312_v49 = vld [vmem:[%s26369_s19 + $0x30d4] ss:$8 sps:$4 sm:$0xff]   ;;  %v23307_v34 = vld [vmem:[%s26369_s19 + $0xad0] ss:$8 sps:$4 sm:$0xff]  }
 0x31f   : > { %17949 = vmatprep.subr.bf16.mxu0 %v23234_v20  ;;  %v23310_v20 = vld [vmem:[%s26369_s19 + $0x30d0] ss:$8 sps:$4 sm:$0xff]  }
 0x320   : > { %16383 = vmatmul.mubr.bf16.vlgmr.msra.gmra.mrb[0].mxu1 %v2963_v37  ;;  %v23313_v37 = vld [vmem:[%s26369_s19 + $0xae0] ss:$8 sps:$4 sm:$0xff]  }
 0x321   : > { %17941 = vmatmul.mubr.bf16.vlgmr.msra.gmra.mrb[0].mxu0 %v3405_v52  ;;  %16392 = vmatpush1.bf16.msra.mxu1 %v23229_v36  ;;  %v23316_v52 = vld [vmem:[%s26369_s19 + $0x30e0] ss:$8 sps:$4 sm:$0xff]   ;;  %v23321_v36 = vld [vmem:[%s26369_s19 + $0xaf4] ss:$8 sps:$4 sm:$0xff]  }
 0x322   : > { %17950 = vmatpush1.bf16.msra.mxu0 %v23232_v43  ;;  %16393 = vmatprep.subr.bf16.mxu1 %v23237_v53  ;;  %v23324_v43 = vld [vmem:[%s26369_s19 + $0x30f4] ss:$8 sps:$4 sm:$0xff]   ;;  %v23319_v53 = vld [vmem:[%s26369_s19 + $0xaf0] ss:$8 sps:$4 sm:$0xff]  }
 0x323   : > { %17951 = vmatprep.subr.bf16.mxu0 %v23240_v55  ;;  %16423 = vmatprep.mubr.bf16.mxu1 %v27229_v56  ;;  %v23322_v55 = vld [vmem:[%s26369_s19 + $0x30f0] ss:$8 sps:$4 sm:$0xff]  }
 0x324   : > { %17981 = vmatprep.mubr.bf16.mxu0 %v27232_v19 }
 0x325   : > { %16394 = vmatpush1.bf16.msra.mxu1 %v23235_v38  ;;  %v23328_v38 = vld [vmem:[%s26369_s19 + $0xb04] ss:$8 sps:$4 sm:$0xff]  }
 0x326   : > { %17952 = vmatpush1.bf16.msra.mxu0 %v23238_v57  ;;  %16395 = vmatprep.subr.bf16.mxu1 %v23243_v58  ;;  %v23331_v57 = vld [vmem:[%s26369_s19 + $0x3104] ss:$8 sps:$4 sm:$0xff]   ;;  %v27298_v58 = vrot.slane %v27210_v48, %v26438_v51  ;;  %v2966_v48 = vcombine.high %v27229_v56, %v27229_v56 }
 0x327   : > { %17953 = vmatprep.subr.bf16.mxu0 %v23246_v59  ;;  %v27302_v59 = vrot.slane %v27202_v17, %v26438_v51  ;;  %v23332_v17 = vld [vmem:[%s26369_s19 + $0xb10] ss:$8 sps:$4 sm:$0xff]   ;;  %v23340_v56 = vld [vmem:[%s26369_s19 + $0xb24] ss:$8 sps:$4 sm:$0xff]  }
 0x329   : > { %16396 = vmatpush1.bf16.msra.mxu1 %v23241_v44  ;;  %v23326_v44 = vld [vmem:[%s26369_s19 + $0xb00] ss:$8 sps:$4 sm:$0xff]  }
 0x32a   : > { %17954 = vmatpush1.bf16.msra.mxu0 %v23244_v0  ;;  %16397 = vmatprep.subr.bf16.mxu1 %v23249_v1  ;;  %v23329_v0 = vld [vmem:[%s26369_s19 + $0x3100] ss:$8 sps:$4 sm:$0xff]   ;;  %v23334_v1 = vld [vmem:[%s26369_s19 + $0xb14] ss:$8 sps:$4 sm:$0xff]  }
 0x32b   : > { %17955 = vmatprep.subr.bf16.mxu0 %v23252_v2  ;;  %v23337_v2 = vld [vmem:[%s26369_s19 + $0x3114] ss:$8 sps:$4 sm:$0xff]  }
 0x32d   : > { %16398 = vmatpush1.bf16.msra.mxu1 %v23247_v3  ;;  %v3455_v3 = vcombine.high %v27232_v19, %v27232_v19  ;;  %v23338_v19 = vld [vmem:[%s26369_s19 + $0xb20] ss:$8 sps:$4 sm:$0xff]  }
 0x32e   : > { %17956 = vmatpush1.bf16.msra.mxu0 %v23250_v47  ;;  %16399 = vmatprep.subr.bf16.mxu1 %v23255_v25  ;;  %v23335_v47 = vld [vmem:[%s26369_s19 + $0x3110] ss:$8 sps:$4 sm:$0xff]   ;;  %v23343_v25 = vld [vmem:[%s26369_s19 + $0x3124] ss:$8 sps:$4 sm:$0xff]  }
 0x32f   : > { %17957 = vmatprep.subr.bf16.mxu0 %v23258_v5  ;;  %v23341_v5 = vld [vmem:[%s26369_s19 + $0x3120] ss:$8 sps:$4 sm:$0xff]  }
 0x331   : > { %16400 = vmatpush1.bf16.msra.mxu1 %v23253_v60  ;;  %v23346_v60 = vld [vmem:[%s26369_s19 + $0xb34] ss:$8 sps:$4 sm:$0xff]  }
 0x332   : > { %17958 = vmatpush1.bf16.msra.mxu0 %v23256_v6  ;;  %16401 = vmatprep.subr.bf16.mxu1 %v23261_v61  ;;  %v23349_v6 = vld [vmem:[%s26369_s19 + $0x3134] ss:$8 sps:$4 sm:$0xff]   ;;  %v23344_v61 = vld [vmem:[%s26369_s19 + $0xb30] ss:$8 sps:$4 sm:$0xff]  }
 0x333   : > { %17959 = vmatprep.subr.bf16.mxu0 %v23264_v7  ;;  %v23347_v7 = vld [vmem:[%s26369_s19 + $0x3130] ss:$8 sps:$4 sm:$0xff]  }
 0x335   : > { %16402 = vmatpush1.bf16.msra.mxu1 %v23259_v8  ;;  %v23352_v8 = vld [vmem:[%s26369_s19 + $0xb44] ss:$8 sps:$4 sm:$0xff]  }
 0x336   : > { %17960 = vmatpush1.bf16.msra.mxu0 %v23262_v9  ;;  %16403 = vmatprep.subr.bf16.mxu1 %v23267_v10  ;;  %v23355_v9 = vld [vmem:[%s26369_s19 + $0x3144] ss:$8 sps:$4 sm:$0xff]   ;;  %v23350_v10 = vld [vmem:[%s26369_s19 + $0xb40] ss:$8 sps:$4 sm:$0xff]  }
 0x337   : > { %17961 = vmatprep.subr.bf16.mxu0 %v23270_v11  ;;  %v23353_v11 = vld [vmem:[%s26369_s19 + $0x3140] ss:$8 sps:$4 sm:$0xff]  }
 0x339   : > { %16404 = vmatpush1.bf16.msra.mxu1 %v23265_v12  ;;  %v23358_v12 = vld [vmem:[%s26369_s19 + $0xb54] ss:$8 sps:$4 sm:$0xff]  }
 0x33a   : > { %17962 = vmatpush1.bf16.msra.mxu0 %v23268_v13  ;;  %16405 = vmatprep.subr.bf16.mxu1 %v23273_v15  ;;  %v23361_v13 = vld [vmem:[%s26369_s19 + $0x3154] ss:$8 sps:$4 sm:$0xff]   ;;  %v23356_v15 = vld [vmem:[%s26369_s19 + $0xb50] ss:$8 sps:$4 sm:$0xff]  }
 0x33b   : > { %17963 = vmatprep.subr.bf16.mxu0 %v23276_v18  ;;  %v23359_v18 = vld [vmem:[%s26369_s19 + $0x3150] ss:$8 sps:$4 sm:$0xff]  }
 0x33d   : > { %16406 = vmatpush1.bf16.msra.mxu1 %v23271_v21  ;;  %v23364_v21 = vld [vmem:[%s26369_s19 + $0xb64] ss:$8 sps:$4 sm:$0xff]  }
 0x33e   : > { %17964 = vmatpush1.bf16.msra.mxu0 %v23274_v22  ;;  %16407 = vmatprep.subr.bf16.mxu1 %v23279_v23  ;;  %v23367_v22 = vld [vmem:[%s26369_s19 + $0x3164] ss:$8 sps:$4 sm:$0xff]   ;;  %v23362_v23 = vld [vmem:[%s26369_s19 + $0xb60] ss:$8 sps:$4 sm:$0xff]  }
 0x33f   : > { %17965 = vmatprep.subr.bf16.mxu0 %v23282_v4  ;;  %v23365_v4 = vld [vmem:[%s26369_s19 + $0x3160] ss:$8 sps:$4 sm:$0xff]  }
 0x341   : > { %16408 = vmatpush1.bf16.msra.mxu1 %v23277_v42  ;;  %v23370_v42 = vld [vmem:[%s26369_s19 + $0xb74] ss:$8 sps:$4 sm:$0xff]  }
 0x342   : > { %17966 = vmatpush1.bf16.msra.mxu0 %v23280_v26  ;;  %16409 = vmatprep.subr.bf16.mxu1 %v23285_v14  ;;  %v23373_v26 = vld [vmem:[%s26369_s19 + $0x3174] ss:$8 sps:$4 sm:$0xff]   ;;  %v23368_v14 = vld [vmem:[%s26369_s19 + $0xb70] ss:$8 sps:$4 sm:$0xff]  }
 0x343   : > { %17967 = vmatprep.subr.bf16.mxu0 %v23288_v54  ;;  %v23371_v54 = vld [vmem:[%s26369_s19 + $0x3170] ss:$8 sps:$4 sm:$0xff]  }
 0x345   : > { %16410 = vmatpush1.bf16.msra.mxu1 %v23283_v62  ;;  %v23376_v62 = vld [vmem:[%s26369_s19 + $0xb84] ss:$8 sps:$4 sm:$0xff]  }
 0x346   : > { %17968 = vmatpush1.bf16.msra.mxu0 %v23286_v27  ;;  %16411 = vmatprep.subr.bf16.mxu1 %v23291_v28  ;;  %v23379_v27 = vld [vmem:[%s26369_s19 + $0x3184] ss:$8 sps:$4 sm:$0xff]   ;;  %v23374_v28 = vld [vmem:[%s26369_s19 + $0xb80] ss:$8 sps:$4 sm:$0xff]  }
 0x347   : > { %17969 = vmatprep.subr.bf16.mxu0 %v23294_v29  ;;  %v23377_v29 = vld [vmem:[%s26369_s19 + $0x3180] ss:$8 sps:$4 sm:$0xff]  }
 0x349   : > { %16412 = vmatpush1.bf16.msra.mxu1 %v23289_v30  ;;  %v23382_v30 = vld [vmem:[%s26369_s19 + $0xb94] ss:$8 sps:$4 sm:$0xff]  }
 0x34a   : > { %17970 = vmatpush1.bf16.msra.mxu0 %v23292_v31  ;;  %16413 = vmatprep.subr.bf16.mxu1 %v23297_v32  ;;  %v23385_v31 = vld [vmem:[%s26369_s19 + $0x3194] ss:$8 sps:$4 sm:$0xff]   ;;  %v23380_v32 = vld [vmem:[%s26369_s19 + $0xb90] ss:$8 sps:$4 sm:$0xff]  }
 0x34b   : > { %17971 = vmatprep.subr.bf16.mxu0 %v23300_v33  ;;  %v23383_v33 = vld [vmem:[%s26369_s19 + $0x3190] ss:$8 sps:$4 sm:$0xff]  }
 0x34d   : > { %16414 = vmatpush1.bf16.msra.mxu1 %v23295_v35  ;;  %v23388_v35 = vld [vmem:[%s26369_s19 + $0xba4] ss:$8 sps:$4 sm:$0xff]  }
 0x34e   : > { %17972 = vmatpush1.bf16.msra.mxu0 %v23298_v39  ;;  %16415 = vmatprep.subr.bf16.mxu1 %v23303_v40  ;;  %v23391_v39 = vld [vmem:[%s26369_s19 + $0x31a4] ss:$8 sps:$4 sm:$0xff]   ;;  %v23386_v40 = vld [vmem:[%s26369_s19 + $0xba0] ss:$8 sps:$4 sm:$0xff]  }
 0x34f   : > { %17973 = vmatprep.subr.bf16.mxu0 %v23306_v41  ;;  %v23389_v41 = vld [vmem:[%s26369_s19 + $0x31a0] ss:$8 sps:$4 sm:$0xff]  }
 0x351   : > { %16416 = vmatpush1.bf16.msra.mxu1 %v23301_v46  ;;  %v23394_v46 = vld [vmem:[%s26369_s19 + $0xbb4] ss:$8 sps:$4 sm:$0xff]  }
 0x352   : > { %17974 = vmatpush1.bf16.msra.mxu0 %v23304_v63  ;;  %16417 = vmatprep.subr.bf16.mxu1 %v23309_v24  ;;  %v23397_v63 = vld [vmem:[%s26369_s19 + $0x31b4] ss:$8 sps:$4 sm:$0xff]   ;;  %v23392_v24 = vld [vmem:[%s26369_s19 + $0xbb0] ss:$8 sps:$4 sm:$0xff]  }
 0x353   : > { %17975 = vmatprep.subr.bf16.mxu0 %v23312_v49  ;;  %v23395_v49 = vld [vmem:[%s26369_s19 + $0x31b0] ss:$8 sps:$4 sm:$0xff]  }
 0x355   : > { %16418 = vmatpush1.bf16.msra.mxu1 %v23307_v34  ;;  %v23400_v34 = vld [vmem:[%s26369_s19 + $0xbc4] ss:$8 sps:$4 sm:$0xff]  }
 0x356   : > { %17976 = vmatpush1.bf16.msra.mxu0 %v23310_v20  ;;  %16419 = vmatprep.subr.bf16.mxu1 %v23315_v16  ;;  %v23403_v20 = vld [vmem:[%s26369_s19 + $0x31c4] ss:$8 sps:$4 sm:$0xff]   ;;  %v23398_v16 = vld [vmem:[%s26369_s19 + $0xbc0] ss:$8 sps:$4 sm:$0xff]  }
 0x357   : > { %17977 = vmatprep.subr.bf16.mxu0 %v23318_v50  ;;  %v23401_v50 = vld [vmem:[%s26369_s19 + $0x31c0] ss:$8 sps:$4 sm:$0xff]  }
 0x359   : > { %16420 = vmatpush1.bf16.msra.mxu1 %v23313_v37  ;;  %v23406_v37 = vld [vmem:[%s26369_s19 + $0xbd4] ss:$8 sps:$4 sm:$0xff]  }
 0x35a   : > { %17978 = vmatpush1.bf16.msra.mxu0 %v23316_v52  ;;  %16421 = vmatprep.subr.bf16.mxu1 %v23321_v36  ;;  %v23409_v52 = vld [vmem:[%s26369_s19 + $0x31d4] ss:$8 sps:$4 sm:$0xff]   ;;  %v23404_v36 = vld [vmem:[%s26369_s19 + $0xbd0] ss:$8 sps:$4 sm:$0xff]  }
 0x35b   : > { %17979 = vmatprep.subr.bf16.mxu0 %v23324_v43  ;;  %v23407_v43 = vld [vmem:[%s26369_s19 + $0x31d0] ss:$8 sps:$4 sm:$0xff]  }
 0x35d   : > { %16422 = vmatpush1.bf16.msra.mxu1 %v23319_v53  ;;  %v23412_v53 = vld [vmem:[%s26369_s19 + $0xbe4] ss:$8 sps:$4 sm:$0xff]  }
 0x35e   : > { %17980 = vmatpush1.bf16.msra.mxu0 %v23322_v55  ;;  %16432 = vmatprep.subr.bf16.mxu1 %v23328_v38  ;;  %v23415_v55 = vld [vmem:[%s26369_s19 + $0x31e4] ss:$8 sps:$4 sm:$0xff]   ;;  %v27367_v38 = vld.sshfl [vmem:[%s26387_s30 + $0x18] sm:$0xff pattern:$0x75316420] }
 0x35f   : > { %17990 = vmatprep.subr.bf16.mxu0 %v23331_v57  ;;  %v25910_v57 = vld [vmem:[%s26387_s30 + $0x60] sm:$0xff] }
 0x360   : > { %16424 = vmatmul.mubr.bf16.vlgmr.msra.gmra.mrb[0].mxu1 %v27298_v58 }
 0x361   : > { %17982 = vmatmul.mubr.bf16.vlgmr.msra.gmra.mrb[0].mxu0 %v27302_v59  ;;  %16433 = vmatpush1.bf16.msra.mxu1 %v23326_v44  ;;  %v3408_v44 = vcombine.high %v25910_v57, %v25910_v57  ;;  %v23488_v57 = vld [vmem:[%s26369_s19 + $0xcb0] ss:$8 sps:$4 sm:$0xff]  }
 0x362   : > { %17991 = vmatpush1.bf16.msra.mxu0 %v23329_v0  ;;  %16434 = vmatprep.subr.bf16.mxu1 %v23334_v1  ;;  %v23410_v0 = vld [vmem:[%s26369_s19 + $0xbe0] ss:$8 sps:$4 sm:$0xff]  }
 0x363   : > { %17992 = vmatprep.subr.bf16.mxu0 %v23337_v2  ;;  %16464 = vmatprep.mubr.bf16.mxu1 %v2966_v48  ;;  %v23413_v1 = vld [vmem:[%s26369_s19 + $0x31e0] ss:$8 sps:$4 sm:$0xff]   ;;  %v23418_v2 = vld [vmem:[%s26369_s19 + $0xbf4] ss:$8 sps:$4 sm:$0xff]  }
 0x364   : > { %18022 = vmatprep.mubr.bf16.mxu0 %v3455_v3  ;;  %v23421_v48 = vld [vmem:[%s26369_s19 + $0x31f4] ss:$8 sps:$4 sm:$0xff]   ;;  %v27375_v3 = vrot.slane %v3408_v44, %v26438_v51  ;;  %v23491_v44 = vld [vmem:[%s26369_s19 + $0x32b0] ss:$8 sps:$4 sm:$0xff]  }
 0x365   : > { %16435 = vmatpush1.bf16.msra.mxu1 %v23332_v17  ;;  %v23416_v17 = vld [vmem:[%s26369_s19 + $0xbf0] ss:$8 sps:$4 sm:$0xff]  }
 0x366   : > { %17993 = vmatpush1.bf16.msra.mxu0 %v23335_v47  ;;  %16436 = vmatprep.subr.bf16.mxu1 %v23340_v56  ;;  %v23419_v47 = vld [vmem:[%s26369_s19 + $0x31f0] ss:$8 sps:$4 sm:$0xff]   ;;  %v23424_v56 = vld [vmem:[%s26369_s19 + $0xc04] ss:$8 sps:$4 sm:$0xff]  }
 0x367   : > { %17994 = vmatprep.subr.bf16.mxu0 %v23343_v25  ;;  %v23427_v25 = vld [vmem:[%s26369_s19 + $0x3204] ss:$8 sps:$4 sm:$0xff]  }
 0x369   : > { %16437 = vmatpush1.bf16.msra.mxu1 %v23338_v19  ;;  %v2982_v19 = vcombine.high %v27367_v38, %v27367_v38 }
 0x36a   : > { %17995 = vmatpush1.bf16.msra.mxu0 %v23341_v5  ;;  %16438 = vmatprep.subr.bf16.mxu1 %v23346_v60  ;;  %v3424_v5 = vcombine.high %v27375_v3, %v27375_v3  ;;  %v2964_v60 = vcombine.high %v27298_v58, %v27298_v58 }
 0x36b   : > { %17996 = vmatprep.subr.bf16.mxu0 %v23349_v6  ;;  %v3453_v6 = vcombine.high %v27302_v59, %v27302_v59  ;;  %v23428_v59 = vld [vmem:[%s26369_s19 + $0xc10] ss:$8 sps:$4 sm:$0xff]  }
 0x36c   : > { %v27397_v58 = vrot.slane %v3424_v5, %v26438_v51  ;;  %v23511_v5 = vld [vmem:[%s26369_s19 + $0x32e4] ss:$8 sps:$4 sm:$0xff]  }
 0x36d   : > { %16439 = vmatpush1.bf16.msra.mxu1 %v23344_v61  ;;  %v23422_v61 = vld [vmem:[%s26369_s19 + $0xc00] ss:$8 sps:$4 sm:$0xff]  }
 0x36e   : > { %17997 = vmatpush1.bf16.msra.mxu0 %v23347_v7  ;;  %16440 = vmatprep.subr.bf16.mxu1 %v23352_v8  ;;  %v23425_v7 = vld [vmem:[%s26369_s19 + $0x3200] ss:$8 sps:$4 sm:$0xff]   ;;  %v23430_v8 = vld [vmem:[%s26369_s19 + $0xc14] ss:$8 sps:$4 sm:$0xff]  }
 0x36f   : > { %17998 = vmatprep.subr.bf16.mxu0 %v23355_v9  ;;  %v23433_v9 = vld [vmem:[%s26369_s19 + $0x3214] ss:$8 sps:$4 sm:$0xff]  }
 0x371   : > { %16441 = vmatpush1.bf16.msra.mxu1 %v23350_v10  ;;  %v27394_v10 = vrot.slane %v2982_v19, %v26438_v51  ;;  %v23508_v19 = vld [vmem:[%s26369_s19 + $0xce4] ss:$8 sps:$4 sm:$0xff]  }
 0x372   : > { %17999 = vmatpush1.bf16.msra.mxu0 %v23353_v11  ;;  %16442 = vmatprep.subr.bf16.mxu1 %v23358_v12  ;;  %v23431_v11 = vld [vmem:[%s26369_s19 + $0x3210] ss:$8 sps:$4 sm:$0xff]   ;;  %v23436_v12 = vld [vmem:[%s26369_s19 + $0xc24] ss:$8 sps:$4 sm:$0xff]  }
 0x373   : > { %18000 = vmatprep.subr.bf16.mxu0 %v23361_v13  ;;  %v23439_v13 = vld [vmem:[%s26369_s19 + $0x3224] ss:$8 sps:$4 sm:$0xff]  }
 0x375   : > { %16443 = vmatpush1.bf16.msra.mxu1 %v23356_v15  ;;  %v23434_v15 = vld [vmem:[%s26369_s19 + $0xc20] ss:$8 sps:$4 sm:$0xff]  }
 0x376   : > { %18001 = vmatpush1.bf16.msra.mxu0 %v23359_v18  ;;  %16444 = vmatprep.subr.bf16.mxu1 %v23364_v21  ;;  %v23437_v18 = vld [vmem:[%s26369_s19 + $0x3220] ss:$8 sps:$4 sm:$0xff]   ;;  %v23442_v21 = vld [vmem:[%s26369_s19 + $0xc34] ss:$8 sps:$4 sm:$0xff]  }
 0x377   : > { %18002 = vmatprep.subr.bf16.mxu0 %v23367_v22  ;;  %v23445_v22 = vld [vmem:[%s26369_s19 + $0x3234] ss:$8 sps:$4 sm:$0xff]  }
 0x379   : > { %16445 = vmatpush1.bf16.msra.mxu1 %v23362_v23  ;;  %v23440_v23 = vld [vmem:[%s26369_s19 + $0xc30] ss:$8 sps:$4 sm:$0xff]  }
 0x37a   : > { %18003 = vmatpush1.bf16.msra.mxu0 %v23365_v4  ;;  %16446 = vmatprep.subr.bf16.mxu1 %v23370_v42  ;;  %v23443_v4 = vld [vmem:[%s26369_s19 + $0x3230] ss:$8 sps:$4 sm:$0xff]   ;;  %v23448_v42 = vld [vmem:[%s26369_s19 + $0xc44] ss:$8 sps:$4 sm:$0xff]  }
 0x37b   : > { %18004 = vmatprep.subr.bf16.mxu0 %v23373_v26  ;;  %v23451_v26 = vld [vmem:[%s26369_s19 + $0x3244] ss:$8 sps:$4 sm:$0xff]  }
 0x37d   : > { %16447 = vmatpush1.bf16.msra.mxu1 %v23368_v14  ;;  %v23446_v14 = vld [vmem:[%s26369_s19 + $0xc40] ss:$8 sps:$4 sm:$0xff]  }
 0x37e   : > { %18005 = vmatpush1.bf16.msra.mxu0 %v23371_v54  ;;  %16448 = vmatprep.subr.bf16.mxu1 %v23376_v62  ;;  %v23449_v54 = vld [vmem:[%s26369_s19 + $0x3240] ss:$8 sps:$4 sm:$0xff]   ;;  %v23454_v62 = vld [vmem:[%s26369_s19 + $0xc54] ss:$8 sps:$4 sm:$0xff]  }
 0x37f   : > { %18006 = vmatprep.subr.bf16.mxu0 %v23379_v27  ;;  %v23457_v27 = vld [vmem:[%s26369_s19 + $0x3254] ss:$8 sps:$4 sm:$0xff]  }
 0x381   : > { %16449 = vmatpush1.bf16.msra.mxu1 %v23374_v28  ;;  %v23452_v28 = vld [vmem:[%s26369_s19 + $0xc50] ss:$8 sps:$4 sm:$0xff]  }
 0x382   : > { %18007 = vmatpush1.bf16.msra.mxu0 %v23377_v29  ;;  %16450 = vmatprep.subr.bf16.mxu1 %v23382_v30  ;;  %v23455_v29 = vld [vmem:[%s26369_s19 + $0x3250] ss:$8 sps:$4 sm:$0xff]   ;;  %v23460_v30 = vld [vmem:[%s26369_s19 + $0xc64] ss:$8 sps:$4 sm:$0xff]  }
 0x383   : > { %18008 = vmatprep.subr.bf16.mxu0 %v23385_v31  ;;  %v23463_v31 = vld [vmem:[%s26369_s19 + $0x3264] ss:$8 sps:$4 sm:$0xff]  }
 0x385   : > { %16451 = vmatpush1.bf16.msra.mxu1 %v23380_v32  ;;  %v23458_v32 = vld [vmem:[%s26369_s19 + $0xc60] ss:$8 sps:$4 sm:$0xff]  }
 0x386   : > { %18009 = vmatpush1.bf16.msra.mxu0 %v23383_v33  ;;  %16452 = vmatprep.subr.bf16.mxu1 %v23388_v35  ;;  %v23461_v33 = vld [vmem:[%s26369_s19 + $0x3260] ss:$8 sps:$4 sm:$0xff]   ;;  %v23466_v35 = vld [vmem:[%s26369_s19 + $0xc74] ss:$8 sps:$4 sm:$0xff]  }
 0x387   : > { %18010 = vmatprep.subr.bf16.mxu0 %v23391_v39  ;;  %v23469_v39 = vld [vmem:[%s26369_s19 + $0x3274] ss:$8 sps:$4 sm:$0xff]  }
 0x389   : > { %16453 = vmatpush1.bf16.msra.mxu1 %v23386_v40  ;;  %v23464_v40 = vld [vmem:[%s26369_s19 + $0xc70] ss:$8 sps:$4 sm:$0xff]  }
 0x38a   : > { %18011 = vmatpush1.bf16.msra.mxu0 %v23389_v41  ;;  %16454 = vmatprep.subr.bf16.mxu1 %v23394_v46  ;;  %v23467_v41 = vld [vmem:[%s26369_s19 + $0x3270] ss:$8 sps:$4 sm:$0xff]   ;;  %v23472_v46 = vld [vmem:[%s26369_s19 + $0xc84] ss:$8 sps:$4 sm:$0xff]  }
 0x38b   : > { %18012 = vmatprep.subr.bf16.mxu0 %v23397_v63  ;;  %v23475_v63 = vld [vmem:[%s26369_s19 + $0x3284] ss:$8 sps:$4 sm:$0xff]  }
 0x38d   : > { %16455 = vmatpush1.bf16.msra.mxu1 %v23392_v24  ;;  %v23470_v24 = vld [vmem:[%s26369_s19 + $0xc80] ss:$8 sps:$4 sm:$0xff]  }
 0x38e   : > { %18013 = vmatpush1.bf16.msra.mxu0 %v23395_v49  ;;  %16456 = vmatprep.subr.bf16.mxu1 %v23400_v34  ;;  %v23473_v49 = vld [vmem:[%s26369_s19 + $0x3280] ss:$8 sps:$4 sm:$0xff]   ;;  %v23478_v34 = vld [vmem:[%s26369_s19 + $0xc94] ss:$8 sps:$4 sm:$0xff]  }
 0x38f   : > { %18014 = vmatprep.subr.bf16.mxu0 %v23403_v20  ;;  %v23481_v20 = vld [vmem:[%s26369_s19 + $0x3294] ss:$8 sps:$4 sm:$0xff]  }
 0x391   : > { %16457 = vmatpush1.bf16.msra.mxu1 %v23398_v16  ;;  %v23476_v16 = vld [vmem:[%s26369_s19 + $0xc90] ss:$8 sps:$4 sm:$0xff]  }
 0x392   : > { %18015 = vmatpush1.bf16.msra.mxu0 %v23401_v50  ;;  %16458 = vmatprep.subr.bf16.mxu1 %v23406_v37  ;;  %v23479_v50 = vld [vmem:[%s26369_s19 + $0x3290] ss:$8 sps:$4 sm:$0xff]   ;;  %v23484_v37 = vld [vmem:[%s26369_s19 + $0xca4] ss:$8 sps:$4 sm:$0xff]  }
 0x393   : > { %18016 = vmatprep.subr.bf16.mxu0 %v23409_v52  ;;  %v23487_v52 = vld [vmem:[%s26369_s19 + $0x32a4] ss:$8 sps:$4 sm:$0xff]  }
 0x395   : > { %16459 = vmatpush1.bf16.msra.mxu1 %v23404_v36  ;;  %v23482_v36 = vld [vmem:[%s26369_s19 + $0xca0] ss:$8 sps:$4 sm:$0xff]  }
 0x396   : > { %18017 = vmatpush1.bf16.msra.mxu0 %v23407_v43  ;;  %16460 = vmatprep.subr.bf16.mxu1 %v23412_v53  ;;  %v23485_v43 = vld [vmem:[%s26369_s19 + $0x32a0] ss:$8 sps:$4 sm:$0xff]   ;;  %v23490_v53 = vld [vmem:[%s26369_s19 + $0xcb4] ss:$8 sps:$4 sm:$0xff]  }
 0x397   : > { %18018 = vmatprep.subr.bf16.mxu0 %v23415_v55  ;;  %v23493_v55 = vld [vmem:[%s26369_s19 + $0x32b4] ss:$8 sps:$4 sm:$0xff]  }
 0x399   : > { %16461 = vmatpush1.bf16.msra.mxu1 %v23410_v0  ;;  %v23496_v0 = vld [vmem:[%s26369_s19 + $0xcc4] ss:$8 sps:$4 sm:$0xff]  }
 0x39a   : > { %18019 = vmatpush1.bf16.msra.mxu0 %v23413_v1  ;;  %16462 = vmatprep.subr.bf16.mxu1 %v23418_v2  ;;  %v23499_v1 = vld [vmem:[%s26369_s19 + $0x32c4] ss:$8 sps:$4 sm:$0xff]   ;;  %v23494_v2 = vld [vmem:[%s26369_s19 + $0xcc0] ss:$8 sps:$4 sm:$0xff]  }
 0x39b   : > { %18020 = vmatprep.subr.bf16.mxu0 %v23421_v48  ;;  %v23497_v48 = vld [vmem:[%s26369_s19 + $0x32c0] ss:$8 sps:$4 sm:$0xff]  }
 0x39d   : > { %16463 = vmatpush1.bf16.msra.mxu1 %v23416_v17  ;;  %v23502_v17 = vld [vmem:[%s26369_s19 + $0xcd4] ss:$8 sps:$4 sm:$0xff]  }
 0x39e   : > { %18021 = vmatpush1.bf16.msra.mxu0 %v23419_v47  ;;  %16473 = vmatprep.subr.bf16.mxu1 %v23424_v56  ;;  %v23505_v47 = vld [vmem:[%s26369_s19 + $0x32d4] ss:$8 sps:$4 sm:$0xff]   ;;  %v23500_v56 = vld [vmem:[%s26369_s19 + $0xcd0] ss:$8 sps:$4 sm:$0xff]  }
 0x39f   : > { %18031 = vmatprep.subr.bf16.mxu0 %v23427_v25  ;;  %v23503_v25 = vld [vmem:[%s26369_s19 + $0x32d0] ss:$8 sps:$4 sm:$0xff]  }
 0x3a0   : > { %16465 = vmatmul.mubr.bf16.vlgmr.msra.gmra.mrb[0].mxu1 %v2964_v60  ;;  %v23506_v60 = vld [vmem:[%s26369_s19 + $0xce0] ss:$8 sps:$4 sm:$0xff]  }
 0x3a1   : > { %18023 = vmatmul.mubr.bf16.vlgmr.msra.gmra.mrb[0].mxu0 %v3453_v6  ;;  %16474 = vmatpush1.bf16.msra.mxu1 %v23422_v61  ;;  %v23509_v6 = vld [vmem:[%s26369_s19 + $0x32e0] ss:$8 sps:$4 sm:$0xff]   ;;  %v23514_v61 = vld [vmem:[%s26369_s19 + $0xcf4] ss:$8 sps:$4 sm:$0xff]  }
 0x3a2   : > { %18032 = vmatpush1.bf16.msra.mxu0 %v23425_v7  ;;  %16475 = vmatprep.subr.bf16.mxu1 %v23430_v8  ;;  %v23517_v7 = vld [vmem:[%s26369_s19 + $0x32f4] ss:$8 sps:$4 sm:$0xff]   ;;  %v23512_v8 = vld [vmem:[%s26369_s19 + $0xcf0] ss:$8 sps:$4 sm:$0xff]  }
 0x3a3   : > { %18033 = vmatprep.subr.bf16.mxu0 %v23433_v9  ;;  %16505 = vmatprep.mubr.bf16.mxu1 %v27394_v10  ;;  %v23515_v9 = vld [vmem:[%s26369_s19 + $0x32f0] ss:$8 sps:$4 sm:$0xff]  }
 0x3a4   : > { %18063 = vmatprep.mubr.bf16.mxu0 %v27397_v58 }
 0x3a5   : > { %16476 = vmatpush1.bf16.msra.mxu1 %v23428_v59  ;;  %v23520_v59 = vld [vmem:[%s26369_s19 + $0xd04] ss:$8 sps:$4 sm:$0xff]  }
 0x3a6   : > { %18034 = vmatpush1.bf16.msra.mxu0 %v23431_v11  ;;  %16477 = vmatprep.subr.bf16.mxu1 %v23436_v12  ;;  %v23524_v11 = vld [vmem:[%s26369_s19 + $0x3304] ss:$8 sps:$4 sm:$0xff]   ;;  %v27463_v12 = vrot.slane %v27367_v38, %v26438_v51  ;;  %v3014_v38 = vcombine.high %v27394_v10, %v27394_v10 }
 0x3a7   : > { %18035 = vmatprep.subr.bf16.mxu0 %v23439_v13  ;;  %v27467_v13 = vrot.slane %v27375_v3, %v26438_v51  ;;  %v23525_v3 = vld [vmem:[%s26369_s19 + $0xd10] ss:$8 sps:$4 sm:$0xff]   ;;  %v23533_v10 = vld [vmem:[%s26369_s19 + $0xd24] ss:$8 sps:$4 sm:$0xff]  }
 0x3a9   : > { %16478 = vmatpush1.bf16.msra.mxu1 %v23434_v15  ;;  %v23518_v15 = vld [vmem:[%s26369_s19 + $0xd00] ss:$8 sps:$4 sm:$0xff]  }
 0x3aa   : > { %18036 = vmatpush1.bf16.msra.mxu0 %v23437_v18  ;;  %16479 = vmatprep.subr.bf16.mxu1 %v23442_v21  ;;  %v23522_v18 = vld [vmem:[%s26369_s19 + $0x3300] ss:$8 sps:$4 sm:$0xff]   ;;  %v23527_v21 = vld [vmem:[%s26369_s19 + $0xd14] ss:$8 sps:$4 sm:$0xff]  }
 0x3ab   : > { %18037 = vmatprep.subr.bf16.mxu0 %v23445_v22  ;;  %v23530_v22 = vld [vmem:[%s26369_s19 + $0x3314] ss:$8 sps:$4 sm:$0xff]  }
 0x3ad   : > { %16480 = vmatpush1.bf16.msra.mxu1 %v23440_v23  ;;  %v3456_v23 = vcombine.high %v27397_v58, %v27397_v58  ;;  %v23531_v58 = vld [vmem:[%s26369_s19 + $0xd20] ss:$8 sps:$4 sm:$0xff]  }
 0x3ae   : > { %18038 = vmatpush1.bf16.msra.mxu0 %v23443_v4  ;;  %16481 = vmatprep.subr.bf16.mxu1 %v23448_v42  ;;  %v23528_v4 = vld [vmem:[%s26369_s19 + $0x3310] ss:$8 sps:$4 sm:$0xff]   ;;  %v23536_v42 = vld [vmem:[%s26369_s19 + $0x3324] ss:$8 sps:$4 sm:$0xff]  }
 0x3af   : > { %18039 = vmatprep.subr.bf16.mxu0 %v23451_v26  ;;  %v23534_v26 = vld [vmem:[%s26369_s19 + $0x3320] ss:$8 sps:$4 sm:$0xff]  }
 0x3b1   : > { %16482 = vmatpush1.bf16.msra.mxu1 %v23446_v14  ;;  %v23539_v14 = vld [vmem:[%s26369_s19 + $0xd34] ss:$8 sps:$4 sm:$0xff]  }
 0x3b2   : > { %18040 = vmatpush1.bf16.msra.mxu0 %v23449_v54  ;;  %16483 = vmatprep.subr.bf16.mxu1 %v23454_v62  ;;  %v23542_v54 = vld [vmem:[%s26369_s19 + $0x3334] ss:$8 sps:$4 sm:$0xff]   ;;  %v23537_v62 = vld [vmem:[%s26369_s19 + $0xd30] ss:$8 sps:$4 sm:$0xff]  }
 0x3b3   : > { %18041 = vmatprep.subr.bf16.mxu0 %v23457_v27  ;;  %v23540_v27 = vld [vmem:[%s26369_s19 + $0x3330] ss:$8 sps:$4 sm:$0xff]  }
 0x3b5   : > { %16484 = vmatpush1.bf16.msra.mxu1 %v23452_v28  ;;  %v23545_v28 = vld [vmem:[%s26369_s19 + $0xd44] ss:$8 sps:$4 sm:$0xff]  }
 0x3b6   : > { %18042 = vmatpush1.bf16.msra.mxu0 %v23455_v29  ;;  %16485 = vmatprep.subr.bf16.mxu1 %v23460_v30  ;;  %v23548_v29 = vld [vmem:[%s26369_s19 + $0x3344] ss:$8 sps:$4 sm:$0xff]   ;;  %v23543_v30 = vld [vmem:[%s26369_s19 + $0xd40] ss:$8 sps:$4 sm:$0xff]  }
 0x3b7   : > { %18043 = vmatprep.subr.bf16.mxu0 %v23463_v31  ;;  %v23546_v31 = vld [vmem:[%s26369_s19 + $0x3340] ss:$8 sps:$4 sm:$0xff]  }
 0x3b9   : > { %16486 = vmatpush1.bf16.msra.mxu1 %v23458_v32  ;;  %v23551_v32 = vld [vmem:[%s26369_s19 + $0xd54] ss:$8 sps:$4 sm:$0xff]  }
 0x3ba   : > { %18044 = vmatpush1.bf16.msra.mxu0 %v23461_v33  ;;  %16487 = vmatprep.subr.bf16.mxu1 %v23466_v35  ;;  %v23554_v33 = vld [vmem:[%s26369_s19 + $0x3354] ss:$8 sps:$4 sm:$0xff]   ;;  %v23549_v35 = vld [vmem:[%s26369_s19 + $0xd50] ss:$8 sps:$4 sm:$0xff]  }
 0x3bb   : > { %18045 = vmatprep.subr.bf16.mxu0 %v23469_v39  ;;  %v23552_v39 = vld [vmem:[%s26369_s19 + $0x3350] ss:$8 sps:$4 sm:$0xff]  }
 0x3bd   : > { %16488 = vmatpush1.bf16.msra.mxu1 %v23464_v40  ;;  %v23557_v40 = vld [vmem:[%s26369_s19 + $0xd64] ss:$8 sps:$4 sm:$0xff]  }
 0x3be   : > { %18046 = vmatpush1.bf16.msra.mxu0 %v23467_v41  ;;  %16489 = vmatprep.subr.bf16.mxu1 %v23472_v46  ;;  %v23560_v41 = vld [vmem:[%s26369_s19 + $0x3364] ss:$8 sps:$4 sm:$0xff]   ;;  %v23555_v46 = vld [vmem:[%s26369_s19 + $0xd60] ss:$8 sps:$4 sm:$0xff]  }
 0x3bf   : > { %18047 = vmatprep.subr.bf16.mxu0 %v23475_v63  ;;  %v23558_v63 = vld [vmem:[%s26369_s19 + $0x3360] ss:$8 sps:$4 sm:$0xff]  }
 0x3c1   : > { %16490 = vmatpush1.bf16.msra.mxu1 %v23470_v24  ;;  %v23563_v24 = vld [vmem:[%s26369_s19 + $0xd74] ss:$8 sps:$4 sm:$0xff]  }
 0x3c2   : > { %18048 = vmatpush1.bf16.msra.mxu0 %v23473_v49  ;;  %16491 = vmatprep.subr.bf16.mxu1 %v23478_v34  ;;  %v23566_v49 = vld [vmem:[%s26369_s19 + $0x3374] ss:$8 sps:$4 sm:$0xff]   ;;  %v23561_v34 = vld [vmem:[%s26369_s19 + $0xd70] ss:$8 sps:$4 sm:$0xff]  }
 0x3c3   : > { %18049 = vmatprep.subr.bf16.mxu0 %v23481_v20  ;;  %v23564_v20 = vld [vmem:[%s26369_s19 + $0x3370] ss:$8 sps:$4 sm:$0xff]  }
 0x3c5   : > { %16492 = vmatpush1.bf16.msra.mxu1 %v23476_v16  ;;  %v23569_v16 = vld [vmem:[%s26369_s19 + $0xd84] ss:$8 sps:$4 sm:$0xff]  }
 0x3c6   : > { %18050 = vmatpush1.bf16.msra.mxu0 %v23479_v50  ;;  %16493 = vmatprep.subr.bf16.mxu1 %v23484_v37  ;;  %v23572_v50 = vld [vmem:[%s26369_s19 + $0x3384] ss:$8 sps:$4 sm:$0xff]   ;;  %v23567_v37 = vld [vmem:[%s26369_s19 + $0xd80] ss:$8 sps:$4 sm:$0xff]  }
 0x3c7   : > { %18051 = vmatprep.subr.bf16.mxu0 %v23487_v52  ;;  %v23570_v52 = vld [vmem:[%s26369_s19 + $0x3380] ss:$8 sps:$4 sm:$0xff]  }
 0x3c9   : > { %16494 = vmatpush1.bf16.msra.mxu1 %v23482_v36  ;;  %v23575_v36 = vld [vmem:[%s26369_s19 + $0xd94] ss:$8 sps:$4 sm:$0xff]  }
 0x3ca   : > { %18052 = vmatpush1.bf16.msra.mxu0 %v23485_v43  ;;  %16495 = vmatprep.subr.bf16.mxu1 %v23490_v53  ;;  %v23578_v43 = vld [vmem:[%s26369_s19 + $0x3394] ss:$8 sps:$4 sm:$0xff]   ;;  %v23573_v53 = vld [vmem:[%s26369_s19 + $0xd90] ss:$8 sps:$4 sm:$0xff]  }
 0x3cb   : > { %18053 = vmatprep.subr.bf16.mxu0 %v23493_v55  ;;  %v23576_v55 = vld [vmem:[%s26369_s19 + $0x3390] ss:$8 sps:$4 sm:$0xff]  }
 0x3cd   : > { %16496 = vmatpush1.bf16.msra.mxu1 %v23488_v57  ;;  %v23581_v57 = vld [vmem:[%s26369_s19 + $0xda4] ss:$8 sps:$4 sm:$0xff]  }
 0x3ce   : > { %18054 = vmatpush1.bf16.msra.mxu0 %v23491_v44  ;;  %16497 = vmatprep.subr.bf16.mxu1 %v23496_v0  ;;  %v23584_v44 = vld [vmem:[%s26369_s19 + $0x33a4] ss:$8 sps:$4 sm:$0xff]   ;;  %v23579_v0 = vld [vmem:[%s26369_s19 + $0xda0] ss:$8 sps:$4 sm:$0xff]  }
 0x3cf   : > { %18055 = vmatprep.subr.bf16.mxu0 %v23499_v1  ;;  %v23582_v1 = vld [vmem:[%s26369_s19 + $0x33a0] ss:$8 sps:$4 sm:$0xff]  }
 0x3d1   : > { %16498 = vmatpush1.bf16.msra.mxu1 %v23494_v2  ;;  %v23587_v2 = vld [vmem:[%s26369_s19 + $0xdb4] ss:$8 sps:$4 sm:$0xff]  }
 0x3d2   : > { %18056 = vmatpush1.bf16.msra.mxu0 %v23497_v48  ;;  %16499 = vmatprep.subr.bf16.mxu1 %v23502_v17  ;;  %v23590_v48 = vld [vmem:[%s26369_s19 + $0x33b4] ss:$8 sps:$4 sm:$0xff]   ;;  %v23585_v17 = vld [vmem:[%s26369_s19 + $0xdb0] ss:$8 sps:$4 sm:$0xff]  }
 0x3d3   : > { %18057 = vmatprep.subr.bf16.mxu0 %v23505_v47  ;;  %v23588_v47 = vld [vmem:[%s26369_s19 + $0x33b0] ss:$8 sps:$4 sm:$0xff]  }
 0x3d5   : > { %16500 = vmatpush1.bf16.msra.mxu1 %v23500_v56  ;;  %v23593_v56 = vld [vmem:[%s26369_s19 + $0xdc4] ss:$8 sps:$4 sm:$0xff]  }
 0x3d6   : > { %18058 = vmatpush1.bf16.msra.mxu0 %v23503_v25  ;;  %16501 = vmatprep.subr.bf16.mxu1 %v23508_v19  ;;  %v23596_v25 = vld [vmem:[%s26369_s19 + $0x33c4] ss:$8 sps:$4 sm:$0xff]   ;;  %v23591_v19 = vld [vmem:[%s26369_s19 + $0xdc0] ss:$8 sps:$4 sm:$0xff]  }
 0x3d7   : > { %18059 = vmatprep.subr.bf16.mxu0 %v23511_v5  ;;  %v23594_v5 = vld [vmem:[%s26369_s19 + $0x33c0] ss:$8 sps:$4 sm:$0xff]  }
 0x3d9   : > { %16502 = vmatpush1.bf16.msra.mxu1 %v23506_v60  ;;  %v23599_v60 = vld [vmem:[%s26369_s19 + $0xdd4] ss:$8 sps:$4 sm:$0xff]  }
 0x3da   : > { %18060 = vmatpush1.bf16.msra.mxu0 %v23509_v6  ;;  %16503 = vmatprep.subr.bf16.mxu1 %v23514_v61  ;;  %v23602_v6 = vld [vmem:[%s26369_s19 + $0x33d4] ss:$8 sps:$4 sm:$0xff]   ;;  %v23597_v61 = vld [vmem:[%s26369_s19 + $0xdd0] ss:$8 sps:$4 sm:$0xff]  }
 0x3db   : > { %18061 = vmatprep.subr.bf16.mxu0 %v23517_v7  ;;  %v23600_v7 = vld [vmem:[%s26369_s19 + $0x33d0] ss:$8 sps:$4 sm:$0xff]  }
 0x3dd   : > { %16504 = vmatpush1.bf16.msra.mxu1 %v23512_v8  ;;  %v23605_v8 = vld [vmem:[%s26369_s19 + $0xde4] ss:$8 sps:$4 sm:$0xff]  }
 0x3de   : > { %18062 = vmatpush1.bf16.msra.mxu0 %v23515_v9  ;;  %16514 = vmatprep.subr.bf16.mxu1 %v23520_v59  ;;  %v23608_v9 = vld [vmem:[%s26369_s19 + $0x33e4] ss:$8 sps:$4 sm:$0xff]  }
 0x3df   : > { %18072 = vmatprep.subr.bf16.mxu0 %v23524_v11  ;;  %v27532_v59 = vld.sshfl [vmem:[%s26387_s30 + $0x68] sm:$0xff pattern:$0x75316420]  ;;  %v25911_v11 = vld [vmem:[%s26387_s30 + $0x18] sm:$0xff] }
 0x3e0   : > { %16506 = vmatmul.mubr.bf16.vlgmr.msra.gmra.mrb[0].mxu1 %v27463_v12 }
 0x3e1   : > { %18064 = vmatmul.mubr.bf16.vlgmr.msra.gmra.mrb[0].mxu0 %v27467_v13  ;;  %16515 = vmatpush1.bf16.msra.mxu1 %v23518_v15  ;;  %v2967_v15 = vcombine.high %v25911_v11, %v25911_v11  ;;  %v23681_v11 = vld [vmem:[%s26369_s19 + $0xeb0] ss:$8 sps:$4 sm:$0xff]  }
 0x3e2   : > { %18073 = vmatpush1.bf16.msra.mxu0 %v23522_v18  ;;  %16516 = vmatprep.subr.bf16.mxu1 %v23527_v21  ;;  %v23603_v18 = vld [vmem:[%s26369_s19 + $0xde0] ss:$8 sps:$4 sm:$0xff]  }
 0x3e3   : > { %18074 = vmatprep.subr.bf16.mxu0 %v23530_v22  ;;  %16546 = vmatprep.mubr.bf16.mxu1 %v3014_v38  ;;  %v23606_v21 = vld [vmem:[%s26369_s19 + $0x33e0] ss:$8 sps:$4 sm:$0xff]   ;;  %v23611_v22 = vld [vmem:[%s26369_s19 + $0xdf4] ss:$8 sps:$4 sm:$0xff]  }
 0x3e4   : > { %18104 = vmatprep.mubr.bf16.mxu0 %v3456_v23  ;;  %v23614_v38 = vld [vmem:[%s26369_s19 + $0x33f4] ss:$8 sps:$4 sm:$0xff]   ;;  %v27540_v23 = vrot.slane %v2967_v15, %v26438_v51  ;;  %v23684_v15 = vld [vmem:[%s26369_s19 + $0x34b0] ss:$8 sps:$4 sm:$0xff]  }
 0x3e5   : > { %16517 = vmatpush1.bf16.msra.mxu1 %v23525_v3  ;;  %v23609_v3 = vld [vmem:[%s26369_s19 + $0xdf0] ss:$8 sps:$4 sm:$0xff]  }
 0x3e6   : > { %18075 = vmatpush1.bf16.msra.mxu0 %v23528_v4  ;;  %16518 = vmatprep.subr.bf16.mxu1 %v23533_v10  ;;  %v23612_v4 = vld [vmem:[%s26369_s19 + $0x33f0] ss:$8 sps:$4 sm:$0xff]   ;;  %v23617_v10 = vld [vmem:[%s26369_s19 + $0xe04] ss:$8 sps:$4 sm:$0xff]  }
 0x3e7   : > { %18076 = vmatprep.subr.bf16.mxu0 %v23536_v42  ;;  %v23620_v42 = vld [vmem:[%s26369_s19 + $0x3404] ss:$8 sps:$4 sm:$0xff]  }
 0x3e9   : > { %16519 = vmatpush1.bf16.msra.mxu1 %v23531_v58  ;;  %v2983_v58 = vcombine.high %v27540_v23, %v27540_v23 }
 0x3ea   : > { %18077 = vmatpush1.bf16.msra.mxu0 %v23534_v26  ;;  %16520 = vmatprep.subr.bf16.mxu1 %v23539_v14  ;;  %v3472_v26 = vcombine.high %v27532_v59, %v27532_v59  ;;  %v3012_v14 = vcombine.high %v27463_v12, %v27463_v12 }
 0x3eb   : > { %18078 = vmatprep.subr.bf16.mxu0 %v23542_v54  ;;  %v3454_v54 = vcombine.high %v27467_v13, %v27467_v13  ;;  %v23621_v13 = vld [vmem:[%s26369_s19 + $0xe10] ss:$8 sps:$4 sm:$0xff]  }
 0x3ec   : > { %v27562_v12 = vrot.slane %v3472_v26, %v26438_v51  ;;  %v23704_v26 = vld [vmem:[%s26369_s19 + $0x34e4] ss:$8 sps:$4 sm:$0xff]  }
 0x3ed   : > { %16521 = vmatpush1.bf16.msra.mxu1 %v23537_v62  ;;  %v23615_v62 = vld [vmem:[%s26369_s19 + $0xe00] ss:$8 sps:$4 sm:$0xff]  }
 0x3ee   : > { %18079 = vmatpush1.bf16.msra.mxu0 %v23540_v27  ;;  %16522 = vmatprep.subr.bf16.mxu1 %v23545_v28  ;;  %v23618_v27 = vld [vmem:[%s26369_s19 + $0x3400] ss:$8 sps:$4 sm:$0xff]   ;;  %v23623_v28 = vld [vmem:[%s26369_s19 + $0xe14] ss:$8 sps:$4 sm:$0xff]  }
 0x3ef   : > { %18080 = vmatprep.subr.bf16.mxu0 %v23548_v29  ;;  %v23626_v29 = vld [vmem:[%s26369_s19 + $0x3414] ss:$8 sps:$4 sm:$0xff]  }
 0x3f1   : > { %16523 = vmatpush1.bf16.msra.mxu1 %v23543_v30  ;;  %v27559_v30 = vrot.slane %v2983_v58, %v26438_v51  ;;  %v23701_v58 = vld [vmem:[%s26369_s19 + $0xee4] ss:$8 sps:$4 sm:$0xff]  }
 0x3f2   : > { %18081 = vmatpush1.bf16.msra.mxu0 %v23546_v31  ;;  %16524 = vmatprep.subr.bf16.mxu1 %v23551_v32  ;;  %v23624_v31 = vld [vmem:[%s26369_s19 + $0x3410] ss:$8 sps:$4 sm:$0xff]   ;;  %v23629_v32 = vld [vmem:[%s26369_s19 + $0xe24] ss:$8 sps:$4 sm:$0xff]  }
 0x3f3   : > { %18082 = vmatprep.subr.bf16.mxu0 %v23554_v33  ;;  %v23632_v33 = vld [vmem:[%s26369_s19 + $0x3424] ss:$8 sps:$4 sm:$0xff]  }
 0x3f5   : > { %16525 = vmatpush1.bf16.msra.mxu1 %v23549_v35  ;;  %v23627_v35 = vld [vmem:[%s26369_s19 + $0xe20] ss:$8 sps:$4 sm:$0xff]  }
 0x3f6   : > { %18083 = vmatpush1.bf16.msra.mxu0 %v23552_v39  ;;  %16526 = vmatprep.subr.bf16.mxu1 %v23557_v40  ;;  %v23630_v39 = vld [vmem:[%s26369_s19 + $0x3420] ss:$8 sps:$4 sm:$0xff]   ;;  %v23635_v40 = vld [vmem:[%s26369_s19 + $0xe34] ss:$8 sps:$4 sm:$0xff]  }
 0x3f7   : > { %18084 = vmatprep.subr.bf16.mxu0 %v23560_v41  ;;  %v23638_v41 = vld [vmem:[%s26369_s19 + $0x3434] ss:$8 sps:$4 sm:$0xff]  }
 0x3f9   : > { %16527 = vmatpush1.bf16.msra.mxu1 %v23555_v46  ;;  %v23633_v46 = vld [vmem:[%s26369_s19 + $0xe30] ss:$8 sps:$4 sm:$0xff]  }
 0x3fa   : > { %18085 = vmatpush1.bf16.msra.mxu0 %v23558_v63  ;;  %16528 = vmatprep.subr.bf16.mxu1 %v23563_v24  ;;  %v23636_v63 = vld [vmem:[%s26369_s19 + $0x3430] ss:$8 sps:$4 sm:$0xff]   ;;  %v23641_v24 = vld [vmem:[%s26369_s19 + $0xe44] ss:$8 sps:$4 sm:$0xff]  }
 0x3fb   : > { %18086 = vmatprep.subr.bf16.mxu0 %v23566_v49  ;;  %v23644_v49 = vld [vmem:[%s26369_s19 + $0x3444] ss:$8 sps:$4 sm:$0xff]  }
 0x3fd   : > { %16529 = vmatpush1.bf16.msra.mxu1 %v23561_v34  ;;  %v23639_v34 = vld [vmem:[%s26369_s19 + $0xe40] ss:$8 sps:$4 sm:$0xff]  }
 0x3fe   : > { %18087 = vmatpush1.bf16.msra.mxu0 %v23564_v20  ;;  %16530 = vmatprep.subr.bf16.mxu1 %v23569_v16  ;;  %v23642_v20 = vld [vmem:[%s26369_s19 + $0x3440] ss:$8 sps:$4 sm:$0xff]   ;;  %v23647_v16 = vld [vmem:[%s26369_s19 + $0xe54] ss:$8 sps:$4 sm:$0xff]  }
 0x3ff   : > { %18088 = vmatprep.subr.bf16.mxu0 %v23572_v50  ;;  %v23650_v50 = vld [vmem:[%s26369_s19 + $0x3454] ss:$8 sps:$4 sm:$0xff]  }
 0x401   : > { %16531 = vmatpush1.bf16.msra.mxu1 %v23567_v37  ;;  %v23645_v37 = vld [vmem:[%s26369_s19 + $0xe50] ss:$8 sps:$4 sm:$0xff]  }
 0x402   : > { %18089 = vmatpush1.bf16.msra.mxu0 %v23570_v52  ;;  %16532 = vmatprep.subr.bf16.mxu1 %v23575_v36  ;;  %v23648_v52 = vld [vmem:[%s26369_s19 + $0x3450] ss:$8 sps:$4 sm:$0xff]   ;;  %v23653_v36 = vld [vmem:[%s26369_s19 + $0xe64] ss:$8 sps:$4 sm:$0xff]  }
 0x403   : > { %18090 = vmatprep.subr.bf16.mxu0 %v23578_v43  ;;  %v23656_v43 = vld [vmem:[%s26369_s19 + $0x3464] ss:$8 sps:$4 sm:$0xff]  }
 0x405   : > { %16533 = vmatpush1.bf16.msra.mxu1 %v23573_v53  ;;  %v23651_v53 = vld [vmem:[%s26369_s19 + $0xe60] ss:$8 sps:$4 sm:$0xff]  }
 0x406   : > { %18091 = vmatpush1.bf16.msra.mxu0 %v23576_v55  ;;  %16534 = vmatprep.subr.bf16.mxu1 %v23581_v57  ;;  %v23654_v55 = vld [vmem:[%s26369_s19 + $0x3460] ss:$8 sps:$4 sm:$0xff]   ;;  %v23659_v57 = vld [vmem:[%s26369_s19 + $0xe74] ss:$8 sps:$4 sm:$0xff]  }
 0x407   : > { %18092 = vmatprep.subr.bf16.mxu0 %v23584_v44  ;;  %v23662_v44 = vld [vmem:[%s26369_s19 + $0x3474] ss:$8 sps:$4 sm:$0xff]  }
 0x409   : > { %16535 = vmatpush1.bf16.msra.mxu1 %v23579_v0  ;;  %v23657_v0 = vld [vmem:[%s26369_s19 + $0xe70] ss:$8 sps:$4 sm:$0xff]  }
 0x40a   : > { %18093 = vmatpush1.bf16.msra.mxu0 %v23582_v1  ;;  %16536 = vmatprep.subr.bf16.mxu1 %v23587_v2  ;;  %v23660_v1 = vld [vmem:[%s26369_s19 + $0x3470] ss:$8 sps:$4 sm:$0xff]   ;;  %v23665_v2 = vld [vmem:[%s26369_s19 + $0xe84] ss:$8 sps:$4 sm:$0xff]  }
 0x40b   : > { %18094 = vmatprep.subr.bf16.mxu0 %v23590_v48  ;;  %v23668_v48 = vld [vmem:[%s26369_s19 + $0x3484] ss:$8 sps:$4 sm:$0xff]  }
 0x40d   : > { %16537 = vmatpush1.bf16.msra.mxu1 %v23585_v17  ;;  %v23663_v17 = vld [vmem:[%s26369_s19 + $0xe80] ss:$8 sps:$4 sm:$0xff]  }
 0x40e   : > { %18095 = vmatpush1.bf16.msra.mxu0 %v23588_v47  ;;  %16538 = vmatprep.subr.bf16.mxu1 %v23593_v56  ;;  %v23666_v47 = vld [vmem:[%s26369_s19 + $0x3480] ss:$8 sps:$4 sm:$0xff]   ;;  %v23671_v56 = vld [vmem:[%s26369_s19 + $0xe94] ss:$8 sps:$4 sm:$0xff]  }
 0x40f   : > { %18096 = vmatprep.subr.bf16.mxu0 %v23596_v25  ;;  %v23674_v25 = vld [vmem:[%s26369_s19 + $0x3494] ss:$8 sps:$4 sm:$0xff]  }
 0x411   : > { %16539 = vmatpush1.bf16.msra.mxu1 %v23591_v19  ;;  %v23669_v19 = vld [vmem:[%s26369_s19 + $0xe90] ss:$8 sps:$4 sm:$0xff]  }
 0x412   : > { %18097 = vmatpush1.bf16.msra.mxu0 %v23594_v5  ;;  %16540 = vmatprep.subr.bf16.mxu1 %v23599_v60  ;;  %v23672_v5 = vld [vmem:[%s26369_s19 + $0x3490] ss:$8 sps:$4 sm:$0xff]   ;;  %v23677_v60 = vld [vmem:[%s26369_s19 + $0xea4] ss:$8 sps:$4 sm:$0xff]  }
 0x413   : > { %18098 = vmatprep.subr.bf16.mxu0 %v23602_v6  ;;  %v23680_v6 = vld [vmem:[%s26369_s19 + $0x34a4] ss:$8 sps:$4 sm:$0xff]  }
 0x415   : > { %16541 = vmatpush1.bf16.msra.mxu1 %v23597_v61  ;;  %v23675_v61 = vld [vmem:[%s26369_s19 + $0xea0] ss:$8 sps:$4 sm:$0xff]  }
 0x416   : > { %18099 = vmatpush1.bf16.msra.mxu0 %v23600_v7  ;;  %16542 = vmatprep.subr.bf16.mxu1 %v23605_v8  ;;  %v23678_v7 = vld [vmem:[%s26369_s19 + $0x34a0] ss:$8 sps:$4 sm:$0xff]   ;;  %v23683_v8 = vld [vmem:[%s26369_s19 + $0xeb4] ss:$8 sps:$4 sm:$0xff]  }
 0x417   : > { %18100 = vmatprep.subr.bf16.mxu0 %v23608_v9  ;;  %v23686_v9 = vld [vmem:[%s26369_s19 + $0x34b4] ss:$8 sps:$4 sm:$0xff]  }
 0x419   : > { %16543 = vmatpush1.bf16.msra.mxu1 %v23603_v18  ;;  %v23689_v18 = vld [vmem:[%s26369_s19 + $0xec4] ss:$8 sps:$4 sm:$0xff]  }
 0x41a   : > { %18101 = vmatpush1.bf16.msra.mxu0 %v23606_v21  ;;  %16544 = vmatprep.subr.bf16.mxu1 %v23611_v22  ;;  %v23692_v21 = vld [vmem:[%s26369_s19 + $0x34c4] ss:$8 sps:$4 sm:$0xff]   ;;  %v23687_v22 = vld [vmem:[%s26369_s19 + $0xec0] ss:$8 sps:$4 sm:$0xff]  }
 0x41b   : > { %18102 = vmatprep.subr.bf16.mxu0 %v23614_v38  ;;  %v23690_v38 = vld [vmem:[%s26369_s19 + $0x34c0] ss:$8 sps:$4 sm:$0xff]  }
 0x41d   : > { %16545 = vmatpush1.bf16.msra.mxu1 %v23609_v3  ;;  %v23695_v3 = vld [vmem:[%s26369_s19 + $0xed4] ss:$8 sps:$4 sm:$0xff]  }
 0x41e   : > { %18103 = vmatpush1.bf16.msra.mxu0 %v23612_v4  ;;  %16555 = vmatprep.subr.bf16.mxu1 %v23617_v10  ;;  %v23698_v4 = vld [vmem:[%s26369_s19 + $0x34d4] ss:$8 sps:$4 sm:$0xff]   ;;  %v23693_v10 = vld [vmem:[%s26369_s19 + $0xed0] ss:$8 sps:$4 sm:$0xff]  }
 0x41f   : > { %18113 = vmatprep.subr.bf16.mxu0 %v23620_v42  ;;  %v23696_v42 = vld [vmem:[%s26369_s19 + $0x34d0] ss:$8 sps:$4 sm:$0xff]  }
 0x420   : > { %16547 = vmatmul.mubr.bf16.vlgmr.msra.gmra.mrb[0].mxu1 %v3012_v14  ;;  %v23699_v14 = vld [vmem:[%s26369_s19 + $0xee0] ss:$8 sps:$4 sm:$0xff]  }
 0x421   : > { %18105 = vmatmul.mubr.bf16.vlgmr.msra.gmra.mrb[0].mxu0 %v3454_v54  ;;  %16556 = vmatpush1.bf16.msra.mxu1 %v23615_v62  ;;  %v23702_v54 = vld [vmem:[%s26369_s19 + $0x34e0] ss:$8 sps:$4 sm:$0xff]   ;;  %v23707_v62 = vld [vmem:[%s26369_s19 + $0xef4] ss:$8 sps:$4 sm:$0xff]  }
 0x422   : > { %18114 = vmatpush1.bf16.msra.mxu0 %v23618_v27  ;;  %16557 = vmatprep.subr.bf16.mxu1 %v23623_v28  ;;  %v23710_v27 = vld [vmem:[%s26369_s19 + $0x34f4] ss:$8 sps:$4 sm:$0xff]   ;;  %v23705_v28 = vld [vmem:[%s26369_s19 + $0xef0] ss:$8 sps:$4 sm:$0xff]  }
 0x423   : > { %18115 = vmatprep.subr.bf16.mxu0 %v23626_v29  ;;  %16587 = vmatprep.mubr.bf16.mxu1 %v27559_v30  ;;  %v23708_v29 = vld [vmem:[%s26369_s19 + $0x34f0] ss:$8 sps:$4 sm:$0xff]  }
 0x424   : > { %18145 = vmatprep.mubr.bf16.mxu0 %v27562_v12 }
 0x425   : > { %16558 = vmatpush1.bf16.msra.mxu1 %v23621_v13  ;;  %v23714_v13 = vld [vmem:[%s26369_s19 + $0xf04] ss:$8 sps:$4 sm:$0xff]  }
 0x426   : > { %18116 = vmatpush1.bf16.msra.mxu0 %v23624_v31  ;;  %16559 = vmatprep.subr.bf16.mxu1 %v23629_v32  ;;  %v23717_v31 = vld [vmem:[%s26369_s19 + $0x3504] ss:$8 sps:$4 sm:$0xff]   ;;  %v27628_v32 = vrot.slane %v27540_v23, %v26438_v51  ;;  %v3015_v23 = vcombine.high %v27559_v30, %v27559_v30 }
 0x427   : > { %18117 = vmatprep.subr.bf16.mxu0 %v23632_v33  ;;  %v27632_v33 = vrot.slane %v27532_v59, %v26438_v51  ;;  %v23718_v59 = vld [vmem:[%s26369_s19 + $0xf10] ss:$8 sps:$4 sm:$0xff]   ;;  %v23726_v30 = vld [vmem:[%s26369_s19 + $0xf24] ss:$8 sps:$4 sm:$0xff]  }
 0x429   : > { %16560 = vmatpush1.bf16.msra.mxu1 %v23627_v35  ;;  %v23712_v35 = vld [vmem:[%s26369_s19 + $0xf00] ss:$8 sps:$4 sm:$0xff]  }
 0x42a   : > { %18118 = vmatpush1.bf16.msra.mxu0 %v23630_v39  ;;  %16561 = vmatprep.subr.bf16.mxu1 %v23635_v40  ;;  %v23715_v39 = vld [vmem:[%s26369_s19 + $0x3500] ss:$8 sps:$4 sm:$0xff]   ;;  %v23720_v40 = vld [vmem:[%s26369_s19 + $0xf14] ss:$8 sps:$4 sm:$0xff]  }
 0x42b   : > { %18119 = vmatprep.subr.bf16.mxu0 %v23638_v41  ;;  %v23723_v41 = vld [vmem:[%s26369_s19 + $0x3514] ss:$8 sps:$4 sm:$0xff]  }
 0x42d   : > { %16562 = vmatpush1.bf16.msra.mxu1 %v23633_v46  ;;  %v3504_v46 = vcombine.high %v27562_v12, %v27562_v12  ;;  %v23724_v12 = vld [vmem:[%s26369_s19 + $0xf20] ss:$8 sps:$4 sm:$0xff]  }
 0x42e   : > { %18120 = vmatpush1.bf16.msra.mxu0 %v23636_v63  ;;  %16563 = vmatprep.subr.bf16.mxu1 %v23641_v24  ;;  %v23721_v63 = vld [vmem:[%s26369_s19 + $0x3510] ss:$8 sps:$4 sm:$0xff]   ;;  %v23729_v24 = vld [vmem:[%s26369_s19 + $0x3524] ss:$8 sps:$4 sm:$0xff]  }
 0x42f   : > { %18121 = vmatprep.subr.bf16.mxu0 %v23644_v49  ;;  %v23727_v49 = vld [vmem:[%s26369_s19 + $0x3520] ss:$8 sps:$4 sm:$0xff]  }
 0x431   : > { %16564 = vmatpush1.bf16.msra.mxu1 %v23639_v34  ;;  %v23732_v34 = vld [vmem:[%s26369_s19 + $0xf34] ss:$8 sps:$4 sm:$0xff]  }
 0x432   : > { %18122 = vmatpush1.bf16.msra.mxu0 %v23642_v20  ;;  %16565 = vmatprep.subr.bf16.mxu1 %v23647_v16  ;;  %v23735_v20 = vld [vmem:[%s26369_s19 + $0x3534] ss:$8 sps:$4 sm:$0xff]   ;;  %v23730_v16 = vld [vmem:[%s26369_s19 + $0xf30] ss:$8 sps:$4 sm:$0xff]  }
 0x433   : > { %18123 = vmatprep.subr.bf16.mxu0 %v23650_v50  ;;  %v23733_v50 = vld [vmem:[%s26369_s19 + $0x3530] ss:$8 sps:$4 sm:$0xff]  }
 0x435   : > { %16566 = vmatpush1.bf16.msra.mxu1 %v23645_v37  ;;  %v23738_v37 = vld [vmem:[%s26369_s19 + $0xf44] ss:$8 sps:$4 sm:$0xff]  }
 0x436   : > { %18124 = vmatpush1.bf16.msra.mxu0 %v23648_v52  ;;  %16567 = vmatprep.subr.bf16.mxu1 %v23653_v36  ;;  %v23741_v52 = vld [vmem:[%s26369_s19 + $0x3544] ss:$8 sps:$4 sm:$0xff]   ;;  %v23736_v36 = vld [vmem:[%s26369_s19 + $0xf40] ss:$8 sps:$4 sm:$0xff]  }
 0x437   : > { %18125 = vmatprep.subr.bf16.mxu0 %v23656_v43  ;;  %v23739_v43 = vld [vmem:[%s26369_s19 + $0x3540] ss:$8 sps:$4 sm:$0xff]  }
 0x439   : > { %16568 = vmatpush1.bf16.msra.mxu1 %v23651_v53  ;;  %v23744_v53 = vld [vmem:[%s26369_s19 + $0xf54] ss:$8 sps:$4 sm:$0xff]  }
 0x43a   : > { %18126 = vmatpush1.bf16.msra.mxu0 %v23654_v55  ;;  %16569 = vmatprep.subr.bf16.mxu1 %v23659_v57  ;;  %v23747_v55 = vld [vmem:[%s26369_s19 + $0x3554] ss:$8 sps:$4 sm:$0xff]   ;;  %v23742_v57 = vld [vmem:[%s26369_s19 + $0xf50] ss:$8 sps:$4 sm:$0xff]  }
 0x43b   : > { %18127 = vmatprep.subr.bf16.mxu0 %v23662_v44  ;;  %v23745_v44 = vld [vmem:[%s26369_s19 + $0x3550] ss:$8 sps:$4 sm:$0xff]  }
 0x43d   : > { %16570 = vmatpush1.bf16.msra.mxu1 %v23657_v0  ;;  %v23750_v0 = vld [vmem:[%s26369_s19 + $0xf64] ss:$8 sps:$4 sm:$0xff]  }
 0x43e   : > { %18128 = vmatpush1.bf16.msra.mxu0 %v23660_v1  ;;  %16571 = vmatprep.subr.bf16.mxu1 %v23665_v2  ;;  %v23753_v1 = vld [vmem:[%s26369_s19 + $0x3564] ss:$8 sps:$4 sm:$0xff]   ;;  %v23748_v2 = vld [vmem:[%s26369_s19 + $0xf60] ss:$8 sps:$4 sm:$0xff]  }
 0x43f   : > { %18129 = vmatprep.subr.bf16.mxu0 %v23668_v48  ;;  %v23751_v48 = vld [vmem:[%s26369_s19 + $0x3560] ss:$8 sps:$4 sm:$0xff]  }
 0x441   : > { %16572 = vmatpush1.bf16.msra.mxu1 %v23663_v17  ;;  %v23756_v17 = vld [vmem:[%s26369_s19 + $0xf74] ss:$8 sps:$4 sm:$0xff]  }
 0x442   : > { %18130 = vmatpush1.bf16.msra.mxu0 %v23666_v47  ;;  %16573 = vmatprep.subr.bf16.mxu1 %v23671_v56  ;;  %v23759_v47 = vld [vmem:[%s26369_s19 + $0x3574] ss:$8 sps:$4 sm:$0xff]   ;;  %v23754_v56 = vld [vmem:[%s26369_s19 + $0xf70] ss:$8 sps:$4 sm:$0xff]  }
 0x443   : > { %18131 = vmatprep.subr.bf16.mxu0 %v23674_v25  ;;  %v23757_v25 = vld [vmem:[%s26369_s19 + $0x3570] ss:$8 sps:$4 sm:$0xff]  }
 0x445   : > { %16574 = vmatpush1.bf16.msra.mxu1 %v23669_v19  ;;  %v23762_v19 = vld [vmem:[%s26369_s19 + $0xf84] ss:$8 sps:$4 sm:$0xff]  }
 0x446   : > { %18132 = vmatpush1.bf16.msra.mxu0 %v23672_v5  ;;  %16575 = vmatprep.subr.bf16.mxu1 %v23677_v60  ;;  %v23765_v5 = vld [vmem:[%s26369_s19 + $0x3584] ss:$8 sps:$4 sm:$0xff]   ;;  %v23760_v60 = vld [vmem:[%s26369_s19 + $0xf80] ss:$8 sps:$4 sm:$0xff]  }
 0x447   : > { %18133 = vmatprep.subr.bf16.mxu0 %v23680_v6  ;;  %v23763_v6 = vld [vmem:[%s26369_s19 + $0x3580] ss:$8 sps:$4 sm:$0xff]  }
 0x449   : > { %16576 = vmatpush1.bf16.msra.mxu1 %v23675_v61  ;;  %v23768_v61 = vld [vmem:[%s26369_s19 + $0xf94] ss:$8 sps:$4 sm:$0xff]  }
 0x44a   : > { %18134 = vmatpush1.bf16.msra.mxu0 %v23678_v7  ;;  %16577 = vmatprep.subr.bf16.mxu1 %v23683_v8  ;;  %v23771_v7 = vld [vmem:[%s26369_s19 + $0x3594] ss:$8 sps:$4 sm:$0xff]   ;;  %v23766_v8 = vld [vmem:[%s26369_s19 + $0xf90] ss:$8 sps:$4 sm:$0xff]  }
 0x44b   : > { %18135 = vmatprep.subr.bf16.mxu0 %v23686_v9  ;;  %v23769_v9 = vld [vmem:[%s26369_s19 + $0x3590] ss:$8 sps:$4 sm:$0xff]  }
 0x44d   : > { %16578 = vmatpush1.bf16.msra.mxu1 %v23681_v11  ;;  %v23774_v11 = vld [vmem:[%s26369_s19 + $0xfa4] ss:$8 sps:$4 sm:$0xff]  }
 0x44e   : > { %18136 = vmatpush1.bf16.msra.mxu0 %v23684_v15  ;;  %16579 = vmatprep.subr.bf16.mxu1 %v23689_v18  ;;  %v23777_v15 = vld [vmem:[%s26369_s19 + $0x35a4] ss:$8 sps:$4 sm:$0xff]   ;;  %v23772_v18 = vld [vmem:[%s26369_s19 + $0xfa0] ss:$8 sps:$4 sm:$0xff]  }
 0x44f   : > { %18137 = vmatprep.subr.bf16.mxu0 %v23692_v21  ;;  %v23775_v21 = vld [vmem:[%s26369_s19 + $0x35a0] ss:$8 sps:$4 sm:$0xff]  }
 0x451   : > { %16580 = vmatpush1.bf16.msra.mxu1 %v23687_v22  ;;  %v23780_v22 = vld [vmem:[%s26369_s19 + $0xfb4] ss:$8 sps:$4 sm:$0xff]  }
 0x452   : > { %18138 = vmatpush1.bf16.msra.mxu0 %v23690_v38  ;;  %16581 = vmatprep.subr.bf16.mxu1 %v23695_v3  ;;  %v23783_v38 = vld [vmem:[%s26369_s19 + $0x35b4] ss:$8 sps:$4 sm:$0xff]   ;;  %v23778_v3 = vld [vmem:[%s26369_s19 + $0xfb0] ss:$8 sps:$4 sm:$0xff]  }
 0x453   : > { %18139 = vmatprep.subr.bf16.mxu0 %v23698_v4  ;;  %v23781_v4 = vld [vmem:[%s26369_s19 + $0x35b0] ss:$8 sps:$4 sm:$0xff]  }
 0x455   : > { %16582 = vmatpush1.bf16.msra.mxu1 %v23693_v10  ;;  %v23786_v10 = vld [vmem:[%s26369_s19 + $0xfc4] ss:$8 sps:$4 sm:$0xff]  }
 0x456   : > { %18140 = vmatpush1.bf16.msra.mxu0 %v23696_v42  ;;  %16583 = vmatprep.subr.bf16.mxu1 %v23701_v58  ;;  %v23789_v42 = vld [vmem:[%s26369_s19 + $0x35c4] ss:$8 sps:$4 sm:$0xff]   ;;  %v23784_v58 = vld [vmem:[%s26369_s19 + $0xfc0] ss:$8 sps:$4 sm:$0xff]  }
 0x457   : > { %18141 = vmatprep.subr.bf16.mxu0 %v23704_v26  ;;  %v23787_v26 = vld [vmem:[%s26369_s19 + $0x35c0] ss:$8 sps:$4 sm:$0xff]  }
 0x459   : > { %16584 = vmatpush1.bf16.msra.mxu1 %v23699_v14  ;;  %v23792_v14 = vld [vmem:[%s26369_s19 + $0xfd4] ss:$8 sps:$4 sm:$0xff]  }
 0x45a   : > { %18142 = vmatpush1.bf16.msra.mxu0 %v23702_v54  ;;  %16585 = vmatprep.subr.bf16.mxu1 %v23707_v62  ;;  %v23795_v54 = vld [vmem:[%s26369_s19 + $0x35d4] ss:$8 sps:$4 sm:$0xff]   ;;  %v23790_v62 = vld [vmem:[%s26369_s19 + $0xfd0] ss:$8 sps:$4 sm:$0xff]  }
 0x45b   : > { %18143 = vmatprep.subr.bf16.mxu0 %v23710_v27  ;;  %v23793_v27 = vld [vmem:[%s26369_s19 + $0x35d0] ss:$8 sps:$4 sm:$0xff]  }
 0x45d   : > { %16586 = vmatpush1.bf16.msra.mxu1 %v23705_v28  ;;  %v23798_v28 = vld [vmem:[%s26369_s19 + $0xfe4] ss:$8 sps:$4 sm:$0xff]  }
 0x45e   : > { %18144 = vmatpush1.bf16.msra.mxu0 %v23708_v29  ;;  %16596 = vmatprep.subr.bf16.mxu1 %v23714_v13  ;;  %v23801_v29 = vld [vmem:[%s26369_s19 + $0x35e4] ss:$8 sps:$4 sm:$0xff]   ;;  %v27697_v13 = vld.sshfl [vmem:[%s26387_s30 + $0x20] sm:$0xff pattern:$0x75316420] }
 0x45f   : > { %18154 = vmatprep.subr.bf16.mxu0 %v23717_v31  ;;  %v25912_v31 = vld [vmem:[%s26387_s30 + $0x68] sm:$0xff] }
 0x460   : > { %16588 = vmatmul.mubr.bf16.vlgmr.msra.gmra.mrb[0].mxu1 %v27628_v32 }
 0x461   : > { %18146 = vmatmul.mubr.bf16.vlgmr.msra.gmra.mrb[0].mxu0 %v27632_v33  ;;  %16597 = vmatpush1.bf16.msra.mxu1 %v23712_v35  ;;  %v3457_v35 = vcombine.high %v25912_v31, %v25912_v31  ;;  %v23874_v31 = vld [vmem:[%s26369_s19 + $0x10b0] ss:$8 sps:$4 sm:$0xff]  }
 0x462   : > { %18155 = vmatpush1.bf16.msra.mxu0 %v23715_v39  ;;  %16598 = vmatprep.subr.bf16.mxu1 %v23720_v40  ;;  %v23796_v39 = vld [vmem:[%s26369_s19 + $0xfe0] ss:$8 sps:$4 sm:$0xff]  }
 0x463   : > { %18156 = vmatprep.subr.bf16.mxu0 %v23723_v41  ;;  %16628 = vmatprep.mubr.bf16.mxu1 %v3015_v23  ;;  %v23799_v40 = vld [vmem:[%s26369_s19 + $0x35e0] ss:$8 sps:$4 sm:$0xff]   ;;  %v23804_v41 = vld [vmem:[%s26369_s19 + $0xff4] ss:$8 sps:$4 sm:$0xff]  }
 0x464   : > { %18186 = vmatprep.mubr.bf16.mxu0 %v3504_v46  ;;  %v23807_v23 = vld [vmem:[%s26369_s19 + $0x35f4] ss:$8 sps:$4 sm:$0xff]   ;;  %v27705_v46 = vrot.slane %v3457_v35, %v26438_v51  ;;  %v23877_v35 = vld [vmem:[%s26369_s19 + $0x36b0] ss:$8 sps:$4 sm:$0xff]  }
 0x465   : > { %16599 = vmatpush1.bf16.msra.mxu1 %v23718_v59  ;;  %v23802_v59 = vld [vmem:[%s26369_s19 + $0xff0] ss:$8 sps:$4 sm:$0xff]  }
 0x466   : > { %18157 = vmatpush1.bf16.msra.mxu0 %v23721_v63  ;;  %16600 = vmatprep.subr.bf16.mxu1 %v23726_v30  ;;  %v23805_v63 = vld [vmem:[%s26369_s19 + $0x35f0] ss:$8 sps:$4 sm:$0xff]   ;;  %v23810_v30 = vld [vmem:[%s26369_s19 + $0x1004] ss:$8 sps:$4 sm:$0xff]  }
 0x467   : > { %18158 = vmatprep.subr.bf16.mxu0 %v23729_v24  ;;  %v23813_v24 = vld [vmem:[%s26369_s19 + $0x3604] ss:$8 sps:$4 sm:$0xff]  }
 0x469   : > { %16601 = vmatpush1.bf16.msra.mxu1 %v23724_v12  ;;  %v3031_v12 = vcombine.high %v27697_v13, %v27697_v13 }
 0x46a   : > { %18159 = vmatpush1.bf16.msra.mxu0 %v23727_v49  ;;  %16602 = vmatprep.subr.bf16.mxu1 %v23732_v34  ;;  %v3473_v49 = vcombine.high %v27705_v46, %v27705_v46  ;;  %v3013_v34 = vcombine.high %v27628_v32, %v27628_v32 }
 0x46b   : > { %18160 = vmatprep.subr.bf16.mxu0 %v23735_v20  ;;  %v3502_v20 = vcombine.high %v27632_v33, %v27632_v33  ;;  %v23814_v33 = vld [vmem:[%s26369_s19 + $0x1010] ss:$8 sps:$4 sm:$0xff]  }
 0x46c   : > { %v27727_v32 = vrot.slane %v3473_v49, %v26438_v51  ;;  %v23897_v49 = vld [vmem:[%s26369_s19 + $0x36e4] ss:$8 sps:$4 sm:$0xff]  }
 0x46d   : > { %16603 = vmatpush1.bf16.msra.mxu1 %v23730_v16  ;;  %v23808_v16 = vld [vmem:[%s26369_s19 + $0x1000] ss:$8 sps:$4 sm:$0xff]  }
 0x46e   : > { %18161 = vmatpush1.bf16.msra.mxu0 %v23733_v50  ;;  %16604 = vmatprep.subr.bf16.mxu1 %v23738_v37  ;;  %v23811_v50 = vld [vmem:[%s26369_s19 + $0x3600] ss:$8 sps:$4 sm:$0xff]   ;;  %v23816_v37 = vld [vmem:[%s26369_s19 + $0x1014] ss:$8 sps:$4 sm:$0xff]  }
 0x46f   : > { %18162 = vmatprep.subr.bf16.mxu0 %v23741_v52  ;;  %v23819_v52 = vld [vmem:[%s26369_s19 + $0x3614] ss:$8 sps:$4 sm:$0xff]  }
 0x471   : > { %16605 = vmatpush1.bf16.msra.mxu1 %v23736_v36  ;;  %v27724_v36 = vrot.slane %v3031_v12, %v26438_v51  ;;  %v23894_v12 = vld [vmem:[%s26369_s19 + $0x10e4] ss:$8 sps:$4 sm:$0xff]  }
 0x472   : > { %18163 = vmatpush1.bf16.msra.mxu0 %v23739_v43  ;;  %16606 = vmatprep.subr.bf16.mxu1 %v23744_v53  ;;  %v23817_v43 = vld [vmem:[%s26369_s19 + $0x3610] ss:$8 sps:$4 sm:$0xff]   ;;  %v23822_v53 = vld [vmem:[%s26369_s19 + $0x1024] ss:$8 sps:$4 sm:$0xff]  }
 0x473   : > { %18164 = vmatprep.subr.bf16.mxu0 %v23747_v55  ;;  %v23825_v55 = vld [vmem:[%s26369_s19 + $0x3624] ss:$8 sps:$4 sm:$0xff]  }
 0x475   : > { %16607 = vmatpush1.bf16.msra.mxu1 %v23742_v57  ;;  %v23820_v57 = vld [vmem:[%s26369_s19 + $0x1020] ss:$8 sps:$4 sm:$0xff]  }
 0x476   : > { %18165 = vmatpush1.bf16.msra.mxu0 %v23745_v44  ;;  %16608 = vmatprep.subr.bf16.mxu1 %v23750_v0  ;;  %v23823_v44 = vld [vmem:[%s26369_s19 + $0x3620] ss:$8 sps:$4 sm:$0xff]   ;;  %v23828_v0 = vld [vmem:[%s26369_s19 + $0x1034] ss:$8 sps:$4 sm:$0xff]  }
 0x477   : > { %18166 = vmatprep.subr.bf16.mxu0 %v23753_v1  ;;  %v23831_v1 = vld [vmem:[%s26369_s19 + $0x3634] ss:$8 sps:$4 sm:$0xff]  }
 0x479   : > { %16609 = vmatpush1.bf16.msra.mxu1 %v23748_v2  ;;  %v23826_v2 = vld [vmem:[%s26369_s19 + $0x1030] ss:$8 sps:$4 sm:$0xff]  }
 0x47a   : > { %18167 = vmatpush1.bf16.msra.mxu0 %v23751_v48  ;;  %16610 = vmatprep.subr.bf16.mxu1 %v23756_v17  ;;  %v23829_v48 = vld [vmem:[%s26369_s19 + $0x3630] ss:$8 sps:$4 sm:$0xff]   ;;  %v23834_v17 = vld [vmem:[%s26369_s19 + $0x1044] ss:$8 sps:$4 sm:$0xff]  }
 0x47b   : > { %18168 = vmatprep.subr.bf16.mxu0 %v23759_v47  ;;  %v23837_v47 = vld [vmem:[%s26369_s19 + $0x3644] ss:$8 sps:$4 sm:$0xff]  }
 0x47d   : > { %16611 = vmatpush1.bf16.msra.mxu1 %v23754_v56  ;;  %v23832_v56 = vld [vmem:[%s26369_s19 + $0x1040] ss:$8 sps:$4 sm:$0xff]  }
 0x47e   : > { %18169 = vmatpush1.bf16.msra.mxu0 %v23757_v25  ;;  %16612 = vmatprep.subr.bf16.mxu1 %v23762_v19  ;;  %v23835_v25 = vld [vmem:[%s26369_s19 + $0x3640] ss:$8 sps:$4 sm:$0xff]   ;;  %v23840_v19 = vld [vmem:[%s26369_s19 + $0x1054] ss:$8 sps:$4 sm:$0xff]  }
 0x47f   : > { %18170 = vmatprep.subr.bf16.mxu0 %v23765_v5  ;;  %v23843_v5 = vld [vmem:[%s26369_s19 + $0x3654] ss:$8 sps:$4 sm:$0xff]  }
 0x481   : > { %16613 = vmatpush1.bf16.msra.mxu1 %v23760_v60  ;;  %v23838_v60 = vld [vmem:[%s26369_s19 + $0x1050] ss:$8 sps:$4 sm:$0xff]  }
 0x482   : > { %18171 = vmatpush1.bf16.msra.mxu0 %v23763_v6  ;;  %16614 = vmatprep.subr.bf16.mxu1 %v23768_v61  ;;  %v23841_v6 = vld [vmem:[%s26369_s19 + $0x3650] ss:$8 sps:$4 sm:$0xff]   ;;  %v23846_v61 = vld [vmem:[%s26369_s19 + $0x1064] ss:$8 sps:$4 sm:$0xff]  }
 0x483   : > { %18172 = vmatprep.subr.bf16.mxu0 %v23771_v7  ;;  %v23849_v7 = vld [vmem:[%s26369_s19 + $0x3664] ss:$8 sps:$4 sm:$0xff]  }
 0x485   : > { %16615 = vmatpush1.bf16.msra.mxu1 %v23766_v8  ;;  %v23844_v8 = vld [vmem:[%s26369_s19 + $0x1060] ss:$8 sps:$4 sm:$0xff]  }
 0x486   : > { %18173 = vmatpush1.bf16.msra.mxu0 %v23769_v9  ;;  %16616 = vmatprep.subr.bf16.mxu1 %v23774_v11  ;;  %v23847_v9 = vld [vmem:[%s26369_s19 + $0x3660] ss:$8 sps:$4 sm:$0xff]   ;;  %v23852_v11 = vld [vmem:[%s26369_s19 + $0x1074] ss:$8 sps:$4 sm:$0xff]  }
 0x487   : > { %18174 = vmatprep.subr.bf16.mxu0 %v23777_v15  ;;  %v23855_v15 = vld [vmem:[%s26369_s19 + $0x3674] ss:$8 sps:$4 sm:$0xff]  }
 0x489   : > { %16617 = vmatpush1.bf16.msra.mxu1 %v23772_v18  ;;  %v23850_v18 = vld [vmem:[%s26369_s19 + $0x1070] ss:$8 sps:$4 sm:$0xff]  }
 0x48a   : > { %18175 = vmatpush1.bf16.msra.mxu0 %v23775_v21  ;;  %16618 = vmatprep.subr.bf16.mxu1 %v23780_v22  ;;  %v23853_v21 = vld [vmem:[%s26369_s19 + $0x3670] ss:$8 sps:$4 sm:$0xff]   ;;  %v23858_v22 = vld [vmem:[%s26369_s19 + $0x1084] ss:$8 sps:$4 sm:$0xff]  }
 0x48b   : > { %18176 = vmatprep.subr.bf16.mxu0 %v23783_v38  ;;  %v23861_v38 = vld [vmem:[%s26369_s19 + $0x3684] ss:$8 sps:$4 sm:$0xff]  }
 0x48d   : > { %16619 = vmatpush1.bf16.msra.mxu1 %v23778_v3  ;;  %v23856_v3 = vld [vmem:[%s26369_s19 + $0x1080] ss:$8 sps:$4 sm:$0xff]  }
 0x48e   : > { %18177 = vmatpush1.bf16.msra.mxu0 %v23781_v4  ;;  %16620 = vmatprep.subr.bf16.mxu1 %v23786_v10  ;;  %v23859_v4 = vld [vmem:[%s26369_s19 + $0x3680] ss:$8 sps:$4 sm:$0xff]   ;;  %v23864_v10 = vld [vmem:[%s26369_s19 + $0x1094] ss:$8 sps:$4 sm:$0xff]  }
 0x48f   : > { %18178 = vmatprep.subr.bf16.mxu0 %v23789_v42  ;;  %v23867_v42 = vld [vmem:[%s26369_s19 + $0x3694] ss:$8 sps:$4 sm:$0xff]  }
 0x491   : > { %16621 = vmatpush1.bf16.msra.mxu1 %v23784_v58  ;;  %v23862_v58 = vld [vmem:[%s26369_s19 + $0x1090] ss:$8 sps:$4 sm:$0xff]  }
 0x492   : > { %18179 = vmatpush1.bf16.msra.mxu0 %v23787_v26  ;;  %16622 = vmatprep.subr.bf16.mxu1 %v23792_v14  ;;  %v23865_v26 = vld [vmem:[%s26369_s19 + $0x3690] ss:$8 sps:$4 sm:$0xff]   ;;  %v23870_v14 = vld [vmem:[%s26369_s19 + $0x10a4] ss:$8 sps:$4 sm:$0xff]  }
 0x493   : > { %18180 = vmatprep.subr.bf16.mxu0 %v23795_v54  ;;  %v23873_v54 = vld [vmem:[%s26369_s19 + $0x36a4] ss:$8 sps:$4 sm:$0xff]  }
 0x495   : > { %16623 = vmatpush1.bf16.msra.mxu1 %v23790_v62  ;;  %v23868_v62 = vld [vmem:[%s26369_s19 + $0x10a0] ss:$8 sps:$4 sm:$0xff]  }
 0x496   : > { %18181 = vmatpush1.bf16.msra.mxu0 %v23793_v27  ;;  %16624 = vmatprep.subr.bf16.mxu1 %v23798_v28  ;;  %v23871_v27 = vld [vmem:[%s26369_s19 + $0x36a0] ss:$8 sps:$4 sm:$0xff]   ;;  %v23876_v28 = vld [vmem:[%s26369_s19 + $0x10b4] ss:$8 sps:$4 sm:$0xff]  }
 0x497   : > { %18182 = vmatprep.subr.bf16.mxu0 %v23801_v29  ;;  %v23879_v29 = vld [vmem:[%s26369_s19 + $0x36b4] ss:$8 sps:$4 sm:$0xff]  }
 0x499   : > { %16625 = vmatpush1.bf16.msra.mxu1 %v23796_v39  ;;  %v23882_v39 = vld [vmem:[%s26369_s19 + $0x10c4] ss:$8 sps:$4 sm:$0xff]  }
 0x49a   : > { %18183 = vmatpush1.bf16.msra.mxu0 %v23799_v40  ;;  %16626 = vmatprep.subr.bf16.mxu1 %v23804_v41  ;;  %v23885_v40 = vld [vmem:[%s26369_s19 + $0x36c4] ss:$8 sps:$4 sm:$0xff]   ;;  %v23880_v41 = vld [vmem:[%s26369_s19 + $0x10c0] ss:$8 sps:$4 sm:$0xff]  }
 0x49b   : > { %18184 = vmatprep.subr.bf16.mxu0 %v23807_v23  ;;  %v23883_v23 = vld [vmem:[%s26369_s19 + $0x36c0] ss:$8 sps:$4 sm:$0xff]  }
 0x49d   : > { %16627 = vmatpush1.bf16.msra.mxu1 %v23802_v59  ;;  %v23888_v59 = vld [vmem:[%s26369_s19 + $0x10d4] ss:$8 sps:$4 sm:$0xff]  }
 0x49e   : > { %18185 = vmatpush1.bf16.msra.mxu0 %v23805_v63  ;;  %16637 = vmatprep.subr.bf16.mxu1 %v23810_v30  ;;  %v23891_v63 = vld [vmem:[%s26369_s19 + $0x36d4] ss:$8 sps:$4 sm:$0xff]   ;;  %v23886_v30 = vld [vmem:[%s26369_s19 + $0x10d0] ss:$8 sps:$4 sm:$0xff]  }
 0x49f   : > { %18195 = vmatprep.subr.bf16.mxu0 %v23813_v24  ;;  %v23889_v24 = vld [vmem:[%s26369_s19 + $0x36d0] ss:$8 sps:$4 sm:$0xff]  }
 0x4a0   : > { %16629 = vmatmul.mubr.bf16.vlgmr.msra.gmra.mrb[0].mxu1 %v3013_v34  ;;  %v23892_v34 = vld [vmem:[%s26369_s19 + $0x10e0] ss:$8 sps:$4 sm:$0xff]  }
 0x4a1   : > { %18187 = vmatmul.mubr.bf16.vlgmr.msra.gmra.mrb[0].mxu0 %v3502_v20  ;;  %16638 = vmatpush1.bf16.msra.mxu1 %v23808_v16  ;;  %v23895_v20 = vld [vmem:[%s26369_s19 + $0x36e0] ss:$8 sps:$4 sm:$0xff]   ;;  %v23900_v16 = vld [vmem:[%s26369_s19 + $0x10f4] ss:$8 sps:$4 sm:$0xff]  }
 0x4a2   : > { %18196 = vmatpush1.bf16.msra.mxu0 %v23811_v50  ;;  %16639 = vmatprep.subr.bf16.mxu1 %v23816_v37  ;;  %v23903_v50 = vld [vmem:[%s26369_s19 + $0x36f4] ss:$8 sps:$4 sm:$0xff]   ;;  %v23898_v37 = vld [vmem:[%s26369_s19 + $0x10f0] ss:$8 sps:$4 sm:$0xff]  }
 0x4a3   : > { %18197 = vmatprep.subr.bf16.mxu0 %v23819_v52  ;;  %16669 = vmatprep.mubr.bf16.mxu1 %v27724_v36  ;;  %v23901_v52 = vld [vmem:[%s26369_s19 + $0x36f0] ss:$8 sps:$4 sm:$0xff]  }
 0x4a4   : > { %18227 = vmatprep.mubr.bf16.mxu0 %v27727_v32 }
 0x4a5   : > { %16640 = vmatpush1.bf16.msra.mxu1 %v23814_v33  ;;  %v23906_v33 = vld [vmem:[%s26369_s19 + $0x1104] ss:$8 sps:$4 sm:$0xff]  }
 0x4a6   : > { %18198 = vmatpush1.bf16.msra.mxu0 %v23817_v43  ;;  %16641 = vmatprep.subr.bf16.mxu1 %v23822_v53  ;;  %v23910_v43 = vld [vmem:[%s26369_s19 + $0x3704] ss:$8 sps:$4 sm:$0xff]   ;;  %v27793_v53 = vrot.slane %v27697_v13, %v26438_v51  ;;  %v3063_v13 = vcombine.high %v27724_v36, %v27724_v36 }
 0x4a7   : > { %18199 = vmatprep.subr.bf16.mxu0 %v23825_v55  ;;  %v27797_v55 = vrot.slane %v27705_v46, %v26438_v51  ;;  %v23911_v46 = vld [vmem:[%s26369_s19 + $0x1110] ss:$8 sps:$4 sm:$0xff]   ;;  %v23919_v36 = vld [vmem:[%s26369_s19 + $0x1124] ss:$8 sps:$4 sm:$0xff]  }
 0x4a9   : > { %16642 = vmatpush1.bf16.msra.mxu1 %v23820_v57  ;;  %v23904_v57 = vld [vmem:[%s26369_s19 + $0x1100] ss:$8 sps:$4 sm:$0xff]  }
 0x4aa   : > { %18200 = vmatpush1.bf16.msra.mxu0 %v23823_v44  ;;  %16643 = vmatprep.subr.bf16.mxu1 %v23828_v0  ;;  %v23908_v44 = vld [vmem:[%s26369_s19 + $0x3700] ss:$8 sps:$4 sm:$0xff]   ;;  %v23913_v0 = vld [vmem:[%s26369_s19 + $0x1114] ss:$8 sps:$4 sm:$0xff]  }
 0x4ab   : > { %18201 = vmatprep.subr.bf16.mxu0 %v23831_v1  ;;  %v23916_v1 = vld [vmem:[%s26369_s19 + $0x3714] ss:$8 sps:$4 sm:$0xff]  }
 0x4ad   : > { %16644 = vmatpush1.bf16.msra.mxu1 %v23826_v2  ;;  %v3505_v2 = vcombine.high %v27727_v32, %v27727_v32  ;;  %v23917_v32 = vld [vmem:[%s26369_s19 + $0x1120] ss:$8 sps:$4 sm:$0xff]  }
 0x4ae   : > { %18202 = vmatpush1.bf16.msra.mxu0 %v23829_v48  ;;  %16645 = vmatprep.subr.bf16.mxu1 %v23834_v17  ;;  %v23914_v48 = vld [vmem:[%s26369_s19 + $0x3710] ss:$8 sps:$4 sm:$0xff]   ;;  %v23922_v17 = vld [vmem:[%s26369_s19 + $0x3724] ss:$8 sps:$4 sm:$0xff]  }
 0x4af   : > { %18203 = vmatprep.subr.bf16.mxu0 %v23837_v47  ;;  %v23920_v47 = vld [vmem:[%s26369_s19 + $0x3720] ss:$8 sps:$4 sm:$0xff]  }
 0x4b1   : > { %16646 = vmatpush1.bf16.msra.mxu1 %v23832_v56  ;;  %v23925_v56 = vld [vmem:[%s26369_s19 + $0x1134] ss:$8 sps:$4 sm:$0xff]  }
 0x4b2   : > { %18204 = vmatpush1.bf16.msra.mxu0 %v23835_v25  ;;  %16647 = vmatprep.subr.bf16.mxu1 %v23840_v19  ;;  %v23928_v25 = vld [vmem:[%s26369_s19 + $0x3734] ss:$8 sps:$4 sm:$0xff]   ;;  %v23923_v19 = vld [vmem:[%s26369_s19 + $0x1130] ss:$8 sps:$4 sm:$0xff]  }
 0x4b3   : > { %18205 = vmatprep.subr.bf16.mxu0 %v23843_v5  ;;  %v23926_v5 = vld [vmem:[%s26369_s19 + $0x3730] ss:$8 sps:$4 sm:$0xff]  }
 0x4b5   : > { %16648 = vmatpush1.bf16.msra.mxu1 %v23838_v60  ;;  %v23931_v60 = vld [vmem:[%s26369_s19 + $0x1144] ss:$8 sps:$4 sm:$0xff]  }
 0x4b6   : > { %18206 = vmatpush1.bf16.msra.mxu0 %v23841_v6  ;;  %16649 = vmatprep.subr.bf16.mxu1 %v23846_v61  ;;  %v23934_v6 = vld [vmem:[%s26369_s19 + $0x3744] ss:$8 sps:$4 sm:$0xff]   ;;  %v23929_v61 = vld [vmem:[%s26369_s19 + $0x1140] ss:$8 sps:$4 sm:$0xff]  }
 0x4b7   : > { %18207 = vmatprep.subr.bf16.mxu0 %v23849_v7  ;;  %v23932_v7 = vld [vmem:[%s26369_s19 + $0x3740] ss:$8 sps:$4 sm:$0xff]  }
 0x4b9   : > { %16650 = vmatpush1.bf16.msra.mxu1 %v23844_v8  ;;  %v23937_v8 = vld [vmem:[%s26369_s19 + $0x1154] ss:$8 sps:$4 sm:$0xff]  }
 0x4ba   : > { %18208 = vmatpush1.bf16.msra.mxu0 %v23847_v9  ;;  %16651 = vmatprep.subr.bf16.mxu1 %v23852_v11  ;;  %v23940_v9 = vld [vmem:[%s26369_s19 + $0x3754] ss:$8 sps:$4 sm:$0xff]   ;;  %v23935_v11 = vld [vmem:[%s26369_s19 + $0x1150] ss:$8 sps:$4 sm:$0xff]  }
 0x4bb   : > { %18209 = vmatprep.subr.bf16.mxu0 %v23855_v15  ;;  %v23938_v15 = vld [vmem:[%s26369_s19 + $0x3750] ss:$8 sps:$4 sm:$0xff]  }
 0x4bd   : > { %16652 = vmatpush1.bf16.msra.mxu1 %v23850_v18  ;;  %v23943_v18 = vld [vmem:[%s26369_s19 + $0x1164] ss:$8 sps:$4 sm:$0xff]  }
 0x4be   : > { %18210 = vmatpush1.bf16.msra.mxu0 %v23853_v21  ;;  %16653 = vmatprep.subr.bf16.mxu1 %v23858_v22  ;;  %v23946_v21 = vld [vmem:[%s26369_s19 + $0x3764] ss:$8 sps:$4 sm:$0xff]   ;;  %v23941_v22 = vld [vmem:[%s26369_s19 + $0x1160] ss:$8 sps:$4 sm:$0xff]  }
 0x4bf   : > { %18211 = vmatprep.subr.bf16.mxu0 %v23861_v38  ;;  %v23944_v38 = vld [vmem:[%s26369_s19 + $0x3760] ss:$8 sps:$4 sm:$0xff]  }
 0x4c1   : > { %16654 = vmatpush1.bf16.msra.mxu1 %v23856_v3  ;;  %v23949_v3 = vld [vmem:[%s26369_s19 + $0x1174] ss:$8 sps:$4 sm:$0xff]  }
 0x4c2   : > { %18212 = vmatpush1.bf16.msra.mxu0 %v23859_v4  ;;  %16655 = vmatprep.subr.bf16.mxu1 %v23864_v10  ;;  %v23952_v4 = vld [vmem:[%s26369_s19 + $0x3774] ss:$8 sps:$4 sm:$0xff]   ;;  %v23947_v10 = vld [vmem:[%s26369_s19 + $0x1170] ss:$8 sps:$4 sm:$0xff]  }
 0x4c3   : > { %18213 = vmatprep.subr.bf16.mxu0 %v23867_v42  ;;  %v23950_v42 = vld [vmem:[%s26369_s19 + $0x3770] ss:$8 sps:$4 sm:$0xff]  }
 0x4c5   : > { %16656 = vmatpush1.bf16.msra.mxu1 %v23862_v58  ;;  %v23955_v58 = vld [vmem:[%s26369_s19 + $0x1184] ss:$8 sps:$4 sm:$0xff]  }
 0x4c6   : > { %18214 = vmatpush1.bf16.msra.mxu0 %v23865_v26  ;;  %16657 = vmatprep.subr.bf16.mxu1 %v23870_v14  ;;  %v23958_v26 = vld [vmem:[%s26369_s19 + $0x3784] ss:$8 sps:$4 sm:$0xff]   ;;  %v23953_v14 = vld [vmem:[%s26369_s19 + $0x1180] ss:$8 sps:$4 sm:$0xff]  }
 0x4c7   : > { %18215 = vmatprep.subr.bf16.mxu0 %v23873_v54  ;;  %v23956_v54 = vld [vmem:[%s26369_s19 + $0x3780] ss:$8 sps:$4 sm:$0xff]  }
 0x4c9   : > { %16658 = vmatpush1.bf16.msra.mxu1 %v23868_v62  ;;  %v23961_v62 = vld [vmem:[%s26369_s19 + $0x1194] ss:$8 sps:$4 sm:$0xff]  }
 0x4ca   : > { %18216 = vmatpush1.bf16.msra.mxu0 %v23871_v27  ;;  %16659 = vmatprep.subr.bf16.mxu1 %v23876_v28  ;;  %v23964_v27 = vld [vmem:[%s26369_s19 + $0x3794] ss:$8 sps:$4 sm:$0xff]   ;;  %v23959_v28 = vld [vmem:[%s26369_s19 + $0x1190] ss:$8 sps:$4 sm:$0xff]  }
 0x4cb   : > { %18217 = vmatprep.subr.bf16.mxu0 %v23879_v29  ;;  %v23962_v29 = vld [vmem:[%s26369_s19 + $0x3790] ss:$8 sps:$4 sm:$0xff]  }
 0x4cd   : > { %16660 = vmatpush1.bf16.msra.mxu1 %v23874_v31  ;;  %v23967_v31 = vld [vmem:[%s26369_s19 + $0x11a4] ss:$8 sps:$4 sm:$0xff]  }
 0x4ce   : > { %18218 = vmatpush1.bf16.msra.mxu0 %v23877_v35  ;;  %16661 = vmatprep.subr.bf16.mxu1 %v23882_v39  ;;  %v23970_v35 = vld [vmem:[%s26369_s19 + $0x37a4] ss:$8 sps:$4 sm:$0xff]   ;;  %v23965_v39 = vld [vmem:[%s26369_s19 + $0x11a0] ss:$8 sps:$4 sm:$0xff]  }
 0x4cf   : > { %18219 = vmatprep.subr.bf16.mxu0 %v23885_v40  ;;  %v23968_v40 = vld [vmem:[%s26369_s19 + $0x37a0] ss:$8 sps:$4 sm:$0xff]  }
 0x4d1   : > { %16662 = vmatpush1.bf16.msra.mxu1 %v23880_v41  ;;  %v23973_v41 = vld [vmem:[%s26369_s19 + $0x11b4] ss:$8 sps:$4 sm:$0xff]  }
 0x4d2   : > { %18220 = vmatpush1.bf16.msra.mxu0 %v23883_v23  ;;  %16663 = vmatprep.subr.bf16.mxu1 %v23888_v59  ;;  %v23976_v23 = vld [vmem:[%s26369_s19 + $0x37b4] ss:$8 sps:$4 sm:$0xff]   ;;  %v23971_v59 = vld [vmem:[%s26369_s19 + $0x11b0] ss:$8 sps:$4 sm:$0xff]  }
 0x4d3   : > { %18221 = vmatprep.subr.bf16.mxu0 %v23891_v63  ;;  %v23974_v63 = vld [vmem:[%s26369_s19 + $0x37b0] ss:$8 sps:$4 sm:$0xff]  }
 0x4d5   : > { %16664 = vmatpush1.bf16.msra.mxu1 %v23886_v30  ;;  %v23979_v30 = vld [vmem:[%s26369_s19 + $0x11c4] ss:$8 sps:$4 sm:$0xff]  }
 0x4d6   : > { %18222 = vmatpush1.bf16.msra.mxu0 %v23889_v24  ;;  %16665 = vmatprep.subr.bf16.mxu1 %v23894_v12  ;;  %v23982_v24 = vld [vmem:[%s26369_s19 + $0x37c4] ss:$8 sps:$4 sm:$0xff]   ;;  %v23977_v12 = vld [vmem:[%s26369_s19 + $0x11c0] ss:$8 sps:$4 sm:$0xff]  }
 0x4d7   : > { %18223 = vmatprep.subr.bf16.mxu0 %v23897_v49  ;;  %v23980_v49 = vld [vmem:[%s26369_s19 + $0x37c0] ss:$8 sps:$4 sm:$0xff]  }
 0x4d9   : > { %16666 = vmatpush1.bf16.msra.mxu1 %v23892_v34  ;;  %v23985_v34 = vld [vmem:[%s26369_s19 + $0x11d4] ss:$8 sps:$4 sm:$0xff]  }
 0x4da   : > { %18224 = vmatpush1.bf16.msra.mxu0 %v23895_v20  ;;  %16667 = vmatprep.subr.bf16.mxu1 %v23900_v16  ;;  %v23988_v20 = vld [vmem:[%s26369_s19 + $0x37d4] ss:$8 sps:$4 sm:$0xff]   ;;  %v23983_v16 = vld [vmem:[%s26369_s19 + $0x11d0] ss:$8 sps:$4 sm:$0xff]  }
 0x4db   : > { %18225 = vmatprep.subr.bf16.mxu0 %v23903_v50  ;;  %v23986_v50 = vld [vmem:[%s26369_s19 + $0x37d0] ss:$8 sps:$4 sm:$0xff]  }
 0x4dd   : > { %16668 = vmatpush1.bf16.msra.mxu1 %v23898_v37  ;;  %v23991_v37 = vld [vmem:[%s26369_s19 + $0x11e4] ss:$8 sps:$4 sm:$0xff]  }
 0x4de   : > { %18226 = vmatpush1.bf16.msra.mxu0 %v23901_v52  ;;  %16678 = vmatprep.subr.bf16.mxu1 %v23906_v33  ;;  %v23994_v52 = vld [vmem:[%s26369_s19 + $0x37e4] ss:$8 sps:$4 sm:$0xff]  }
 0x4df   : > { %18236 = vmatprep.subr.bf16.mxu0 %v23910_v43  ;;  %v27862_v33 = vld.sshfl [vmem:[%s26387_s30 + $0x70] sm:$0xff pattern:$0x75316420]  ;;  %v25913_v43 = vld [vmem:[%s26387_s30 + $0x20] sm:$0xff] }
 0x4e0   : > { %16670 = vmatmul.mubr.bf16.vlgmr.msra.gmra.mrb[0].mxu1 %v27793_v53 }
 0x4e1   : > { %18228 = vmatmul.mubr.bf16.vlgmr.msra.gmra.mrb[0].mxu0 %v27797_v55  ;;  %16679 = vmatpush1.bf16.msra.mxu1 %v23904_v57  ;;  %v3016_v57 = vcombine.high %v25913_v43, %v25913_v43  ;;  %v24067_v43 = vld [vmem:[%s26369_s19 + $0x12b0] ss:$8 sps:$4 sm:$0xff]  }
 0x4e2   : > { %18237 = vmatpush1.bf16.msra.mxu0 %v23908_v44  ;;  %16680 = vmatprep.subr.bf16.mxu1 %v23913_v0  ;;  %v23989_v44 = vld [vmem:[%s26369_s19 + $0x11e0] ss:$8 sps:$4 sm:$0xff]  }
 0x4e3   : > { %18238 = vmatprep.subr.bf16.mxu0 %v23916_v1  ;;  %16710 = vmatprep.mubr.bf16.mxu1 %v3063_v13  ;;  %v23992_v0 = vld [vmem:[%s26369_s19 + $0x37e0] ss:$8 sps:$4 sm:$0xff]   ;;  %v23997_v1 = vld [vmem:[%s26369_s19 + $0x11f4] ss:$8 sps:$4 sm:$0xff]  }
 0x4e4   : > { %18268 = vmatprep.mubr.bf16.mxu0 %v3505_v2  ;;  %v24000_v13 = vld [vmem:[%s26369_s19 + $0x37f4] ss:$8 sps:$4 sm:$0xff]   ;;  %v27870_v2 = vrot.slane %v3016_v57, %v26438_v51  ;;  %v24070_v57 = vld [vmem:[%s26369_s19 + $0x38b0] ss:$8 sps:$4 sm:$0xff]  }
 0x4e5   : > { %16681 = vmatpush1.bf16.msra.mxu1 %v23911_v46  ;;  %v23995_v46 = vld [vmem:[%s26369_s19 + $0x11f0] ss:$8 sps:$4 sm:$0xff]  }
 0x4e6   : > { %18239 = vmatpush1.bf16.msra.mxu0 %v23914_v48  ;;  %16682 = vmatprep.subr.bf16.mxu1 %v23919_v36  ;;  %v23998_v48 = vld [vmem:[%s26369_s19 + $0x37f0] ss:$8 sps:$4 sm:$0xff]   ;;  %v24003_v36 = vld [vmem:[%s26369_s19 + $0x1204] ss:$8 sps:$4 sm:$0xff]  }
 0x4e7   : > { %18240 = vmatprep.subr.bf16.mxu0 %v23922_v17  ;;  %v24006_v17 = vld [vmem:[%s26369_s19 + $0x3804] ss:$8 sps:$4 sm:$0xff]  }
 0x4e9   : > { %16683 = vmatpush1.bf16.msra.mxu1 %v23917_v32  ;;  %v3032_v32 = vcombine.high %v27870_v2, %v27870_v2 }
 0x4ea   : > { %18241 = vmatpush1.bf16.msra.mxu0 %v23920_v47  ;;  %16684 = vmatprep.subr.bf16.mxu1 %v23925_v56  ;;  %v3521_v47 = vcombine.high %v27862_v33, %v27862_v33  ;;  %v3061_v56 = vcombine.high %v27793_v53, %v27793_v53 }
 0x4eb   : > { %18242 = vmatprep.subr.bf16.mxu0 %v23928_v25  ;;  %v3503_v25 = vcombine.high %v27797_v55, %v27797_v55  ;;  %v24007_v55 = vld [vmem:[%s26369_s19 + $0x1210] ss:$8 sps:$4 sm:$0xff]  }
 0x4ec   : > { %v27892_v53 = vrot.slane %v3521_v47, %v26438_v51  ;;  %v24090_v47 = vld [vmem:[%s26369_s19 + $0x38e4] ss:$8 sps:$4 sm:$0xff]  }
 0x4ed   : > { %16685 = vmatpush1.bf16.msra.mxu1 %v23923_v19  ;;  %v24001_v19 = vld [vmem:[%s26369_s19 + $0x1200] ss:$8 sps:$4 sm:$0xff]  }
 0x4ee   : > { %18243 = vmatpush1.bf16.msra.mxu0 %v23926_v5  ;;  %16686 = vmatprep.subr.bf16.mxu1 %v23931_v60  ;;  %v24004_v5 = vld [vmem:[%s26369_s19 + $0x3800] ss:$8 sps:$4 sm:$0xff]   ;;  %v24009_v60 = vld [vmem:[%s26369_s19 + $0x1214] ss:$8 sps:$4 sm:$0xff]  }
 0x4ef   : > { %18244 = vmatprep.subr.bf16.mxu0 %v23934_v6  ;;  %v24012_v6 = vld [vmem:[%s26369_s19 + $0x3814] ss:$8 sps:$4 sm:$0xff]  }
 0x4f1   : > { %16687 = vmatpush1.bf16.msra.mxu1 %v23929_v61  ;;  %v27889_v61 = vrot.slane %v3032_v32, %v26438_v51  ;;  %v24087_v32 = vld [vmem:[%s26369_s19 + $0x12e4] ss:$8 sps:$4 sm:$0xff]  }
 0x4f2   : > { %18245 = vmatpush1.bf16.msra.mxu0 %v23932_v7  ;;  %16688 = vmatprep.subr.bf16.mxu1 %v23937_v8  ;;  %v24010_v7 = vld [vmem:[%s26369_s19 + $0x3810] ss:$8 sps:$4 sm:$0xff]   ;;  %v24015_v8 = vld [vmem:[%s26369_s19 + $0x1224] ss:$8 sps:$4 sm:$0xff]  }
 0x4f3   : > { %18246 = vmatprep.subr.bf16.mxu0 %v23940_v9  ;;  %v24018_v9 = vld [vmem:[%s26369_s19 + $0x3824] ss:$8 sps:$4 sm:$0xff]  }
 0x4f5   : > { %16689 = vmatpush1.bf16.msra.mxu1 %v23935_v11  ;;  %v24013_v11 = vld [vmem:[%s26369_s19 + $0x1220] ss:$8 sps:$4 sm:$0xff]  }
 0x4f6   : > { %18247 = vmatpush1.bf16.msra.mxu0 %v23938_v15  ;;  %16690 = vmatprep.subr.bf16.mxu1 %v23943_v18  ;;  %v24016_v15 = vld [vmem:[%s26369_s19 + $0x3820] ss:$8 sps:$4 sm:$0xff]   ;;  %v24021_v18 = vld [vmem:[%s26369_s19 + $0x1234] ss:$8 sps:$4 sm:$0xff]  }
 0x4f7   : > { %18248 = vmatprep.subr.bf16.mxu0 %v23946_v21  ;;  %v24024_v21 = vld [vmem:[%s26369_s19 + $0x3834] ss:$8 sps:$4 sm:$0xff]  }
 0x4f9   : > { %16691 = vmatpush1.bf16.msra.mxu1 %v23941_v22  ;;  %v24019_v22 = vld [vmem:[%s26369_s19 + $0x1230] ss:$8 sps:$4 sm:$0xff]  }
 0x4fa   : > { %18249 = vmatpush1.bf16.msra.mxu0 %v23944_v38  ;;  %16692 = vmatprep.subr.bf16.mxu1 %v23949_v3  ;;  %v24022_v38 = vld [vmem:[%s26369_s19 + $0x3830] ss:$8 sps:$4 sm:$0xff]   ;;  %v24027_v3 = vld [vmem:[%s26369_s19 + $0x1244] ss:$8 sps:$4 sm:$0xff]  }
 0x4fb   : > { %18250 = vmatprep.subr.bf16.mxu0 %v23952_v4  ;;  %v24030_v4 = vld [vmem:[%s26369_s19 + $0x3844] ss:$8 sps:$4 sm:$0xff]  }
 0x4fd   : > { %16693 = vmatpush1.bf16.msra.mxu1 %v23947_v10  ;;  %v24025_v10 = vld [vmem:[%s26369_s19 + $0x1240] ss:$8 sps:$4 sm:$0xff]  }
 0x4fe   : > { %18251 = vmatpush1.bf16.msra.mxu0 %v23950_v42  ;;  %16694 = vmatprep.subr.bf16.mxu1 %v23955_v58  ;;  %v24028_v42 = vld [vmem:[%s26369_s19 + $0x3840] ss:$8 sps:$4 sm:$0xff]   ;;  %v24033_v58 = vld [vmem:[%s26369_s19 + $0x1254] ss:$8 sps:$4 sm:$0xff]  }
 0x4ff   : > { %18252 = vmatprep.subr.bf16.mxu0 %v23958_v26  ;;  %v24036_v26 = vld [vmem:[%s26369_s19 + $0x3854] ss:$8 sps:$4 sm:$0xff]  }
 0x501   : > { %16695 = vmatpush1.bf16.msra.mxu1 %v23953_v14  ;;  %v24031_v14 = vld [vmem:[%s26369_s19 + $0x1250] ss:$8 sps:$4 sm:$0xff]  }
 0x502   : > { %18253 = vmatpush1.bf16.msra.mxu0 %v23956_v54  ;;  %16696 = vmatprep.subr.bf16.mxu1 %v23961_v62  ;;  %v24034_v54 = vld [vmem:[%s26369_s19 + $0x3850] ss:$8 sps:$4 sm:$0xff]   ;;  %v24039_v62 = vld [vmem:[%s26369_s19 + $0x1264] ss:$8 sps:$4 sm:$0xff]  }
 0x503   : > { %18254 = vmatprep.subr.bf16.mxu0 %v23964_v27  ;;  %v24042_v27 = vld [vmem:[%s26369_s19 + $0x3864] ss:$8 sps:$4 sm:$0xff]  }
 0x505   : > { %16697 = vmatpush1.bf16.msra.mxu1 %v23959_v28  ;;  %v24037_v28 = vld [vmem:[%s26369_s19 + $0x1260] ss:$8 sps:$4 sm:$0xff]  }
 0x506   : > { %18255 = vmatpush1.bf16.msra.mxu0 %v23962_v29  ;;  %16698 = vmatprep.subr.bf16.mxu1 %v23967_v31  ;;  %v24040_v29 = vld [vmem:[%s26369_s19 + $0x3860] ss:$8 sps:$4 sm:$0xff]   ;;  %v24045_v31 = vld [vmem:[%s26369_s19 + $0x1274] ss:$8 sps:$4 sm:$0xff]  }
 0x507   : > { %18256 = vmatprep.subr.bf16.mxu0 %v23970_v35  ;;  %v24048_v35 = vld [vmem:[%s26369_s19 + $0x3874] ss:$8 sps:$4 sm:$0xff]  }
 0x509   : > { %16699 = vmatpush1.bf16.msra.mxu1 %v23965_v39  ;;  %v24043_v39 = vld [vmem:[%s26369_s19 + $0x1270] ss:$8 sps:$4 sm:$0xff]  }
 0x50a   : > { %18257 = vmatpush1.bf16.msra.mxu0 %v23968_v40  ;;  %16700 = vmatprep.subr.bf16.mxu1 %v23973_v41  ;;  %v24046_v40 = vld [vmem:[%s26369_s19 + $0x3870] ss:$8 sps:$4 sm:$0xff]   ;;  %v24051_v41 = vld [vmem:[%s26369_s19 + $0x1284] ss:$8 sps:$4 sm:$0xff]  }
 0x50b   : > { %18258 = vmatprep.subr.bf16.mxu0 %v23976_v23  ;;  %v24054_v23 = vld [vmem:[%s26369_s19 + $0x3884] ss:$8 sps:$4 sm:$0xff]  }
 0x50d   : > { %16701 = vmatpush1.bf16.msra.mxu1 %v23971_v59  ;;  %v24049_v59 = vld [vmem:[%s26369_s19 + $0x1280] ss:$8 sps:$4 sm:$0xff]  }
 0x50e   : > { %18259 = vmatpush1.bf16.msra.mxu0 %v23974_v63  ;;  %16702 = vmatprep.subr.bf16.mxu1 %v23979_v30  ;;  %v24052_v63 = vld [vmem:[%s26369_s19 + $0x3880] ss:$8 sps:$4 sm:$0xff]   ;;  %v24057_v30 = vld [vmem:[%s26369_s19 + $0x1294] ss:$8 sps:$4 sm:$0xff]  }
 0x50f   : > { %18260 = vmatprep.subr.bf16.mxu0 %v23982_v24  ;;  %v24060_v24 = vld [vmem:[%s26369_s19 + $0x3894] ss:$8 sps:$4 sm:$0xff]  }
 0x511   : > { %16703 = vmatpush1.bf16.msra.mxu1 %v23977_v12  ;;  %v24055_v12 = vld [vmem:[%s26369_s19 + $0x1290] ss:$8 sps:$4 sm:$0xff]  }
 0x512   : > { %18261 = vmatpush1.bf16.msra.mxu0 %v23980_v49  ;;  %16704 = vmatprep.subr.bf16.mxu1 %v23985_v34  ;;  %v24058_v49 = vld [vmem:[%s26369_s19 + $0x3890] ss:$8 sps:$4 sm:$0xff]   ;;  %v24063_v34 = vld [vmem:[%s26369_s19 + $0x12a4] ss:$8 sps:$4 sm:$0xff]  }
 0x513   : > { %18262 = vmatprep.subr.bf16.mxu0 %v23988_v20  ;;  %v24066_v20 = vld [vmem:[%s26369_s19 + $0x38a4] ss:$8 sps:$4 sm:$0xff]  }
 0x515   : > { %16705 = vmatpush1.bf16.msra.mxu1 %v23983_v16  ;;  %v24061_v16 = vld [vmem:[%s26369_s19 + $0x12a0] ss:$8 sps:$4 sm:$0xff]  }
 0x516   : > { %18263 = vmatpush1.bf16.msra.mxu0 %v23986_v50  ;;  %16706 = vmatprep.subr.bf16.mxu1 %v23991_v37  ;;  %v24064_v50 = vld [vmem:[%s26369_s19 + $0x38a0] ss:$8 sps:$4 sm:$0xff]   ;;  %v24069_v37 = vld [vmem:[%s26369_s19 + $0x12b4] ss:$8 sps:$4 sm:$0xff]  }
 0x517   : > { %18264 = vmatprep.subr.bf16.mxu0 %v23994_v52  ;;  %v24072_v52 = vld [vmem:[%s26369_s19 + $0x38b4] ss:$8 sps:$4 sm:$0xff]  }
 0x519   : > { %16707 = vmatpush1.bf16.msra.mxu1 %v23989_v44  ;;  %v24075_v44 = vld [vmem:[%s26369_s19 + $0x12c4] ss:$8 sps:$4 sm:$0xff]  }
 0x51a   : > { %18265 = vmatpush1.bf16.msra.mxu0 %v23992_v0  ;;  %16708 = vmatprep.subr.bf16.mxu1 %v23997_v1  ;;  %v24078_v0 = vld [vmem:[%s26369_s19 + $0x38c4] ss:$8 sps:$4 sm:$0xff]   ;;  %v24073_v1 = vld [vmem:[%s26369_s19 + $0x12c0] ss:$8 sps:$4 sm:$0xff]  }
 0x51b   : > { %18266 = vmatprep.subr.bf16.mxu0 %v24000_v13  ;;  %v24076_v13 = vld [vmem:[%s26369_s19 + $0x38c0] ss:$8 sps:$4 sm:$0xff]  }
 0x51d   : > { %16709 = vmatpush1.bf16.msra.mxu1 %v23995_v46  ;;  %v24081_v46 = vld [vmem:[%s26369_s19 + $0x12d4] ss:$8 sps:$4 sm:$0xff]  }
 0x51e   : > { %18267 = vmatpush1.bf16.msra.mxu0 %v23998_v48  ;;  %16719 = vmatprep.subr.bf16.mxu1 %v24003_v36  ;;  %v24084_v48 = vld [vmem:[%s26369_s19 + $0x38d4] ss:$8 sps:$4 sm:$0xff]   ;;  %v24079_v36 = vld [vmem:[%s26369_s19 + $0x12d0] ss:$8 sps:$4 sm:$0xff]  }
 0x51f   : > { %18277 = vmatprep.subr.bf16.mxu0 %v24006_v17  ;;  %v24082_v17 = vld [vmem:[%s26369_s19 + $0x38d0] ss:$8 sps:$4 sm:$0xff]  }
 0x520   : > { %16711 = vmatmul.mubr.bf16.vlgmr.msra.gmra.mrb[0].mxu1 %v3061_v56  ;;  %v24085_v56 = vld [vmem:[%s26369_s19 + $0x12e0] ss:$8 sps:$4 sm:$0xff]  }
 0x521   : > { %18269 = vmatmul.mubr.bf16.vlgmr.msra.gmra.mrb[0].mxu0 %v3503_v25  ;;  %16720 = vmatpush1.bf16.msra.mxu1 %v24001_v19  ;;  %v24088_v25 = vld [vmem:[%s26369_s19 + $0x38e0] ss:$8 sps:$4 sm:$0xff]   ;;  %v24093_v19 = vld [vmem:[%s26369_s19 + $0x12f4] ss:$8 sps:$4 sm:$0xff]  }
 0x522   : > { %18278 = vmatpush1.bf16.msra.mxu0 %v24004_v5  ;;  %16721 = vmatprep.subr.bf16.mxu1 %v24009_v60  ;;  %v24096_v5 = vld [vmem:[%s26369_s19 + $0x38f4] ss:$8 sps:$4 sm:$0xff]   ;;  %v24091_v60 = vld [vmem:[%s26369_s19 + $0x12f0] ss:$8 sps:$4 sm:$0xff]  }
 0x523   : > { %18279 = vmatprep.subr.bf16.mxu0 %v24012_v6  ;;  %16751 = vmatprep.mubr.bf16.mxu1 %v27889_v61  ;;  %v24094_v6 = vld [vmem:[%s26369_s19 + $0x38f0] ss:$8 sps:$4 sm:$0xff]  }
 0x524   : > { %18309 = vmatprep.mubr.bf16.mxu0 %v27892_v53 }
 0x525   : > { %16722 = vmatpush1.bf16.msra.mxu1 %v24007_v55  ;;  %v24100_v55 = vld [vmem:[%s26369_s19 + $0x1304] ss:$8 sps:$4 sm:$0xff]  }
 0x526   : > { %18280 = vmatpush1.bf16.msra.mxu0 %v24010_v7  ;;  %16723 = vmatprep.subr.bf16.mxu1 %v24015_v8  ;;  %v24103_v7 = vld [vmem:[%s26369_s19 + $0x3904] ss:$8 sps:$4 sm:$0xff]   ;;  %v27958_v8 = vrot.slane %v27870_v2, %v26438_v51  ;;  %v3064_v2 = vcombine.high %v27889_v61, %v27889_v61 }
 0x527   : > { %18281 = vmatprep.subr.bf16.mxu0 %v24018_v9  ;;  %v27962_v9 = vrot.slane %v27862_v33, %v26438_v51  ;;  %v24104_v33 = vld [vmem:[%s26369_s19 + $0x1310] ss:$8 sps:$4 sm:$0xff]   ;;  %v24112_v61 = vld [vmem:[%s26369_s19 + $0x1324] ss:$8 sps:$4 sm:$0xff]  }
 0x529   : > { %16724 = vmatpush1.bf16.msra.mxu1 %v24013_v11  ;;  %v24098_v11 = vld [vmem:[%s26369_s19 + $0x1300] ss:$8 sps:$4 sm:$0xff]  }
 0x52a   : > { %18282 = vmatpush1.bf16.msra.mxu0 %v24016_v15  ;;  %16725 = vmatprep.subr.bf16.mxu1 %v24021_v18  ;;  %v24101_v15 = vld [vmem:[%s26369_s19 + $0x3900] ss:$8 sps:$4 sm:$0xff]   ;;  %v24106_v18 = vld [vmem:[%s26369_s19 + $0x1314] ss:$8 sps:$4 sm:$0xff]  }
 0x52b   : > { %18283 = vmatprep.subr.bf16.mxu0 %v24024_v21  ;;  %v24109_v21 = vld [vmem:[%s26369_s19 + $0x3914] ss:$8 sps:$4 sm:$0xff]  }
 0x52d   : > { %16726 = vmatpush1.bf16.msra.mxu1 %v24019_v22  ;;  %v3553_v22 = vcombine.high %v27892_v53, %v27892_v53  ;;  %v24110_v53 = vld [vmem:[%s26369_s19 + $0x1320] ss:$8 sps:$4 sm:$0xff]  }
 0x52e   : > { %18284 = vmatpush1.bf16.msra.mxu0 %v24022_v38  ;;  %16727 = vmatprep.subr.bf16.mxu1 %v24027_v3  ;;  %v24107_v38 = vld [vmem:[%s26369_s19 + $0x3910] ss:$8 sps:$4 sm:$0xff]   ;;  %v24115_v3 = vld [vmem:[%s26369_s19 + $0x3924] ss:$8 sps:$4 sm:$0xff]  }
 0x52f   : > { %18285 = vmatprep.subr.bf16.mxu0 %v24030_v4  ;;  %v24113_v4 = vld [vmem:[%s26369_s19 + $0x3920] ss:$8 sps:$4 sm:$0xff]  }
 0x531   : > { %16728 = vmatpush1.bf16.msra.mxu1 %v24025_v10  ;;  %v24118_v10 = vld [vmem:[%s26369_s19 + $0x1334] ss:$8 sps:$4 sm:$0xff]  }
 0x532   : > { %18286 = vmatpush1.bf16.msra.mxu0 %v24028_v42  ;;  %16729 = vmatprep.subr.bf16.mxu1 %v24033_v58  ;;  %v24121_v42 = vld [vmem:[%s26369_s19 + $0x3934] ss:$8 sps:$4 sm:$0xff]   ;;  %v24116_v58 = vld [vmem:[%s26369_s19 + $0x1330] ss:$8 sps:$4 sm:$0xff]  }
 0x533   : > { %18287 = vmatprep.subr.bf16.mxu0 %v24036_v26  ;;  %v24119_v26 = vld [vmem:[%s26369_s19 + $0x3930] ss:$8 sps:$4 sm:$0xff]  }
 0x535   : > { %16730 = vmatpush1.bf16.msra.mxu1 %v24031_v14  ;;  %v24124_v14 = vld [vmem:[%s26369_s19 + $0x1344] ss:$8 sps:$4 sm:$0xff]  }
 0x536   : > { %18288 = vmatpush1.bf16.msra.mxu0 %v24034_v54  ;;  %16731 = vmatprep.subr.bf16.mxu1 %v24039_v62  ;;  %v24127_v54 = vld [vmem:[%s26369_s19 + $0x3944] ss:$8 sps:$4 sm:$0xff]   ;;  %v24122_v62 = vld [vmem:[%s26369_s19 + $0x1340] ss:$8 sps:$4 sm:$0xff]  }
 0x537   : > { %18289 = vmatprep.subr.bf16.mxu0 %v24042_v27  ;;  %v24125_v27 = vld [vmem:[%s26369_s19 + $0x3940] ss:$8 sps:$4 sm:$0xff]  }
 0x539   : > { %16732 = vmatpush1.bf16.msra.mxu1 %v24037_v28  ;;  %v24130_v28 = vld [vmem:[%s26369_s19 + $0x1354] ss:$8 sps:$4 sm:$0xff]  }
 0x53a   : > { %18290 = vmatpush1.bf16.msra.mxu0 %v24040_v29  ;;  %16733 = vmatprep.subr.bf16.mxu1 %v24045_v31  ;;  %v24133_v29 = vld [vmem:[%s26369_s19 + $0x3954] ss:$8 sps:$4 sm:$0xff]   ;;  %v24128_v31 = vld [vmem:[%s26369_s19 + $0x1350] ss:$8 sps:$4 sm:$0xff]  }
 0x53b   : > { %18291 = vmatprep.subr.bf16.mxu0 %v24048_v35  ;;  %v24131_v35 = vld [vmem:[%s26369_s19 + $0x3950] ss:$8 sps:$4 sm:$0xff]  }
 0x53d   : > { %16734 = vmatpush1.bf16.msra.mxu1 %v24043_v39  ;;  %v24136_v39 = vld [vmem:[%s26369_s19 + $0x1364] ss:$8 sps:$4 sm:$0xff]  }
 0x53e   : > { %18292 = vmatpush1.bf16.msra.mxu0 %v24046_v40  ;;  %16735 = vmatprep.subr.bf16.mxu1 %v24051_v41  ;;  %v24139_v40 = vld [vmem:[%s26369_s19 + $0x3964] ss:$8 sps:$4 sm:$0xff]   ;;  %v24134_v41 = vld [vmem:[%s26369_s19 + $0x1360] ss:$8 sps:$4 sm:$0xff]  }
 0x53f   : > { %18293 = vmatprep.subr.bf16.mxu0 %v24054_v23  ;;  %v24137_v23 = vld [vmem:[%s26369_s19 + $0x3960] ss:$8 sps:$4 sm:$0xff]  }
 0x541   : > { %16736 = vmatpush1.bf16.msra.mxu1 %v24049_v59  ;;  %v24142_v59 = vld [vmem:[%s26369_s19 + $0x1374] ss:$8 sps:$4 sm:$0xff]  }
 0x542   : > { %18294 = vmatpush1.bf16.msra.mxu0 %v24052_v63  ;;  %16737 = vmatprep.subr.bf16.mxu1 %v24057_v30  ;;  %v24145_v63 = vld [vmem:[%s26369_s19 + $0x3974] ss:$8 sps:$4 sm:$0xff]   ;;  %v24140_v30 = vld [vmem:[%s26369_s19 + $0x1370] ss:$8 sps:$4 sm:$0xff]  }
 0x543   : > { %18295 = vmatprep.subr.bf16.mxu0 %v24060_v24  ;;  %v24143_v24 = vld [vmem:[%s26369_s19 + $0x3970] ss:$8 sps:$4 sm:$0xff]  }
 0x545   : > { %16738 = vmatpush1.bf16.msra.mxu1 %v24055_v12  ;;  %v24148_v12 = vld [vmem:[%s26369_s19 + $0x1384] ss:$8 sps:$4 sm:$0xff]  }
 0x546   : > { %18296 = vmatpush1.bf16.msra.mxu0 %v24058_v49  ;;  %16739 = vmatprep.subr.bf16.mxu1 %v24063_v34  ;;  %v24151_v49 = vld [vmem:[%s26369_s19 + $0x3984] ss:$8 sps:$4 sm:$0xff]   ;;  %v24146_v34 = vld [vmem:[%s26369_s19 + $0x1380] ss:$8 sps:$4 sm:$0xff]  }
 0x547   : > { %18297 = vmatprep.subr.bf16.mxu0 %v24066_v20  ;;  %v24149_v20 = vld [vmem:[%s26369_s19 + $0x3980] ss:$8 sps:$4 sm:$0xff]  }
 0x549   : > { %16740 = vmatpush1.bf16.msra.mxu1 %v24061_v16  ;;  %v24154_v16 = vld [vmem:[%s26369_s19 + $0x1394] ss:$8 sps:$4 sm:$0xff]  }
 0x54a   : > { %18298 = vmatpush1.bf16.msra.mxu0 %v24064_v50  ;;  %16741 = vmatprep.subr.bf16.mxu1 %v24069_v37  ;;  %v24157_v50 = vld [vmem:[%s26369_s19 + $0x3994] ss:$8 sps:$4 sm:$0xff]   ;;  %v24152_v37 = vld [vmem:[%s26369_s19 + $0x1390] ss:$8 sps:$4 sm:$0xff]  }
 0x54b   : > { %18299 = vmatprep.subr.bf16.mxu0 %v24072_v52  ;;  %v24155_v52 = vld [vmem:[%s26369_s19 + $0x3990] ss:$8 sps:$4 sm:$0xff]  }
 0x54d   : > { %16742 = vmatpush1.bf16.msra.mxu1 %v24067_v43  ;;  %v24160_v43 = vld [vmem:[%s26369_s19 + $0x13a4] ss:$8 sps:$4 sm:$0xff]  }
 0x54e   : > { %18300 = vmatpush1.bf16.msra.mxu0 %v24070_v57  ;;  %16743 = vmatprep.subr.bf16.mxu1 %v24075_v44  ;;  %v24163_v57 = vld [vmem:[%s26369_s19 + $0x39a4] ss:$8 sps:$4 sm:$0xff]   ;;  %v24158_v44 = vld [vmem:[%s26369_s19 + $0x13a0] ss:$8 sps:$4 sm:$0xff]  }
 0x54f   : > { %18301 = vmatprep.subr.bf16.mxu0 %v24078_v0  ;;  %v24161_v0 = vld [vmem:[%s26369_s19 + $0x39a0] ss:$8 sps:$4 sm:$0xff]  }
 0x551   : > { %16744 = vmatpush1.bf16.msra.mxu1 %v24073_v1  ;;  %v24166_v1 = vld [vmem:[%s26369_s19 + $0x13b4] ss:$8 sps:$4 sm:$0xff]  }
 0x552   : > { %18302 = vmatpush1.bf16.msra.mxu0 %v24076_v13  ;;  %16745 = vmatprep.subr.bf16.mxu1 %v24081_v46  ;;  %v24169_v13 = vld [vmem:[%s26369_s19 + $0x39b4] ss:$8 sps:$4 sm:$0xff]   ;;  %v24164_v46 = vld [vmem:[%s26369_s19 + $0x13b0] ss:$8 sps:$4 sm:$0xff]  }
 0x553   : > { %18303 = vmatprep.subr.bf16.mxu0 %v24084_v48  ;;  %v24167_v48 = vld [vmem:[%s26369_s19 + $0x39b0] ss:$8 sps:$4 sm:$0xff]  }
 0x555   : > { %16746 = vmatpush1.bf16.msra.mxu1 %v24079_v36  ;;  %v24172_v36 = vld [vmem:[%s26369_s19 + $0x13c4] ss:$8 sps:$4 sm:$0xff]  }
 0x556   : > { %18304 = vmatpush1.bf16.msra.mxu0 %v24082_v17  ;;  %16747 = vmatprep.subr.bf16.mxu1 %v24087_v32  ;;  %v24175_v17 = vld [vmem:[%s26369_s19 + $0x39c4] ss:$8 sps:$4 sm:$0xff]   ;;  %v24170_v32 = vld [vmem:[%s26369_s19 + $0x13c0] ss:$8 sps:$4 sm:$0xff]  }
 0x557   : > { %18305 = vmatprep.subr.bf16.mxu0 %v24090_v47  ;;  %v24173_v47 = vld [vmem:[%s26369_s19 + $0x39c0] ss:$8 sps:$4 sm:$0xff]  }
 0x559   : > { %16748 = vmatpush1.bf16.msra.mxu1 %v24085_v56  ;;  %v24178_v56 = vld [vmem:[%s26369_s19 + $0x13d4] ss:$8 sps:$4 sm:$0xff]  }
 0x55a   : > { %18306 = vmatpush1.bf16.msra.mxu0 %v24088_v25  ;;  %16749 = vmatprep.subr.bf16.mxu1 %v24093_v19  ;;  %v24181_v25 = vld [vmem:[%s26369_s19 + $0x39d4] ss:$8 sps:$4 sm:$0xff]   ;;  %v24176_v19 = vld [vmem:[%s26369_s19 + $0x13d0] ss:$8 sps:$4 sm:$0xff]  }
 0x55b   : > { %18307 = vmatprep.subr.bf16.mxu0 %v24096_v5  ;;  %v24179_v5 = vld [vmem:[%s26369_s19 + $0x39d0] ss:$8 sps:$4 sm:$0xff]  }
 0x55d   : > { %16750 = vmatpush1.bf16.msra.mxu1 %v24091_v60  ;;  %v24184_v60 = vld [vmem:[%s26369_s19 + $0x13e4] ss:$8 sps:$4 sm:$0xff]  }
 0x55e   : > { %18308 = vmatpush1.bf16.msra.mxu0 %v24094_v6  ;;  %16760 = vmatprep.subr.bf16.mxu1 %v24100_v55  ;;  %v24187_v6 = vld [vmem:[%s26369_s19 + $0x39e4] ss:$8 sps:$4 sm:$0xff]  }
 0x55f   : > { %18318 = vmatprep.subr.bf16.mxu0 %v24103_v7  ;;  %v28027_v55 = vld [vmem:[%s26387_s30 + $0x28] sm:$0xff]  ;;  %v25914_v7 = vld [vmem:[%s26387_s30 + $0x70] sm:$0xff] }
 0x560   : > { %16752 = vmatmul.mubr.bf16.vlgmr.msra.gmra.mrb[0].mxu1 %v27958_v8 }
 0x561   : > { %18310 = vmatmul.mubr.bf16.vlgmr.msra.gmra.mrb[0].mxu0 %v27962_v9  ;;  %16761 = vmatpush1.bf16.msra.mxu1 %v24098_v11  ;;  %v3506_v11 = vcombine.high %v25914_v7, %v25914_v7  ;;  %v24265_v7 = vld [vmem:[%s26369_s19 + $0x3ab4] ss:$8 sps:$4 sm:$0xff]  }
 0x562   : > { %18319 = vmatpush1.bf16.msra.mxu0 %v24101_v15  ;;  %16762 = vmatprep.subr.bf16.mxu1 %v24106_v18  ;;  %v24182_v15 = vld [vmem:[%s26369_s19 + $0x13e0] ss:$8 sps:$4 sm:$0xff]  }
 0x563   : > { %18320 = vmatprep.subr.bf16.mxu0 %v24109_v21  ;;  %16792 = vmatprep.mubr.bf16.mxu1 %v3064_v2  ;;  %v24185_v18 = vld [vmem:[%s26369_s19 + $0x39e0] ss:$8 sps:$4 sm:$0xff]   ;;  %v24190_v21 = vld [vmem:[%s26369_s19 + $0x13f4] ss:$8 sps:$4 sm:$0xff]  }
 0x564   : > { %18350 = vmatprep.mubr.bf16.mxu0 %v3553_v22  ;;  %v24193_v2 = vld [vmem:[%s26369_s19 + $0x39f4] ss:$8 sps:$4 sm:$0xff]   ;;  %v28036_v22 = vrot.slane %v28027_v55, %v26438_v51 }
 0x565   : > { %16763 = vmatpush1.bf16.msra.mxu1 %v24104_v33  ;;  %v28039_v33 = vrot.slane %v3506_v11, %v26438_v51  ;;  %v24260_v11 = vld [vmem:[%s26369_s19 + $0x14b0] ss:$8 sps:$4 sm:$0xff]  }
 0x566   : > { %18321 = vmatpush1.bf16.msra.mxu0 %v24107_v38  ;;  %16764 = vmatprep.subr.bf16.mxu1 %v24112_v61  ;;  %v24188_v38 = vld [vmem:[%s26369_s19 + $0x13f0] ss:$8 sps:$4 sm:$0xff]  }
 0x567   : > { %18322 = vmatprep.subr.bf16.mxu0 %v24115_v3  ;;  %v24191_v61 = vld [vmem:[%s26369_s19 + $0x39f0] ss:$8 sps:$4 sm:$0xff]   ;;  %v24196_v3 = vld [vmem:[%s26369_s19 + $0x1404] ss:$8 sps:$4 sm:$0xff]  }
 0x569   : > { %16765 = vmatpush1.bf16.msra.mxu1 %v24110_v53  ;;  %v24199_v53 = vld [vmem:[%s26369_s19 + $0x3a04] ss:$8 sps:$4 sm:$0xff]  }
 0x56a   : > { %18323 = vmatpush1.bf16.msra.mxu0 %v24113_v4  ;;  %16766 = vmatprep.subr.bf16.mxu1 %v24118_v10  ;;  %v3080_v4 = vcombine.high %v28036_v22, %v28036_v22  ;;  %v3522_v10 = vcombine.high %v28039_v33, %v28039_v33 }
 0x56b   : > { %18324 = vmatprep.subr.bf16.mxu0 %v24121_v42  ;;  %v3062_v42 = vcombine.high %v27958_v8, %v27958_v8 }
 0x56c   : > { %v28061_v8 = vrot.slane %v3522_v10, %v26438_v51  ;;  %v24280_v10 = vld [vmem:[%s26369_s19 + $0x14e4] ss:$8 sps:$4 sm:$0xff]  }
 0x56d   : > { %16767 = vmatpush1.bf16.msra.mxu1 %v24116_v58  ;;  %v3551_v58 = vcombine.high %v27962_v9, %v27962_v9  ;;  %v24200_v9 = vld [vmem:[%s26369_s19 + $0x1410] ss:$8 sps:$4 sm:$0xff]  }
 0x56e   : > { %18325 = vmatpush1.bf16.msra.mxu0 %v24119_v26  ;;  %16768 = vmatprep.subr.bf16.mxu1 %v24124_v14  ;;  %v24194_v26 = vld [vmem:[%s26369_s19 + $0x1400] ss:$8 sps:$4 sm:$0xff]  }
 0x56f   : > { %18326 = vmatprep.subr.bf16.mxu0 %v24127_v54  ;;  %v24197_v14 = vld [vmem:[%s26369_s19 + $0x3a00] ss:$8 sps:$4 sm:$0xff]   ;;  %v24202_v54 = vld [vmem:[%s26369_s19 + $0x1414] ss:$8 sps:$4 sm:$0xff]  }
 0x571   : > { %16769 = vmatpush1.bf16.msra.mxu1 %v24122_v62  ;;  %v24205_v62 = vld [vmem:[%s26369_s19 + $0x3a14] ss:$8 sps:$4 sm:$0xff]  }
 0x572   : > { %18327 = vmatpush1.bf16.msra.mxu0 %v24125_v27  ;;  %16770 = vmatprep.subr.bf16.mxu1 %v24130_v28  ;;  %v28058_v27 = vrot.slane %v3080_v4, %v26438_v51  ;;  %v24203_v28 = vld [vmem:[%s26369_s19 + $0x3a10] ss:$8 sps:$4 sm:$0xff]  }
 0x573   : > { %18328 = vmatprep.subr.bf16.mxu0 %v24133_v29  ;;  %v24208_v29 = vld [vmem:[%s26369_s19 + $0x1424] ss:$8 sps:$4 sm:$0xff]   ;;  %v24275_v4 = vld [vmem:[%s26369_s19 + $0x3ad0] ss:$8 sps:$4 sm:$0xff]  }
 0x575   : > { %16771 = vmatpush1.bf16.msra.mxu1 %v24128_v31  ;;  %v24211_v31 = vld [vmem:[%s26369_s19 + $0x3a24] ss:$8 sps:$4 sm:$0xff]  }
 0x576   : > { %18329 = vmatpush1.bf16.msra.mxu0 %v24131_v35  ;;  %16772 = vmatprep.subr.bf16.mxu1 %v24136_v39  ;;  %v24206_v35 = vld [vmem:[%s26369_s19 + $0x1420] ss:$8 sps:$4 sm:$0xff]  }
 0x577   : > { %18330 = vmatprep.subr.bf16.mxu0 %v24139_v40  ;;  %v24209_v39 = vld [vmem:[%s26369_s19 + $0x3a20] ss:$8 sps:$4 sm:$0xff]   ;;  %v24214_v40 = vld [vmem:[%s26369_s19 + $0x1434] ss:$8 sps:$4 sm:$0xff]  }
 0x579   : > { %16773 = vmatpush1.bf16.msra.mxu1 %v24134_v41  ;;  %v24217_v41 = vld [vmem:[%s26369_s19 + $0x3a34] ss:$8 sps:$4 sm:$0xff]  }
 0x57a   : > { %18331 = vmatpush1.bf16.msra.mxu0 %v24137_v23  ;;  %16774 = vmatprep.subr.bf16.mxu1 %v24142_v59  ;;  %v24212_v23 = vld [vmem:[%s26369_s19 + $0x1430] ss:$8 sps:$4 sm:$0xff]  }
 0x57b   : > { %18332 = vmatprep.subr.bf16.mxu0 %v24145_v63  ;;  %v24215_v59 = vld [vmem:[%s26369_s19 + $0x3a30] ss:$8 sps:$4 sm:$0xff]   ;;  %v24220_v63 = vld [vmem:[%s26369_s19 + $0x1444] ss:$8 sps:$4 sm:$0xff]  }
 0x57d   : > { %16775 = vmatpush1.bf16.msra.mxu1 %v24140_v30  ;;  %v24223_v30 = vld [vmem:[%s26369_s19 + $0x3a44] ss:$8 sps:$4 sm:$0xff]  }
 0x57e   : > { %18333 = vmatpush1.bf16.msra.mxu0 %v24143_v24  ;;  %16776 = vmatprep.subr.bf16.mxu1 %v24148_v12  ;;  %v24218_v24 = vld [vmem:[%s26369_s19 + $0x1440] ss:$8 sps:$4 sm:$0xff]  }
 0x57f   : > { %18334 = vmatprep.subr.bf16.mxu0 %v24151_v49  ;;  %v24221_v12 = vld [vmem:[%s26369_s19 + $0x3a40] ss:$8 sps:$4 sm:$0xff]   ;;  %v24226_v49 = vld [vmem:[%s26369_s19 + $0x1454] ss:$8 sps:$4 sm:$0xff]  }
 0x581   : > { %16777 = vmatpush1.bf16.msra.mxu1 %v24146_v34  ;;  %v24229_v34 = vld [vmem:[%s26369_s19 + $0x3a54] ss:$8 sps:$4 sm:$0xff]  }
 0x582   : > { %18335 = vmatpush1.bf16.msra.mxu0 %v24149_v20  ;;  %16778 = vmatprep.subr.bf16.mxu1 %v24154_v16  ;;  %v24224_v20 = vld [vmem:[%s26369_s19 + $0x1450] ss:$8 sps:$4 sm:$0xff]  }
 0x583   : > { %18336 = vmatprep.subr.bf16.mxu0 %v24157_v50  ;;  %v24227_v16 = vld [vmem:[%s26369_s19 + $0x3a50] ss:$8 sps:$4 sm:$0xff]   ;;  %v24232_v50 = vld [vmem:[%s26369_s19 + $0x1464] ss:$8 sps:$4 sm:$0xff]  }
 0x585   : > { %16779 = vmatpush1.bf16.msra.mxu1 %v24152_v37  ;;  %v24235_v37 = vld [vmem:[%s26369_s19 + $0x3a64] ss:$8 sps:$4 sm:$0xff]  }
 0x586   : > { %18337 = vmatpush1.bf16.msra.mxu0 %v24155_v52  ;;  %16780 = vmatprep.subr.bf16.mxu1 %v24160_v43  ;;  %v24230_v52 = vld [vmem:[%s26369_s19 + $0x1460] ss:$8 sps:$4 sm:$0xff]  }
 0x587   : > { %18338 = vmatprep.subr.bf16.mxu0 %v24163_v57  ;;  %v24233_v43 = vld [vmem:[%s26369_s19 + $0x3a60] ss:$8 sps:$4 sm:$0xff]   ;;  %v24238_v57 = vld [vmem:[%s26369_s19 + $0x1474] ss:$8 sps:$4 sm:$0xff]  }
 0x589   : > { %16781 = vmatpush1.bf16.msra.mxu1 %v24158_v44  ;;  %v24241_v44 = vld [vmem:[%s26369_s19 + $0x3a74] ss:$8 sps:$4 sm:$0xff]  }
 0x58a   : > { %18339 = vmatpush1.bf16.msra.mxu0 %v24161_v0  ;;  %16782 = vmatprep.subr.bf16.mxu1 %v24166_v1  ;;  %v24236_v0 = vld [vmem:[%s26369_s19 + $0x1470] ss:$8 sps:$4 sm:$0xff]  }
 0x58b   : > { %18340 = vmatprep.subr.bf16.mxu0 %v24169_v13  ;;  %v24239_v1 = vld [vmem:[%s26369_s19 + $0x3a70] ss:$8 sps:$4 sm:$0xff]   ;;  %v24244_v13 = vld [vmem:[%s26369_s19 + $0x1484] ss:$8 sps:$4 sm:$0xff]  }
 0x58d   : > { %16783 = vmatpush1.bf16.msra.mxu1 %v24164_v46  ;;  %v24247_v46 = vld [vmem:[%s26369_s19 + $0x3a84] ss:$8 sps:$4 sm:$0xff]  }
 0x58e   : > { %18341 = vmatpush1.bf16.msra.mxu0 %v24167_v48  ;;  %16784 = vmatprep.subr.bf16.mxu1 %v24172_v36  ;;  %v24242_v48 = vld [vmem:[%s26369_s19 + $0x1480] ss:$8 sps:$4 sm:$0xff]  }
 0x58f   : > { %18342 = vmatprep.subr.bf16.mxu0 %v24175_v17  ;;  %v24245_v36 = vld [vmem:[%s26369_s19 + $0x3a80] ss:$8 sps:$4 sm:$0xff]   ;;  %v24250_v17 = vld [vmem:[%s26369_s19 + $0x1494] ss:$8 sps:$4 sm:$0xff]  }
 0x591   : > { %16785 = vmatpush1.bf16.msra.mxu1 %v24170_v32  ;;  %v24253_v32 = vld [vmem:[%s26369_s19 + $0x3a94] ss:$8 sps:$4 sm:$0xff]  }
 0x592   : > { %18343 = vmatpush1.bf16.msra.mxu0 %v24173_v47  ;;  %16786 = vmatprep.subr.bf16.mxu1 %v24178_v56  ;;  %v24248_v47 = vld [vmem:[%s26369_s19 + $0x1490] ss:$8 sps:$4 sm:$0xff]  }
 0x593   : > { %18344 = vmatprep.subr.bf16.mxu0 %v24181_v25  ;;  %v24251_v56 = vld [vmem:[%s26369_s19 + $0x3a90] ss:$8 sps:$4 sm:$0xff]   ;;  %v24256_v25 = vld [vmem:[%s26369_s19 + $0x14a4] ss:$8 sps:$4 sm:$0xff]  }
 0x595   : > { %16787 = vmatpush1.bf16.msra.mxu1 %v24176_v19  ;;  %v24259_v19 = vld [vmem:[%s26369_s19 + $0x3aa4] ss:$8 sps:$4 sm:$0xff]  }
 0x596   : > { %18345 = vmatpush1.bf16.msra.mxu0 %v24179_v5  ;;  %16788 = vmatprep.subr.bf16.mxu1 %v24184_v60  ;;  %v24254_v5 = vld [vmem:[%s26369_s19 + $0x14a0] ss:$8 sps:$4 sm:$0xff]  }
 0x597   : > { %18346 = vmatprep.subr.bf16.mxu0 %v24187_v6  ;;  %v24257_v60 = vld [vmem:[%s26369_s19 + $0x3aa0] ss:$8 sps:$4 sm:$0xff]   ;;  %v24262_v6 = vld [vmem:[%s26369_s19 + $0x14b4] ss:$8 sps:$4 sm:$0xff]  }
 0x599   : > { %16789 = vmatpush1.bf16.msra.mxu1 %v24182_v15  ;;  %v24263_v15 = vld [vmem:[%s26369_s19 + $0x3ab0] ss:$8 sps:$4 sm:$0xff]  }
 0x59a   : > { %18347 = vmatpush1.bf16.msra.mxu0 %v24185_v18  ;;  %16790 = vmatprep.subr.bf16.mxu1 %v24190_v21  ;;  %v24268_v18 = vld [vmem:[%s26369_s19 + $0x14c4] ss:$8 sps:$4 sm:$0xff]  }
 0x59b   : > { %18348 = vmatprep.subr.bf16.mxu0 %v24193_v2  ;;  %v24271_v21 = vld [vmem:[%s26369_s19 + $0x3ac4] ss:$8 sps:$4 sm:$0xff]   ;;  %v24266_v2 = vld [vmem:[%s26369_s19 + $0x14c0] ss:$8 sps:$4 sm:$0xff]  }
 0x59d   : > { %16791 = vmatpush1.bf16.msra.mxu1 %v24188_v38  ;;  %v24269_v38 = vld [vmem:[%s26369_s19 + $0x3ac0] ss:$8 sps:$4 sm:$0xff]  }
 0x59e   : > { %18349 = vmatpush1.bf16.msra.mxu0 %v24191_v61  ;;  %16801 = vmatprep.subr.bf16.mxu1 %v24196_v3  ;;  %v24274_v61 = vld [vmem:[%s26369_s19 + $0x14d4] ss:$8 sps:$4 sm:$0xff]  }
 0x59f   : > { %18359 = vmatprep.subr.bf16.mxu0 %v24199_v53  ;;  %v24277_v3 = vld [vmem:[%s26369_s19 + $0x3ad4] ss:$8 sps:$4 sm:$0xff]   ;;  %v24272_v53 = vld [vmem:[%s26369_s19 + $0x14d0] ss:$8 sps:$4 sm:$0xff]  }
 0x5a0   : > { %16793 = vmatmul.mubr.bf16.vlgmr.msra.gmra.mrb[0].mxu1 %v3062_v42  ;;  %v24283_v42 = vld [vmem:[%s26369_s19 + $0x3ae4] ss:$8 sps:$4 sm:$0xff]  }
 0x5a1   : > { %18351 = vmatmul.mubr.bf16.vlgmr.msra.gmra.mrb[0].mxu0 %v3551_v58  ;;  %16802 = vmatpush1.bf16.msra.mxu1 %v24194_v26  ;;  %v24278_v58 = vld [vmem:[%s26369_s19 + $0x14e0] ss:$8 sps:$4 sm:$0xff]  }
 0x5a2   : > { %18360 = vmatpush1.bf16.msra.mxu0 %v24197_v14  ;;  %16803 = vmatprep.subr.bf16.mxu1 %v24202_v54  ;;  %v24281_v26 = vld [vmem:[%s26369_s19 + $0x3ae0] ss:$8 sps:$4 sm:$0xff]   ;;  %v24286_v14 = vld [vmem:[%s26369_s19 + $0x14f4] ss:$8 sps:$4 sm:$0xff]  }
 0x5a3   : > { %18361 = vmatprep.subr.bf16.mxu0 %v24205_v62  ;;  %16833 = vmatprep.mubr.bf16.mxu1 %v28058_v27  ;;  %v24289_v54 = vld [vmem:[%s26369_s19 + $0x3af4] ss:$8 sps:$4 sm:$0xff]   ;;  %v24284_v62 = vld [vmem:[%s26369_s19 + $0x14f0] ss:$8 sps:$4 sm:$0xff]  }
 0x5a4   : > { %18391 = vmatprep.mubr.bf16.mxu0 %v28061_v8 }
 0x5a5   : > { %16804 = vmatpush1.bf16.msra.mxu1 %v24200_v9  ;;  %v24287_v9 = vld [vmem:[%s26369_s19 + $0x3af0] ss:$8 sps:$4 sm:$0xff]  }
 0x5a6   : > { %18362 = vmatpush1.bf16.msra.mxu0 %v24203_v28  ;;  %16805 = vmatprep.subr.bf16.mxu1 %v24208_v29  ;;  %v24292_v28 = vld [vmem:[%s26369_s19 + $0x1504] ss:$8 sps:$4 sm:$0xff]  }
 0x5a7   : > { %18363 = vmatprep.subr.bf16.mxu0 %v24211_v31  ;;  %v24296_v29 = vld [vmem:[%s26369_s19 + $0x3b04] ss:$8 sps:$4 sm:$0xff]   ;;  %v28127_v31 = vrot.slane %v28036_v22, %v26438_v51  ;;  %v3112_v22 = vcombine.high %v28058_v27, %v28058_v27 }
 0x5a8   : > { %v24305_v27 = vld [vmem:[%s26369_s19 + $0x1524] ss:$8 sps:$4 sm:$0xff]  }
 0x5a9   : > { %16806 = vmatpush1.bf16.msra.mxu1 %v24206_v35  ;;  %v28131_v35 = vrot.slane %v28039_v33, %v26438_v51  ;;  %v24297_v33 = vld [vmem:[%s26369_s19 + $0x1510] ss:$8 sps:$4 sm:$0xff]  }
 0x5aa   : > { %18364 = vmatpush1.bf16.msra.mxu0 %v24209_v39  ;;  %16807 = vmatprep.subr.bf16.mxu1 %v24214_v40  ;;  %v24290_v39 = vld [vmem:[%s26369_s19 + $0x1500] ss:$8 sps:$4 sm:$0xff]  }
 0x5ab   : > { %18365 = vmatprep.subr.bf16.mxu0 %v24217_v41  ;;  %v24294_v40 = vld [vmem:[%s26369_s19 + $0x3b00] ss:$8 sps:$4 sm:$0xff]   ;;  %v24299_v41 = vld [vmem:[%s26369_s19 + $0x1514] ss:$8 sps:$4 sm:$0xff]  }
 0x5ad   : > { %16808 = vmatpush1.bf16.msra.mxu1 %v24212_v23  ;;  %v24302_v23 = vld [vmem:[%s26369_s19 + $0x3b14] ss:$8 sps:$4 sm:$0xff]  }
 0x5ae   : > { %18366 = vmatpush1.bf16.msra.mxu0 %v24215_v59  ;;  %16809 = vmatprep.subr.bf16.mxu1 %v24220_v63  ;;  %v3554_v59 = vcombine.high %v28061_v8, %v28061_v8  ;;  %v24300_v63 = vld [vmem:[%s26369_s19 + $0x3b10] ss:$8 sps:$4 sm:$0xff]   ;;  %v24303_v8 = vld [vmem:[%s26369_s19 + $0x1520] ss:$8 sps:$4 sm:$0xff]  }
 0x5af   : > { %18367 = vmatprep.subr.bf16.mxu0 %v24223_v30  ;;  %v24308_v30 = vld [vmem:[%s26369_s19 + $0x3b24] ss:$8 sps:$4 sm:$0xff]  }
 0x5b1   : > { %16810 = vmatpush1.bf16.msra.mxu1 %v24218_v24  ;;  %v24306_v24 = vld [vmem:[%s26369_s19 + $0x3b20] ss:$8 sps:$4 sm:$0xff]  }
 0x5b2   : > { %18368 = vmatpush1.bf16.msra.mxu0 %v24221_v12  ;;  %16811 = vmatprep.subr.bf16.mxu1 %v24226_v49  ;;  %v24311_v12 = vld [vmem:[%s26369_s19 + $0x1534] ss:$8 sps:$4 sm:$0xff]  }
 0x5b3   : > { %18369 = vmatprep.subr.bf16.mxu0 %v24229_v34  ;;  %v24314_v49 = vld [vmem:[%s26369_s19 + $0x3b34] ss:$8 sps:$4 sm:$0xff]   ;;  %v24309_v34 = vld [vmem:[%s26369_s19 + $0x1530] ss:$8 sps:$4 sm:$0xff]  }
 0x5b5   : > { %16812 = vmatpush1.bf16.msra.mxu1 %v24224_v20  ;;  %v24312_v20 = vld [vmem:[%s26369_s19 + $0x3b30] ss:$8 sps:$4 sm:$0xff]  }
 0x5b6   : > { %18370 = vmatpush1.bf16.msra.mxu0 %v24227_v16  ;;  %16813 = vmatprep.subr.bf16.mxu1 %v24232_v50  ;;  %v24317_v16 = vld [vmem:[%s26369_s19 + $0x1544] ss:$8 sps:$4 sm:$0xff]  }
 0x5b7   : > { %18371 = vmatprep.subr.bf16.mxu0 %v24235_v37  ;;  %v24320_v50 = vld [vmem:[%s26369_s19 + $0x3b44] ss:$8 sps:$4 sm:$0xff]   ;;  %v24315_v37 = vld [vmem:[%s26369_s19 + $0x1540] ss:$8 sps:$4 sm:$0xff]  }
 0x5b9   : > { %16814 = vmatpush1.bf16.msra.mxu1 %v24230_v52  ;;  %v24318_v52 = vld [vmem:[%s26369_s19 + $0x3b40] ss:$8 sps:$4 sm:$0xff]  }
 0x5ba   : > { %18372 = vmatpush1.bf16.msra.mxu0 %v24233_v43  ;;  %16815 = vmatprep.subr.bf16.mxu1 %v24238_v57  ;;  %v24323_v43 = vld [vmem:[%s26369_s19 + $0x1554] ss:$8 sps:$4 sm:$0xff]  }
 0x5bb   : > { %18373 = vmatprep.subr.bf16.mxu0 %v24241_v44  ;;  %v24326_v57 = vld [vmem:[%s26369_s19 + $0x3b54] ss:$8 sps:$4 sm:$0xff]   ;;  %v24321_v44 = vld [vmem:[%s26369_s19 + $0x1550] ss:$8 sps:$4 sm:$0xff]  }
 0x5bd   : > { %16816 = vmatpush1.bf16.msra.mxu1 %v24236_v0  ;;  %v24324_v0 = vld [vmem:[%s26369_s19 + $0x3b50] ss:$8 sps:$4 sm:$0xff]  }
 0x5be   : > { %18374 = vmatpush1.bf16.msra.mxu0 %v24239_v1  ;;  %16817 = vmatprep.subr.bf16.mxu1 %v24244_v13  ;;  %v24329_v1 = vld [vmem:[%s26369_s19 + $0x1564] ss:$8 sps:$4 sm:$0xff]  }
 0x5bf   : > { %18375 = vmatprep.subr.bf16.mxu0 %v24247_v46  ;;  %v24332_v13 = vld [vmem:[%s26369_s19 + $0x3b64] ss:$8 sps:$4 sm:$0xff]   ;;  %v24327_v46 = vld [vmem:[%s26369_s19 + $0x1560] ss:$8 sps:$4 sm:$0xff]  }
 0x5c1   : > { %16818 = vmatpush1.bf16.msra.mxu1 %v24242_v48  ;;  %v24330_v48 = vld [vmem:[%s26369_s19 + $0x3b60] ss:$8 sps:$4 sm:$0xff]  }
 0x5c2   : > { %18376 = vmatpush1.bf16.msra.mxu0 %v24245_v36  ;;  %16819 = vmatprep.subr.bf16.mxu1 %v24250_v17  ;;  %v24335_v36 = vld [vmem:[%s26369_s19 + $0x1574] ss:$8 sps:$4 sm:$0xff]  }
 0x5c3   : > { %18377 = vmatprep.subr.bf16.mxu0 %v24253_v32  ;;  %v24338_v17 = vld [vmem:[%s26369_s19 + $0x3b74] ss:$8 sps:$4 sm:$0xff]   ;;  %v24333_v32 = vld [vmem:[%s26369_s19 + $0x1570] ss:$8 sps:$4 sm:$0xff]  }
 0x5c5   : > { %16820 = vmatpush1.bf16.msra.mxu1 %v24248_v47  ;;  %v24336_v47 = vld [vmem:[%s26369_s19 + $0x3b70] ss:$8 sps:$4 sm:$0xff]  }
 0x5c6   : > { %18378 = vmatpush1.bf16.msra.mxu0 %v24251_v56  ;;  %16821 = vmatprep.subr.bf16.mxu1 %v24256_v25  ;;  %v24341_v56 = vld [vmem:[%s26369_s19 + $0x1584] ss:$8 sps:$4 sm:$0xff]  }
 0x5c7   : > { %18379 = vmatprep.subr.bf16.mxu0 %v24259_v19  ;;  %v24344_v25 = vld [vmem:[%s26369_s19 + $0x3b84] ss:$8 sps:$4 sm:$0xff]   ;;  %v24339_v19 = vld [vmem:[%s26369_s19 + $0x1580] ss:$8 sps:$4 sm:$0xff]  }
 0x5c9   : > { %16822 = vmatpush1.bf16.msra.mxu1 %v24254_v5  ;;  %v24342_v5 = vld [vmem:[%s26369_s19 + $0x3b80] ss:$8 sps:$4 sm:$0xff]  }
 0x5ca   : > { %18380 = vmatpush1.bf16.msra.mxu0 %v24257_v60  ;;  %16823 = vmatprep.subr.bf16.mxu1 %v24262_v6  ;;  %v24347_v60 = vld [vmem:[%s26369_s19 + $0x1594] ss:$8 sps:$4 sm:$0xff]  }
 0x5cb   : > { %18381 = vmatprep.subr.bf16.mxu0 %v24265_v7  ;;  %v24350_v6 = vld [vmem:[%s26369_s19 + $0x3b94] ss:$8 sps:$4 sm:$0xff]   ;;  %v24345_v7 = vld [vmem:[%s26369_s19 + $0x1590] ss:$8 sps:$4 sm:$0xff]  }
 0x5cd   : > { %16824 = vmatpush1.bf16.msra.mxu1 %v24260_v11  ;;  %v24348_v11 = vld [vmem:[%s26369_s19 + $0x3b90] ss:$8 sps:$4 sm:$0xff]  }
 0x5ce   : > { %18382 = vmatpush1.bf16.msra.mxu0 %v24263_v15  ;;  %16825 = vmatprep.subr.bf16.mxu1 %v24268_v18  ;;  %v24353_v15 = vld [vmem:[%s26369_s19 + $0x15a4] ss:$8 sps:$4 sm:$0xff]  }
 0x5cf   : > { %18383 = vmatprep.subr.bf16.mxu0 %v24271_v21  ;;  %v24356_v18 = vld [vmem:[%s26369_s19 + $0x3ba4] ss:$8 sps:$4 sm:$0xff]   ;;  %v24351_v21 = vld [vmem:[%s26369_s19 + $0x15a0] ss:$8 sps:$4 sm:$0xff]  }
 0x5d1   : > { %16826 = vmatpush1.bf16.msra.mxu1 %v24266_v2  ;;  %v24354_v2 = vld [vmem:[%s26369_s19 + $0x3ba0] ss:$8 sps:$4 sm:$0xff]  }
 0x5d2   : > { %18384 = vmatpush1.bf16.msra.mxu0 %v24269_v38  ;;  %16827 = vmatprep.subr.bf16.mxu1 %v24274_v61  ;;  %v24359_v38 = vld [vmem:[%s26369_s19 + $0x15b4] ss:$8 sps:$4 sm:$0xff]  }
 0x5d3   : > { %18385 = vmatprep.subr.bf16.mxu0 %v24277_v3  ;;  %v24362_v61 = vld [vmem:[%s26369_s19 + $0x3bb4] ss:$8 sps:$4 sm:$0xff]   ;;  %v24357_v3 = vld [vmem:[%s26369_s19 + $0x15b0] ss:$8 sps:$4 sm:$0xff]  }
 0x5d5   : > { %16828 = vmatpush1.bf16.msra.mxu1 %v24272_v53  ;;  %v24360_v53 = vld [vmem:[%s26369_s19 + $0x3bb0] ss:$8 sps:$4 sm:$0xff]  }
 0x5d6   : > { %18386 = vmatpush1.bf16.msra.mxu0 %v24275_v4  ;;  %16829 = vmatprep.subr.bf16.mxu1 %v24280_v10  ;;  %v24365_v4 = vld [vmem:[%s26369_s19 + $0x15c4] ss:$8 sps:$4 sm:$0xff]  }
 0x5d7   : > { %18387 = vmatprep.subr.bf16.mxu0 %v24283_v42  ;;  %v24368_v10 = vld [vmem:[%s26369_s19 + $0x3bc4] ss:$8 sps:$4 sm:$0xff]   ;;  %v24363_v42 = vld [vmem:[%s26369_s19 + $0x15c0] ss:$8 sps:$4 sm:$0xff]  }
 0x5d9   : > { %16830 = vmatpush1.bf16.msra.mxu1 %v24278_v58  ;;  %v24366_v58 = vld [vmem:[%s26369_s19 + $0x3bc0] ss:$8 sps:$4 sm:$0xff]  }
 0x5da   : > { %18388 = vmatpush1.bf16.msra.mxu0 %v24281_v26  ;;  %16831 = vmatprep.subr.bf16.mxu1 %v24286_v14  ;;  %v24371_v26 = vld [vmem:[%s26369_s19 + $0x15d4] ss:$8 sps:$4 sm:$0xff]  }
 0x5db   : > { %18389 = vmatprep.subr.bf16.mxu0 %v24289_v54  ;;  %v24374_v14 = vld [vmem:[%s26369_s19 + $0x3bd4] ss:$8 sps:$4 sm:$0xff]   ;;  %v24369_v54 = vld [vmem:[%s26369_s19 + $0x15d0] ss:$8 sps:$4 sm:$0xff]  }
 0x5dd   : > { %16832 = vmatpush1.bf16.msra.mxu1 %v24284_v62  ;;  %v24372_v62 = vld [vmem:[%s26369_s19 + $0x3bd0] ss:$8 sps:$4 sm:$0xff]  }
 0x5de   : > { %18390 = vmatpush1.bf16.msra.mxu0 %v24287_v9  ;;  %16842 = vmatprep.subr.bf16.mxu1 %v24292_v28  ;;  %v24377_v9 = vld [vmem:[%s26369_s19 + $0x15e4] ss:$8 sps:$4 sm:$0xff]  }
 0x5df   : > { %18400 = vmatprep.subr.bf16.mxu0 %v24296_v29  ;;  %v24380_v28 = vld [vmem:[%s26369_s19 + $0x3be4] ss:$8 sps:$4 sm:$0xff]   ;;  %v3065_v29 = vcombine.high %v28027_v55, %v28027_v55  ;;  %v24381_v55 = vld [vmem:[%s26369_s19 + $0x15f0] ss:$8 sps:$4 sm:$0xff]  }
 0x5e0   : > { %16834 = vmatmul.mubr.bf16.vlgmr.msra.gmra.mrb[0].mxu1 %v28127_v31 }
 0x5e1   : > { %18392 = vmatmul.mubr.bf16.vlgmr.msra.gmra.mrb[0].mxu0 %v28131_v35  ;;  %16843 = vmatpush1.bf16.msra.mxu1 %v24290_v39  ;;  %v28198_v39 = vld [vmem:[%s26387_s30 + $0x78] sm:$0xff] }
 0x5e2   : > { %18401 = vmatpush1.bf16.msra.mxu0 %v24294_v40  ;;  %16844 = vmatprep.subr.bf16.mxu1 %v24299_v41  ;;  %v24375_v40 = vld [vmem:[%s26369_s19 + $0x15e0] ss:$8 sps:$4 sm:$0xff]  }
 0x5e3   : > { %18402 = vmatprep.subr.bf16.mxu0 %v24302_v23  ;;  %16874 = vmatprep.mubr.bf16.mxu1 %v3112_v22  ;;  %v24378_v41 = vld [vmem:[%s26369_s19 + $0x3be0] ss:$8 sps:$4 sm:$0xff]   ;;  %v24383_v23 = vld [vmem:[%s26369_s19 + $0x15f4] ss:$8 sps:$4 sm:$0xff]  }
 0x5e4   : > { %18432 = vmatprep.mubr.bf16.mxu0 %v3554_v59  ;;  %v24386_v22 = vld [vmem:[%s26369_s19 + $0x3bf4] ss:$8 sps:$4 sm:$0xff]   ;;  %v28205_v59 = vrot.slane %v3065_v29, %v26438_v51  ;;  %v24453_v29 = vld [vmem:[%s26369_s19 + $0x16b0] ss:$8 sps:$4 sm:$0xff]  }
 0x5e5   : > { %16845 = vmatpush1.bf16.msra.mxu1 %v24297_v33  ;;  %v28209_v33 = vrot.slane %v28198_v39, %v26438_v51 }
 0x5e6   : > { %18403 = vmatpush1.bf16.msra.mxu0 %v24300_v63  ;;  %16846 = vmatprep.subr.bf16.mxu1 %v24305_v27  ;;  %v24384_v63 = vld [vmem:[%s26369_s19 + $0x3bf0] ss:$8 sps:$4 sm:$0xff]   ;;  %v24389_v27 = vld [vmem:[%s26369_s19 + $0x1604] ss:$8 sps:$4 sm:$0xff]  }
 0x5e7   : > { %18404 = vmatprep.subr.bf16.mxu0 %v24308_v30  ;;  %v24392_v30 = vld [vmem:[%s26369_s19 + $0x3c04] ss:$8 sps:$4 sm:$0xff]  }
 0x5e9   : > { %16847 = vmatpush1.bf16.msra.mxu1 %v24303_v8  ;;  %v3081_v8 = vcombine.high %v28205_v59, %v28205_v59 }
 0x5ea   : > { %18405 = vmatpush1.bf16.msra.mxu0 %v24306_v24  ;;  %16848 = vmatprep.subr.bf16.mxu1 %v24311_v12  ;;  %v3570_v24 = vcombine.high %v28209_v33, %v28209_v33  ;;  %v3110_v12 = vcombine.high %v28127_v31, %v28127_v31 }
 0x5eb   : > { %18406 = vmatprep.subr.bf16.mxu0 %v24314_v49  ;;  %v3552_v49 = vcombine.high %v28131_v35, %v28131_v35  ;;  %v24393_v35 = vld [vmem:[%s26369_s19 + $0x1610] ss:$8 sps:$4 sm:$0xff]  }
 0x5ec   : > { %v28231_v31 = vrot.slane %v3570_v24, %v26438_v51  ;;  %v24473_v24 = vld [vmem:[%s26369_s19 + $0x16e4] ss:$8 sps:$4 sm:$0xff]  }
 0x5ed   : > { %16849 = vmatpush1.bf16.msra.mxu1 %v24309_v34  ;;  %v24387_v34 = vld [vmem:[%s26369_s19 + $0x1600] ss:$8 sps:$4 sm:$0xff]  }
 0x5ee   : > { %18407 = vmatpush1.bf16.msra.mxu0 %v24312_v20  ;;  %16850 = vmatprep.subr.bf16.mxu1 %v24317_v16  ;;  %v24390_v20 = vld [vmem:[%s26369_s19 + $0x3c00] ss:$8 sps:$4 sm:$0xff]   ;;  %v24395_v16 = vld [vmem:[%s26369_s19 + $0x1614] ss:$8 sps:$4 sm:$0xff]  }
 0x5ef   : > { %18408 = vmatprep.subr.bf16.mxu0 %v24320_v50  ;;  %v24398_v50 = vld [vmem:[%s26369_s19 + $0x3c14] ss:$8 sps:$4 sm:$0xff]  }
 0x5f1   : > { %16851 = vmatpush1.bf16.msra.mxu1 %v24315_v37  ;;  %v28228_v37 = vrot.slane %v3081_v8, %v26438_v51  ;;  %v24468_v8 = vld [vmem:[%s26369_s19 + $0x3cd0] ss:$8 sps:$4 sm:$0xff]  }
 0x5f2   : > { %18409 = vmatpush1.bf16.msra.mxu0 %v24318_v52  ;;  %16852 = vmatprep.subr.bf16.mxu1 %v24323_v43  ;;  %v24396_v52 = vld [vmem:[%s26369_s19 + $0x3c10] ss:$8 sps:$4 sm:$0xff]   ;;  %v24401_v43 = vld [vmem:[%s26369_s19 + $0x1624] ss:$8 sps:$4 sm:$0xff]  }
 0x5f3   : > { %18410 = vmatprep.subr.bf16.mxu0 %v24326_v57  ;;  %v24404_v57 = vld [vmem:[%s26369_s19 + $0x3c24] ss:$8 sps:$4 sm:$0xff]  }
 0x5f5   : > { %16853 = vmatpush1.bf16.msra.mxu1 %v24321_v44  ;;  %v24399_v44 = vld [vmem:[%s26369_s19 + $0x1620] ss:$8 sps:$4 sm:$0xff]  }
 0x5f6   : > { %18411 = vmatpush1.bf16.msra.mxu0 %v24324_v0  ;;  %16854 = vmatprep.subr.bf16.mxu1 %v24329_v1  ;;  %v24402_v0 = vld [vmem:[%s26369_s19 + $0x3c20] ss:$8 sps:$4 sm:$0xff]   ;;  %v24407_v1 = vld [vmem:[%s26369_s19 + $0x1634] ss:$8 sps:$4 sm:$0xff]  }
 0x5f7   : > { %18412 = vmatprep.subr.bf16.mxu0 %v24332_v13  ;;  %v24410_v13 = vld [vmem:[%s26369_s19 + $0x3c34] ss:$8 sps:$4 sm:$0xff]  }
 0x5f9   : > { %16855 = vmatpush1.bf16.msra.mxu1 %v24327_v46  ;;  %v24405_v46 = vld [vmem:[%s26369_s19 + $0x1630] ss:$8 sps:$4 sm:$0xff]  }
 0x5fa   : > { %18413 = vmatpush1.bf16.msra.mxu0 %v24330_v48  ;;  %16856 = vmatprep.subr.bf16.mxu1 %v24335_v36  ;;  %v24408_v48 = vld [vmem:[%s26369_s19 + $0x3c30] ss:$8 sps:$4 sm:$0xff]   ;;  %v24413_v36 = vld [vmem:[%s26369_s19 + $0x1644] ss:$8 sps:$4 sm:$0xff]  }
 0x5fb   : > { %18414 = vmatprep.subr.bf16.mxu0 %v24338_v17  ;;  %v24416_v17 = vld [vmem:[%s26369_s19 + $0x3c44] ss:$8 sps:$4 sm:$0xff]  }
 0x5fd   : > { %16857 = vmatpush1.bf16.msra.mxu1 %v24333_v32  ;;  %v24411_v32 = vld [vmem:[%s26369_s19 + $0x1640] ss:$8 sps:$4 sm:$0xff]  }
 0x5fe   : > { %18415 = vmatpush1.bf16.msra.mxu0 %v24336_v47  ;;  %16858 = vmatprep.subr.bf16.mxu1 %v24341_v56  ;;  %v24414_v47 = vld [vmem:[%s26369_s19 + $0x3c40] ss:$8 sps:$4 sm:$0xff]   ;;  %v24419_v56 = vld [vmem:[%s26369_s19 + $0x1654] ss:$8 sps:$4 sm:$0xff]  }
 0x5ff   : > { %18416 = vmatprep.subr.bf16.mxu0 %v24344_v25  ;;  %v24422_v25 = vld [vmem:[%s26369_s19 + $0x3c54] ss:$8 sps:$4 sm:$0xff]  }
 0x601   : > { %16859 = vmatpush1.bf16.msra.mxu1 %v24339_v19  ;;  %v24417_v19 = vld [vmem:[%s26369_s19 + $0x1650] ss:$8 sps:$4 sm:$0xff]  }
 0x602   : > { %18417 = vmatpush1.bf16.msra.mxu0 %v24342_v5  ;;  %16860 = vmatprep.subr.bf16.mxu1 %v24347_v60  ;;  %v24420_v5 = vld [vmem:[%s26369_s19 + $0x3c50] ss:$8 sps:$4 sm:$0xff]   ;;  %v24425_v60 = vld [vmem:[%s26369_s19 + $0x1664] ss:$8 sps:$4 sm:$0xff]  }
 0x603   : > { %18418 = vmatprep.subr.bf16.mxu0 %v24350_v6  ;;  %v24428_v6 = vld [vmem:[%s26369_s19 + $0x3c64] ss:$8 sps:$4 sm:$0xff]  }
 0x605   : > { %16861 = vmatpush1.bf16.msra.mxu1 %v24345_v7  ;;  %v24423_v7 = vld [vmem:[%s26369_s19 + $0x1660] ss:$8 sps:$4 sm:$0xff]  }
 0x606   : > { %18419 = vmatpush1.bf16.msra.mxu0 %v24348_v11  ;;  %16862 = vmatprep.subr.bf16.mxu1 %v24353_v15  ;;  %v24426_v11 = vld [vmem:[%s26369_s19 + $0x3c60] ss:$8 sps:$4 sm:$0xff]   ;;  %v24431_v15 = vld [vmem:[%s26369_s19 + $0x1674] ss:$8 sps:$4 sm:$0xff]  }
 0x607   : > { %18420 = vmatprep.subr.bf16.mxu0 %v24356_v18  ;;  %v24434_v18 = vld [vmem:[%s26369_s19 + $0x3c74] ss:$8 sps:$4 sm:$0xff]  }
 0x609   : > { %16863 = vmatpush1.bf16.msra.mxu1 %v24351_v21  ;;  %v24429_v21 = vld [vmem:[%s26369_s19 + $0x1670] ss:$8 sps:$4 sm:$0xff]  }
 0x60a   : > { %18421 = vmatpush1.bf16.msra.mxu0 %v24354_v2  ;;  %16864 = vmatprep.subr.bf16.mxu1 %v24359_v38  ;;  %v24432_v2 = vld [vmem:[%s26369_s19 + $0x3c70] ss:$8 sps:$4 sm:$0xff]   ;;  %v24437_v38 = vld [vmem:[%s26369_s19 + $0x1684] ss:$8 sps:$4 sm:$0xff]  }
 0x60b   : > { %18422 = vmatprep.subr.bf16.mxu0 %v24362_v61  ;;  %v24440_v61 = vld [vmem:[%s26369_s19 + $0x3c84] ss:$8 sps:$4 sm:$0xff]  }
 0x60d   : > { %16865 = vmatpush1.bf16.msra.mxu1 %v24357_v3  ;;  %v24435_v3 = vld [vmem:[%s26369_s19 + $0x1680] ss:$8 sps:$4 sm:$0xff]  }
 0x60e   : > { %18423 = vmatpush1.bf16.msra.mxu0 %v24360_v53  ;;  %16866 = vmatprep.subr.bf16.mxu1 %v24365_v4  ;;  %v24438_v53 = vld [vmem:[%s26369_s19 + $0x3c80] ss:$8 sps:$4 sm:$0xff]   ;;  %v24443_v4 = vld [vmem:[%s26369_s19 + $0x1694] ss:$8 sps:$4 sm:$0xff]  }
 0x60f   : > { %18424 = vmatprep.subr.bf16.mxu0 %v24368_v10  ;;  %v24446_v10 = vld [vmem:[%s26369_s19 + $0x3c94] ss:$8 sps:$4 sm:$0xff]  }
 0x611   : > { %16867 = vmatpush1.bf16.msra.mxu1 %v24363_v42  ;;  %v24441_v42 = vld [vmem:[%s26369_s19 + $0x1690] ss:$8 sps:$4 sm:$0xff]  }
 0x612   : > { %18425 = vmatpush1.bf16.msra.mxu0 %v24366_v58  ;;  %16868 = vmatprep.subr.bf16.mxu1 %v24371_v26  ;;  %v24444_v58 = vld [vmem:[%s26369_s19 + $0x3c90] ss:$8 sps:$4 sm:$0xff]   ;;  %v24449_v26 = vld [vmem:[%s26369_s19 + $0x16a4] ss:$8 sps:$4 sm:$0xff]  }
 0x613   : > { %18426 = vmatprep.subr.bf16.mxu0 %v24374_v14  ;;  %v24452_v14 = vld [vmem:[%s26369_s19 + $0x3ca4] ss:$8 sps:$4 sm:$0xff]  }
 0x615   : > { %16869 = vmatpush1.bf16.msra.mxu1 %v24369_v54  ;;  %v24447_v54 = vld [vmem:[%s26369_s19 + $0x16a0] ss:$8 sps:$4 sm:$0xff]  }
 0x616   : > { %18427 = vmatpush1.bf16.msra.mxu0 %v24372_v62  ;;  %16870 = vmatprep.subr.bf16.mxu1 %v24377_v9  ;;  %v24450_v62 = vld [vmem:[%s26369_s19 + $0x3ca0] ss:$8 sps:$4 sm:$0xff]   ;;  %v24455_v9 = vld [vmem:[%s26369_s19 + $0x16b4] ss:$8 sps:$4 sm:$0xff]  }
 0x617   : > { %18428 = vmatprep.subr.bf16.mxu0 %v24380_v28  ;;  %v24458_v28 = vld [vmem:[%s26369_s19 + $0x3cb4] ss:$8 sps:$4 sm:$0xff]  }
 0x619   : > { %16871 = vmatpush1.bf16.msra.mxu1 %v24375_v40  ;;  %v24456_v40 = vld [vmem:[%s26369_s19 + $0x3cb0] ss:$8 sps:$4 sm:$0xff]  }
 0x61a   : > { %18429 = vmatpush1.bf16.msra.mxu0 %v24378_v41  ;;  %16872 = vmatprep.subr.bf16.mxu1 %v24383_v23  ;;  %v24461_v41 = vld [vmem:[%s26369_s19 + $0x16c4] ss:$8 sps:$4 sm:$0xff]  }
 0x61b   : > { %18430 = vmatprep.subr.bf16.mxu0 %v24386_v22  ;;  %v24464_v23 = vld [vmem:[%s26369_s19 + $0x3cc4] ss:$8 sps:$4 sm:$0xff]   ;;  %v24459_v22 = vld [vmem:[%s26369_s19 + $0x16c0] ss:$8 sps:$4 sm:$0xff]  }
 0x61d   : > { %16873 = vmatpush1.bf16.msra.mxu1 %v24381_v55  ;;  %v24462_v55 = vld [vmem:[%s26369_s19 + $0x3cc0] ss:$8 sps:$4 sm:$0xff]  }
 0x61e   : > { %18431 = vmatpush1.bf16.msra.mxu0 %v24384_v63  ;;  %16883 = vmatprep.subr.bf16.mxu1 %v24389_v27  ;;  %v24467_v63 = vld [vmem:[%s26369_s19 + $0x16d4] ss:$8 sps:$4 sm:$0xff]  }
 0x61f   : > { %18441 = vmatprep.subr.bf16.mxu0 %v24392_v30  ;;  %v24470_v27 = vld [vmem:[%s26369_s19 + $0x3cd4] ss:$8 sps:$4 sm:$0xff]   ;;  %v24465_v30 = vld [vmem:[%s26369_s19 + $0x16d0] ss:$8 sps:$4 sm:$0xff]  }
 0x620   : > { %16875 = vmatmul.mubr.bf16.vlgmr.msra.gmra.mrb[0].mxu1 %v3110_v12  ;;  %v24476_v12 = vld [vmem:[%s26369_s19 + $0x3ce4] ss:$8 sps:$4 sm:$0xff]  }
 0x621   : > { %18433 = vmatmul.mubr.bf16.vlgmr.msra.gmra.mrb[0].mxu0 %v3552_v49  ;;  %16884 = vmatpush1.bf16.msra.mxu1 %v24387_v34  ;;  %v24471_v49 = vld [vmem:[%s26369_s19 + $0x16e0] ss:$8 sps:$4 sm:$0xff]  }
 0x622   : > { %18442 = vmatpush1.bf16.msra.mxu0 %v24390_v20  ;;  %16885 = vmatprep.subr.bf16.mxu1 %v24395_v16  ;;  %v24474_v34 = vld [vmem:[%s26369_s19 + $0x3ce0] ss:$8 sps:$4 sm:$0xff]   ;;  %v24479_v20 = vld [vmem:[%s26369_s19 + $0x16f4] ss:$8 sps:$4 sm:$0xff]  }
 0x623   : > { %18443 = vmatprep.subr.bf16.mxu0 %v24398_v50  ;;  %16915 = vmatprep.mubr.bf16.mxu1 %v28228_v37  ;;  %v24482_v16 = vld [vmem:[%s26369_s19 + $0x3cf4] ss:$8 sps:$4 sm:$0xff]   ;;  %v24477_v50 = vld [vmem:[%s26369_s19 + $0x16f0] ss:$8 sps:$4 sm:$0xff]  }
 0x624   : > { %18473 = vmatprep.mubr.bf16.mxu0 %v28231_v31 }
 0x625   : > { %16886 = vmatpush1.bf16.msra.mxu1 %v24393_v35  ;;  %v24480_v35 = vld [vmem:[%s26369_s19 + $0x3cf0] ss:$8 sps:$4 sm:$0xff]  }
 0x626   : > { %18444 = vmatpush1.bf16.msra.mxu0 %v24396_v52  ;;  %16887 = vmatprep.subr.bf16.mxu1 %v24401_v43  ;;  %v24486_v52 = vld [vmem:[%s26369_s19 + $0x1704] ss:$8 sps:$4 sm:$0xff]  }
 0x627   : > { %18445 = vmatprep.subr.bf16.mxu0 %v24404_v57  ;;  %v24489_v43 = vld [vmem:[%s26369_s19 + $0x3d04] ss:$8 sps:$4 sm:$0xff]   ;;  %v28297_v57 = vrot.slane %v28205_v59, %v26438_v51  ;;  %v3113_v59 = vcombine.high %v28228_v37, %v28228_v37 }
 0x628   : > { %v24498_v37 = vld [vmem:[%s26369_s19 + $0x1724] ss:$8 sps:$4 sm:$0xff]  }
 0x629   : > { %16888 = vmatpush1.bf16.msra.mxu1 %v24399_v44  ;;  %v28301_v44 = vrot.slane %v28209_v33, %v26438_v51  ;;  %v24490_v33 = vld [vmem:[%s26369_s19 + $0x1710] ss:$8 sps:$4 sm:$0xff]  }
 0x62a   : > { %18446 = vmatpush1.bf16.msra.mxu0 %v24402_v0  ;;  %16889 = vmatprep.subr.bf16.mxu1 %v24407_v1  ;;  %v24484_v0 = vld [vmem:[%s26369_s19 + $0x1700] ss:$8 sps:$4 sm:$0xff]  }
 0x62b   : > { %18447 = vmatprep.subr.bf16.mxu0 %v24410_v13  ;;  %v24487_v1 = vld [vmem:[%s26369_s19 + $0x3d00] ss:$8 sps:$4 sm:$0xff]   ;;  %v24492_v13 = vld [vmem:[%s26369_s19 + $0x1714] ss:$8 sps:$4 sm:$0xff]  }
 0x62d   : > { %16890 = vmatpush1.bf16.msra.mxu1 %v24405_v46  ;;  %v24495_v46 = vld [vmem:[%s26369_s19 + $0x3d14] ss:$8 sps:$4 sm:$0xff]  }
 0x62e   : > { %18448 = vmatpush1.bf16.msra.mxu0 %v24408_v48  ;;  %16891 = vmatprep.subr.bf16.mxu1 %v24413_v36  ;;  %v3602_v48 = vcombine.high %v28231_v31, %v28231_v31  ;;  %v24493_v36 = vld [vmem:[%s26369_s19 + $0x3d10] ss:$8 sps:$4 sm:$0xff]   ;;  %v24496_v31 = vld [vmem:[%s26369_s19 + $0x1720] ss:$8 sps:$4 sm:$0xff]  }
 0x62f   : > { %18449 = vmatprep.subr.bf16.mxu0 %v24416_v17  ;;  %v24501_v17 = vld [vmem:[%s26369_s19 + $0x3d24] ss:$8 sps:$4 sm:$0xff]  }
 0x631   : > { %16892 = vmatpush1.bf16.msra.mxu1 %v24411_v32  ;;  %v24499_v32 = vld [vmem:[%s26369_s19 + $0x3d20] ss:$8 sps:$4 sm:$0xff]  }
 0x632   : > { %18450 = vmatpush1.bf16.msra.mxu0 %v24414_v47  ;;  %16893 = vmatprep.subr.bf16.mxu1 %v24419_v56  ;;  %v24504_v47 = vld [vmem:[%s26369_s19 + $0x1734] ss:$8 sps:$4 sm:$0xff]  }
 0x633   : > { %18451 = vmatprep.subr.bf16.mxu0 %v24422_v25  ;;  %v24507_v56 = vld [vmem:[%s26369_s19 + $0x3d34] ss:$8 sps:$4 sm:$0xff]   ;;  %v24502_v25 = vld [vmem:[%s26369_s19 + $0x1730] ss:$8 sps:$4 sm:$0xff]  }
 0x635   : > { %16894 = vmatpush1.bf16.msra.mxu1 %v24417_v19  ;;  %v24505_v19 = vld [vmem:[%s26369_s19 + $0x3d30] ss:$8 sps:$4 sm:$0xff]  }
 0x636   : > { %18452 = vmatpush1.bf16.msra.mxu0 %v24420_v5  ;;  %16895 = vmatprep.subr.bf16.mxu1 %v24425_v60  ;;  %v24510_v5 = vld [vmem:[%s26369_s19 + $0x1744] ss:$8 sps:$4 sm:$0xff]  }
 0x637   : > { %18453 = vmatprep.subr.bf16.mxu0 %v24428_v6  ;;  %v24513_v60 = vld [vmem:[%s26369_s19 + $0x3d44] ss:$8 sps:$4 sm:$0xff]   ;;  %v24508_v6 = vld [vmem:[%s26369_s19 + $0x1740] ss:$8 sps:$4 sm:$0xff]  }
 0x639   : > { %16896 = vmatpush1.bf16.msra.mxu1 %v24423_v7  ;;  %v24511_v7 = vld [vmem:[%s26369_s19 + $0x3d40] ss:$8 sps:$4 sm:$0xff]  }
 0x63a   : > { %18454 = vmatpush1.bf16.msra.mxu0 %v24426_v11  ;;  %16897 = vmatprep.subr.bf16.mxu1 %v24431_v15  ;;  %v24516_v11 = vld [vmem:[%s26369_s19 + $0x1754] ss:$8 sps:$4 sm:$0xff]  }
 0x63b   : > { %18455 = vmatprep.subr.bf16.mxu0 %v24434_v18  ;;  %v24519_v15 = vld [vmem:[%s26369_s19 + $0x3d54] ss:$8 sps:$4 sm:$0xff]   ;;  %v24514_v18 = vld [vmem:[%s26369_s19 + $0x1750] ss:$8 sps:$4 sm:$0xff]  }
 0x63d   : > { %16898 = vmatpush1.bf16.msra.mxu1 %v24429_v21  ;;  %v24517_v21 = vld [vmem:[%s26369_s19 + $0x3d50] ss:$8 sps:$4 sm:$0xff]  }
 0x63e   : > { %18456 = vmatpush1.bf16.msra.mxu0 %v24432_v2  ;;  %16899 = vmatprep.subr.bf16.mxu1 %v24437_v38  ;;  %v24522_v2 = vld [vmem:[%s26369_s19 + $0x1764] ss:$8 sps:$4 sm:$0xff]  }
 0x63f   : > { %18457 = vmatprep.subr.bf16.mxu0 %v24440_v61  ;;  %v24525_v38 = vld [vmem:[%s26369_s19 + $0x3d64] ss:$8 sps:$4 sm:$0xff]   ;;  %v24520_v61 = vld [vmem:[%s26369_s19 + $0x1760] ss:$8 sps:$4 sm:$0xff]  }
 0x641   : > { %16900 = vmatpush1.bf16.msra.mxu1 %v24435_v3  ;;  %v24523_v3 = vld [vmem:[%s26369_s19 + $0x3d60] ss:$8 sps:$4 sm:$0xff]  }
 0x642   : > { %18458 = vmatpush1.bf16.msra.mxu0 %v24438_v53  ;;  %16901 = vmatprep.subr.bf16.mxu1 %v24443_v4  ;;  %v24528_v53 = vld [vmem:[%s26369_s19 + $0x1774] ss:$8 sps:$4 sm:$0xff]  }
 0x643   : > { %18459 = vmatprep.subr.bf16.mxu0 %v24446_v10  ;;  %v24531_v4 = vld [vmem:[%s26369_s19 + $0x3d74] ss:$8 sps:$4 sm:$0xff]   ;;  %v24526_v10 = vld [vmem:[%s26369_s19 + $0x1770] ss:$8 sps:$4 sm:$0xff]  }
 0x645   : > { %16902 = vmatpush1.bf16.msra.mxu1 %v24441_v42  ;;  %v24529_v42 = vld [vmem:[%s26369_s19 + $0x3d70] ss:$8 sps:$4 sm:$0xff]  }
 0x646   : > { %18460 = vmatpush1.bf16.msra.mxu0 %v24444_v58  ;;  %16903 = vmatprep.subr.bf16.mxu1 %v24449_v26  ;;  %v24534_v58 = vld [vmem:[%s26369_s19 + $0x1784] ss:$8 sps:$4 sm:$0xff]  }
 0x647   : > { %18461 = vmatprep.subr.bf16.mxu0 %v24452_v14  ;;  %v24537_v26 = vld [vmem:[%s26369_s19 + $0x3d84] ss:$8 sps:$4 sm:$0xff]   ;;  %v24532_v14 = vld [vmem:[%s26369_s19 + $0x1780] ss:$8 sps:$4 sm:$0xff]  }
 0x649   : > { %16904 = vmatpush1.bf16.msra.mxu1 %v24447_v54  ;;  %v24535_v54 = vld [vmem:[%s26369_s19 + $0x3d80] ss:$8 sps:$4 sm:$0xff]  }
 0x64a   : > { %18462 = vmatpush1.bf16.msra.mxu0 %v24450_v62  ;;  %16905 = vmatprep.subr.bf16.mxu1 %v24455_v9  ;;  %v24540_v62 = vld [vmem:[%s26369_s19 + $0x1794] ss:$8 sps:$4 sm:$0xff]  }
 0x64b   : > { %18463 = vmatprep.subr.bf16.mxu0 %v24458_v28  ;;  %v24543_v9 = vld [vmem:[%s26369_s19 + $0x3d94] ss:$8 sps:$4 sm:$0xff]   ;;  %v24538_v28 = vld [vmem:[%s26369_s19 + $0x1790] ss:$8 sps:$4 sm:$0xff]  }
 0x64d   : > { %16906 = vmatpush1.bf16.msra.mxu1 %v24453_v29  ;;  %v24541_v29 = vld [vmem:[%s26369_s19 + $0x3d90] ss:$8 sps:$4 sm:$0xff]  }
 0x64e   : > { %18464 = vmatpush1.bf16.msra.mxu0 %v24456_v40  ;;  %16907 = vmatprep.subr.bf16.mxu1 %v24461_v41  ;;  %v24546_v40 = vld [vmem:[%s26369_s19 + $0x17a4] ss:$8 sps:$4 sm:$0xff]  }
 0x64f   : > { %18465 = vmatprep.subr.bf16.mxu0 %v24464_v23  ;;  %v24549_v41 = vld [vmem:[%s26369_s19 + $0x3da4] ss:$8 sps:$4 sm:$0xff]   ;;  %v24544_v23 = vld [vmem:[%s26369_s19 + $0x17a0] ss:$8 sps:$4 sm:$0xff]  }
 0x651   : > { %16908 = vmatpush1.bf16.msra.mxu1 %v24459_v22  ;;  %v24547_v22 = vld [vmem:[%s26369_s19 + $0x3da0] ss:$8 sps:$4 sm:$0xff]  }
 0x652   : > { %18466 = vmatpush1.bf16.msra.mxu0 %v24462_v55  ;;  %16909 = vmatprep.subr.bf16.mxu1 %v24467_v63  ;;  %v24552_v55 = vld [vmem:[%s26369_s19 + $0x17b4] ss:$8 sps:$4 sm:$0xff]  }
 0x653   : > { %18467 = vmatprep.subr.bf16.mxu0 %v24470_v27  ;;  %v24555_v63 = vld [vmem:[%s26369_s19 + $0x3db4] ss:$8 sps:$4 sm:$0xff]   ;;  %v24550_v27 = vld [vmem:[%s26369_s19 + $0x17b0] ss:$8 sps:$4 sm:$0xff]  }
 0x655   : > { %16910 = vmatpush1.bf16.msra.mxu1 %v24465_v30  ;;  %v24553_v30 = vld [vmem:[%s26369_s19 + $0x3db0] ss:$8 sps:$4 sm:$0xff]  }
 0x656   : > { %18468 = vmatpush1.bf16.msra.mxu0 %v24468_v8  ;;  %16911 = vmatprep.subr.bf16.mxu1 %v24473_v24  ;;  %v24558_v8 = vld [vmem:[%s26369_s19 + $0x17c4] ss:$8 sps:$4 sm:$0xff]  }
 0x657   : > { %18469 = vmatprep.subr.bf16.mxu0 %v24476_v12  ;;  %v24561_v24 = vld [vmem:[%s26369_s19 + $0x3dc4] ss:$8 sps:$4 sm:$0xff]   ;;  %v24556_v12 = vld [vmem:[%s26369_s19 + $0x17c0] ss:$8 sps:$4 sm:$0xff]  }
 0x659   : > { %16912 = vmatpush1.bf16.msra.mxu1 %v24471_v49  ;;  %v24559_v49 = vld [vmem:[%s26369_s19 + $0x3dc0] ss:$8 sps:$4 sm:$0xff]  }
 0x65a   : > { %18470 = vmatpush1.bf16.msra.mxu0 %v24474_v34  ;;  %16913 = vmatprep.subr.bf16.mxu1 %v24479_v20  ;;  %v24564_v34 = vld [vmem:[%s26369_s19 + $0x17d4] ss:$8 sps:$4 sm:$0xff]  }
 0x65b   : > { %18471 = vmatprep.subr.bf16.mxu0 %v24482_v16  ;;  %v24567_v20 = vld [vmem:[%s26369_s19 + $0x3dd4] ss:$8 sps:$4 sm:$0xff]   ;;  %v24562_v16 = vld [vmem:[%s26369_s19 + $0x17d0] ss:$8 sps:$4 sm:$0xff]  }
 0x65d   : > { %16914 = vmatpush1.bf16.msra.mxu1 %v24477_v50  ;;  %v24565_v50 = vld [vmem:[%s26369_s19 + $0x3dd0] ss:$8 sps:$4 sm:$0xff]  }
 0x65e   : > { %18472 = vmatpush1.bf16.msra.mxu0 %v24480_v35  ;;  %16924 = vmatprep.subr.bf16.mxu1 %v24486_v52  ;;  %v24570_v35 = vld [vmem:[%s26369_s19 + $0x17e4] ss:$8 sps:$4 sm:$0xff]  }
 0x65f   : > { %18482 = vmatprep.subr.bf16.mxu0 %v24489_v43  ;;  %v24573_v52 = vld [vmem:[%s26369_s19 + $0x3de4] ss:$8 sps:$4 sm:$0xff]   ;;  %v3555_v43 = vcombine.high %v28198_v39, %v28198_v39  ;;  %v24574_v39 = vld [vmem:[%s26369_s19 + $0x17f0] ss:$8 sps:$4 sm:$0xff]  }
 0x660   : > { %16916 = vmatmul.mubr.bf16.vlgmr.msra.gmra.mrb[0].mxu1 %v28297_v57 }
 0x661   : > { %18474 = vmatmul.mubr.bf16.vlgmr.msra.gmra.mrb[0].mxu0 %v28301_v44  ;;  %16925 = vmatpush1.bf16.msra.mxu1 %v24484_v0  ;;  %v28368_v0 = vld [vmem:[%s26387_s30 + $0x30] sm:$0xff] }
 0x662   : > { %18483 = vmatpush1.bf16.msra.mxu0 %v24487_v1  ;;  %16926 = vmatprep.subr.bf16.mxu1 %v24492_v13  ;;  %v24568_v1 = vld [vmem:[%s26369_s19 + $0x17e0] ss:$8 sps:$4 sm:$0xff]  }
 0x663   : > { %18484 = vmatprep.subr.bf16.mxu0 %v24495_v46  ;;  %16956 = vmatprep.mubr.bf16.mxu1 %v3113_v59  ;;  %v24571_v13 = vld [vmem:[%s26369_s19 + $0x3de0] ss:$8 sps:$4 sm:$0xff]   ;;  %v24576_v46 = vld [vmem:[%s26369_s19 + $0x17f4] ss:$8 sps:$4 sm:$0xff]  }
 0x664   : > { %18514 = vmatprep.mubr.bf16.mxu0 %v3602_v48  ;;  %v24579_v59 = vld [vmem:[%s26369_s19 + $0x3df4] ss:$8 sps:$4 sm:$0xff]   ;;  %v28376_v48 = vrot.slane %v28368_v0, %v26438_v51 }
 0x665   : > { %16927 = vmatpush1.bf16.msra.mxu1 %v24490_v33  ;;  %v28379_v33 = vrot.slane %v3555_v43, %v26438_v51  ;;  %v24646_v43 = vld [vmem:[%s26369_s19 + $0x18b0] ss:$8 sps:$4 sm:$0xff]  }
 0x666   : > { %18485 = vmatpush1.bf16.msra.mxu0 %v24493_v36  ;;  %16928 = vmatprep.subr.bf16.mxu1 %v24498_v37  ;;  %v24577_v36 = vld [vmem:[%s26369_s19 + $0x3df0] ss:$8 sps:$4 sm:$0xff]   ;;  %v24582_v37 = vld [vmem:[%s26369_s19 + $0x1804] ss:$8 sps:$4 sm:$0xff]  }
 0x667   : > { %18486 = vmatprep.subr.bf16.mxu0 %v24501_v17  ;;  %v24585_v17 = vld [vmem:[%s26369_s19 + $0x3e04] ss:$8 sps:$4 sm:$0xff]  }
 0x669   : > { %16929 = vmatpush1.bf16.msra.mxu1 %v24496_v31  ;;  %v3129_v31 = vcombine.high %v28376_v48, %v28376_v48 }
 0x66a   : > { %18487 = vmatpush1.bf16.msra.mxu0 %v24499_v32  ;;  %16930 = vmatprep.subr.bf16.mxu1 %v24504_v47  ;;  %v3571_v32 = vcombine.high %v28379_v33, %v28379_v33  ;;  %v3111_v47 = vcombine.high %v28297_v57, %v28297_v57 }
 0x66b   : > { %18488 = vmatprep.subr.bf16.mxu0 %v24507_v56  ;;  %v3600_v56 = vcombine.high %v28301_v44, %v28301_v44  ;;  %v24586_v44 = vld [vmem:[%s26369_s19 + $0x1810] ss:$8 sps:$4 sm:$0xff]  }
 0x66c   : > { %v28401_v57 = vrot.slane %v3571_v32, %v26438_v51  ;;  %v24666_v32 = vld [vmem:[%s26369_s19 + $0x18e4] ss:$8 sps:$4 sm:$0xff]  }
 0x66d   : > { %16931 = vmatpush1.bf16.msra.mxu1 %v24502_v25  ;;  %v24580_v25 = vld [vmem:[%s26369_s19 + $0x1800] ss:$8 sps:$4 sm:$0xff]  }
 0x66e   : > { %18489 = vmatpush1.bf16.msra.mxu0 %v24505_v19  ;;  %16932 = vmatprep.subr.bf16.mxu1 %v24510_v5  ;;  %v24583_v19 = vld [vmem:[%s26369_s19 + $0x3e00] ss:$8 sps:$4 sm:$0xff]   ;;  %v24588_v5 = vld [vmem:[%s26369_s19 + $0x1814] ss:$8 sps:$4 sm:$0xff]  }
 0x66f   : > { %18490 = vmatprep.subr.bf16.mxu0 %v24513_v60  ;;  %v24591_v60 = vld [vmem:[%s26369_s19 + $0x3e14] ss:$8 sps:$4 sm:$0xff]  }
 0x671   : > { %16933 = vmatpush1.bf16.msra.mxu1 %v24508_v6  ;;  %v28398_v6 = vrot.slane %v3129_v31, %v26438_v51  ;;  %v24661_v31 = vld [vmem:[%s26369_s19 + $0x3ed0] ss:$8 sps:$4 sm:$0xff]  }
 0x672   : > { %18491 = vmatpush1.bf16.msra.mxu0 %v24511_v7  ;;  %16934 = vmatprep.subr.bf16.mxu1 %v24516_v11  ;;  %v24589_v7 = vld [vmem:[%s26369_s19 + $0x3e10] ss:$8 sps:$4 sm:$0xff]   ;;  %v24594_v11 = vld [vmem:[%s26369_s19 + $0x1824] ss:$8 sps:$4 sm:$0xff]  }
 0x673   : > { %18492 = vmatprep.subr.bf16.mxu0 %v24519_v15  ;;  %v24597_v15 = vld [vmem:[%s26369_s19 + $0x3e24] ss:$8 sps:$4 sm:$0xff]  }
 0x675   : > { %16935 = vmatpush1.bf16.msra.mxu1 %v24514_v18  ;;  %v24592_v18 = vld [vmem:[%s26369_s19 + $0x1820] ss:$8 sps:$4 sm:$0xff]  }
 0x676   : > { %18493 = vmatpush1.bf16.msra.mxu0 %v24517_v21  ;;  %16936 = vmatprep.subr.bf16.mxu1 %v24522_v2  ;;  %v24595_v21 = vld [vmem:[%s26369_s19 + $0x3e20] ss:$8 sps:$4 sm:$0xff]   ;;  %v24600_v2 = vld [vmem:[%s26369_s19 + $0x1834] ss:$8 sps:$4 sm:$0xff]  }
 0x677   : > { %18494 = vmatprep.subr.bf16.mxu0 %v24525_v38  ;;  %v24603_v38 = vld [vmem:[%s26369_s19 + $0x3e34] ss:$8 sps:$4 sm:$0xff]  }
 0x679   : > { %16937 = vmatpush1.bf16.msra.mxu1 %v24520_v61  ;;  %v24598_v61 = vld [vmem:[%s26369_s19 + $0x1830] ss:$8 sps:$4 sm:$0xff]  }
 0x67a   : > { %18495 = vmatpush1.bf16.msra.mxu0 %v24523_v3  ;;  %16938 = vmatprep.subr.bf16.mxu1 %v24528_v53  ;;  %v24601_v3 = vld [vmem:[%s26369_s19 + $0x3e30] ss:$8 sps:$4 sm:$0xff]   ;;  %v24606_v53 = vld [vmem:[%s26369_s19 + $0x1844] ss:$8 sps:$4 sm:$0xff]  }
 0x67b   : > { %18496 = vmatprep.subr.bf16.mxu0 %v24531_v4  ;;  %v24609_v4 = vld [vmem:[%s26369_s19 + $0x3e44] ss:$8 sps:$4 sm:$0xff]  }
 0x67d   : > { %16939 = vmatpush1.bf16.msra.mxu1 %v24526_v10  ;;  %v24604_v10 = vld [vmem:[%s26369_s19 + $0x1840] ss:$8 sps:$4 sm:$0xff]  }
 0x67e   : > { %18497 = vmatpush1.bf16.msra.mxu0 %v24529_v42  ;;  %16940 = vmatprep.subr.bf16.mxu1 %v24534_v58  ;;  %v24607_v42 = vld [vmem:[%s26369_s19 + $0x3e40] ss:$8 sps:$4 sm:$0xff]   ;;  %v24612_v58 = vld [vmem:[%s26369_s19 + $0x1854] ss:$8 sps:$4 sm:$0xff]  }
 0x67f   : > { %18498 = vmatprep.subr.bf16.mxu0 %v24537_v26  ;;  %v24615_v26 = vld [vmem:[%s26369_s19 + $0x3e54] ss:$8 sps:$4 sm:$0xff]  }
 0x681   : > { %16941 = vmatpush1.bf16.msra.mxu1 %v24532_v14  ;;  %v24610_v14 = vld [vmem:[%s26369_s19 + $0x1850] ss:$8 sps:$4 sm:$0xff]  }
 0x682   : > { %18499 = vmatpush1.bf16.msra.mxu0 %v24535_v54  ;;  %16942 = vmatprep.subr.bf16.mxu1 %v24540_v62  ;;  %v24613_v54 = vld [vmem:[%s26369_s19 + $0x3e50] ss:$8 sps:$4 sm:$0xff]   ;;  %v24618_v62 = vld [vmem:[%s26369_s19 + $0x1864] ss:$8 sps:$4 sm:$0xff]  }
 0x683   : > { %18500 = vmatprep.subr.bf16.mxu0 %v24543_v9  ;;  %v24621_v9 = vld [vmem:[%s26369_s19 + $0x3e64] ss:$8 sps:$4 sm:$0xff]  }
 0x685   : > { %16943 = vmatpush1.bf16.msra.mxu1 %v24538_v28  ;;  %v24616_v28 = vld [vmem:[%s26369_s19 + $0x1860] ss:$8 sps:$4 sm:$0xff]  }
 0x686   : > { %18501 = vmatpush1.bf16.msra.mxu0 %v24541_v29  ;;  %16944 = vmatprep.subr.bf16.mxu1 %v24546_v40  ;;  %v24619_v29 = vld [vmem:[%s26369_s19 + $0x3e60] ss:$8 sps:$4 sm:$0xff]   ;;  %v24624_v40 = vld [vmem:[%s26369_s19 + $0x1874] ss:$8 sps:$4 sm:$0xff]  }
 0x687   : > { %18502 = vmatprep.subr.bf16.mxu0 %v24549_v41  ;;  %v24627_v41 = vld [vmem:[%s26369_s19 + $0x3e74] ss:$8 sps:$4 sm:$0xff]  }
 0x689   : > { %16945 = vmatpush1.bf16.msra.mxu1 %v24544_v23  ;;  %v24622_v23 = vld [vmem:[%s26369_s19 + $0x1870] ss:$8 sps:$4 sm:$0xff]  }
 0x68a   : > { %18503 = vmatpush1.bf16.msra.mxu0 %v24547_v22  ;;  %16946 = vmatprep.subr.bf16.mxu1 %v24552_v55  ;;  %v24625_v22 = vld [vmem:[%s26369_s19 + $0x3e70] ss:$8 sps:$4 sm:$0xff]   ;;  %v24630_v55 = vld [vmem:[%s26369_s19 + $0x1884] ss:$8 sps:$4 sm:$0xff]  }
 0x68b   : > { %18504 = vmatprep.subr.bf16.mxu0 %v24555_v63  ;;  %v24633_v63 = vld [vmem:[%s26369_s19 + $0x3e84] ss:$8 sps:$4 sm:$0xff]  }
 0x68d   : > { %16947 = vmatpush1.bf16.msra.mxu1 %v24550_v27  ;;  %v24628_v27 = vld [vmem:[%s26369_s19 + $0x1880] ss:$8 sps:$4 sm:$0xff]  }
 0x68e   : > { %18505 = vmatpush1.bf16.msra.mxu0 %v24553_v30  ;;  %16948 = vmatprep.subr.bf16.mxu1 %v24558_v8  ;;  %v24631_v30 = vld [vmem:[%s26369_s19 + $0x3e80] ss:$8 sps:$4 sm:$0xff]   ;;  %v24636_v8 = vld [vmem:[%s26369_s19 + $0x1894] ss:$8 sps:$4 sm:$0xff]  }
 0x68f   : > { %18506 = vmatprep.subr.bf16.mxu0 %v24561_v24  ;;  %v24639_v24 = vld [vmem:[%s26369_s19 + $0x3e94] ss:$8 sps:$4 sm:$0xff]  }
 0x691   : > { %16949 = vmatpush1.bf16.msra.mxu1 %v24556_v12  ;;  %v24634_v12 = vld [vmem:[%s26369_s19 + $0x1890] ss:$8 sps:$4 sm:$0xff]  }
 0x692   : > { %18507 = vmatpush1.bf16.msra.mxu0 %v24559_v49  ;;  %16950 = vmatprep.subr.bf16.mxu1 %v24564_v34  ;;  %v24637_v49 = vld [vmem:[%s26369_s19 + $0x3e90] ss:$8 sps:$4 sm:$0xff]   ;;  %v24642_v34 = vld [vmem:[%s26369_s19 + $0x18a4] ss:$8 sps:$4 sm:$0xff]  }
 0x693   : > { %18508 = vmatprep.subr.bf16.mxu0 %v24567_v20  ;;  %v24645_v20 = vld [vmem:[%s26369_s19 + $0x3ea4] ss:$8 sps:$4 sm:$0xff]  }
 0x695   : > { %16951 = vmatpush1.bf16.msra.mxu1 %v24562_v16  ;;  %v24640_v16 = vld [vmem:[%s26369_s19 + $0x18a0] ss:$8 sps:$4 sm:$0xff]  }
 0x696   : > { %18509 = vmatpush1.bf16.msra.mxu0 %v24565_v50  ;;  %16952 = vmatprep.subr.bf16.mxu1 %v24570_v35  ;;  %v24643_v50 = vld [vmem:[%s26369_s19 + $0x3ea0] ss:$8 sps:$4 sm:$0xff]   ;;  %v24648_v35 = vld [vmem:[%s26369_s19 + $0x18b4] ss:$8 sps:$4 sm:$0xff]  }
 0x697   : > { %18510 = vmatprep.subr.bf16.mxu0 %v24573_v52  ;;  %v24651_v52 = vld [vmem:[%s26369_s19 + $0x3eb4] ss:$8 sps:$4 sm:$0xff]  }
 0x699   : > { %16953 = vmatpush1.bf16.msra.mxu1 %v24568_v1  ;;  %v24649_v1 = vld [vmem:[%s26369_s19 + $0x3eb0] ss:$8 sps:$4 sm:$0xff]  }
 0x69a   : > { %18511 = vmatpush1.bf16.msra.mxu0 %v24571_v13  ;;  %16954 = vmatprep.subr.bf16.mxu1 %v24576_v46  ;;  %v24654_v13 = vld [vmem:[%s26369_s19 + $0x18c4] ss:$8 sps:$4 sm:$0xff]  }
 0x69b   : > { %18512 = vmatprep.subr.bf16.mxu0 %v24579_v59  ;;  %v24657_v46 = vld [vmem:[%s26369_s19 + $0x3ec4] ss:$8 sps:$4 sm:$0xff]   ;;  %v24652_v59 = vld [vmem:[%s26369_s19 + $0x18c0] ss:$8 sps:$4 sm:$0xff]  }
 0x69d   : > { %16955 = vmatpush1.bf16.msra.mxu1 %v24574_v39  ;;  %v24655_v39 = vld [vmem:[%s26369_s19 + $0x3ec0] ss:$8 sps:$4 sm:$0xff]  }
 0x69e   : > { %18513 = vmatpush1.bf16.msra.mxu0 %v24577_v36  ;;  %16965 = vmatprep.subr.bf16.mxu1 %v24582_v37  ;;  %v24660_v36 = vld [vmem:[%s26369_s19 + $0x18d4] ss:$8 sps:$4 sm:$0xff]  }
 0x69f   : > { %18523 = vmatprep.subr.bf16.mxu0 %v24585_v17  ;;  %v24663_v37 = vld [vmem:[%s26369_s19 + $0x3ed4] ss:$8 sps:$4 sm:$0xff]   ;;  %v24658_v17 = vld [vmem:[%s26369_s19 + $0x18d0] ss:$8 sps:$4 sm:$0xff]  }
 0x6a0   : > { %16957 = vmatmul.mubr.bf16.vlgmr.msra.gmra.mrb[0].mxu1 %v3111_v47  ;;  %v24669_v47 = vld [vmem:[%s26369_s19 + $0x3ee4] ss:$8 sps:$4 sm:$0xff]  }
 0x6a1   : > { %18515 = vmatmul.mubr.bf16.vlgmr.msra.gmra.mrb[0].mxu0 %v3600_v56  ;;  %16966 = vmatpush1.bf16.msra.mxu1 %v24580_v25  ;;  %v24664_v56 = vld [vmem:[%s26369_s19 + $0x18e0] ss:$8 sps:$4 sm:$0xff]  }
 0x6a2   : > { %18524 = vmatpush1.bf16.msra.mxu0 %v24583_v19  ;;  %16967 = vmatprep.subr.bf16.mxu1 %v24588_v5  ;;  %v24667_v25 = vld [vmem:[%s26369_s19 + $0x3ee0] ss:$8 sps:$4 sm:$0xff]   ;;  %v24672_v19 = vld [vmem:[%s26369_s19 + $0x18f4] ss:$8 sps:$4 sm:$0xff]  }
 0x6a3   : > { %18525 = vmatprep.subr.bf16.mxu0 %v24591_v60  ;;  %16997 = vmatprep.mubr.bf16.mxu1 %v28398_v6  ;;  %v24675_v5 = vld [vmem:[%s26369_s19 + $0x3ef4] ss:$8 sps:$4 sm:$0xff]   ;;  %v24670_v60 = vld [vmem:[%s26369_s19 + $0x18f0] ss:$8 sps:$4 sm:$0xff]  }
 0x6a4   : > { %18555 = vmatprep.mubr.bf16.mxu0 %v28401_v57 }
 0x6a5   : > { %16968 = vmatpush1.bf16.msra.mxu1 %v24586_v44  ;;  %v24673_v44 = vld [vmem:[%s26369_s19 + $0x3ef0] ss:$8 sps:$4 sm:$0xff]  }
 0x6a6   : > { %18526 = vmatpush1.bf16.msra.mxu0 %v24589_v7  ;;  %16969 = vmatprep.subr.bf16.mxu1 %v24594_v11  ;;  %v24678_v7 = vld [vmem:[%s26369_s19 + $0x1904] ss:$8 sps:$4 sm:$0xff]  }
 0x6a7   : > { %18527 = vmatprep.subr.bf16.mxu0 %v24597_v15  ;;  %v24682_v11 = vld [vmem:[%s26369_s19 + $0x3f04] ss:$8 sps:$4 sm:$0xff]   ;;  %v28467_v15 = vrot.slane %v28376_v48, %v26438_v51  ;;  %v3161_v48 = vcombine.high %v28398_v6, %v28398_v6 }
 0x6a8   : > { %v24691_v6 = vld [vmem:[%s26369_s19 + $0x1924] ss:$8 sps:$4 sm:$0xff]  }
 0x6a9   : > { %16970 = vmatpush1.bf16.msra.mxu1 %v24592_v18  ;;  %v28471_v18 = vrot.slane %v28379_v33, %v26438_v51  ;;  %v24683_v33 = vld [vmem:[%s26369_s19 + $0x1910] ss:$8 sps:$4 sm:$0xff]  }
 0x6aa   : > { %18528 = vmatpush1.bf16.msra.mxu0 %v24595_v21  ;;  %16971 = vmatprep.subr.bf16.mxu1 %v24600_v2  ;;  %v24676_v21 = vld [vmem:[%s26369_s19 + $0x1900] ss:$8 sps:$4 sm:$0xff]  }
 0x6ab   : > { %18529 = vmatprep.subr.bf16.mxu0 %v24603_v38  ;;  %v24680_v2 = vld [vmem:[%s26369_s19 + $0x3f00] ss:$8 sps:$4 sm:$0xff]   ;;  %v24685_v38 = vld [vmem:[%s26369_s19 + $0x1914] ss:$8 sps:$4 sm:$0xff]  }
 0x6ad   : > { %16972 = vmatpush1.bf16.msra.mxu1 %v24598_v61  ;;  %v24688_v61 = vld [vmem:[%s26369_s19 + $0x3f14] ss:$8 sps:$4 sm:$0xff]  }
 0x6ae   : > { %18530 = vmatpush1.bf16.msra.mxu0 %v24601_v3  ;;  %16973 = vmatprep.subr.bf16.mxu1 %v24606_v53  ;;  %v3603_v3 = vcombine.high %v28401_v57, %v28401_v57  ;;  %v24686_v53 = vld [vmem:[%s26369_s19 + $0x3f10] ss:$8 sps:$4 sm:$0xff]   ;;  %v24689_v57 = vld [vmem:[%s26369_s19 + $0x1920] ss:$8 sps:$4 sm:$0xff]  }
 0x6af   : > { %18531 = vmatprep.subr.bf16.mxu0 %v24609_v4  ;;  %v24694_v4 = vld [vmem:[%s26369_s19 + $0x3f24] ss:$8 sps:$4 sm:$0xff]  }
 0x6b1   : > { %16974 = vmatpush1.bf16.msra.mxu1 %v24604_v10  ;;  %v24692_v10 = vld [vmem:[%s26369_s19 + $0x3f20] ss:$8 sps:$4 sm:$0xff]  }
 0x6b2   : > { %18532 = vmatpush1.bf16.msra.mxu0 %v24607_v42  ;;  %16975 = vmatprep.subr.bf16.mxu1 %v24612_v58  ;;  %v24697_v42 = vld [vmem:[%s26369_s19 + $0x1934] ss:$8 sps:$4 sm:$0xff]  }
 0x6b3   : > { %18533 = vmatprep.subr.bf16.mxu0 %v24615_v26  ;;  %v24700_v58 = vld [vmem:[%s26369_s19 + $0x3f34] ss:$8 sps:$4 sm:$0xff]   ;;  %v24695_v26 = vld [vmem:[%s26369_s19 + $0x1930] ss:$8 sps:$4 sm:$0xff]  }
 0x6b5   : > { %16976 = vmatpush1.bf16.msra.mxu1 %v24610_v14  ;;  %v24698_v14 = vld [vmem:[%s26369_s19 + $0x3f30] ss:$8 sps:$4 sm:$0xff]  }
 0x6b6   : > { %18534 = vmatpush1.bf16.msra.mxu0 %v24613_v54  ;;  %16977 = vmatprep.subr.bf16.mxu1 %v24618_v62  ;;  %v24703_v54 = vld [vmem:[%s26369_s19 + $0x1944] ss:$8 sps:$4 sm:$0xff]  }
 0x6b7   : > { %18535 = vmatprep.subr.bf16.mxu0 %v24621_v9  ;;  %v24706_v62 = vld [vmem:[%s26369_s19 + $0x3f44] ss:$8 sps:$4 sm:$0xff]   ;;  %v24701_v9 = vld [vmem:[%s26369_s19 + $0x1940] ss:$8 sps:$4 sm:$0xff]  }
 0x6b9   : > { %16978 = vmatpush1.bf16.msra.mxu1 %v24616_v28  ;;  %v24704_v28 = vld [vmem:[%s26369_s19 + $0x3f40] ss:$8 sps:$4 sm:$0xff]  }
 0x6ba   : > { %18536 = vmatpush1.bf16.msra.mxu0 %v24619_v29  ;;  %16979 = vmatprep.subr.bf16.mxu1 %v24624_v40  ;;  %v24709_v29 = vld [vmem:[%s26369_s19 + $0x1954] ss:$8 sps:$4 sm:$0xff]  }
 0x6bb   : > { %18537 = vmatprep.subr.bf16.mxu0 %v24627_v41  ;;  %v24712_v40 = vld [vmem:[%s26369_s19 + $0x3f54] ss:$8 sps:$4 sm:$0xff]   ;;  %v24707_v41 = vld [vmem:[%s26369_s19 + $0x1950] ss:$8 sps:$4 sm:$0xff]  }
 0x6bd   : > { %16980 = vmatpush1.bf16.msra.mxu1 %v24622_v23  ;;  %v24710_v23 = vld [vmem:[%s26369_s19 + $0x3f50] ss:$8 sps:$4 sm:$0xff]  }
 0x6be   : > { %18538 = vmatpush1.bf16.msra.mxu0 %v24625_v22  ;;  %16981 = vmatprep.subr.bf16.mxu1 %v24630_v55  ;;  %v24715_v22 = vld [vmem:[%s26369_s19 + $0x1964] ss:$8 sps:$4 sm:$0xff]  }
 0x6bf   : > { %18539 = vmatprep.subr.bf16.mxu0 %v24633_v63  ;;  %v24718_v55 = vld [vmem:[%s26369_s19 + $0x3f64] ss:$8 sps:$4 sm:$0xff]   ;;  %v24713_v63 = vld [vmem:[%s26369_s19 + $0x1960] ss:$8 sps:$4 sm:$0xff]  }
 0x6c1   : > { %16982 = vmatpush1.bf16.msra.mxu1 %v24628_v27  ;;  %v24716_v27 = vld [vmem:[%s26369_s19 + $0x3f60] ss:$8 sps:$4 sm:$0xff]  }
 0x6c2   : > { %18540 = vmatpush1.bf16.msra.mxu0 %v24631_v30  ;;  %16983 = vmatprep.subr.bf16.mxu1 %v24636_v8  ;;  %v24721_v30 = vld [vmem:[%s26369_s19 + $0x1974] ss:$8 sps:$4 sm:$0xff]  }
 0x6c3   : > { %18541 = vmatprep.subr.bf16.mxu0 %v24639_v24  ;;  %v24724_v8 = vld [vmem:[%s26369_s19 + $0x3f74] ss:$8 sps:$4 sm:$0xff]   ;;  %v24719_v24 = vld [vmem:[%s26369_s19 + $0x1970] ss:$8 sps:$4 sm:$0xff]  }
 0x6c5   : > { %16984 = vmatpush1.bf16.msra.mxu1 %v24634_v12  ;;  %v24722_v12 = vld [vmem:[%s26369_s19 + $0x3f70] ss:$8 sps:$4 sm:$0xff]  }
 0x6c6   : > { %18542 = vmatpush1.bf16.msra.mxu0 %v24637_v49  ;;  %16985 = vmatprep.subr.bf16.mxu1 %v24642_v34  ;;  %v24727_v49 = vld [vmem:[%s26369_s19 + $0x1984] ss:$8 sps:$4 sm:$0xff]  }
 0x6c7   : > { %18543 = vmatprep.subr.bf16.mxu0 %v24645_v20  ;;  %v24730_v34 = vld [vmem:[%s26369_s19 + $0x3f84] ss:$8 sps:$4 sm:$0xff]   ;;  %v24725_v20 = vld [vmem:[%s26369_s19 + $0x1980] ss:$8 sps:$4 sm:$0xff]  }
 0x6c9   : > { %16986 = vmatpush1.bf16.msra.mxu1 %v24640_v16  ;;  %v24728_v16 = vld [vmem:[%s26369_s19 + $0x3f80] ss:$8 sps:$4 sm:$0xff]  }
 0x6ca   : > { %18544 = vmatpush1.bf16.msra.mxu0 %v24643_v50  ;;  %16987 = vmatprep.subr.bf16.mxu1 %v24648_v35  ;;  %v24733_v50 = vld [vmem:[%s26369_s19 + $0x1994] ss:$8 sps:$4 sm:$0xff]  }
 0x6cb   : > { %18545 = vmatprep.subr.bf16.mxu0 %v24651_v52  ;;  %v24736_v35 = vld [vmem:[%s26369_s19 + $0x3f94] ss:$8 sps:$4 sm:$0xff]   ;;  %v24731_v52 = vld [vmem:[%s26369_s19 + $0x1990] ss:$8 sps:$4 sm:$0xff]  }
 0x6cd   : > { %16988 = vmatpush1.bf16.msra.mxu1 %v24646_v43  ;;  %v24734_v43 = vld [vmem:[%s26369_s19 + $0x3f90] ss:$8 sps:$4 sm:$0xff]  }
 0x6ce   : > { %18546 = vmatpush1.bf16.msra.mxu0 %v24649_v1  ;;  %16989 = vmatprep.subr.bf16.mxu1 %v24654_v13  ;;  %v24739_v1 = vld [vmem:[%s26369_s19 + $0x19a4] ss:$8 sps:$4 sm:$0xff]  }
 0x6cf   : > { %18547 = vmatprep.subr.bf16.mxu0 %v24657_v46  ;;  %v24742_v13 = vld [vmem:[%s26369_s19 + $0x3fa4] ss:$8 sps:$4 sm:$0xff]   ;;  %v24737_v46 = vld [vmem:[%s26369_s19 + $0x19a0] ss:$8 sps:$4 sm:$0xff]  }
 0x6d1   : > { %16990 = vmatpush1.bf16.msra.mxu1 %v24652_v59  ;;  %v24740_v59 = vld [vmem:[%s26369_s19 + $0x3fa0] ss:$8 sps:$4 sm:$0xff]  }
 0x6d2   : > { %18548 = vmatpush1.bf16.msra.mxu0 %v24655_v39  ;;  %16991 = vmatprep.subr.bf16.mxu1 %v24660_v36  ;;  %v24745_v39 = vld [vmem:[%s26369_s19 + $0x19b4] ss:$8 sps:$4 sm:$0xff]  }
 0x6d3   : > { %18549 = vmatprep.subr.bf16.mxu0 %v24663_v37  ;;  %v24748_v36 = vld [vmem:[%s26369_s19 + $0x3fb4] ss:$8 sps:$4 sm:$0xff]   ;;  %v24743_v37 = vld [vmem:[%s26369_s19 + $0x19b0] ss:$8 sps:$4 sm:$0xff]  }
 0x6d5   : > { %16992 = vmatpush1.bf16.msra.mxu1 %v24658_v17  ;;  %v24746_v17 = vld [vmem:[%s26369_s19 + $0x3fb0] ss:$8 sps:$4 sm:$0xff]  }
 0x6d6   : > { %18550 = vmatpush1.bf16.msra.mxu0 %v24661_v31  ;;  %16993 = vmatprep.subr.bf16.mxu1 %v24666_v32  ;;  %v24751_v31 = vld [vmem:[%s26369_s19 + $0x19c4] ss:$8 sps:$4 sm:$0xff]  }
 0x6d7   : > { %18551 = vmatprep.subr.bf16.mxu0 %v24669_v47  ;;  %v24754_v32 = vld [vmem:[%s26369_s19 + $0x3fc4] ss:$8 sps:$4 sm:$0xff]   ;;  %v24749_v47 = vld [vmem:[%s26369_s19 + $0x19c0] ss:$8 sps:$4 sm:$0xff]  }
 0x6d9   : > { %16994 = vmatpush1.bf16.msra.mxu1 %v24664_v56  ;;  %v24752_v56 = vld [vmem:[%s26369_s19 + $0x3fc0] ss:$8 sps:$4 sm:$0xff]  }
 0x6da   : > { %18552 = vmatpush1.bf16.msra.mxu0 %v24667_v25  ;;  %16995 = vmatprep.subr.bf16.mxu1 %v24672_v19  ;;  %v24757_v25 = vld [vmem:[%s26369_s19 + $0x19d4] ss:$8 sps:$4 sm:$0xff]  }
 0x6db   : > { %18553 = vmatprep.subr.bf16.mxu0 %v24675_v5  ;;  %v24760_v19 = vld [vmem:[%s26369_s19 + $0x3fd4] ss:$8 sps:$4 sm:$0xff]   ;;  %v24755_v5 = vld [vmem:[%s26369_s19 + $0x19d0] ss:$8 sps:$4 sm:$0xff]  }
 0x6dd   : > { %16996 = vmatpush1.bf16.msra.mxu1 %v24670_v60  ;;  %v24758_v60 = vld [vmem:[%s26369_s19 + $0x3fd0] ss:$8 sps:$4 sm:$0xff]  }
 0x6de   : > { %18554 = vmatpush1.bf16.msra.mxu0 %v24673_v44  ;;  %17006 = vmatprep.subr.bf16.mxu1 %v24678_v7  ;;  %v24763_v44 = vld [vmem:[%s26369_s19 + $0x19e4] ss:$8 sps:$4 sm:$0xff]  }
 0x6df   : > { %18564 = vmatprep.subr.bf16.mxu0 %v24682_v11  ;;  %v24766_v7 = vld [vmem:[%s26369_s19 + $0x3fe4] ss:$8 sps:$4 sm:$0xff]   ;;  %v3114_v11 = vcombine.high %v28368_v0, %v28368_v0  ;;  %v24767_v0 = vld [vmem:[%s26369_s19 + $0x19f0] ss:$8 sps:$4 sm:$0xff]  }
 0x6e0   : > { %16998 = vmatmul.mubr.bf16.vlgmr.msra.gmra.mrb[0].mxu1 %v28467_v15 }
 0x6e1   : > { %18556 = vmatmul.mubr.bf16.vlgmr.msra.gmra.mrb[0].mxu0 %v28471_v18  ;;  %17007 = vmatpush1.bf16.msra.mxu1 %v24676_v21  ;;  %v28538_v21 = vld [vmem:[%s26387_s30 + $0x80] sm:$0xff] }
 0x6e2   : > { %18565 = vmatpush1.bf16.msra.mxu0 %v24680_v2  ;;  %17008 = vmatprep.subr.bf16.mxu1 %v24685_v38  ;;  %v24761_v2 = vld [vmem:[%s26369_s19 + $0x19e0] ss:$8 sps:$4 sm:$0xff]  }
 0x6e3   : > { %18566 = vmatprep.subr.bf16.mxu0 %v24688_v61  ;;  %17038 = vmatprep.mubr.bf16.mxu1 %v3161_v48  ;;  %v24764_v38 = vld [vmem:[%s26369_s19 + $0x3fe0] ss:$8 sps:$4 sm:$0xff]   ;;  %v24769_v61 = vld [vmem:[%s26369_s19 + $0x19f4] ss:$8 sps:$4 sm:$0xff]  }
 0x6e4   : > { %18596 = vmatprep.mubr.bf16.mxu0 %v3603_v3  ;;  %v24772_v48 = vld [vmem:[%s26369_s19 + $0x3ff4] ss:$8 sps:$4 sm:$0xff]   ;;  %v28545_v3 = vrot.slane %v3114_v11, %v26438_v51  ;;  %v24839_v11 = vld [vmem:[%s26369_s19 + $0x1ab0] ss:$8 sps:$4 sm:$0xff]  }
 0x6e5   : > { %17009 = vmatpush1.bf16.msra.mxu1 %v24683_v33  ;;  %v28549_v33 = vrot.slane %v28538_v21, %v26438_v51 }
 0x6e6   : > { %18567 = vmatpush1.bf16.msra.mxu0 %v24686_v53  ;;  %17010 = vmatprep.subr.bf16.mxu1 %v24691_v6  ;;  %v24770_v53 = vld [vmem:[%s26369_s19 + $0x3ff0] ss:$8 sps:$4 sm:$0xff]   ;;  %v24775_v6 = vld [vmem:[%s26369_s19 + $0x1a04] ss:$8 sps:$4 sm:$0xff]  }
 0x6e7   : > { %18568 = vmatprep.subr.bf16.mxu0 %v24694_v4  ;;  %v24778_v4 = vld [vmem:[%s26369_s19 + $0x4004] ss:$8 sps:$4 sm:$0xff]  }
 0x6e9   : > { %17011 = vmatpush1.bf16.msra.mxu1 %v24689_v57  ;;  %v3130_v57 = vcombine.high %v28545_v3, %v28545_v3 }
 0x6ea   : > { %18569 = vmatpush1.bf16.msra.mxu0 %v24692_v10  ;;  %17012 = vmatprep.subr.bf16.mxu1 %v24697_v42  ;;  %v3619_v10 = vcombine.high %v28549_v33, %v28549_v33  ;;  %v3159_v42 = vcombine.high %v28467_v15, %v28467_v15 }
 0x6eb   : > { %18570 = vmatprep.subr.bf16.mxu0 %v24700_v58  ;;  %v3601_v58 = vcombine.high %v28471_v18, %v28471_v18  ;;  %v24779_v18 = vld [vmem:[%s26369_s19 + $0x1a10] ss:$8 sps:$4 sm:$0xff]  }
 0x6ec   : > { %v28571_v15 = vrot.slane %v3619_v10, %v26438_v51  ;;  %v24859_v10 = vld [vmem:[%s26369_s19 + $0x1ae4] ss:$8 sps:$4 sm:$0xff]  }
 0x6ed   : > { %17013 = vmatpush1.bf16.msra.mxu1 %v24695_v26  ;;  %v24773_v26 = vld [vmem:[%s26369_s19 + $0x1a00] ss:$8 sps:$4 sm:$0xff]  }
 0x6ee   : > { %18571 = vmatpush1.bf16.msra.mxu0 %v24698_v14  ;;  %17014 = vmatprep.subr.bf16.mxu1 %v24703_v54  ;;  %v24776_v14 = vld [vmem:[%s26369_s19 + $0x4000] ss:$8 sps:$4 sm:$0xff]   ;;  %v24781_v54 = vld [vmem:[%s26369_s19 + $0x1a14] ss:$8 sps:$4 sm:$0xff]  }
 0x6ef   : > { %18572 = vmatprep.subr.bf16.mxu0 %v24706_v62  ;;  %v24784_v62 = vld [vmem:[%s26369_s19 + $0x4014] ss:$8 sps:$4 sm:$0xff]  }
 0x6f1   : > { %17015 = vmatpush1.bf16.msra.mxu1 %v24701_v9  ;;  %v28568_v9 = vrot.slane %v3130_v57, %v26438_v51  ;;  %v24854_v57 = vld [vmem:[%s26369_s19 + $0x40d0] ss:$8 sps:$4 sm:$0xff]  }
 0x6f2   : > { %18573 = vmatpush1.bf16.msra.mxu0 %v24704_v28  ;;  %17016 = vmatprep.subr.bf16.mxu1 %v24709_v29  ;;  %v24782_v28 = vld [vmem:[%s26369_s19 + $0x4010] ss:$8 sps:$4 sm:$0xff]   ;;  %v24787_v29 = vld [vmem:[%s26369_s19 + $0x1a24] ss:$8 sps:$4 sm:$0xff]  }
 0x6f3   : > { %18574 = vmatprep.subr.bf16.mxu0 %v24712_v40  ;;  %v24790_v40 = vld [vmem:[%s26369_s19 + $0x4024] ss:$8 sps:$4 sm:$0xff]  }
 0x6f5   : > { %17017 = vmatpush1.bf16.msra.mxu1 %v24707_v41  ;;  %v24785_v41 = vld [vmem:[%s26369_s19 + $0x1a20] ss:$8 sps:$4 sm:$0xff]  }
 0x6f6   : > { %18575 = vmatpush1.bf16.msra.mxu0 %v24710_v23  ;;  %17018 = vmatprep.subr.bf16.mxu1 %v24715_v22  ;;  %v24788_v23 = vld [vmem:[%s26369_s19 + $0x4020] ss:$8 sps:$4 sm:$0xff]   ;;  %v24793_v22 = vld [vmem:[%s26369_s19 + $0x1a34] ss:$8 sps:$4 sm:$0xff]  }
 0x6f7   : > { %18576 = vmatprep.subr.bf16.mxu0 %v24718_v55  ;;  %v24796_v55 = vld [vmem:[%s26369_s19 + $0x4034] ss:$8 sps:$4 sm:$0xff]  }
 0x6f9   : > { %17019 = vmatpush1.bf16.msra.mxu1 %v24713_v63  ;;  %v24791_v63 = vld [vmem:[%s26369_s19 + $0x1a30] ss:$8 sps:$4 sm:$0xff]  }
 0x6fa   : > { %18577 = vmatpush1.bf16.msra.mxu0 %v24716_v27  ;;  %17020 = vmatprep.subr.bf16.mxu1 %v24721_v30  ;;  %v24794_v27 = vld [vmem:[%s26369_s19 + $0x4030] ss:$8 sps:$4 sm:$0xff]   ;;  %v24799_v30 = vld [vmem:[%s26369_s19 + $0x1a44] ss:$8 sps:$4 sm:$0xff]  }
 0x6fb   : > { %18578 = vmatprep.subr.bf16.mxu0 %v24724_v8  ;;  %v24802_v8 = vld [vmem:[%s26369_s19 + $0x4044] ss:$8 sps:$4 sm:$0xff]  }
 0x6fd   : > { %17021 = vmatpush1.bf16.msra.mxu1 %v24719_v24  ;;  %v24797_v24 = vld [vmem:[%s26369_s19 + $0x1a40] ss:$8 sps:$4 sm:$0xff]  }
 0x6fe   : > { %18579 = vmatpush1.bf16.msra.mxu0 %v24722_v12  ;;  %17022 = vmatprep.subr.bf16.mxu1 %v24727_v49  ;;  %v24800_v12 = vld [vmem:[%s26369_s19 + $0x4040] ss:$8 sps:$4 sm:$0xff]   ;;  %v24805_v49 = vld [vmem:[%s26369_s19 + $0x1a54] ss:$8 sps:$4 sm:$0xff]  }
 0x6ff   : > { %18580 = vmatprep.subr.bf16.mxu0 %v24730_v34  ;;  %v24808_v34 = vld [vmem:[%s26369_s19 + $0x4054] ss:$8 sps:$4 sm:$0xff]  }
 0x701   : > { %17023 = vmatpush1.bf16.msra.mxu1 %v24725_v20  ;;  %v24803_v20 = vld [vmem:[%s26369_s19 + $0x1a50] ss:$8 sps:$4 sm:$0xff]  }
 0x702   : > { %18581 = vmatpush1.bf16.msra.mxu0 %v24728_v16  ;;  %17024 = vmatprep.subr.bf16.mxu1 %v24733_v50  ;;  %v24806_v16 = vld [vmem:[%s26369_s19 + $0x4050] ss:$8 sps:$4 sm:$0xff]   ;;  %v24811_v50 = vld [vmem:[%s26369_s19 + $0x1a64] ss:$8 sps:$4 sm:$0xff]  }
 0x703   : > { %18582 = vmatprep.subr.bf16.mxu0 %v24736_v35  ;;  %v24814_v35 = vld [vmem:[%s26369_s19 + $0x4064] ss:$8 sps:$4 sm:$0xff]  }
 0x705   : > { %17025 = vmatpush1.bf16.msra.mxu1 %v24731_v52  ;;  %v24809_v52 = vld [vmem:[%s26369_s19 + $0x1a60] ss:$8 sps:$4 sm:$0xff]  }
 0x706   : > { %18583 = vmatpush1.bf16.msra.mxu0 %v24734_v43  ;;  %17026 = vmatprep.subr.bf16.mxu1 %v24739_v1  ;;  %v24812_v43 = vld [vmem:[%s26369_s19 + $0x4060] ss:$8 sps:$4 sm:$0xff]   ;;  %v24817_v1 = vld [vmem:[%s26369_s19 + $0x1a74] ss:$8 sps:$4 sm:$0xff]  }
 0x707   : > { %18584 = vmatprep.subr.bf16.mxu0 %v24742_v13  ;;  %v24820_v13 = vld [vmem:[%s26369_s19 + $0x4074] ss:$8 sps:$4 sm:$0xff]  }
 0x709   : > { %17027 = vmatpush1.bf16.msra.mxu1 %v24737_v46  ;;  %v24815_v46 = vld [vmem:[%s26369_s19 + $0x1a70] ss:$8 sps:$4 sm:$0xff]  }
 0x70a   : > { %18585 = vmatpush1.bf16.msra.mxu0 %v24740_v59  ;;  %17028 = vmatprep.subr.bf16.mxu1 %v24745_v39  ;;  %v24818_v59 = vld [vmem:[%s26369_s19 + $0x4070] ss:$8 sps:$4 sm:$0xff]   ;;  %v24823_v39 = vld [vmem:[%s26369_s19 + $0x1a84] ss:$8 sps:$4 sm:$0xff]  }
 0x70b   : > { %18586 = vmatprep.subr.bf16.mxu0 %v24748_v36  ;;  %v24826_v36 = vld [vmem:[%s26369_s19 + $0x4084] ss:$8 sps:$4 sm:$0xff]  }
 0x70d   : > { %17029 = vmatpush1.bf16.msra.mxu1 %v24743_v37  ;;  %v24821_v37 = vld [vmem:[%s26369_s19 + $0x1a80] ss:$8 sps:$4 sm:$0xff]  }
 0x70e   : > { %18587 = vmatpush1.bf16.msra.mxu0 %v24746_v17  ;;  %17030 = vmatprep.subr.bf16.mxu1 %v24751_v31  ;;  %v24824_v17 = vld [vmem:[%s26369_s19 + $0x4080] ss:$8 sps:$4 sm:$0xff]   ;;  %v24829_v31 = vld [vmem:[%s26369_s19 + $0x1a94] ss:$8 sps:$4 sm:$0xff]  }
 0x70f   : > { %18588 = vmatprep.subr.bf16.mxu0 %v24754_v32  ;;  %v24832_v32 = vld [vmem:[%s26369_s19 + $0x4094] ss:$8 sps:$4 sm:$0xff]  }
 0x711   : > { %17031 = vmatpush1.bf16.msra.mxu1 %v24749_v47  ;;  %v24827_v47 = vld [vmem:[%s26369_s19 + $0x1a90] ss:$8 sps:$4 sm:$0xff]  }
 0x712   : > { %18589 = vmatpush1.bf16.msra.mxu0 %v24752_v56  ;;  %17032 = vmatprep.subr.bf16.mxu1 %v24757_v25  ;;  %v24830_v56 = vld [vmem:[%s26369_s19 + $0x4090] ss:$8 sps:$4 sm:$0xff]   ;;  %v24835_v25 = vld [vmem:[%s26369_s19 + $0x1aa4] ss:$8 sps:$4 sm:$0xff]  }
 0x713   : > { %18590 = vmatprep.subr.bf16.mxu0 %v24760_v19  ;;  %v24838_v19 = vld [vmem:[%s26369_s19 + $0x40a4] ss:$8 sps:$4 sm:$0xff]  }
 0x715   : > { %17033 = vmatpush1.bf16.msra.mxu1 %v24755_v5  ;;  %v24833_v5 = vld [vmem:[%s26369_s19 + $0x1aa0] ss:$8 sps:$4 sm:$0xff]  }
 0x716   : > { %18591 = vmatpush1.bf16.msra.mxu0 %v24758_v60  ;;  %17034 = vmatprep.subr.bf16.mxu1 %v24763_v44  ;;  %v24836_v60 = vld [vmem:[%s26369_s19 + $0x40a0] ss:$8 sps:$4 sm:$0xff]   ;;  %v24841_v44 = vld [vmem:[%s26369_s19 + $0x1ab4] ss:$8 sps:$4 sm:$0xff]  }
 0x717   : > { %18592 = vmatprep.subr.bf16.mxu0 %v24766_v7  ;;  %v24844_v7 = vld [vmem:[%s26369_s19 + $0x40b4] ss:$8 sps:$4 sm:$0xff]  }
 0x719   : > { %17035 = vmatpush1.bf16.msra.mxu1 %v24761_v2  ;;  %v24842_v2 = vld [vmem:[%s26369_s19 + $0x40b0] ss:$8 sps:$4 sm:$0xff]  }
 0x71a   : > { %18593 = vmatpush1.bf16.msra.mxu0 %v24764_v38  ;;  %17036 = vmatprep.subr.bf16.mxu1 %v24769_v61  ;;  %v24847_v38 = vld [vmem:[%s26369_s19 + $0x1ac4] ss:$8 sps:$4 sm:$0xff]  }
 0x71b   : > { %18594 = vmatprep.subr.bf16.mxu0 %v24772_v48  ;;  %v24850_v61 = vld [vmem:[%s26369_s19 + $0x40c4] ss:$8 sps:$4 sm:$0xff]   ;;  %v24845_v48 = vld [vmem:[%s26369_s19 + $0x1ac0] ss:$8 sps:$4 sm:$0xff]  }
 0x71d   : > { %17037 = vmatpush1.bf16.msra.mxu1 %v24767_v0  ;;  %v24848_v0 = vld [vmem:[%s26369_s19 + $0x40c0] ss:$8 sps:$4 sm:$0xff]  }
 0x71e   : > { %18595 = vmatpush1.bf16.msra.mxu0 %v24770_v53  ;;  %17047 = vmatprep.subr.bf16.mxu1 %v24775_v6  ;;  %v24853_v53 = vld [vmem:[%s26369_s19 + $0x1ad4] ss:$8 sps:$4 sm:$0xff]  }
 0x71f   : > { %18605 = vmatprep.subr.bf16.mxu0 %v24778_v4  ;;  %v24856_v6 = vld [vmem:[%s26369_s19 + $0x40d4] ss:$8 sps:$4 sm:$0xff]   ;;  %v24851_v4 = vld [vmem:[%s26369_s19 + $0x1ad0] ss:$8 sps:$4 sm:$0xff]  }
 0x720   : > { %17039 = vmatmul.mubr.bf16.vlgmr.msra.gmra.mrb[0].mxu1 %v3159_v42  ;;  %v24862_v42 = vld [vmem:[%s26369_s19 + $0x40e4] ss:$8 sps:$4 sm:$0xff]  }
 0x721   : > { %18597 = vmatmul.mubr.bf16.vlgmr.msra.gmra.mrb[0].mxu0 %v3601_v58  ;;  %17048 = vmatpush1.bf16.msra.mxu1 %v24773_v26  ;;  %v24857_v58 = vld [vmem:[%s26369_s19 + $0x1ae0] ss:$8 sps:$4 sm:$0xff]  }
 0x722   : > { %18606 = vmatpush1.bf16.msra.mxu0 %v24776_v14  ;;  %17049 = vmatprep.subr.bf16.mxu1 %v24781_v54  ;;  %v24860_v26 = vld [vmem:[%s26369_s19 + $0x40e0] ss:$8 sps:$4 sm:$0xff]   ;;  %v24865_v14 = vld [vmem:[%s26369_s19 + $0x1af4] ss:$8 sps:$4 sm:$0xff]  }
 0x723   : > { %18607 = vmatprep.subr.bf16.mxu0 %v24784_v62  ;;  %17079 = vmatprep.mubr.bf16.mxu1 %v28568_v9  ;;  %v24868_v54 = vld [vmem:[%s26369_s19 + $0x40f4] ss:$8 sps:$4 sm:$0xff]   ;;  %v24863_v62 = vld [vmem:[%s26369_s19 + $0x1af0] ss:$8 sps:$4 sm:$0xff]  }
 0x724   : > { %18637 = vmatprep.mubr.bf16.mxu0 %v28571_v15 }
 0x725   : > { %17050 = vmatpush1.bf16.msra.mxu1 %v24779_v18  ;;  %v24866_v18 = vld [vmem:[%s26369_s19 + $0x40f0] ss:$8 sps:$4 sm:$0xff]  }
 0x726   : > { %18608 = vmatpush1.bf16.msra.mxu0 %v24782_v28  ;;  %17051 = vmatprep.subr.bf16.mxu1 %v24787_v29  ;;  %v24872_v28 = vld [vmem:[%s26369_s19 + $0x1b04] ss:$8 sps:$4 sm:$0xff]  }
 0x727   : > { %18609 = vmatprep.subr.bf16.mxu0 %v24790_v40  ;;  %v24875_v29 = vld [vmem:[%s26369_s19 + $0x4104] ss:$8 sps:$4 sm:$0xff]   ;;  %v28637_v40 = vrot.slane %v28545_v3, %v26438_v51  ;;  %v3162_v3 = vcombine.high %v28568_v9, %v28568_v9 }
 0x728   : > { %v24884_v9 = vld [vmem:[%s26369_s19 + $0x1b24] ss:$8 sps:$4 sm:$0xff]  }
 0x729   : > { %17052 = vmatpush1.bf16.msra.mxu1 %v24785_v41  ;;  %v28641_v41 = vrot.slane %v28549_v33, %v26438_v51  ;;  %v24876_v33 = vld [vmem:[%s26369_s19 + $0x1b10] ss:$8 sps:$4 sm:$0xff]  }
 0x72a   : > { %18610 = vmatpush1.bf16.msra.mxu0 %v24788_v23  ;;  %17053 = vmatprep.subr.bf16.mxu1 %v24793_v22  ;;  %v24870_v23 = vld [vmem:[%s26369_s19 + $0x1b00] ss:$8 sps:$4 sm:$0xff]  }
 0x72b   : > { %18611 = vmatprep.subr.bf16.mxu0 %v24796_v55  ;;  %v24873_v22 = vld [vmem:[%s26369_s19 + $0x4100] ss:$8 sps:$4 sm:$0xff]   ;;  %v24878_v55 = vld [vmem:[%s26369_s19 + $0x1b14] ss:$8 sps:$4 sm:$0xff]  }
 0x72d   : > { %17054 = vmatpush1.bf16.msra.mxu1 %v24791_v63  ;;  %v24881_v63 = vld [vmem:[%s26369_s19 + $0x4114] ss:$8 sps:$4 sm:$0xff]  }
 0x72e   : > { %18612 = vmatpush1.bf16.msra.mxu0 %v24794_v27  ;;  %17055 = vmatprep.subr.bf16.mxu1 %v24799_v30  ;;  %v3651_v27 = vcombine.high %v28571_v15, %v28571_v15  ;;  %v24879_v30 = vld [vmem:[%s26369_s19 + $0x4110] ss:$8 sps:$4 sm:$0xff]   ;;  %v24882_v15 = vld [vmem:[%s26369_s19 + $0x1b20] ss:$8 sps:$4 sm:$0xff]  }
 0x72f   : > { %18613 = vmatprep.subr.bf16.mxu0 %v24802_v8  ;;  %v24887_v8 = vld [vmem:[%s26369_s19 + $0x4124] ss:$8 sps:$4 sm:$0xff]  }
 0x731   : > { %17056 = vmatpush1.bf16.msra.mxu1 %v24797_v24  ;;  %v24885_v24 = vld [vmem:[%s26369_s19 + $0x4120] ss:$8 sps:$4 sm:$0xff]  }
 0x732   : > { %18614 = vmatpush1.bf16.msra.mxu0 %v24800_v12  ;;  %17057 = vmatprep.subr.bf16.mxu1 %v24805_v49  ;;  %v24890_v12 = vld [vmem:[%s26369_s19 + $0x1b34] ss:$8 sps:$4 sm:$0xff]  }
 0x733   : > { %18615 = vmatprep.subr.bf16.mxu0 %v24808_v34  ;;  %v24893_v49 = vld [vmem:[%s26369_s19 + $0x4134] ss:$8 sps:$4 sm:$0xff]   ;;  %v24888_v34 = vld [vmem:[%s26369_s19 + $0x1b30] ss:$8 sps:$4 sm:$0xff]  }
 0x735   : > { %17058 = vmatpush1.bf16.msra.mxu1 %v24803_v20  ;;  %v24891_v20 = vld [vmem:[%s26369_s19 + $0x4130] ss:$8 sps:$4 sm:$0xff]  }
 0x736   : > { %18616 = vmatpush1.bf16.msra.mxu0 %v24806_v16  ;;  %17059 = vmatprep.subr.bf16.mxu1 %v24811_v50  ;;  %v24896_v16 = vld [vmem:[%s26369_s19 + $0x1b44] ss:$8 sps:$4 sm:$0xff]  }
 0x737   : > { %18617 = vmatprep.subr.bf16.mxu0 %v24814_v35  ;;  %v24899_v50 = vld [vmem:[%s26369_s19 + $0x4144] ss:$8 sps:$4 sm:$0xff]   ;;  %v24894_v35 = vld [vmem:[%s26369_s19 + $0x1b40] ss:$8 sps:$4 sm:$0xff]  }
 0x739   : > { %17060 = vmatpush1.bf16.msra.mxu1 %v24809_v52  ;;  %v24897_v52 = vld [vmem:[%s26369_s19 + $0x4140] ss:$8 sps:$4 sm:$0xff]  }
 0x73a   : > { %18618 = vmatpush1.bf16.msra.mxu0 %v24812_v43  ;;  %17061 = vmatprep.subr.bf16.mxu1 %v24817_v1  ;;  %v24902_v43 = vld [vmem:[%s26369_s19 + $0x1b54] ss:$8 sps:$4 sm:$0xff]  }
 0x73b   : > { %18619 = vmatprep.subr.bf16.mxu0 %v24820_v13  ;;  %v24905_v1 = vld [vmem:[%s26369_s19 + $0x4154] ss:$8 sps:$4 sm:$0xff]   ;;  %v24900_v13 = vld [vmem:[%s26369_s19 + $0x1b50] ss:$8 sps:$4 sm:$0xff]  }
 0x73d   : > { %17062 = vmatpush1.bf16.msra.mxu1 %v24815_v46  ;;  %v24903_v46 = vld [vmem:[%s26369_s19 + $0x4150] ss:$8 sps:$4 sm:$0xff]  }
 0x73e   : > { %18620 = vmatpush1.bf16.msra.mxu0 %v24818_v59  ;;  %17063 = vmatprep.subr.bf16.mxu1 %v24823_v39  ;;  %v24908_v59 = vld [vmem:[%s26369_s19 + $0x1b64] ss:$8 sps:$4 sm:$0xff]  }
 0x73f   : > { %18621 = vmatprep.subr.bf16.mxu0 %v24826_v36  ;;  %v24911_v39 = vld [vmem:[%s26369_s19 + $0x4164] ss:$8 sps:$4 sm:$0xff]   ;;  %v24906_v36 = vld [vmem:[%s26369_s19 + $0x1b60] ss:$8 sps:$4 sm:$0xff]  }
 0x741   : > { %17064 = vmatpush1.bf16.msra.mxu1 %v24821_v37  ;;  %v24909_v37 = vld [vmem:[%s26369_s19 + $0x4160] ss:$8 sps:$4 sm:$0xff]  }
 0x742   : > { %18622 = vmatpush1.bf16.msra.mxu0 %v24824_v17  ;;  %17065 = vmatprep.subr.bf16.mxu1 %v24829_v31  ;;  %v24914_v17 = vld [vmem:[%s26369_s19 + $0x1b74] ss:$8 sps:$4 sm:$0xff]  }
 0x743   : > { %18623 = vmatprep.subr.bf16.mxu0 %v24832_v32  ;;  %v24917_v31 = vld [vmem:[%s26369_s19 + $0x4174] ss:$8 sps:$4 sm:$0xff]   ;;  %v24912_v32 = vld [vmem:[%s26369_s19 + $0x1b70] ss:$8 sps:$4 sm:$0xff]  }
 0x745   : > { %17066 = vmatpush1.bf16.msra.mxu1 %v24827_v47  ;;  %v24915_v47 = vld [vmem:[%s26369_s19 + $0x4170] ss:$8 sps:$4 sm:$0xff]  }
 0x746   : > { %18624 = vmatpush1.bf16.msra.mxu0 %v24830_v56  ;;  %17067 = vmatprep.subr.bf16.mxu1 %v24835_v25  ;;  %v24920_v56 = vld [vmem:[%s26369_s19 + $0x1b84] ss:$8 sps:$4 sm:$0xff]  }
 0x747   : > { %18625 = vmatprep.subr.bf16.mxu0 %v24838_v19  ;;  %v24923_v25 = vld [vmem:[%s26369_s19 + $0x4184] ss:$8 sps:$4 sm:$0xff]   ;;  %v24918_v19 = vld [vmem:[%s26369_s19 + $0x1b80] ss:$8 sps:$4 sm:$0xff]  }
 0x749   : > { %17068 = vmatpush1.bf16.msra.mxu1 %v24833_v5  ;;  %v24921_v5 = vld [vmem:[%s26369_s19 + $0x4180] ss:$8 sps:$4 sm:$0xff]  }
 0x74a   : > { %18626 = vmatpush1.bf16.msra.mxu0 %v24836_v60  ;;  %17069 = vmatprep.subr.bf16.mxu1 %v24841_v44  ;;  %v24926_v60 = vld [vmem:[%s26369_s19 + $0x1b94] ss:$8 sps:$4 sm:$0xff]  }
 0x74b   : > { %18627 = vmatprep.subr.bf16.mxu0 %v24844_v7  ;;  %v24929_v44 = vld [vmem:[%s26369_s19 + $0x4194] ss:$8 sps:$4 sm:$0xff]   ;;  %v24924_v7 = vld [vmem:[%s26369_s19 + $0x1b90] ss:$8 sps:$4 sm:$0xff]  }
 0x74d   : > { %17070 = vmatpush1.bf16.msra.mxu1 %v24839_v11  ;;  %v24927_v11 = vld [vmem:[%s26369_s19 + $0x4190] ss:$8 sps:$4 sm:$0xff]  }
 0x74e   : > { %18628 = vmatpush1.bf16.msra.mxu0 %v24842_v2  ;;  %17071 = vmatprep.subr.bf16.mxu1 %v24847_v38  ;;  %v24932_v2 = vld [vmem:[%s26369_s19 + $0x1ba4] ss:$8 sps:$4 sm:$0xff]  }
 0x74f   : > { %18629 = vmatprep.subr.bf16.mxu0 %v24850_v61  ;;  %v24935_v38 = vld [vmem:[%s26369_s19 + $0x41a4] ss:$8 sps:$4 sm:$0xff]   ;;  %v24930_v61 = vld [vmem:[%s26369_s19 + $0x1ba0] ss:$8 sps:$4 sm:$0xff]  }
 0x751   : > { %17072 = vmatpush1.bf16.msra.mxu1 %v24845_v48  ;;  %v24933_v48 = vld [vmem:[%s26369_s19 + $0x41a0] ss:$8 sps:$4 sm:$0xff]  }
 0x752   : > { %18630 = vmatpush1.bf16.msra.mxu0 %v24848_v0  ;;  %17073 = vmatprep.subr.bf16.mxu1 %v24853_v53  ;;  %v24938_v0 = vld [vmem:[%s26369_s19 + $0x1bb4] ss:$8 sps:$4 sm:$0xff]  }
 0x753   : > { %18631 = vmatprep.subr.bf16.mxu0 %v24856_v6  ;;  %v24941_v53 = vld [vmem:[%s26369_s19 + $0x41b4] ss:$8 sps:$4 sm:$0xff]   ;;  %v24936_v6 = vld [vmem:[%s26369_s19 + $0x1bb0] ss:$8 sps:$4 sm:$0xff]  }
 0x755   : > { %17074 = vmatpush1.bf16.msra.mxu1 %v24851_v4  ;;  %v24939_v4 = vld [vmem:[%s26369_s19 + $0x41b0] ss:$8 sps:$4 sm:$0xff]  }
 0x756   : > { %18632 = vmatpush1.bf16.msra.mxu0 %v24854_v57  ;;  %17075 = vmatprep.subr.bf16.mxu1 %v24859_v10  ;;  %v24944_v57 = vld [vmem:[%s26369_s19 + $0x1bc4] ss:$8 sps:$4 sm:$0xff]  }
 0x757   : > { %18633 = vmatprep.subr.bf16.mxu0 %v24862_v42  ;;  %v24947_v10 = vld [vmem:[%s26369_s19 + $0x41c4] ss:$8 sps:$4 sm:$0xff]   ;;  %v24942_v42 = vld [vmem:[%s26369_s19 + $0x1bc0] ss:$8 sps:$4 sm:$0xff]  }
 0x759   : > { %17076 = vmatpush1.bf16.msra.mxu1 %v24857_v58  ;;  %v24945_v58 = vld [vmem:[%s26369_s19 + $0x41c0] ss:$8 sps:$4 sm:$0xff]  }
 0x75a   : > { %18634 = vmatpush1.bf16.msra.mxu0 %v24860_v26  ;;  %17077 = vmatprep.subr.bf16.mxu1 %v24865_v14  ;;  %v24950_v26 = vld [vmem:[%s26369_s19 + $0x1bd4] ss:$8 sps:$4 sm:$0xff]  }
 0x75b   : > { %18635 = vmatprep.subr.bf16.mxu0 %v24868_v54  ;;  %v24953_v14 = vld [vmem:[%s26369_s19 + $0x41d4] ss:$8 sps:$4 sm:$0xff]   ;;  %v24948_v54 = vld [vmem:[%s26369_s19 + $0x1bd0] ss:$8 sps:$4 sm:$0xff]  }
 0x75d   : > { %17078 = vmatpush1.bf16.msra.mxu1 %v24863_v62  ;;  %v24951_v62 = vld [vmem:[%s26369_s19 + $0x41d0] ss:$8 sps:$4 sm:$0xff]  }
 0x75e   : > { %18636 = vmatpush1.bf16.msra.mxu0 %v24866_v18  ;;  %17088 = vmatprep.subr.bf16.mxu1 %v24872_v28  ;;  %v24956_v18 = vld [vmem:[%s26369_s19 + $0x1be4] ss:$8 sps:$4 sm:$0xff]  }
 0x75f   : > { %18646 = vmatprep.subr.bf16.mxu0 %v24875_v29  ;;  %v24959_v28 = vld [vmem:[%s26369_s19 + $0x41e4] ss:$8 sps:$4 sm:$0xff]   ;;  %v3604_v29 = vcombine.high %v28538_v21, %v28538_v21  ;;  %v24960_v21 = vld [vmem:[%s26369_s19 + $0x1bf0] ss:$8 sps:$4 sm:$0xff]  }
 0x760   : > { %17080 = vmatmul.mubr.bf16.vlgmr.msra.gmra.mrb[0].mxu1 %v28637_v40 }
 0x761   : > { %18638 = vmatmul.mubr.bf16.vlgmr.msra.gmra.mrb[0].mxu0 %v28641_v41  ;;  %17089 = vmatpush1.bf16.msra.mxu1 %v24870_v23  ;;  %v28708_v23 = vld [vmem:[%s26387_s30 + $0x38] sm:$0xff] }
 0x762   : > { %18647 = vmatpush1.bf16.msra.mxu0 %v24873_v22  ;;  %17090 = vmatprep.subr.bf16.mxu1 %v24878_v55  ;;  %v24954_v22 = vld [vmem:[%s26369_s19 + $0x1be0] ss:$8 sps:$4 sm:$0xff]  }
 0x763   : > { %18648 = vmatprep.subr.bf16.mxu0 %v24881_v63  ;;  %17120 = vmatprep.mubr.bf16.mxu1 %v3162_v3  ;;  %v24957_v55 = vld [vmem:[%s26369_s19 + $0x41e0] ss:$8 sps:$4 sm:$0xff]   ;;  %v24962_v63 = vld [vmem:[%s26369_s19 + $0x1bf4] ss:$8 sps:$4 sm:$0xff]  }
 0x764   : > { %18678 = vmatprep.mubr.bf16.mxu0 %v3651_v27  ;;  %v24965_v3 = vld [vmem:[%s26369_s19 + $0x41f4] ss:$8 sps:$4 sm:$0xff]   ;;  %v28716_v27 = vrot.slane %v28708_v23, %v26438_v51 }
 0x765   : > { %17091 = vmatpush1.bf16.msra.mxu1 %v24876_v33  ;;  %v28719_v33 = vrot.slane %v3604_v29, %v26438_v51  ;;  %v25032_v29 = vld [vmem:[%s26369_s19 + $0x1cb0] ss:$8 sps:$4 sm:$0xff]  }
 0x766   : > { %18649 = vmatpush1.bf16.msra.mxu0 %v24879_v30  ;;  %17092 = vmatprep.subr.bf16.mxu1 %v24884_v9  ;;  %v24963_v30 = vld [vmem:[%s26369_s19 + $0x41f0] ss:$8 sps:$4 sm:$0xff]   ;;  %v24968_v9 = vld [vmem:[%s26369_s19 + $0x1c04] ss:$8 sps:$4 sm:$0xff]  }
 0x767   : > { %18650 = vmatprep.subr.bf16.mxu0 %v24887_v8  ;;  %v24971_v8 = vld [vmem:[%s26369_s19 + $0x4204] ss:$8 sps:$4 sm:$0xff]  }
 0x769   : > { %17093 = vmatpush1.bf16.msra.mxu1 %v24882_v15  ;;  %v3178_v15 = vcombine.high %v28716_v27, %v28716_v27 }
 0x76a   : > { %18651 = vmatpush1.bf16.msra.mxu0 %v24885_v24  ;;  %17094 = vmatprep.subr.bf16.mxu1 %v24890_v12  ;;  %v3620_v24 = vcombine.high %v28719_v33, %v28719_v33  ;;  %v3160_v12 = vcombine.high %v28637_v40, %v28637_v40 }
 0x76b   : > { %18652 = vmatprep.subr.bf16.mxu0 %v24893_v49  ;;  %v3649_v49 = vcombine.high %v28641_v41, %v28641_v41  ;;  %v24972_v41 = vld [vmem:[%s26369_s19 + $0x1c10] ss:$8 sps:$4 sm:$0xff]  }
 0x76c   : > { %v28741_v40 = vrot.slane %v3620_v24, %v26438_v51  ;;  %v25052_v24 = vld [vmem:[%s26369_s19 + $0x1ce4] ss:$8 sps:$4 sm:$0xff]  }
 0x76d   : > { %17095 = vmatpush1.bf16.msra.mxu1 %v24888_v34  ;;  %v24966_v34 = vld [vmem:[%s26369_s19 + $0x1c00] ss:$8 sps:$4 sm:$0xff]  }
 0x76e   : > { %18653 = vmatpush1.bf16.msra.mxu0 %v24891_v20  ;;  %17096 = vmatprep.subr.bf16.mxu1 %v24896_v16  ;;  %v24969_v20 = vld [vmem:[%s26369_s19 + $0x4200] ss:$8 sps:$4 sm:$0xff]   ;;  %v24974_v16 = vld [vmem:[%s26369_s19 + $0x1c14] ss:$8 sps:$4 sm:$0xff]  }
 0x76f   : > { %18654 = vmatprep.subr.bf16.mxu0 %v24899_v50  ;;  %v24977_v50 = vld [vmem:[%s26369_s19 + $0x4214] ss:$8 sps:$4 sm:$0xff]  }
 0x771   : > { %17097 = vmatpush1.bf16.msra.mxu1 %v24894_v35  ;;  %v28738_v35 = vrot.slane %v3178_v15, %v26438_v51  ;;  %v25047_v15 = vld [vmem:[%s26369_s19 + $0x42d0] ss:$8 sps:$4 sm:$0xff]  }
 0x772   : > { %18655 = vmatpush1.bf16.msra.mxu0 %v24897_v52  ;;  %17098 = vmatprep.subr.bf16.mxu1 %v24902_v43  ;;  %v24975_v52 = vld [vmem:[%s26369_s19 + $0x4210] ss:$8 sps:$4 sm:$0xff]   ;;  %v24980_v43 = vld [vmem:[%s26369_s19 + $0x1c24] ss:$8 sps:$4 sm:$0xff]  }
 0x773   : > { %18656 = vmatprep.subr.bf16.mxu0 %v24905_v1  ;;  %v24983_v1 = vld [vmem:[%s26369_s19 + $0x4224] ss:$8 sps:$4 sm:$0xff]  }
 0x775   : > { %17099 = vmatpush1.bf16.msra.mxu1 %v24900_v13  ;;  %v24978_v13 = vld [vmem:[%s26369_s19 + $0x1c20] ss:$8 sps:$4 sm:$0xff]  }
 0x776   : > { %18657 = vmatpush1.bf16.msra.mxu0 %v24903_v46  ;;  %17100 = vmatprep.subr.bf16.mxu1 %v24908_v59  ;;  %v24981_v46 = vld [vmem:[%s26369_s19 + $0x4220] ss:$8 sps:$4 sm:$0xff]   ;;  %v24986_v59 = vld [vmem:[%s26369_s19 + $0x1c34] ss:$8 sps:$4 sm:$0xff]  }
 0x777   : > { %18658 = vmatprep.subr.bf16.mxu0 %v24911_v39  ;;  %v24989_v39 = vld [vmem:[%s26369_s19 + $0x4234] ss:$8 sps:$4 sm:$0xff]  }
 0x779   : > { %17101 = vmatpush1.bf16.msra.mxu1 %v24906_v36  ;;  %v24984_v36 = vld [vmem:[%s26369_s19 + $0x1c30] ss:$8 sps:$4 sm:$0xff]  }
 0x77a   : > { %18659 = vmatpush1.bf16.msra.mxu0 %v24909_v37  ;;  %17102 = vmatprep.subr.bf16.mxu1 %v24914_v17  ;;  %v24987_v37 = vld [vmem:[%s26369_s19 + $0x4230] ss:$8 sps:$4 sm:$0xff]   ;;  %v24992_v17 = vld [vmem:[%s26369_s19 + $0x1c44] ss:$8 sps:$4 sm:$0xff]  }
 0x77b   : > { %18660 = vmatprep.subr.bf16.mxu0 %v24917_v31  ;;  %v24995_v31 = vld [vmem:[%s26369_s19 + $0x4244] ss:$8 sps:$4 sm:$0xff]  }
 0x77d   : > { %17103 = vmatpush1.bf16.msra.mxu1 %v24912_v32  ;;  %v24990_v32 = vld [vmem:[%s26369_s19 + $0x1c40] ss:$8 sps:$4 sm:$0xff]  }
 0x77e   : > { %18661 = vmatpush1.bf16.msra.mxu0 %v24915_v47  ;;  %17104 = vmatprep.subr.bf16.mxu1 %v24920_v56  ;;  %v24993_v47 = vld [vmem:[%s26369_s19 + $0x4240] ss:$8 sps:$4 sm:$0xff]   ;;  %v24998_v56 = vld [vmem:[%s26369_s19 + $0x1c54] ss:$8 sps:$4 sm:$0xff]  }
 0x77f   : > { %18662 = vmatprep.subr.bf16.mxu0 %v24923_v25  ;;  %v25001_v25 = vld [vmem:[%s26369_s19 + $0x4254] ss:$8 sps:$4 sm:$0xff]  }
 0x781   : > { %17105 = vmatpush1.bf16.msra.mxu1 %v24918_v19  ;;  %v24996_v19 = vld [vmem:[%s26369_s19 + $0x1c50] ss:$8 sps:$4 sm:$0xff]  }
 0x782   : > { %18663 = vmatpush1.bf16.msra.mxu0 %v24921_v5  ;;  %17106 = vmatprep.subr.bf16.mxu1 %v24926_v60  ;;  %v24999_v5 = vld [vmem:[%s26369_s19 + $0x4250] ss:$8 sps:$4 sm:$0xff]   ;;  %v25004_v60 = vld [vmem:[%s26369_s19 + $0x1c64] ss:$8 sps:$4 sm:$0xff]  }
 0x783   : > { %18664 = vmatprep.subr.bf16.mxu0 %v24929_v44  ;;  %v25007_v44 = vld [vmem:[%s26369_s19 + $0x4264] ss:$8 sps:$4 sm:$0xff]  }
 0x785   : > { %17107 = vmatpush1.bf16.msra.mxu1 %v24924_v7  ;;  %v25002_v7 = vld [vmem:[%s26369_s19 + $0x1c60] ss:$8 sps:$4 sm:$0xff]  }
 0x786   : > { %18665 = vmatpush1.bf16.msra.mxu0 %v24927_v11  ;;  %17108 = vmatprep.subr.bf16.mxu1 %v24932_v2  ;;  %v25005_v11 = vld [vmem:[%s26369_s19 + $0x4260] ss:$8 sps:$4 sm:$0xff]   ;;  %v25010_v2 = vld [vmem:[%s26369_s19 + $0x1c74] ss:$8 sps:$4 sm:$0xff]  }
 0x787   : > { %18666 = vmatprep.subr.bf16.mxu0 %v24935_v38  ;;  %v25013_v38 = vld [vmem:[%s26369_s19 + $0x4274] ss:$8 sps:$4 sm:$0xff]  }
 0x789   : > { %17109 = vmatpush1.bf16.msra.mxu1 %v24930_v61  ;;  %v25008_v61 = vld [vmem:[%s26369_s19 + $0x1c70] ss:$8 sps:$4 sm:$0xff]  }
 0x78a   : > { %18667 = vmatpush1.bf16.msra.mxu0 %v24933_v48  ;;  %17110 = vmatprep.subr.bf16.mxu1 %v24938_v0  ;;  %v25011_v48 = vld [vmem:[%s26369_s19 + $0x4270] ss:$8 sps:$4 sm:$0xff]   ;;  %v25016_v0 = vld [vmem:[%s26369_s19 + $0x1c84] ss:$8 sps:$4 sm:$0xff]  }
 0x78b   : > { %18668 = vmatprep.subr.bf16.mxu0 %v24941_v53  ;;  %v25019_v53 = vld [vmem:[%s26369_s19 + $0x4284] ss:$8 sps:$4 sm:$0xff]  }
 0x78d   : > { %17111 = vmatpush1.bf16.msra.mxu1 %v24936_v6  ;;  %v25014_v6 = vld [vmem:[%s26369_s19 + $0x1c80] ss:$8 sps:$4 sm:$0xff]  }
 0x78e   : > { %18669 = vmatpush1.bf16.msra.mxu0 %v24939_v4  ;;  %17112 = vmatprep.subr.bf16.mxu1 %v24944_v57  ;;  %v25017_v4 = vld [vmem:[%s26369_s19 + $0x4280] ss:$8 sps:$4 sm:$0xff]   ;;  %v25022_v57 = vld [vmem:[%s26369_s19 + $0x1c94] ss:$8 sps:$4 sm:$0xff]  }
 0x78f   : > { %18670 = vmatprep.subr.bf16.mxu0 %v24947_v10  ;;  %v25025_v10 = vld [vmem:[%s26369_s19 + $0x4294] ss:$8 sps:$4 sm:$0xff]  }
 0x791   : > { %17113 = vmatpush1.bf16.msra.mxu1 %v24942_v42  ;;  %v25020_v42 = vld [vmem:[%s26369_s19 + $0x1c90] ss:$8 sps:$4 sm:$0xff]  }
 0x792   : > { %18671 = vmatpush1.bf16.msra.mxu0 %v24945_v58  ;;  %17114 = vmatprep.subr.bf16.mxu1 %v24950_v26  ;;  %v25023_v58 = vld [vmem:[%s26369_s19 + $0x4290] ss:$8 sps:$4 sm:$0xff]   ;;  %v25028_v26 = vld [vmem:[%s26369_s19 + $0x1ca4] ss:$8 sps:$4 sm:$0xff]  }
 0x793   : > { %18672 = vmatprep.subr.bf16.mxu0 %v24953_v14  ;;  %v25031_v14 = vld [vmem:[%s26369_s19 + $0x42a4] ss:$8 sps:$4 sm:$0xff]  }
 0x795   : > { %17115 = vmatpush1.bf16.msra.mxu1 %v24948_v54  ;;  %v25026_v54 = vld [vmem:[%s26369_s19 + $0x1ca0] ss:$8 sps:$4 sm:$0xff]  }
 0x796   : > { %18673 = vmatpush1.bf16.msra.mxu0 %v24951_v62  ;;  %17116 = vmatprep.subr.bf16.mxu1 %v24956_v18  ;;  %v25029_v62 = vld [vmem:[%s26369_s19 + $0x42a0] ss:$8 sps:$4 sm:$0xff]   ;;  %v25034_v18 = vld [vmem:[%s26369_s19 + $0x1cb4] ss:$8 sps:$4 sm:$0xff]  }
 0x797   : > { %18674 = vmatprep.subr.bf16.mxu0 %v24959_v28  ;;  %v25037_v28 = vld [vmem:[%s26369_s19 + $0x42b4] ss:$8 sps:$4 sm:$0xff]  }
 0x799   : > { %17117 = vmatpush1.bf16.msra.mxu1 %v24954_v22  ;;  %v25035_v22 = vld [vmem:[%s26369_s19 + $0x42b0] ss:$8 sps:$4 sm:$0xff]  }
 0x79a   : > { %18675 = vmatpush1.bf16.msra.mxu0 %v24957_v55  ;;  %17118 = vmatprep.subr.bf16.mxu1 %v24962_v63  ;;  %v25040_v55 = vld [vmem:[%s26369_s19 + $0x1cc4] ss:$8 sps:$4 sm:$0xff]  }
 0x79b   : > { %18676 = vmatprep.subr.bf16.mxu0 %v24965_v3  ;;  %v25043_v63 = vld [vmem:[%s26369_s19 + $0x42c4] ss:$8 sps:$4 sm:$0xff]   ;;  %v25038_v3 = vld [vmem:[%s26369_s19 + $0x1cc0] ss:$8 sps:$4 sm:$0xff]  }
 0x79d   : > { %17119 = vmatpush1.bf16.msra.mxu1 %v24960_v21  ;;  %v25041_v21 = vld [vmem:[%s26369_s19 + $0x42c0] ss:$8 sps:$4 sm:$0xff]  }
 0x79e   : > { %18677 = vmatpush1.bf16.msra.mxu0 %v24963_v30  ;;  %17129 = vmatprep.subr.bf16.mxu1 %v24968_v9  ;;  %v25046_v30 = vld [vmem:[%s26369_s19 + $0x1cd4] ss:$8 sps:$4 sm:$0xff]  }
 0x79f   : > { %18687 = vmatprep.subr.bf16.mxu0 %v24971_v8  ;;  %v25049_v9 = vld [vmem:[%s26369_s19 + $0x42d4] ss:$8 sps:$4 sm:$0xff]   ;;  %v25044_v8 = vld [vmem:[%s26369_s19 + $0x1cd0] ss:$8 sps:$4 sm:$0xff]  }
 0x7a0   : > { %17121 = vmatmul.mubr.bf16.vlgmr.msra.gmra.mrb[0].mxu1 %v3160_v12  ;;  %v25055_v12 = vld [vmem:[%s26369_s19 + $0x42e4] ss:$8 sps:$4 sm:$0xff]  }
 0x7a1   : > { %18679 = vmatmul.mubr.bf16.vlgmr.msra.gmra.mrb[0].mxu0 %v3649_v49  ;;  %17130 = vmatpush1.bf16.msra.mxu1 %v24966_v34  ;;  %v25050_v49 = vld [vmem:[%s26369_s19 + $0x1ce0] ss:$8 sps:$4 sm:$0xff]  }
 0x7a2   : > { %18688 = vmatpush1.bf16.msra.mxu0 %v24969_v20  ;;  %17131 = vmatprep.subr.bf16.mxu1 %v24974_v16  ;;  %v25053_v34 = vld [vmem:[%s26369_s19 + $0x42e0] ss:$8 sps:$4 sm:$0xff]   ;;  %v25058_v20 = vld [vmem:[%s26369_s19 + $0x1cf4] ss:$8 sps:$4 sm:$0xff]  }
 0x7a3   : > { %18689 = vmatprep.subr.bf16.mxu0 %v24977_v50  ;;  %17161 = vmatprep.mubr.bf16.mxu1 %v28738_v35  ;;  %v25061_v16 = vld [vmem:[%s26369_s19 + $0x42f4] ss:$8 sps:$4 sm:$0xff]   ;;  %v25056_v50 = vld [vmem:[%s26369_s19 + $0x1cf0] ss:$8 sps:$4 sm:$0xff]  }
 0x7a4   : > { %18719 = vmatprep.mubr.bf16.mxu0 %v28741_v40 }
 0x7a5   : > { %17132 = vmatpush1.bf16.msra.mxu1 %v24972_v41  ;;  %v25059_v41 = vld [vmem:[%s26369_s19 + $0x42f0] ss:$8 sps:$4 sm:$0xff]  }
 0x7a6   : > { %18690 = vmatpush1.bf16.msra.mxu0 %v24975_v52  ;;  %17133 = vmatprep.subr.bf16.mxu1 %v24980_v43  ;;  %v25064_v52 = vld [vmem:[%s26369_s19 + $0x1d04] ss:$8 sps:$4 sm:$0xff]  }
 0x7a7   : > { %18691 = vmatprep.subr.bf16.mxu0 %v24983_v1  ;;  %v25068_v43 = vld [vmem:[%s26369_s19 + $0x4304] ss:$8 sps:$4 sm:$0xff]   ;;  %v28807_v1 = vrot.slane %v28716_v27, %v26438_v51  ;;  %v3210_v27 = vcombine.high %v28738_v35, %v28738_v35 }
 0x7a8   : > { %v25077_v35 = vld [vmem:[%s26369_s19 + $0x1d24] ss:$8 sps:$4 sm:$0xff]  }
 0x7a9   : > { %17134 = vmatpush1.bf16.msra.mxu1 %v24978_v13  ;;  %v28811_v13 = vrot.slane %v28719_v33, %v26438_v51  ;;  %v25069_v33 = vld [vmem:[%s26369_s19 + $0x1d10] ss:$8 sps:$4 sm:$0xff]  }
 0x7aa   : > { %18692 = vmatpush1.bf16.msra.mxu0 %v24981_v46  ;;  %17135 = vmatprep.subr.bf16.mxu1 %v24986_v59  ;;  %v25062_v46 = vld [vmem:[%s26369_s19 + $0x1d00] ss:$8 sps:$4 sm:$0xff]  }
 0x7ab   : > { %18693 = vmatprep.subr.bf16.mxu0 %v24989_v39  ;;  %v25066_v59 = vld [vmem:[%s26369_s19 + $0x4300] ss:$8 sps:$4 sm:$0xff]   ;;  %v25071_v39 = vld [vmem:[%s26369_s19 + $0x1d14] ss:$8 sps:$4 sm:$0xff]  }
 0x7ad   : > { %17136 = vmatpush1.bf16.msra.mxu1 %v24984_v36  ;;  %v25074_v36 = vld [vmem:[%s26369_s19 + $0x4314] ss:$8 sps:$4 sm:$0xff]  }
 0x7ae   : > { %18694 = vmatpush1.bf16.msra.mxu0 %v24987_v37  ;;  %17137 = vmatprep.subr.bf16.mxu1 %v24992_v17  ;;  %v3652_v37 = vcombine.high %v28741_v40, %v28741_v40  ;;  %v25072_v17 = vld [vmem:[%s26369_s19 + $0x4310] ss:$8 sps:$4 sm:$0xff]   ;;  %v25075_v40 = vld [vmem:[%s26369_s19 + $0x1d20] ss:$8 sps:$4 sm:$0xff]  }
 0x7af   : > { %18695 = vmatprep.subr.bf16.mxu0 %v24995_v31  ;;  %v25080_v31 = vld [vmem:[%s26369_s19 + $0x4324] ss:$8 sps:$4 sm:$0xff]  }
 0x7b1   : > { %17138 = vmatpush1.bf16.msra.mxu1 %v24990_v32  ;;  %v25078_v32 = vld [vmem:[%s26369_s19 + $0x4320] ss:$8 sps:$4 sm:$0xff]  }
 0x7b2   : > { %18696 = vmatpush1.bf16.msra.mxu0 %v24993_v47  ;;  %17139 = vmatprep.subr.bf16.mxu1 %v24998_v56  ;;  %v25083_v47 = vld [vmem:[%s26369_s19 + $0x1d34] ss:$8 sps:$4 sm:$0xff]  }
 0x7b3   : > { %18697 = vmatprep.subr.bf16.mxu0 %v25001_v25  ;;  %v25086_v56 = vld [vmem:[%s26369_s19 + $0x4334] ss:$8 sps:$4 sm:$0xff]   ;;  %v25081_v25 = vld [vmem:[%s26369_s19 + $0x1d30] ss:$8 sps:$4 sm:$0xff]  }
 0x7b5   : > { %17140 = vmatpush1.bf16.msra.mxu1 %v24996_v19  ;;  %v25084_v19 = vld [vmem:[%s26369_s19 + $0x4330] ss:$8 sps:$4 sm:$0xff]  }
 0x7b6   : > { %18698 = vmatpush1.bf16.msra.mxu0 %v24999_v5  ;;  %17141 = vmatprep.subr.bf16.mxu1 %v25004_v60  ;;  %v25089_v5 = vld [vmem:[%s26369_s19 + $0x1d44] ss:$8 sps:$4 sm:$0xff]  }
 0x7b7   : > { %18699 = vmatprep.subr.bf16.mxu0 %v25007_v44  ;;  %v25092_v60 = vld [vmem:[%s26369_s19 + $0x4344] ss:$8 sps:$4 sm:$0xff]   ;;  %v25087_v44 = vld [vmem:[%s26369_s19 + $0x1d40] ss:$8 sps:$4 sm:$0xff]  }
 0x7b9   : > { %17142 = vmatpush1.bf16.msra.mxu1 %v25002_v7  ;;  %v25090_v7 = vld [vmem:[%s26369_s19 + $0x4340] ss:$8 sps:$4 sm:$0xff]  }
 0x7ba   : > { %18700 = vmatpush1.bf16.msra.mxu0 %v25005_v11  ;;  %17143 = vmatprep.subr.bf16.mxu1 %v25010_v2  ;;  %v25095_v11 = vld [vmem:[%s26369_s19 + $0x1d54] ss:$8 sps:$4 sm:$0xff]  }
 0x7bb   : > { %18701 = vmatprep.subr.bf16.mxu0 %v25013_v38  ;;  %v25098_v2 = vld [vmem:[%s26369_s19 + $0x4354] ss:$8 sps:$4 sm:$0xff]   ;;  %v25093_v38 = vld [vmem:[%s26369_s19 + $0x1d50] ss:$8 sps:$4 sm:$0xff]  }
 0x7bd   : > { %17144 = vmatpush1.bf16.msra.mxu1 %v25008_v61  ;;  %v25096_v61 = vld [vmem:[%s26369_s19 + $0x4350] ss:$8 sps:$4 sm:$0xff]  }
 0x7be   : > { %18702 = vmatpush1.bf16.msra.mxu0 %v25011_v48  ;;  %17145 = vmatprep.subr.bf16.mxu1 %v25016_v0  ;;  %v25101_v48 = vld [vmem:[%s26369_s19 + $0x1d64] ss:$8 sps:$4 sm:$0xff]  }
 0x7bf   : > { %18703 = vmatprep.subr.bf16.mxu0 %v25019_v53  ;;  %v25104_v0 = vld [vmem:[%s26369_s19 + $0x4364] ss:$8 sps:$4 sm:$0xff]   ;;  %v25099_v53 = vld [vmem:[%s26369_s19 + $0x1d60] ss:$8 sps:$4 sm:$0xff]  }
 0x7c1   : > { %17146 = vmatpush1.bf16.msra.mxu1 %v25014_v6  ;;  %v25102_v6 = vld [vmem:[%s26369_s19 + $0x4360] ss:$8 sps:$4 sm:$0xff]  }
 0x7c2   : > { %18704 = vmatpush1.bf16.msra.mxu0 %v25017_v4  ;;  %17147 = vmatprep.subr.bf16.mxu1 %v25022_v57  ;;  %v25107_v4 = vld [vmem:[%s26369_s19 + $0x1d74] ss:$8 sps:$4 sm:$0xff]  }
 0x7c3   : > { %18705 = vmatprep.subr.bf16.mxu0 %v25025_v10  ;;  %v25110_v57 = vld [vmem:[%s26369_s19 + $0x4374] ss:$8 sps:$4 sm:$0xff]   ;;  %v25105_v10 = vld [vmem:[%s26369_s19 + $0x1d70] ss:$8 sps:$4 sm:$0xff]  }
 0x7c5   : > { %17148 = vmatpush1.bf16.msra.mxu1 %v25020_v42  ;;  %v25108_v42 = vld [vmem:[%s26369_s19 + $0x4370] ss:$8 sps:$4 sm:$0xff]  }
 0x7c6   : > { %18706 = vmatpush1.bf16.msra.mxu0 %v25023_v58  ;;  %17149 = vmatprep.subr.bf16.mxu1 %v25028_v26  ;;  %v25113_v58 = vld [vmem:[%s26369_s19 + $0x1d84] ss:$8 sps:$4 sm:$0xff]  }
 0x7c7   : > { %18707 = vmatprep.subr.bf16.mxu0 %v25031_v14  ;;  %v25116_v26 = vld [vmem:[%s26369_s19 + $0x4384] ss:$8 sps:$4 sm:$0xff]   ;;  %v25111_v14 = vld [vmem:[%s26369_s19 + $0x1d80] ss:$8 sps:$4 sm:$0xff]  }
 0x7c9   : > { %17150 = vmatpush1.bf16.msra.mxu1 %v25026_v54  ;;  %v25114_v54 = vld [vmem:[%s26369_s19 + $0x4380] ss:$8 sps:$4 sm:$0xff]  }
 0x7ca   : > { %18708 = vmatpush1.bf16.msra.mxu0 %v25029_v62  ;;  %17151 = vmatprep.subr.bf16.mxu1 %v25034_v18  ;;  %v25119_v62 = vld [vmem:[%s26369_s19 + $0x1d94] ss:$8 sps:$4 sm:$0xff]  }
 0x7cb   : > { %18709 = vmatprep.subr.bf16.mxu0 %v25037_v28  ;;  %v25122_v18 = vld [vmem:[%s26369_s19 + $0x4394] ss:$8 sps:$4 sm:$0xff]   ;;  %v25117_v28 = vld [vmem:[%s26369_s19 + $0x1d90] ss:$8 sps:$4 sm:$0xff]  }
 0x7cd   : > { %17152 = vmatpush1.bf16.msra.mxu1 %v25032_v29  ;;  %v25120_v29 = vld [vmem:[%s26369_s19 + $0x4390] ss:$8 sps:$4 sm:$0xff]  }
 0x7ce   : > { %18710 = vmatpush1.bf16.msra.mxu0 %v25035_v22  ;;  %17153 = vmatprep.subr.bf16.mxu1 %v25040_v55  ;;  %v25125_v22 = vld [vmem:[%s26369_s19 + $0x1da4] ss:$8 sps:$4 sm:$0xff]  }
 0x7cf   : > { %18711 = vmatprep.subr.bf16.mxu0 %v25043_v63  ;;  %v25128_v55 = vld [vmem:[%s26369_s19 + $0x43a4] ss:$8 sps:$4 sm:$0xff]   ;;  %v25123_v63 = vld [vmem:[%s26369_s19 + $0x1da0] ss:$8 sps:$4 sm:$0xff]  }
 0x7d1   : > { %17154 = vmatpush1.bf16.msra.mxu1 %v25038_v3  ;;  %v25126_v3 = vld [vmem:[%s26369_s19 + $0x43a0] ss:$8 sps:$4 sm:$0xff]  }
 0x7d2   : > { %18712 = vmatpush1.bf16.msra.mxu0 %v25041_v21  ;;  %17155 = vmatprep.subr.bf16.mxu1 %v25046_v30  ;;  %v25131_v21 = vld [vmem:[%s26369_s19 + $0x1db4] ss:$8 sps:$4 sm:$0xff]  }
 0x7d3   : > { %18713 = vmatprep.subr.bf16.mxu0 %v25049_v9  ;;  %v25134_v30 = vld [vmem:[%s26369_s19 + $0x43b4] ss:$8 sps:$4 sm:$0xff]   ;;  %v25129_v9 = vld [vmem:[%s26369_s19 + $0x1db0] ss:$8 sps:$4 sm:$0xff]  }
 0x7d5   : > { %17156 = vmatpush1.bf16.msra.mxu1 %v25044_v8  ;;  %v25132_v8 = vld [vmem:[%s26369_s19 + $0x43b0] ss:$8 sps:$4 sm:$0xff]  }
 0x7d6   : > { %18714 = vmatpush1.bf16.msra.mxu0 %v25047_v15  ;;  %17157 = vmatprep.subr.bf16.mxu1 %v25052_v24  ;;  %v25137_v15 = vld [vmem:[%s26369_s19 + $0x1dc4] ss:$8 sps:$4 sm:$0xff]  }
 0x7d7   : > { %18715 = vmatprep.subr.bf16.mxu0 %v25055_v12  ;;  %v25140_v24 = vld [vmem:[%s26369_s19 + $0x43c4] ss:$8 sps:$4 sm:$0xff]   ;;  %v25135_v12 = vld [vmem:[%s26369_s19 + $0x1dc0] ss:$8 sps:$4 sm:$0xff]  }
 0x7d9   : > { %17158 = vmatpush1.bf16.msra.mxu1 %v25050_v49  ;;  %v25138_v49 = vld [vmem:[%s26369_s19 + $0x43c0] ss:$8 sps:$4 sm:$0xff]  }
 0x7da   : > { %18716 = vmatpush1.bf16.msra.mxu0 %v25053_v34  ;;  %17159 = vmatprep.subr.bf16.mxu1 %v25058_v20  ;;  %v25143_v34 = vld [vmem:[%s26369_s19 + $0x1dd4] ss:$8 sps:$4 sm:$0xff]  }
 0x7db   : > { %18717 = vmatprep.subr.bf16.mxu0 %v25061_v16  ;;  %v25146_v20 = vld [vmem:[%s26369_s19 + $0x43d4] ss:$8 sps:$4 sm:$0xff]   ;;  %v25141_v16 = vld [vmem:[%s26369_s19 + $0x1dd0] ss:$8 sps:$4 sm:$0xff]  }
 0x7dd   : > { %17160 = vmatpush1.bf16.msra.mxu1 %v25056_v50  ;;  %v25144_v50 = vld [vmem:[%s26369_s19 + $0x43d0] ss:$8 sps:$4 sm:$0xff]  }
 0x7de   : > { %18718 = vmatpush1.bf16.msra.mxu0 %v25059_v41  ;;  %17170 = vmatprep.subr.bf16.mxu1 %v25064_v52  ;;  %v25149_v41 = vld [vmem:[%s26369_s19 + $0x1de4] ss:$8 sps:$4 sm:$0xff]  }
 0x7df   : > { %18728 = vmatprep.subr.bf16.mxu0 %v25068_v43  ;;  %v25152_v52 = vld [vmem:[%s26369_s19 + $0x43e4] ss:$8 sps:$4 sm:$0xff]   ;;  %v3163_v43 = vcombine.high %v28708_v23, %v28708_v23  ;;  %v25153_v23 = vld [vmem:[%s26369_s19 + $0x1df0] ss:$8 sps:$4 sm:$0xff]  }
 0x7e0   : > { %17162 = vmatmul.mubr.bf16.vlgmr.msra.gmra.mrb[0].mxu1 %v28807_v1 }
 0x7e1   : > { %18720 = vmatmul.mubr.bf16.vlgmr.msra.gmra.mrb[0].mxu0 %v28811_v13  ;;  %17171 = vmatpush1.bf16.msra.mxu1 %v25062_v46  ;;  %v28878_v46 = vld [vmem:[%s26387_s30 + $0x88] sm:$0xff] }
 0x7e2   : > { %18729 = vmatpush1.bf16.msra.mxu0 %v25066_v59  ;;  %17172 = vmatprep.subr.bf16.mxu1 %v25071_v39  ;;  %v25147_v59 = vld [vmem:[%s26369_s19 + $0x1de0] ss:$8 sps:$4 sm:$0xff]  }
 0x7e3   : > { %18730 = vmatprep.subr.bf16.mxu0 %v25074_v36  ;;  %17202 = vmatprep.mubr.bf16.mxu1 %v3210_v27  ;;  %v25150_v39 = vld [vmem:[%s26369_s19 + $0x43e0] ss:$8 sps:$4 sm:$0xff]   ;;  %v25155_v36 = vld [vmem:[%s26369_s19 + $0x1df4] ss:$8 sps:$4 sm:$0xff]  }
 0x7e4   : > { %18760 = vmatprep.mubr.bf16.mxu0 %v3652_v37  ;;  %v25158_v27 = vld [vmem:[%s26369_s19 + $0x43f4] ss:$8 sps:$4 sm:$0xff]   ;;  %v28885_v37 = vrot.slane %v3163_v43, %v26438_v51  ;;  %v25225_v43 = vld [vmem:[%s26369_s19 + $0x1eb0] ss:$8 sps:$4 sm:$0xff]  }
 0x7e5   : > { %17173 = vmatpush1.bf16.msra.mxu1 %v25069_v33  ;;  %v28889_v33 = vrot.slane %v28878_v46, %v26438_v51 }
 0x7e6   : > { %18731 = vmatpush1.bf16.msra.mxu0 %v25072_v17  ;;  %17174 = vmatprep.subr.bf16.mxu1 %v25077_v35  ;;  %v25156_v17 = vld [vmem:[%s26369_s19 + $0x43f0] ss:$8 sps:$4 sm:$0xff]   ;;  %v25161_v35 = vld [vmem:[%s26369_s19 + $0x1e04] ss:$8 sps:$4 sm:$0xff]  }
 0x7e7   : > { %18732 = vmatprep.subr.bf16.mxu0 %v25080_v31  ;;  %v25164_v31 = vld [vmem:[%s26369_s19 + $0x4404] ss:$8 sps:$4 sm:$0xff]  }
 0x7e9   : > { %17175 = vmatpush1.bf16.msra.mxu1 %v25075_v40  ;;  %v3179_v40 = vcombine.high %v28885_v37, %v28885_v37 }
 0x7ea   : > { %18733 = vmatpush1.bf16.msra.mxu0 %v25078_v32  ;;  %17176 = vmatprep.subr.bf16.mxu1 %v25083_v47  ;;  %v3668_v32 = vcombine.high %v28889_v33, %v28889_v33  ;;  %v3208_v47 = vcombine.high %v28807_v1, %v28807_v1 }
 0x7eb   : > { %18734 = vmatprep.subr.bf16.mxu0 %v25086_v56  ;;  %v3650_v56 = vcombine.high %v28811_v13, %v28811_v13  ;;  %v25165_v13 = vld [vmem:[%s26369_s19 + $0x1e10] ss:$8 sps:$4 sm:$0xff]  }
 0x7ec   : > { %v28911_v1 = vrot.slane %v3668_v32, %v26438_v51  ;;  %v25245_v32 = vld [vmem:[%s26369_s19 + $0x1ee4] ss:$8 sps:$4 sm:$0xff]  }
 0x7ed   : > { %17177 = vmatpush1.bf16.msra.mxu1 %v25081_v25  ;;  %v25159_v25 = vld [vmem:[%s26369_s19 + $0x1e00] ss:$8 sps:$4 sm:$0xff]  }
 0x7ee   : > { %18735 = vmatpush1.bf16.msra.mxu0 %v25084_v19  ;;  %17178 = vmatprep.subr.bf16.mxu1 %v25089_v5  ;;  %v25162_v19 = vld [vmem:[%s26369_s19 + $0x4400] ss:$8 sps:$4 sm:$0xff]   ;;  %v25167_v5 = vld [vmem:[%s26369_s19 + $0x1e14] ss:$8 sps:$4 sm:$0xff]  }
 0x7ef   : > { %18736 = vmatprep.subr.bf16.mxu0 %v25092_v60  ;;  %v25170_v60 = vld [vmem:[%s26369_s19 + $0x4414] ss:$8 sps:$4 sm:$0xff]  }
 0x7f1   : > { %17179 = vmatpush1.bf16.msra.mxu1 %v25087_v44  ;;  %v28908_v44 = vrot.slane %v3179_v40, %v26438_v51  ;;  %v25240_v40 = vld [vmem:[%s26369_s19 + $0x44d0] ss:$8 sps:$4 sm:$0xff]  }
 0x7f2   : > { %18737 = vmatpush1.bf16.msra.mxu0 %v25090_v7  ;;  %17180 = vmatprep.subr.bf16.mxu1 %v25095_v11  ;;  %v25168_v7 = vld [vmem:[%s26369_s19 + $0x4410] ss:$8 sps:$4 sm:$0xff]   ;;  %v25173_v11 = vld [vmem:[%s26369_s19 + $0x1e24] ss:$8 sps:$4 sm:$0xff]  }
 0x7f3   : > { %18738 = vmatprep.subr.bf16.mxu0 %v25098_v2  ;;  %v25176_v2 = vld [vmem:[%s26369_s19 + $0x4424] ss:$8 sps:$4 sm:$0xff]  }
 0x7f5   : > { %17181 = vmatpush1.bf16.msra.mxu1 %v25093_v38  ;;  %v25171_v38 = vld [vmem:[%s26369_s19 + $0x1e20] ss:$8 sps:$4 sm:$0xff]  }
 0x7f6   : > { %18739 = vmatpush1.bf16.msra.mxu0 %v25096_v61  ;;  %17182 = vmatprep.subr.bf16.mxu1 %v25101_v48  ;;  %v25174_v61 = vld [vmem:[%s26369_s19 + $0x4420] ss:$8 sps:$4 sm:$0xff]   ;;  %v25179_v48 = vld [vmem:[%s26369_s19 + $0x1e34] ss:$8 sps:$4 sm:$0xff]  }
 0x7f7   : > { %18740 = vmatprep.subr.bf16.mxu0 %v25104_v0  ;;  %v25182_v0 = vld [vmem:[%s26369_s19 + $0x4434] ss:$8 sps:$4 sm:$0xff]  }
 0x7f9   : > { %17183 = vmatpush1.bf16.msra.mxu1 %v25099_v53  ;;  %v25177_v53 = vld [vmem:[%s26369_s19 + $0x1e30] ss:$8 sps:$4 sm:$0xff]  }
 0x7fa   : > { %18741 = vmatpush1.bf16.msra.mxu0 %v25102_v6  ;;  %17184 = vmatprep.subr.bf16.mxu1 %v25107_v4  ;;  %v25180_v6 = vld [vmem:[%s26369_s19 + $0x4430] ss:$8 sps:$4 sm:$0xff]   ;;  %v25185_v4 = vld [vmem:[%s26369_s19 + $0x1e44] ss:$8 sps:$4 sm:$0xff]  }
 0x7fb   : > { %18742 = vmatprep.subr.bf16.mxu0 %v25110_v57  ;;  %v25188_v57 = vld [vmem:[%s26369_s19 + $0x4444] ss:$8 sps:$4 sm:$0xff]  }
 0x7fd   : > { %17185 = vmatpush1.bf16.msra.mxu1 %v25105_v10  ;;  %v25183_v10 = vld [vmem:[%s26369_s19 + $0x1e40] ss:$8 sps:$4 sm:$0xff]  }
 0x7fe   : > { %18743 = vmatpush1.bf16.msra.mxu0 %v25108_v42  ;;  %17186 = vmatprep.subr.bf16.mxu1 %v25113_v58  ;;  %v25186_v42 = vld [vmem:[%s26369_s19 + $0x4440] ss:$8 sps:$4 sm:$0xff]   ;;  %v25191_v58 = vld [vmem:[%s26369_s19 + $0x1e54] ss:$8 sps:$4 sm:$0xff]  }
 0x7ff   : > { %18744 = vmatprep.subr.bf16.mxu0 %v25116_v26  ;;  %v25194_v26 = vld [vmem:[%s26369_s19 + $0x4454] ss:$8 sps:$4 sm:$0xff]  }
 0x801   : > { %17187 = vmatpush1.bf16.msra.mxu1 %v25111_v14  ;;  %v25189_v14 = vld [vmem:[%s26369_s19 + $0x1e50] ss:$8 sps:$4 sm:$0xff]  }
 0x802   : > { %18745 = vmatpush1.bf16.msra.mxu0 %v25114_v54  ;;  %17188 = vmatprep.subr.bf16.mxu1 %v25119_v62  ;;  %v25192_v54 = vld [vmem:[%s26369_s19 + $0x4450] ss:$8 sps:$4 sm:$0xff]   ;;  %v25197_v62 = vld [vmem:[%s26369_s19 + $0x1e64] ss:$8 sps:$4 sm:$0xff]  }
 0x803   : > { %18746 = vmatprep.subr.bf16.mxu0 %v25122_v18  ;;  %v25200_v18 = vld [vmem:[%s26369_s19 + $0x4464] ss:$8 sps:$4 sm:$0xff]  }
 0x805   : > { %17189 = vmatpush1.bf16.msra.mxu1 %v25117_v28  ;;  %v25195_v28 = vld [vmem:[%s26369_s19 + $0x1e60] ss:$8 sps:$4 sm:$0xff]  }
 0x806   : > { %18747 = vmatpush1.bf16.msra.mxu0 %v25120_v29  ;;  %17190 = vmatprep.subr.bf16.mxu1 %v25125_v22  ;;  %v25198_v29 = vld [vmem:[%s26369_s19 + $0x4460] ss:$8 sps:$4 sm:$0xff]   ;;  %v25203_v22 = vld [vmem:[%s26369_s19 + $0x1e74] ss:$8 sps:$4 sm:$0xff]  }
 0x807   : > { %18748 = vmatprep.subr.bf16.mxu0 %v25128_v55  ;;  %v25206_v55 = vld [vmem:[%s26369_s19 + $0x4474] ss:$8 sps:$4 sm:$0xff]  }
 0x809   : > { %17191 = vmatpush1.bf16.msra.mxu1 %v25123_v63  ;;  %v25201_v63 = vld [vmem:[%s26369_s19 + $0x1e70] ss:$8 sps:$4 sm:$0xff]  }
 0x80a   : > { %18749 = vmatpush1.bf16.msra.mxu0 %v25126_v3  ;;  %17192 = vmatprep.subr.bf16.mxu1 %v25131_v21  ;;  %v25204_v3 = vld [vmem:[%s26369_s19 + $0x4470] ss:$8 sps:$4 sm:$0xff]   ;;  %v25209_v21 = vld [vmem:[%s26369_s19 + $0x1e84] ss:$8 sps:$4 sm:$0xff]  }
 0x80b   : > { %18750 = vmatprep.subr.bf16.mxu0 %v25134_v30  ;;  %v25212_v30 = vld [vmem:[%s26369_s19 + $0x4484] ss:$8 sps:$4 sm:$0xff]  }
 0x80d   : > { %17193 = vmatpush1.bf16.msra.mxu1 %v25129_v9  ;;  %v25207_v9 = vld [vmem:[%s26369_s19 + $0x1e80] ss:$8 sps:$4 sm:$0xff]  }
 0x80e   : > { %18751 = vmatpush1.bf16.msra.mxu0 %v25132_v8  ;;  %17194 = vmatprep.subr.bf16.mxu1 %v25137_v15  ;;  %v25210_v8 = vld [vmem:[%s26369_s19 + $0x4480] ss:$8 sps:$4 sm:$0xff]   ;;  %v25215_v15 = vld [vmem:[%s26369_s19 + $0x1e94] ss:$8 sps:$4 sm:$0xff]  }
 0x80f   : > { %18752 = vmatprep.subr.bf16.mxu0 %v25140_v24  ;;  %v25218_v24 = vld [vmem:[%s26369_s19 + $0x4494] ss:$8 sps:$4 sm:$0xff]  }
 0x811   : > { %17195 = vmatpush1.bf16.msra.mxu1 %v25135_v12  ;;  %v25213_v12 = vld [vmem:[%s26369_s19 + $0x1e90] ss:$8 sps:$4 sm:$0xff]  }
 0x812   : > { %18753 = vmatpush1.bf16.msra.mxu0 %v25138_v49  ;;  %17196 = vmatprep.subr.bf16.mxu1 %v25143_v34  ;;  %v25216_v49 = vld [vmem:[%s26369_s19 + $0x4490] ss:$8 sps:$4 sm:$0xff]   ;;  %v25221_v34 = vld [vmem:[%s26369_s19 + $0x1ea4] ss:$8 sps:$4 sm:$0xff]  }
 0x813   : > { %18754 = vmatprep.subr.bf16.mxu0 %v25146_v20  ;;  %v25224_v20 = vld [vmem:[%s26369_s19 + $0x44a4] ss:$8 sps:$4 sm:$0xff]  }
 0x815   : > { %17197 = vmatpush1.bf16.msra.mxu1 %v25141_v16  ;;  %v25219_v16 = vld [vmem:[%s26369_s19 + $0x1ea0] ss:$8 sps:$4 sm:$0xff]  }
 0x816   : > { %18755 = vmatpush1.bf16.msra.mxu0 %v25144_v50  ;;  %17198 = vmatprep.subr.bf16.mxu1 %v25149_v41  ;;  %v25222_v50 = vld [vmem:[%s26369_s19 + $0x44a0] ss:$8 sps:$4 sm:$0xff]   ;;  %v25227_v41 = vld [vmem:[%s26369_s19 + $0x1eb4] ss:$8 sps:$4 sm:$0xff]  }
 0x817   : > { %18756 = vmatprep.subr.bf16.mxu0 %v25152_v52  ;;  %v25230_v52 = vld [vmem:[%s26369_s19 + $0x44b4] ss:$8 sps:$4 sm:$0xff]  }
 0x819   : > { %17199 = vmatpush1.bf16.msra.mxu1 %v25147_v59  ;;  %v25228_v59 = vld [vmem:[%s26369_s19 + $0x44b0] ss:$8 sps:$4 sm:$0xff]  }
 0x81a   : > { %18757 = vmatpush1.bf16.msra.mxu0 %v25150_v39  ;;  %17200 = vmatprep.subr.bf16.mxu1 %v25155_v36  ;;  %v25233_v39 = vld [vmem:[%s26369_s19 + $0x1ec4] ss:$8 sps:$4 sm:$0xff]  }
 0x81b   : > { %18758 = vmatprep.subr.bf16.mxu0 %v25158_v27  ;;  %v25236_v36 = vld [vmem:[%s26369_s19 + $0x44c4] ss:$8 sps:$4 sm:$0xff]   ;;  %v25231_v27 = vld [vmem:[%s26369_s19 + $0x1ec0] ss:$8 sps:$4 sm:$0xff]  }
 0x81d   : > { %17201 = vmatpush1.bf16.msra.mxu1 %v25153_v23  ;;  %v25234_v23 = vld [vmem:[%s26369_s19 + $0x44c0] ss:$8 sps:$4 sm:$0xff]  }
 0x81e   : > { %18759 = vmatpush1.bf16.msra.mxu0 %v25156_v17  ;;  %17211 = vmatprep.subr.bf16.mxu1 %v25161_v35  ;;  %v25239_v17 = vld [vmem:[%s26369_s19 + $0x1ed4] ss:$8 sps:$4 sm:$0xff]  }
 0x81f   : > { %18769 = vmatprep.subr.bf16.mxu0 %v25164_v31  ;;  %v25242_v35 = vld [vmem:[%s26369_s19 + $0x44d4] ss:$8 sps:$4 sm:$0xff]   ;;  %v25237_v31 = vld [vmem:[%s26369_s19 + $0x1ed0] ss:$8 sps:$4 sm:$0xff]  }
 0x820   : > { %17203 = vmatmul.mubr.bf16.vlgmr.msra.gmra.mrb[0].mxu1 %v3208_v47  ;;  %v25248_v47 = vld [vmem:[%s26369_s19 + $0x44e4] ss:$8 sps:$4 sm:$0xff]  }
 0x821   : > { %18761 = vmatmul.mubr.bf16.vlgmr.msra.gmra.mrb[0].mxu0 %v3650_v56  ;;  %17212 = vmatpush1.bf16.msra.mxu1 %v25159_v25  ;;  %v25243_v56 = vld [vmem:[%s26369_s19 + $0x1ee0] ss:$8 sps:$4 sm:$0xff]  }
 0x822   : > { %18770 = vmatpush1.bf16.msra.mxu0 %v25162_v19  ;;  %17213 = vmatprep.subr.bf16.mxu1 %v25167_v5  ;;  %v25246_v25 = vld [vmem:[%s26369_s19 + $0x44e0] ss:$8 sps:$4 sm:$0xff]   ;;  %v25251_v19 = vld [vmem:[%s26369_s19 + $0x1ef4] ss:$8 sps:$4 sm:$0xff]  }
 0x823   : > { %18771 = vmatprep.subr.bf16.mxu0 %v25170_v60  ;;  %17243 = vmatprep.mubr.bf16.mxu1 %v28908_v44  ;;  %v25254_v5 = vld [vmem:[%s26369_s19 + $0x44f4] ss:$8 sps:$4 sm:$0xff]   ;;  %v25249_v60 = vld [vmem:[%s26369_s19 + $0x1ef0] ss:$8 sps:$4 sm:$0xff]  }
 0x824   : > { %18801 = vmatprep.mubr.bf16.mxu0 %v28911_v1 }
 0x825   : > { %17214 = vmatpush1.bf16.msra.mxu1 %v25165_v13  ;;  %v25252_v13 = vld [vmem:[%s26369_s19 + $0x44f0] ss:$8 sps:$4 sm:$0xff]  }
 0x826   : > { %18772 = vmatpush1.bf16.msra.mxu0 %v25168_v7  ;;  %17215 = vmatprep.subr.bf16.mxu1 %v25173_v11  ;;  %v25258_v7 = vld [vmem:[%s26369_s19 + $0x1f04] ss:$8 sps:$4 sm:$0xff]  }
 0x827   : > { %18773 = vmatprep.subr.bf16.mxu0 %v25176_v2  ;;  %v25261_v11 = vld [vmem:[%s26369_s19 + $0x4504] ss:$8 sps:$4 sm:$0xff]   ;;  %v28977_v2 = vrot.slane %v28885_v37, %v26438_v51  ;;  %v3211_v37 = vcombine.high %v28908_v44, %v28908_v44 }
 0x828   : > { %v25270_v44 = vld [vmem:[%s26369_s19 + $0x1f24] ss:$8 sps:$4 sm:$0xff]  }
 0x829   : > { %17216 = vmatpush1.bf16.msra.mxu1 %v25171_v38  ;;  %v28981_v38 = vrot.slane %v28889_v33, %v26438_v51  ;;  %v25262_v33 = vld [vmem:[%s26369_s19 + $0x1f10] ss:$8 sps:$4 sm:$0xff]  }
 0x82a   : > { %18774 = vmatpush1.bf16.msra.mxu0 %v25174_v61  ;;  %17217 = vmatprep.subr.bf16.mxu1 %v25179_v48  ;;  %v25256_v61 = vld [vmem:[%s26369_s19 + $0x1f00] ss:$8 sps:$4 sm:$0xff]  }
 0x82b   : > { %18775 = vmatprep.subr.bf16.mxu0 %v25182_v0  ;;  %v25259_v48 = vld [vmem:[%s26369_s19 + $0x4500] ss:$8 sps:$4 sm:$0xff]   ;;  %v25264_v0 = vld [vmem:[%s26369_s19 + $0x1f14] ss:$8 sps:$4 sm:$0xff]  }
 0x82d   : > { %17218 = vmatpush1.bf16.msra.mxu1 %v25177_v53  ;;  %v25267_v53 = vld [vmem:[%s26369_s19 + $0x4514] ss:$8 sps:$4 sm:$0xff]  }
 0x82e   : > { %18776 = vmatpush1.bf16.msra.mxu0 %v25180_v6  ;;  %17219 = vmatprep.subr.bf16.mxu1 %v25185_v4  ;;  %v3700_v6 = vcombine.high %v28911_v1, %v28911_v1  ;;  %v25265_v4 = vld [vmem:[%s26369_s19 + $0x4510] ss:$8 sps:$4 sm:$0xff]   ;;  %v25268_v1 = vld [vmem:[%s26369_s19 + $0x1f20] ss:$8 sps:$4 sm:$0xff]  }
 0x82f   : > { %18777 = vmatprep.subr.bf16.mxu0 %v25188_v57  ;;  %v25273_v57 = vld [vmem:[%s26369_s19 + $0x4524] ss:$8 sps:$4 sm:$0xff]  }
 0x831   : > { %17220 = vmatpush1.bf16.msra.mxu1 %v25183_v10  ;;  %v25271_v10 = vld [vmem:[%s26369_s19 + $0x4520] ss:$8 sps:$4 sm:$0xff]  }
 0x832   : > { %18778 = vmatpush1.bf16.msra.mxu0 %v25186_v42  ;;  %17221 = vmatprep.subr.bf16.mxu1 %v25191_v58  ;;  %v25276_v42 = vld [vmem:[%s26369_s19 + $0x1f34] ss:$8 sps:$4 sm:$0xff]  }
 0x833   : > { %18779 = vmatprep.subr.bf16.mxu0 %v25194_v26  ;;  %v25279_v58 = vld [vmem:[%s26369_s19 + $0x4534] ss:$8 sps:$4 sm:$0xff]   ;;  %v25274_v26 = vld [vmem:[%s26369_s19 + $0x1f30] ss:$8 sps:$4 sm:$0xff]  }
 0x835   : > { %17222 = vmatpush1.bf16.msra.mxu1 %v25189_v14  ;;  %v25277_v14 = vld [vmem:[%s26369_s19 + $0x4530] ss:$8 sps:$4 sm:$0xff]  }
 0x836   : > { %18780 = vmatpush1.bf16.msra.mxu0 %v25192_v54  ;;  %17223 = vmatprep.subr.bf16.mxu1 %v25197_v62  ;;  %v25282_v54 = vld [vmem:[%s26369_s19 + $0x1f44] ss:$8 sps:$4 sm:$0xff]  }
 0x837   : > { %18781 = vmatprep.subr.bf16.mxu0 %v25200_v18  ;;  %v25285_v62 = vld [vmem:[%s26369_s19 + $0x4544] ss:$8 sps:$4 sm:$0xff]   ;;  %v25280_v18 = vld [vmem:[%s26369_s19 + $0x1f40] ss:$8 sps:$4 sm:$0xff]  }
 0x839   : > { %17224 = vmatpush1.bf16.msra.mxu1 %v25195_v28  ;;  %v25283_v28 = vld [vmem:[%s26369_s19 + $0x4540] ss:$8 sps:$4 sm:$0xff]  }
 0x83a   : > { %18782 = vmatpush1.bf16.msra.mxu0 %v25198_v29  ;;  %17225 = vmatprep.subr.bf16.mxu1 %v25203_v22  ;;  %v25288_v29 = vld [vmem:[%s26369_s19 + $0x1f54] ss:$8 sps:$4 sm:$0xff]  }
 0x83b   : > { %18783 = vmatprep.subr.bf16.mxu0 %v25206_v55  ;;  %v25291_v22 = vld [vmem:[%s26369_s19 + $0x4554] ss:$8 sps:$4 sm:$0xff]   ;;  %v25286_v55 = vld [vmem:[%s26369_s19 + $0x1f50] ss:$8 sps:$4 sm:$0xff]  }
 0x83d   : > { %17226 = vmatpush1.bf16.msra.mxu1 %v25201_v63  ;;  %v25289_v63 = vld [vmem:[%s26369_s19 + $0x4550] ss:$8 sps:$4 sm:$0xff]  }
 0x83e   : > { %18784 = vmatpush1.bf16.msra.mxu0 %v25204_v3  ;;  %17227 = vmatprep.subr.bf16.mxu1 %v25209_v21  ;;  %v25294_v3 = vld [vmem:[%s26369_s19 + $0x1f64] ss:$8 sps:$4 sm:$0xff]  }
 0x83f   : > { %18785 = vmatprep.subr.bf16.mxu0 %v25212_v30  ;;  %v25297_v21 = vld [vmem:[%s26369_s19 + $0x4564] ss:$8 sps:$4 sm:$0xff]   ;;  %v25292_v30 = vld [vmem:[%s26369_s19 + $0x1f60] ss:$8 sps:$4 sm:$0xff]  }
 0x841   : > { %17228 = vmatpush1.bf16.msra.mxu1 %v25207_v9  ;;  %v25295_v9 = vld [vmem:[%s26369_s19 + $0x4560] ss:$8 sps:$4 sm:$0xff]  }
 0x842   : > { %18786 = vmatpush1.bf16.msra.mxu0 %v25210_v8  ;;  %17229 = vmatprep.subr.bf16.mxu1 %v25215_v15  ;;  %v25300_v8 = vld [vmem:[%s26369_s19 + $0x1f74] ss:$8 sps:$4 sm:$0xff]  }
 0x843   : > { %18787 = vmatprep.subr.bf16.mxu0 %v25218_v24  ;;  %v25303_v15 = vld [vmem:[%s26369_s19 + $0x4574] ss:$8 sps:$4 sm:$0xff]   ;;  %v25298_v24 = vld [vmem:[%s26369_s19 + $0x1f70] ss:$8 sps:$4 sm:$0xff]  }
 0x845   : > { %17230 = vmatpush1.bf16.msra.mxu1 %v25213_v12  ;;  %v25301_v12 = vld [vmem:[%s26369_s19 + $0x4570] ss:$8 sps:$4 sm:$0xff]  }
 0x846   : > { %18788 = vmatpush1.bf16.msra.mxu0 %v25216_v49  ;;  %17231 = vmatprep.subr.bf16.mxu1 %v25221_v34  ;;  %v25306_v49 = vld [vmem:[%s26369_s19 + $0x1f84] ss:$8 sps:$4 sm:$0xff]  }
 0x847   : > { %18789 = vmatprep.subr.bf16.mxu0 %v25224_v20  ;;  %v25309_v34 = vld [vmem:[%s26369_s19 + $0x4584] ss:$8 sps:$4 sm:$0xff]   ;;  %v25304_v20 = vld [vmem:[%s26369_s19 + $0x1f80] ss:$8 sps:$4 sm:$0xff]  }
 0x849   : > { %17232 = vmatpush1.bf16.msra.mxu1 %v25219_v16  ;;  %v25307_v16 = vld [vmem:[%s26369_s19 + $0x4580] ss:$8 sps:$4 sm:$0xff]  }
 0x84a   : > { %18790 = vmatpush1.bf16.msra.mxu0 %v25222_v50  ;;  %17233 = vmatprep.subr.bf16.mxu1 %v25227_v41  ;;  %v25312_v50 = vld [vmem:[%s26369_s19 + $0x1f94] ss:$8 sps:$4 sm:$0xff]  }
 0x84b   : > { %18791 = vmatprep.subr.bf16.mxu0 %v25230_v52  ;;  %v25315_v41 = vld [vmem:[%s26369_s19 + $0x4594] ss:$8 sps:$4 sm:$0xff]   ;;  %v25310_v52 = vld [vmem:[%s26369_s19 + $0x1f90] ss:$8 sps:$4 sm:$0xff]  }
 0x84d   : > { %17234 = vmatpush1.bf16.msra.mxu1 %v25225_v43  ;;  %v25313_v43 = vld [vmem:[%s26369_s19 + $0x4590] ss:$8 sps:$4 sm:$0xff]  }
 0x84e   : > { %18792 = vmatpush1.bf16.msra.mxu0 %v25228_v59  ;;  %17235 = vmatprep.subr.bf16.mxu1 %v25233_v39  ;;  %v25318_v59 = vld [vmem:[%s26369_s19 + $0x1fa4] ss:$8 sps:$4 sm:$0xff]  }
 0x84f   : > { %18793 = vmatprep.subr.bf16.mxu0 %v25236_v36  ;;  %v25321_v39 = vld [vmem:[%s26369_s19 + $0x45a4] ss:$8 sps:$4 sm:$0xff]   ;;  %v25316_v36 = vld [vmem:[%s26369_s19 + $0x1fa0] ss:$8 sps:$4 sm:$0xff]  }
 0x851   : > { %17236 = vmatpush1.bf16.msra.mxu1 %v25231_v27  ;;  %v25319_v27 = vld [vmem:[%s26369_s19 + $0x45a0] ss:$8 sps:$4 sm:$0xff]  }
 0x852   : > { %18794 = vmatpush1.bf16.msra.mxu0 %v25234_v23  ;;  %17237 = vmatprep.subr.bf16.mxu1 %v25239_v17  ;;  %v25324_v23 = vld [vmem:[%s26369_s19 + $0x1fb4] ss:$8 sps:$4 sm:$0xff]  }
 0x853   : > { %18795 = vmatprep.subr.bf16.mxu0 %v25242_v35  ;;  %v25327_v17 = vld [vmem:[%s26369_s19 + $0x45b4] ss:$8 sps:$4 sm:$0xff]   ;;  %v25322_v35 = vld [vmem:[%s26369_s19 + $0x1fb0] ss:$8 sps:$4 sm:$0xff]  }
 0x855   : > { %17238 = vmatpush1.bf16.msra.mxu1 %v25237_v31  ;;  %v25325_v31 = vld [vmem:[%s26369_s19 + $0x45b0] ss:$8 sps:$4 sm:$0xff]  }
 0x856   : > { %18796 = vmatpush1.bf16.msra.mxu0 %v25240_v40  ;;  %17239 = vmatprep.subr.bf16.mxu1 %v25245_v32  ;;  %v25330_v40 = vld [vmem:[%s26369_s19 + $0x1fc4] ss:$8 sps:$4 sm:$0xff]  }
 0x857   : > { %18797 = vmatprep.subr.bf16.mxu0 %v25248_v47  ;;  %v25333_v32 = vld [vmem:[%s26369_s19 + $0x45c4] ss:$8 sps:$4 sm:$0xff]   ;;  %v25328_v47 = vld [vmem:[%s26369_s19 + $0x1fc0] ss:$8 sps:$4 sm:$0xff]  }
 0x859   : > { %17240 = vmatpush1.bf16.msra.mxu1 %v25243_v56  ;;  %v25331_v56 = vld [vmem:[%s26369_s19 + $0x45c0] ss:$8 sps:$4 sm:$0xff]  }
 0x85a   : > { %18798 = vmatpush1.bf16.msra.mxu0 %v25246_v25  ;;  %17241 = vmatprep.subr.bf16.mxu1 %v25251_v19  ;;  %v25336_v25 = vld [vmem:[%s26369_s19 + $0x1fd4] ss:$8 sps:$4 sm:$0xff]  }
 0x85b   : > { %18799 = vmatprep.subr.bf16.mxu0 %v25254_v5  ;;  %v25339_v19 = vld [vmem:[%s26369_s19 + $0x45d4] ss:$8 sps:$4 sm:$0xff]   ;;  %v25334_v5 = vld [vmem:[%s26369_s19 + $0x1fd0] ss:$8 sps:$4 sm:$0xff]  }
 0x85d   : > { %17242 = vmatpush1.bf16.msra.mxu1 %v25249_v60  ;;  %v25337_v60 = vld [vmem:[%s26369_s19 + $0x45d0] ss:$8 sps:$4 sm:$0xff]  }
 0x85e   : > { %18800 = vmatpush1.bf16.msra.mxu0 %v25252_v13  ;;  %17252 = vmatprep.subr.bf16.mxu1 %v25258_v7  ;;  %v25342_v13 = vld [vmem:[%s26369_s19 + $0x1fe4] ss:$8 sps:$4 sm:$0xff]  }
 0x85f   : > { %18810 = vmatprep.subr.bf16.mxu0 %v25261_v11  ;;  %v25345_v7 = vld [vmem:[%s26369_s19 + $0x45e4] ss:$8 sps:$4 sm:$0xff]   ;;  %v3653_v11 = vcombine.high %v28878_v46, %v28878_v46  ;;  %v25346_v46 = vld [vmem:[%s26369_s19 + $0x1ff0] ss:$8 sps:$4 sm:$0xff]  }
 0x860   : > { %17244 = vmatmul.mubr.bf16.vlgmr.msra.gmra.mrb[0].mxu1 %v28977_v2 }
 0x861   : > { %18802 = vmatmul.mubr.bf16.vlgmr.msra.gmra.mrb[0].mxu0 %v28981_v38  ;;  %17253 = vmatpush1.bf16.msra.mxu1 %v25256_v61  ;;  %v29048_v61 = vld [vmem:[%s26387_s30 + $0x40] sm:$0xff] }
 0x862   : > { %18811 = vmatpush1.bf16.msra.mxu0 %v25259_v48  ;;  %17254 = vmatprep.subr.bf16.mxu1 %v25264_v0  ;;  %v25340_v48 = vld [vmem:[%s26369_s19 + $0x1fe0] ss:$8 sps:$4 sm:$0xff]  }
 0x863   : > { %18812 = vmatprep.subr.bf16.mxu0 %v25267_v53  ;;  %17284 = vmatprep.mubr.bf16.mxu1 %v3211_v37  ;;  %v25343_v0 = vld [vmem:[%s26369_s19 + $0x45e0] ss:$8 sps:$4 sm:$0xff]   ;;  %v25348_v53 = vld [vmem:[%s26369_s19 + $0x1ff4] ss:$8 sps:$4 sm:$0xff]  }
 0x864   : > { %18842 = vmatprep.mubr.bf16.mxu0 %v3700_v6  ;;  %v25351_v37 = vld [vmem:[%s26369_s19 + $0x45f4] ss:$8 sps:$4 sm:$0xff]   ;;  %v29056_v6 = vrot.slane %v29048_v61, %v26438_v51 }
 0x865   : > { %17255 = vmatpush1.bf16.msra.mxu1 %v25262_v33  ;;  %v29059_v33 = vrot.slane %v3653_v11, %v26438_v51  ;;  %v25418_v11 = vld [vmem:[%s26369_s19 + $0x20b0] ss:$8 sps:$4 sm:$0xff]  }
 0x866   : > { %18813 = vmatpush1.bf16.msra.mxu0 %v25265_v4  ;;  %17256 = vmatprep.subr.bf16.mxu1 %v25270_v44  ;;  %v25349_v4 = vld [vmem:[%s26369_s19 + $0x45f0] ss:$8 sps:$4 sm:$0xff]   ;;  %v25354_v44 = vld [vmem:[%s26369_s19 + $0x2004] ss:$8 sps:$4 sm:$0xff]  }
 0x867   : > { %18814 = vmatprep.subr.bf16.mxu0 %v25273_v57  ;;  %v25357_v57 = vld [vmem:[%s26369_s19 + $0x4604] ss:$8 sps:$4 sm:$0xff]  }
 0x869   : > { %17257 = vmatpush1.bf16.msra.mxu1 %v25268_v1  ;;  %v3227_v1 = vcombine.high %v29056_v6, %v29056_v6 }
 0x86a   : > { %18815 = vmatpush1.bf16.msra.mxu0 %v25271_v10  ;;  %17258 = vmatprep.subr.bf16.mxu1 %v25276_v42  ;;  %v3669_v10 = vcombine.high %v29059_v33, %v29059_v33  ;;  %v3209_v42 = vcombine.high %v28977_v2, %v28977_v2 }
 0x86b   : > { %18816 = vmatprep.subr.bf16.mxu0 %v25279_v58  ;;  %v3698_v58 = vcombine.high %v28981_v38, %v28981_v38  ;;  %v25358_v38 = vld [vmem:[%s26369_s19 + $0x2010] ss:$8 sps:$4 sm:$0xff]  }
 0x86c   : > { %v29081_v2 = vrot.slane %v3669_v10, %v26438_v51  ;;  %v25438_v10 = vld [vmem:[%s26369_s19 + $0x20e4] ss:$8 sps:$4 sm:$0xff]  }
 0x86d   : > { %17259 = vmatpush1.bf16.msra.mxu1 %v25274_v26  ;;  %v25352_v26 = vld [vmem:[%s26369_s19 + $0x2000] ss:$8 sps:$4 sm:$0xff]  }
 0x86e   : > { %18817 = vmatpush1.bf16.msra.mxu0 %v25277_v14  ;;  %17260 = vmatprep.subr.bf16.mxu1 %v25282_v54  ;;  %v25355_v14 = vld [vmem:[%s26369_s19 + $0x4600] ss:$8 sps:$4 sm:$0xff]   ;;  %v25360_v54 = vld [vmem:[%s26369_s19 + $0x2014] ss:$8 sps:$4 sm:$0xff]  }
 0x86f   : > { %18818 = vmatprep.subr.bf16.mxu0 %v25285_v62  ;;  %v25363_v62 = vld [vmem:[%s26369_s19 + $0x4614] ss:$8 sps:$4 sm:$0xff]  }
 0x871   : > { %17261 = vmatpush1.bf16.msra.mxu1 %v25280_v18  ;;  %v29078_v18 = vrot.slane %v3227_v1, %v26438_v51  ;;  %v25433_v1 = vld [vmem:[%s26369_s19 + $0x46d0] ss:$8 sps:$4 sm:$0xff]  }
 0x872   : > { %18819 = vmatpush1.bf16.msra.mxu0 %v25283_v28  ;;  %17262 = vmatprep.subr.bf16.mxu1 %v25288_v29  ;;  %v25361_v28 = vld [vmem:[%s26369_s19 + $0x4610] ss:$8 sps:$4 sm:$0xff]   ;;  %v25366_v29 = vld [vmem:[%s26369_s19 + $0x2024] ss:$8 sps:$4 sm:$0xff]  }
 0x873   : > { %18820 = vmatprep.subr.bf16.mxu0 %v25291_v22  ;;  %v25369_v22 = vld [vmem:[%s26369_s19 + $0x4624] ss:$8 sps:$4 sm:$0xff]  }
 0x875   : > { %17263 = vmatpush1.bf16.msra.mxu1 %v25286_v55  ;;  %v25364_v55 = vld [vmem:[%s26369_s19 + $0x2020] ss:$8 sps:$4 sm:$0xff]  }
 0x876   : > { %18821 = vmatpush1.bf16.msra.mxu0 %v25289_v63  ;;  %17264 = vmatprep.subr.bf16.mxu1 %v25294_v3  ;;  %v25367_v63 = vld [vmem:[%s26369_s19 + $0x4620] ss:$8 sps:$4 sm:$0xff]   ;;  %v25372_v3 = vld [vmem:[%s26369_s19 + $0x2034] ss:$8 sps:$4 sm:$0xff]  }
 0x877   : > { %18822 = vmatprep.subr.bf16.mxu0 %v25297_v21  ;;  %v25375_v21 = vld [vmem:[%s26369_s19 + $0x4634] ss:$8 sps:$4 sm:$0xff]  }
 0x879   : > { %17265 = vmatpush1.bf16.msra.mxu1 %v25292_v30  ;;  %v25370_v30 = vld [vmem:[%s26369_s19 + $0x2030] ss:$8 sps:$4 sm:$0xff]  }
 0x87a   : > { %18823 = vmatpush1.bf16.msra.mxu0 %v25295_v9  ;;  %17266 = vmatprep.subr.bf16.mxu1 %v25300_v8  ;;  %v25373_v9 = vld [vmem:[%s26369_s19 + $0x4630] ss:$8 sps:$4 sm:$0xff]   ;;  %v25378_v8 = vld [vmem:[%s26369_s19 + $0x2044] ss:$8 sps:$4 sm:$0xff]  }
 0x87b   : > { %18824 = vmatprep.subr.bf16.mxu0 %v25303_v15  ;;  %v25381_v15 = vld [vmem:[%s26369_s19 + $0x4644] ss:$8 sps:$4 sm:$0xff]  }
 0x87d   : > { %17267 = vmatpush1.bf16.msra.mxu1 %v25298_v24  ;;  %v25376_v24 = vld [vmem:[%s26369_s19 + $0x2040] ss:$8 sps:$4 sm:$0xff]  }
 0x87e   : > { %18825 = vmatpush1.bf16.msra.mxu0 %v25301_v12  ;;  %17268 = vmatprep.subr.bf16.mxu1 %v25306_v49  ;;  %v25379_v12 = vld [vmem:[%s26369_s19 + $0x4640] ss:$8 sps:$4 sm:$0xff]   ;;  %v25384_v49 = vld [vmem:[%s26369_s19 + $0x2054] ss:$8 sps:$4 sm:$0xff]  }
 0x87f   : > { %18826 = vmatprep.subr.bf16.mxu0 %v25309_v34  ;;  %v25387_v34 = vld [vmem:[%s26369_s19 + $0x4654] ss:$8 sps:$4 sm:$0xff]  }
 0x881   : > { %17269 = vmatpush1.bf16.msra.mxu1 %v25304_v20  ;;  %v25382_v20 = vld [vmem:[%s26369_s19 + $0x2050] ss:$8 sps:$4 sm:$0xff]  }
 0x882   : > { %18827 = vmatpush1.bf16.msra.mxu0 %v25307_v16  ;;  %17270 = vmatprep.subr.bf16.mxu1 %v25312_v50  ;;  %v25385_v16 = vld [vmem:[%s26369_s19 + $0x4650] ss:$8 sps:$4 sm:$0xff]   ;;  %v25390_v50 = vld [vmem:[%s26369_s19 + $0x2064] ss:$8 sps:$4 sm:$0xff]  }
 0x883   : > { %18828 = vmatprep.subr.bf16.mxu0 %v25315_v41  ;;  %v25393_v41 = vld [vmem:[%s26369_s19 + $0x4664] ss:$8 sps:$4 sm:$0xff]  }
 0x885   : > { %17271 = vmatpush1.bf16.msra.mxu1 %v25310_v52  ;;  %v25388_v52 = vld [vmem:[%s26369_s19 + $0x2060] ss:$8 sps:$4 sm:$0xff]  }
 0x886   : > { %18829 = vmatpush1.bf16.msra.mxu0 %v25313_v43  ;;  %17272 = vmatprep.subr.bf16.mxu1 %v25318_v59  ;;  %v25391_v43 = vld [vmem:[%s26369_s19 + $0x4660] ss:$8 sps:$4 sm:$0xff]   ;;  %v25396_v59 = vld [vmem:[%s26369_s19 + $0x2074] ss:$8 sps:$4 sm:$0xff]  }
 0x887   : > { %18830 = vmatprep.subr.bf16.mxu0 %v25321_v39  ;;  %v25399_v39 = vld [vmem:[%s26369_s19 + $0x4674] ss:$8 sps:$4 sm:$0xff]  }
 0x889   : > { %17273 = vmatpush1.bf16.msra.mxu1 %v25316_v36  ;;  %v25394_v36 = vld [vmem:[%s26369_s19 + $0x2070] ss:$8 sps:$4 sm:$0xff]  }
 0x88a   : > { %18831 = vmatpush1.bf16.msra.mxu0 %v25319_v27  ;;  %17274 = vmatprep.subr.bf16.mxu1 %v25324_v23  ;;  %v25397_v27 = vld [vmem:[%s26369_s19 + $0x4670] ss:$8 sps:$4 sm:$0xff]   ;;  %v25402_v23 = vld [vmem:[%s26369_s19 + $0x2084] ss:$8 sps:$4 sm:$0xff]  }
 0x88b   : > { %18832 = vmatprep.subr.bf16.mxu0 %v25327_v17  ;;  %v25405_v17 = vld [vmem:[%s26369_s19 + $0x4684] ss:$8 sps:$4 sm:$0xff]  }
 0x88d   : > { %17275 = vmatpush1.bf16.msra.mxu1 %v25322_v35  ;;  %v25400_v35 = vld [vmem:[%s26369_s19 + $0x2080] ss:$8 sps:$4 sm:$0xff]  }
 0x88e   : > { %18833 = vmatpush1.bf16.msra.mxu0 %v25325_v31  ;;  %17276 = vmatprep.subr.bf16.mxu1 %v25330_v40  ;;  %v25403_v31 = vld [vmem:[%s26369_s19 + $0x4680] ss:$8 sps:$4 sm:$0xff]   ;;  %v25408_v40 = vld [vmem:[%s26369_s19 + $0x2094] ss:$8 sps:$4 sm:$0xff]  }
 0x88f   : > { %18834 = vmatprep.subr.bf16.mxu0 %v25333_v32  ;;  %v25411_v32 = vld [vmem:[%s26369_s19 + $0x4694] ss:$8 sps:$4 sm:$0xff]  }
 0x891   : > { %17277 = vmatpush1.bf16.msra.mxu1 %v25328_v47  ;;  %v25406_v47 = vld [vmem:[%s26369_s19 + $0x2090] ss:$8 sps:$4 sm:$0xff]  }
 0x892   : > { %18835 = vmatpush1.bf16.msra.mxu0 %v25331_v56  ;;  %17278 = vmatprep.subr.bf16.mxu1 %v25336_v25  ;;  %v25409_v56 = vld [vmem:[%s26369_s19 + $0x4690] ss:$8 sps:$4 sm:$0xff]   ;;  %v25414_v25 = vld [vmem:[%s26369_s19 + $0x20a4] ss:$8 sps:$4 sm:$0xff]  }
 0x893   : > { %18836 = vmatprep.subr.bf16.mxu0 %v25339_v19  ;;  %v25417_v19 = vld [vmem:[%s26369_s19 + $0x46a4] ss:$8 sps:$4 sm:$0xff]  }
 0x895   : > { %17279 = vmatpush1.bf16.msra.mxu1 %v25334_v5  ;;  %v25412_v5 = vld [vmem:[%s26369_s19 + $0x20a0] ss:$8 sps:$4 sm:$0xff]  }
 0x896   : > { %18837 = vmatpush1.bf16.msra.mxu0 %v25337_v60  ;;  %17280 = vmatprep.subr.bf16.mxu1 %v25342_v13  ;;  %v25415_v60 = vld [vmem:[%s26369_s19 + $0x46a0] ss:$8 sps:$4 sm:$0xff]   ;;  %v25420_v13 = vld [vmem:[%s26369_s19 + $0x20b4] ss:$8 sps:$4 sm:$0xff]  }
 0x897   : > { %18838 = vmatprep.subr.bf16.mxu0 %v25345_v7  ;;  %v25423_v7 = vld [vmem:[%s26369_s19 + $0x46b4] ss:$8 sps:$4 sm:$0xff]  }
 0x899   : > { %17281 = vmatpush1.bf16.msra.mxu1 %v25340_v48  ;;  %v25421_v48 = vld [vmem:[%s26369_s19 + $0x46b0] ss:$8 sps:$4 sm:$0xff]  }
 0x89a   : > { %18839 = vmatpush1.bf16.msra.mxu0 %v25343_v0  ;;  %17282 = vmatprep.subr.bf16.mxu1 %v25348_v53  ;;  %v25426_v0 = vld [vmem:[%s26369_s19 + $0x20c4] ss:$8 sps:$4 sm:$0xff]  }
 0x89b   : > { %18840 = vmatprep.subr.bf16.mxu0 %v25351_v37  ;;  %v25429_v53 = vld [vmem:[%s26369_s19 + $0x46c4] ss:$8 sps:$4 sm:$0xff]   ;;  %v25424_v37 = vld [vmem:[%s26369_s19 + $0x20c0] ss:$8 sps:$4 sm:$0xff]  }
 0x89d   : > { %17283 = vmatpush1.bf16.msra.mxu1 %v25346_v46  ;;  %v25427_v46 = vld [vmem:[%s26369_s19 + $0x46c0] ss:$8 sps:$4 sm:$0xff]  }
 0x89e   : > { %18841 = vmatpush1.bf16.msra.mxu0 %v25349_v4  ;;  %17293 = vmatprep.subr.bf16.mxu1 %v25354_v44  ;;  %v25432_v4 = vld [vmem:[%s26369_s19 + $0x20d4] ss:$8 sps:$4 sm:$0xff]  }
 0x89f   : > { %18851 = vmatprep.subr.bf16.mxu0 %v25357_v57  ;;  %v25435_v44 = vld [vmem:[%s26369_s19 + $0x46d4] ss:$8 sps:$4 sm:$0xff]   ;;  %v25430_v57 = vld [vmem:[%s26369_s19 + $0x20d0] ss:$8 sps:$4 sm:$0xff]  }
 0x8a0   : > { %17285 = vmatmul.mubr.bf16.vlgmr.msra.gmra.mrb[0].mxu1 %v3209_v42  ;;  %v25441_v42 = vld [vmem:[%s26369_s19 + $0x46e4] ss:$8 sps:$4 sm:$0xff]  }
 0x8a1   : > { %18843 = vmatmul.mubr.bf16.vlgmr.msra.gmra.mrb[0].mxu0 %v3698_v58  ;;  %17294 = vmatpush1.bf16.msra.mxu1 %v25352_v26  ;;  %v25436_v58 = vld [vmem:[%s26369_s19 + $0x20e0] ss:$8 sps:$4 sm:$0xff]  }
 0x8a2   : > { %18852 = vmatpush1.bf16.msra.mxu0 %v25355_v14  ;;  %17295 = vmatprep.subr.bf16.mxu1 %v25360_v54  ;;  %v25439_v26 = vld [vmem:[%s26369_s19 + $0x46e0] ss:$8 sps:$4 sm:$0xff]   ;;  %v25444_v14 = vld [vmem:[%s26369_s19 + $0x20f4] ss:$8 sps:$4 sm:$0xff]  }
 0x8a3   : > { %18853 = vmatprep.subr.bf16.mxu0 %v25363_v62  ;;  %17325 = vmatprep.mubr.bf16.mxu1 %v29078_v18  ;;  %v25447_v54 = vld [vmem:[%s26369_s19 + $0x46f4] ss:$8 sps:$4 sm:$0xff]   ;;  %v25442_v62 = vld [vmem:[%s26369_s19 + $0x20f0] ss:$8 sps:$4 sm:$0xff]  }
 0x8a4   : > { %18883 = vmatprep.mubr.bf16.mxu0 %v29081_v2 }
 0x8a5   : > { %17296 = vmatpush1.bf16.msra.mxu1 %v25358_v38  ;;  %v25445_v38 = vld [vmem:[%s26369_s19 + $0x46f0] ss:$8 sps:$4 sm:$0xff]  }
 0x8a6   : > { %18854 = vmatpush1.bf16.msra.mxu0 %v25361_v28  ;;  %17297 = vmatprep.subr.bf16.mxu1 %v25366_v29  ;;  %v25450_v28 = vld [vmem:[%s26369_s19 + $0x2104] ss:$8 sps:$4 sm:$0xff]  }
 0x8a7   : > { %18855 = vmatprep.subr.bf16.mxu0 %v25369_v22  ;;  %v25454_v29 = vld [vmem:[%s26369_s19 + $0x4704] ss:$8 sps:$4 sm:$0xff]   ;;  %v29147_v22 = vrot.slane %v29056_v6, %v26438_v51  ;;  %v3259_v6 = vcombine.high %v29078_v18, %v29078_v18 }
 0x8a8   : > { %v25463_v18 = vld [vmem:[%s26369_s19 + $0x2124] ss:$8 sps:$4 sm:$0xff]  }
 0x8a9   : > { %17298 = vmatpush1.bf16.msra.mxu1 %v25364_v55  ;;  %v29151_v55 = vrot.slane %v29059_v33, %v26438_v51  ;;  %v25455_v33 = vld [vmem:[%s26369_s19 + $0x2110] ss:$8 sps:$4 sm:$0xff]  }
 0x8aa   : > { %18856 = vmatpush1.bf16.msra.mxu0 %v25367_v63  ;;  %17299 = vmatprep.subr.bf16.mxu1 %v25372_v3  ;;  %v25448_v63 = vld [vmem:[%s26369_s19 + $0x2100] ss:$8 sps:$4 sm:$0xff]  }
 0x8ab   : > { %18857 = vmatprep.subr.bf16.mxu0 %v25375_v21  ;;  %v25452_v3 = vld [vmem:[%s26369_s19 + $0x4700] ss:$8 sps:$4 sm:$0xff]   ;;  %v25457_v21 = vld [vmem:[%s26369_s19 + $0x2114] ss:$8 sps:$4 sm:$0xff]  }
 0x8ad   : > { %17300 = vmatpush1.bf16.msra.mxu1 %v25370_v30  ;;  %v25460_v30 = vld [vmem:[%s26369_s19 + $0x4714] ss:$8 sps:$4 sm:$0xff]  }
 0x8ae   : > { %18858 = vmatpush1.bf16.msra.mxu0 %v25373_v9  ;;  %17301 = vmatprep.subr.bf16.mxu1 %v25378_v8  ;;  %v3701_v9 = vcombine.high %v29081_v2, %v29081_v2  ;;  %v25458_v8 = vld [vmem:[%s26369_s19 + $0x4710] ss:$8 sps:$4 sm:$0xff]   ;;  %v25461_v2 = vld [vmem:[%s26369_s19 + $0x2120] ss:$8 sps:$4 sm:$0xff]  }
 0x8af   : > { %18859 = vmatprep.subr.bf16.mxu0 %v25381_v15  ;;  %v25466_v15 = vld [vmem:[%s26369_s19 + $0x4724] ss:$8 sps:$4 sm:$0xff]  }
 0x8b1   : > { %17302 = vmatpush1.bf16.msra.mxu1 %v25376_v24  ;;  %v25464_v24 = vld [vmem:[%s26369_s19 + $0x4720] ss:$8 sps:$4 sm:$0xff]  }
 0x8b2   : > { %18860 = vmatpush1.bf16.msra.mxu0 %v25379_v12  ;;  %17303 = vmatprep.subr.bf16.mxu1 %v25384_v49  ;;  %v25469_v12 = vld [vmem:[%s26369_s19 + $0x2134] ss:$8 sps:$4 sm:$0xff]  }
 0x8b3   : > { %18861 = vmatprep.subr.bf16.mxu0 %v25387_v34  ;;  %v25472_v49 = vld [vmem:[%s26369_s19 + $0x4734] ss:$8 sps:$4 sm:$0xff]   ;;  %v25467_v34 = vld [vmem:[%s26369_s19 + $0x2130] ss:$8 sps:$4 sm:$0xff]  }
 0x8b5   : > { %17304 = vmatpush1.bf16.msra.mxu1 %v25382_v20  ;;  %v25470_v20 = vld [vmem:[%s26369_s19 + $0x4730] ss:$8 sps:$4 sm:$0xff]  }
 0x8b6   : > { %18862 = vmatpush1.bf16.msra.mxu0 %v25385_v16  ;;  %17305 = vmatprep.subr.bf16.mxu1 %v25390_v50  ;;  %v25475_v16 = vld [vmem:[%s26369_s19 + $0x2144] ss:$8 sps:$4 sm:$0xff]  }
 0x8b7   : > { %18863 = vmatprep.subr.bf16.mxu0 %v25393_v41  ;;  %v25478_v50 = vld [vmem:[%s26369_s19 + $0x4744] ss:$8 sps:$4 sm:$0xff]   ;;  %v25473_v41 = vld [vmem:[%s26369_s19 + $0x2140] ss:$8 sps:$4 sm:$0xff]  }
 0x8b9   : > { %17306 = vmatpush1.bf16.msra.mxu1 %v25388_v52  ;;  %v25476_v52 = vld [vmem:[%s26369_s19 + $0x4740] ss:$8 sps:$4 sm:$0xff]  }
 0x8ba   : > { %18864 = vmatpush1.bf16.msra.mxu0 %v25391_v43  ;;  %17307 = vmatprep.subr.bf16.mxu1 %v25396_v59  ;;  %v25481_v43 = vld [vmem:[%s26369_s19 + $0x2154] ss:$8 sps:$4 sm:$0xff]  }
 0x8bb   : > { %18865 = vmatprep.subr.bf16.mxu0 %v25399_v39  ;;  %v25484_v59 = vld [vmem:[%s26369_s19 + $0x4754] ss:$8 sps:$4 sm:$0xff]   ;;  %v25479_v39 = vld [vmem:[%s26369_s19 + $0x2150] ss:$8 sps:$4 sm:$0xff]  }
 0x8bd   : > { %17308 = vmatpush1.bf16.msra.mxu1 %v25394_v36  ;;  %v25482_v36 = vld [vmem:[%s26369_s19 + $0x4750] ss:$8 sps:$4 sm:$0xff]  }
 0x8be   : > { %18866 = vmatpush1.bf16.msra.mxu0 %v25397_v27  ;;  %17309 = vmatprep.subr.bf16.mxu1 %v25402_v23  ;;  %v25487_v27 = vld [vmem:[%s26369_s19 + $0x2164] ss:$8 sps:$4 sm:$0xff]  }
 0x8bf   : > { %18867 = vmatprep.subr.bf16.mxu0 %v25405_v17  ;;  %v25490_v23 = vld [vmem:[%s26369_s19 + $0x4764] ss:$8 sps:$4 sm:$0xff]   ;;  %v25485_v17 = vld [vmem:[%s26369_s19 + $0x2160] ss:$8 sps:$4 sm:$0xff]  }
 0x8c1   : > { %17310 = vmatpush1.bf16.msra.mxu1 %v25400_v35  ;;  %v25488_v35 = vld [vmem:[%s26369_s19 + $0x4760] ss:$8 sps:$4 sm:$0xff]  }
 0x8c2   : > { %18868 = vmatpush1.bf16.msra.mxu0 %v25403_v31  ;;  %17311 = vmatprep.subr.bf16.mxu1 %v25408_v40  ;;  %v25493_v31 = vld [vmem:[%s26369_s19 + $0x2174] ss:$8 sps:$4 sm:$0xff]  }
 0x8c3   : > { %18869 = vmatprep.subr.bf16.mxu0 %v25411_v32  ;;  %v25496_v40 = vld [vmem:[%s26369_s19 + $0x4774] ss:$8 sps:$4 sm:$0xff]   ;;  %v25491_v32 = vld [vmem:[%s26369_s19 + $0x2170] ss:$8 sps:$4 sm:$0xff]  }
 0x8c5   : > { %17312 = vmatpush1.bf16.msra.mxu1 %v25406_v47  ;;  %v25494_v47 = vld [vmem:[%s26369_s19 + $0x4770] ss:$8 sps:$4 sm:$0xff]  }
 0x8c6   : > { %18870 = vmatpush1.bf16.msra.mxu0 %v25409_v56  ;;  %17313 = vmatprep.subr.bf16.mxu1 %v25414_v25  ;;  %v25499_v56 = vld [vmem:[%s26369_s19 + $0x2184] ss:$8 sps:$4 sm:$0xff]  }
 0x8c7   : > { %18871 = vmatprep.subr.bf16.mxu0 %v25417_v19  ;;  %v25502_v25 = vld [vmem:[%s26369_s19 + $0x4784] ss:$8 sps:$4 sm:$0xff]   ;;  %v25497_v19 = vld [vmem:[%s26369_s19 + $0x2180] ss:$8 sps:$4 sm:$0xff]  }
 0x8c9   : > { %17314 = vmatpush1.bf16.msra.mxu1 %v25412_v5  ;;  %v25500_v5 = vld [vmem:[%s26369_s19 + $0x4780] ss:$8 sps:$4 sm:$0xff]  }
 0x8ca   : > { %18872 = vmatpush1.bf16.msra.mxu0 %v25415_v60  ;;  %17315 = vmatprep.subr.bf16.mxu1 %v25420_v13  ;;  %v25505_v60 = vld [vmem:[%s26369_s19 + $0x2194] ss:$8 sps:$4 sm:$0xff]  }
 0x8cb   : > { %18873 = vmatprep.subr.bf16.mxu0 %v25423_v7  ;;  %v25508_v13 = vld [vmem:[%s26369_s19 + $0x4794] ss:$8 sps:$4 sm:$0xff]   ;;  %v25503_v7 = vld [vmem:[%s26369_s19 + $0x2190] ss:$8 sps:$4 sm:$0xff]  }
 0x8cd   : > { %17316 = vmatpush1.bf16.msra.mxu1 %v25418_v11  ;;  %v25506_v11 = vld [vmem:[%s26369_s19 + $0x4790] ss:$8 sps:$4 sm:$0xff]  }
 0x8ce   : > { %18874 = vmatpush1.bf16.msra.mxu0 %v25421_v48  ;;  %17317 = vmatprep.subr.bf16.mxu1 %v25426_v0  ;;  %v25511_v48 = vld [vmem:[%s26369_s19 + $0x21a4] ss:$8 sps:$4 sm:$0xff]  }
 0x8cf   : > { %18875 = vmatprep.subr.bf16.mxu0 %v25429_v53  ;;  %v25514_v0 = vld [vmem:[%s26369_s19 + $0x47a4] ss:$8 sps:$4 sm:$0xff]   ;;  %v25509_v53 = vld [vmem:[%s26369_s19 + $0x21a0] ss:$8 sps:$4 sm:$0xff]  }
 0x8d1   : > { %17318 = vmatpush1.bf16.msra.mxu1 %v25424_v37  ;;  %v25512_v37 = vld [vmem:[%s26369_s19 + $0x47a0] ss:$8 sps:$4 sm:$0xff]  }
 0x8d2   : > { %18876 = vmatpush1.bf16.msra.mxu0 %v25427_v46  ;;  %17319 = vmatprep.subr.bf16.mxu1 %v25432_v4  ;;  %v25517_v46 = vld [vmem:[%s26369_s19 + $0x21b4] ss:$8 sps:$4 sm:$0xff]  }
 0x8d3   : > { %18877 = vmatprep.subr.bf16.mxu0 %v25435_v44  ;;  %v25520_v4 = vld [vmem:[%s26369_s19 + $0x47b4] ss:$8 sps:$4 sm:$0xff]   ;;  %v25515_v44 = vld [vmem:[%s26369_s19 + $0x21b0] ss:$8 sps:$4 sm:$0xff]  }
 0x8d5   : > { %17320 = vmatpush1.bf16.msra.mxu1 %v25430_v57  ;;  %v25518_v57 = vld [vmem:[%s26369_s19 + $0x47b0] ss:$8 sps:$4 sm:$0xff]  }
 0x8d6   : > { %18878 = vmatpush1.bf16.msra.mxu0 %v25433_v1  ;;  %17321 = vmatprep.subr.bf16.mxu1 %v25438_v10  ;;  %v25523_v1 = vld [vmem:[%s26369_s19 + $0x21c4] ss:$8 sps:$4 sm:$0xff]  }
 0x8d7   : > { %18879 = vmatprep.subr.bf16.mxu0 %v25441_v42  ;;  %v25526_v10 = vld [vmem:[%s26369_s19 + $0x47c4] ss:$8 sps:$4 sm:$0xff]   ;;  %v25521_v42 = vld [vmem:[%s26369_s19 + $0x21c0] ss:$8 sps:$4 sm:$0xff]  }
 0x8d9   : > { %17322 = vmatpush1.bf16.msra.mxu1 %v25436_v58  ;;  %v25524_v58 = vld [vmem:[%s26369_s19 + $0x47c0] ss:$8 sps:$4 sm:$0xff]  }
 0x8da   : > { %18880 = vmatpush1.bf16.msra.mxu0 %v25439_v26  ;;  %17323 = vmatprep.subr.bf16.mxu1 %v25444_v14  ;;  %v25529_v26 = vld [vmem:[%s26369_s19 + $0x21d4] ss:$8 sps:$4 sm:$0xff]  }
 0x8db   : > { %18881 = vmatprep.subr.bf16.mxu0 %v25447_v54  ;;  %v25532_v14 = vld [vmem:[%s26369_s19 + $0x47d4] ss:$8 sps:$4 sm:$0xff]   ;;  %v25527_v54 = vld [vmem:[%s26369_s19 + $0x21d0] ss:$8 sps:$4 sm:$0xff]  }
 0x8dd   : > { %17324 = vmatpush1.bf16.msra.mxu1 %v25442_v62  ;;  %v25530_v62 = vld [vmem:[%s26369_s19 + $0x47d0] ss:$8 sps:$4 sm:$0xff]  }
 0x8de   : > { %18882 = vmatpush1.bf16.msra.mxu0 %v25445_v38  ;;  %17334 = vmatprep.subr.bf16.mxu1 %v25450_v28  ;;  %v25535_v38 = vld [vmem:[%s26369_s19 + $0x21e4] ss:$8 sps:$4 sm:$0xff]  }
 0x8df   : > { %18892 = vmatprep.subr.bf16.mxu0 %v25454_v29  ;;  %v25538_v28 = vld [vmem:[%s26369_s19 + $0x47e4] ss:$8 sps:$4 sm:$0xff]   ;;  %v3212_v29 = vcombine.high %v29048_v61, %v29048_v61  ;;  %v25539_v61 = vld [vmem:[%s26369_s19 + $0x21f0] ss:$8 sps:$4 sm:$0xff]  }
 0x8e0   : > { %17326 = vmatmul.mubr.bf16.vlgmr.msra.gmra.mrb[0].mxu1 %v29147_v22 }
 0x8e1   : > { %18884 = vmatmul.mubr.bf16.vlgmr.msra.gmra.mrb[0].mxu0 %v29151_v55  ;;  %17335 = vmatpush1.bf16.msra.mxu1 %v25448_v63  ;;  %v29218_v63 = vld [vmem:[%s26387_s30 + $0x90] sm:$0x7f] }
 0x8e2   : > { %18893 = vmatpush1.bf16.msra.mxu0 %v25452_v3  ;;  %17336 = vmatprep.subr.bf16.mxu1 %v25457_v21  ;;  %v25533_v3 = vld [vmem:[%s26369_s19 + $0x21e0] ss:$8 sps:$4 sm:$0xff]  }
 0x8e3   : > { %18894 = vmatprep.subr.bf16.mxu0 %v25460_v30  ;;  %17366 = vmatprep.mubr.bf16.mxu1 %v3259_v6  ;;  %v25536_v21 = vld [vmem:[%s26369_s19 + $0x47e0] ss:$8 sps:$4 sm:$0xff]   ;;  %v25541_v30 = vld [vmem:[%s26369_s19 + $0x21f4] ss:$8 sps:$4 sm:$0xff]  }
 0x8e4   : > { %18924 = vmatprep.mubr.bf16.mxu0 %v3701_v9  ;;  %v25544_v6 = vld [vmem:[%s26369_s19 + $0x47f4] ss:$8 sps:$4 sm:$0xff]   ;;  %v29225_v9 = vrot.slane %v3212_v29, %v26438_v51  ;;  %v25611_v29 = vld [vmem:[%s26369_s19 + $0x22b0] ss:$8 sps:$4 sm:$0xff]  }
 0x8e5   : > { %17337 = vmatpush1.bf16.msra.mxu1 %v25455_v33  ;;  %v29229_v33 = vrot.slane %v29218_v63, %v26438_v51 }
 0x8e6   : > { %18895 = vmatpush1.bf16.msra.mxu0 %v25458_v8  ;;  %17338 = vmatprep.subr.bf16.mxu1 %v25463_v18  ;;  %v25542_v8 = vld [vmem:[%s26369_s19 + $0x47f0] ss:$8 sps:$4 sm:$0xff]   ;;  %v25547_v18 = vld [vmem:[%s26369_s19 + $0x2204] ss:$8 sps:$4 sm:$0xff]  }
 0x8e7   : > { %18896 = vmatprep.subr.bf16.mxu0 %v25466_v15  ;;  %v25550_v15 = vld [vmem:[%s26369_s19 + $0x4804] ss:$8 sps:$4 sm:$0xff]  }
 0x8e9   : > { %17339 = vmatpush1.bf16.msra.mxu1 %v25461_v2  ;;  %v3228_v2 = vcombine.high %v29225_v9, %v29225_v9 }
 0x8ea   : > { %18897 = vmatpush1.bf16.msra.mxu0 %v25464_v24  ;;  %17340 = vmatprep.subr.bf16.mxu1 %v25469_v12  ;;  %v3717_v24 = vcombine.high %v29229_v33, %v29229_v33  ;;  %v3257_v12 = vcombine.high %v29147_v22, %v29147_v22 }
 0x8eb   : > { %18898 = vmatprep.subr.bf16.mxu0 %v25472_v49  ;;  %v3699_v49 = vcombine.high %v29151_v55, %v29151_v55  ;;  %v25551_v55 = vld [vmem:[%s26369_s19 + $0x2210] ss:$8 sps:$4 sm:$0xff]  }
 0x8ec   : > { %v29251_v22 = vrot.slane %v3717_v24, %v26438_v51  ;;  %v25631_v24 = vld [vmem:[%s26369_s19 + $0x22e4] ss:$8 sps:$4 sm:$0xff]  }
 0x8ed   : > { %17341 = vmatpush1.bf16.msra.mxu1 %v25467_v34  ;;  %v25545_v34 = vld [vmem:[%s26369_s19 + $0x2200] ss:$8 sps:$4 sm:$0xff]  }
 0x8ee   : > { %18899 = vmatpush1.bf16.msra.mxu0 %v25470_v20  ;;  %17342 = vmatprep.subr.bf16.mxu1 %v25475_v16  ;;  %v25548_v20 = vld [vmem:[%s26369_s19 + $0x4800] ss:$8 sps:$4 sm:$0xff]   ;;  %v25553_v16 = vld [vmem:[%s26369_s19 + $0x2214] ss:$8 sps:$4 sm:$0xff]  }
 0x8ef   : > { %18900 = vmatprep.subr.bf16.mxu0 %v25478_v50  ;;  %v25556_v50 = vld [vmem:[%s26369_s19 + $0x4814] ss:$8 sps:$4 sm:$0xff]  }
 0x8f1   : > { %17343 = vmatpush1.bf16.msra.mxu1 %v25473_v41  ;;  %v29248_v41 = vrot.slane %v3228_v2, %v26438_v51  ;;  %v25626_v2 = vld [vmem:[%s26369_s19 + $0x48d0] ss:$8 sps:$4 sm:$0xff]  }
 0x8f2   : > { %18901 = vmatpush1.bf16.msra.mxu0 %v25476_v52  ;;  %17344 = vmatprep.subr.bf16.mxu1 %v25481_v43  ;;  %v25554_v52 = vld [vmem:[%s26369_s19 + $0x4810] ss:$8 sps:$4 sm:$0xff]   ;;  %v25559_v43 = vld [vmem:[%s26369_s19 + $0x2224] ss:$8 sps:$4 sm:$0xff]  }
 0x8f3   : > { %18902 = vmatprep.subr.bf16.mxu0 %v25484_v59  ;;  %v25562_v59 = vld [vmem:[%s26369_s19 + $0x4824] ss:$8 sps:$4 sm:$0xff]  }
 0x8f5   : > { %17345 = vmatpush1.bf16.msra.mxu1 %v25479_v39  ;;  %v25557_v39 = vld [vmem:[%s26369_s19 + $0x2220] ss:$8 sps:$4 sm:$0xff]  }
 0x8f6   : > { %18903 = vmatpush1.bf16.msra.mxu0 %v25482_v36  ;;  %17346 = vmatprep.subr.bf16.mxu1 %v25487_v27  ;;  %v25560_v36 = vld [vmem:[%s26369_s19 + $0x4820] ss:$8 sps:$4 sm:$0xff]   ;;  %v25565_v27 = vld [vmem:[%s26369_s19 + $0x2234] ss:$8 sps:$4 sm:$0xff]  }
 0x8f7   : > { %18904 = vmatprep.subr.bf16.mxu0 %v25490_v23  ;;  %v25568_v23 = vld [vmem:[%s26369_s19 + $0x4834] ss:$8 sps:$4 sm:$0xff]  }
 0x8f9   : > { %17347 = vmatpush1.bf16.msra.mxu1 %v25485_v17  ;;  %v25563_v17 = vld [vmem:[%s26369_s19 + $0x2230] ss:$8 sps:$4 sm:$0xff]  }
 0x8fa   : > { %18905 = vmatpush1.bf16.msra.mxu0 %v25488_v35  ;;  %17348 = vmatprep.subr.bf16.mxu1 %v25493_v31  ;;  %v25566_v35 = vld [vmem:[%s26369_s19 + $0x4830] ss:$8 sps:$4 sm:$0xff]   ;;  %v25571_v31 = vld [vmem:[%s26369_s19 + $0x2244] ss:$8 sps:$4 sm:$0xff]  }
 0x8fb   : > { %18906 = vmatprep.subr.bf16.mxu0 %v25496_v40  ;;  %v25574_v40 = vld [vmem:[%s26369_s19 + $0x4844] ss:$8 sps:$4 sm:$0xff]  }
 0x8fd   : > { %17349 = vmatpush1.bf16.msra.mxu1 %v25491_v32  ;;  %v25569_v32 = vld [vmem:[%s26369_s19 + $0x2240] ss:$8 sps:$4 sm:$0xff]  }
 0x8fe   : > { %18907 = vmatpush1.bf16.msra.mxu0 %v25494_v47  ;;  %17350 = vmatprep.subr.bf16.mxu1 %v25499_v56  ;;  %v25572_v47 = vld [vmem:[%s26369_s19 + $0x4840] ss:$8 sps:$4 sm:$0xff]   ;;  %v25577_v56 = vld [vmem:[%s26369_s19 + $0x2254] ss:$8 sps:$4 sm:$0xff]  }
 0x8ff   : > { %18908 = vmatprep.subr.bf16.mxu0 %v25502_v25  ;;  %v25580_v25 = vld [vmem:[%s26369_s19 + $0x4854] ss:$8 sps:$4 sm:$0xff]  }
 0x901   : > { %17351 = vmatpush1.bf16.msra.mxu1 %v25497_v19  ;;  %v25575_v19 = vld [vmem:[%s26369_s19 + $0x2250] ss:$8 sps:$4 sm:$0xff]  }
 0x902   : > { %18909 = vmatpush1.bf16.msra.mxu0 %v25500_v5  ;;  %17352 = vmatprep.subr.bf16.mxu1 %v25505_v60  ;;  %v25578_v5 = vld [vmem:[%s26369_s19 + $0x4850] ss:$8 sps:$4 sm:$0xff]   ;;  %v25583_v60 = vld [vmem:[%s26369_s19 + $0x2264] ss:$8 sps:$4 sm:$0xff]  }
 0x903   : > { %18910 = vmatprep.subr.bf16.mxu0 %v25508_v13  ;;  %v25586_v13 = vld [vmem:[%s26369_s19 + $0x4864] ss:$8 sps:$4 sm:$0xff]  }
 0x905   : > { %17353 = vmatpush1.bf16.msra.mxu1 %v25503_v7  ;;  %v25581_v7 = vld [vmem:[%s26369_s19 + $0x2260] ss:$8 sps:$4 sm:$0xff]  }
 0x906   : > { %18911 = vmatpush1.bf16.msra.mxu0 %v25506_v11  ;;  %17354 = vmatprep.subr.bf16.mxu1 %v25511_v48  ;;  %v25584_v11 = vld [vmem:[%s26369_s19 + $0x4860] ss:$8 sps:$4 sm:$0xff]   ;;  %v25589_v48 = vld [vmem:[%s26369_s19 + $0x2274] ss:$8 sps:$4 sm:$0xff]  }
 0x907   : > { %18912 = vmatprep.subr.bf16.mxu0 %v25514_v0  ;;  %v25592_v0 = vld [vmem:[%s26369_s19 + $0x4874] ss:$8 sps:$4 sm:$0xff]  }
 0x909   : > { %17355 = vmatpush1.bf16.msra.mxu1 %v25509_v53  ;;  %v25587_v53 = vld [vmem:[%s26369_s19 + $0x2270] ss:$8 sps:$4 sm:$0xff]  }
 0x90a   : > { %18913 = vmatpush1.bf16.msra.mxu0 %v25512_v37  ;;  %17356 = vmatprep.subr.bf16.mxu1 %v25517_v46  ;;  %v25590_v37 = vld [vmem:[%s26369_s19 + $0x4870] ss:$8 sps:$4 sm:$0xff]   ;;  %v25595_v46 = vld [vmem:[%s26369_s19 + $0x2284] ss:$8 sps:$4 sm:$0xff]  }
 0x90b   : > { %18914 = vmatprep.subr.bf16.mxu0 %v25520_v4  ;;  %v25598_v4 = vld [vmem:[%s26369_s19 + $0x4884] ss:$8 sps:$4 sm:$0xff]  }
 0x90d   : > { %17357 = vmatpush1.bf16.msra.mxu1 %v25515_v44  ;;  %v25593_v44 = vld [vmem:[%s26369_s19 + $0x2280] ss:$8 sps:$4 sm:$0xff]  }
 0x90e   : > { %18915 = vmatpush1.bf16.msra.mxu0 %v25518_v57  ;;  %17358 = vmatprep.subr.bf16.mxu1 %v25523_v1  ;;  %v25596_v57 = vld [vmem:[%s26369_s19 + $0x4880] ss:$8 sps:$4 sm:$0xff]   ;;  %v25601_v1 = vld [vmem:[%s26369_s19 + $0x2294] ss:$8 sps:$4 sm:$0xff]  }
 0x90f   : > { %18916 = vmatprep.subr.bf16.mxu0 %v25526_v10  ;;  %v25604_v10 = vld [vmem:[%s26369_s19 + $0x4894] ss:$8 sps:$4 sm:$0xff]  }
 0x911   : > { %17359 = vmatpush1.bf16.msra.mxu1 %v25521_v42  ;;  %v25599_v42 = vld [vmem:[%s26369_s19 + $0x2290] ss:$8 sps:$4 sm:$0xff]  }
 0x912   : > { %18917 = vmatpush1.bf16.msra.mxu0 %v25524_v58  ;;  %17360 = vmatprep.subr.bf16.mxu1 %v25529_v26  ;;  %v25602_v58 = vld [vmem:[%s26369_s19 + $0x4890] ss:$8 sps:$4 sm:$0xff]   ;;  %v25607_v26 = vld [vmem:[%s26369_s19 + $0x22a4] ss:$8 sps:$4 sm:$0xff]  }
 0x913   : > { %18918 = vmatprep.subr.bf16.mxu0 %v25532_v14  ;;  %v25610_v14 = vld [vmem:[%s26369_s19 + $0x48a4] ss:$8 sps:$4 sm:$0xff]  }
 0x915   : > { %17361 = vmatpush1.bf16.msra.mxu1 %v25527_v54  ;;  %v25605_v54 = vld [vmem:[%s26369_s19 + $0x22a0] ss:$8 sps:$4 sm:$0xff]  }
 0x916   : > { %18919 = vmatpush1.bf16.msra.mxu0 %v25530_v62  ;;  %17362 = vmatprep.subr.bf16.mxu1 %v25535_v38  ;;  %v25608_v62 = vld [vmem:[%s26369_s19 + $0x48a0] ss:$8 sps:$4 sm:$0xff]   ;;  %v25613_v38 = vld [vmem:[%s26369_s19 + $0x22b4] ss:$8 sps:$4 sm:$0xff]  }
 0x917   : > { %18920 = vmatprep.subr.bf16.mxu0 %v25538_v28  ;;  %v25616_v28 = vld [vmem:[%s26369_s19 + $0x48b4] ss:$8 sps:$4 sm:$0xff]  }
 0x919   : > { %17363 = vmatpush1.bf16.msra.mxu1 %v25533_v3  ;;  %v25614_v3 = vld [vmem:[%s26369_s19 + $0x48b0] ss:$8 sps:$4 sm:$0xff]  }
 0x91a   : > { %18921 = vmatpush1.bf16.msra.mxu0 %v25536_v21  ;;  %17364 = vmatprep.subr.bf16.mxu1 %v25541_v30  ;;  %v25619_v21 = vld [vmem:[%s26369_s19 + $0x22c4] ss:$8 sps:$4 sm:$0xff]  }
 0x91b   : > { %18922 = vmatprep.subr.bf16.mxu0 %v25544_v6  ;;  %v25622_v30 = vld [vmem:[%s26369_s19 + $0x48c4] ss:$8 sps:$4 sm:$0xff]   ;;  %v25617_v6 = vld [vmem:[%s26369_s19 + $0x22c0] ss:$8 sps:$4 sm:$0xff]  }
 0x91d   : > { %17365 = vmatpush1.bf16.msra.mxu1 %v25539_v61  ;;  %v25620_v61 = vld [vmem:[%s26369_s19 + $0x48c0] ss:$8 sps:$4 sm:$0xff]  }
 0x91e   : > { %18923 = vmatpush1.bf16.msra.mxu0 %v25542_v8  ;;  %17375 = vmatprep.subr.bf16.mxu1 %v25547_v18  ;;  %v25625_v8 = vld [vmem:[%s26369_s19 + $0x22d4] ss:$8 sps:$4 sm:$0xff]  }
 0x91f   : > { %18933 = vmatprep.subr.bf16.mxu0 %v25550_v15  ;;  %v25628_v18 = vld [vmem:[%s26369_s19 + $0x48d4] ss:$8 sps:$4 sm:$0xff]   ;;  %v25623_v15 = vld [vmem:[%s26369_s19 + $0x22d0] ss:$8 sps:$4 sm:$0xff]  }
 0x920   : > { %17367 = vmatmul.mubr.bf16.vlgmr.msra.gmra.mrb[0].mxu1 %v3257_v12  ;;  %v25634_v12 = vld [vmem:[%s26369_s19 + $0x48e4] ss:$8 sps:$4 sm:$0xff]  }
 0x921   : > { %18925 = vmatmul.mubr.bf16.vlgmr.msra.gmra.mrb[0].mxu0 %v3699_v49  ;;  %17376 = vmatpush1.bf16.msra.mxu1 %v25545_v34  ;;  %v25629_v49 = vld [vmem:[%s26369_s19 + $0x22e0] ss:$8 sps:$4 sm:$0xff]  }
 0x922   : > { %18934 = vmatpush1.bf16.msra.mxu0 %v25548_v20  ;;  %17377 = vmatprep.subr.bf16.mxu1 %v25553_v16  ;;  %v25632_v34 = vld [vmem:[%s26369_s19 + $0x48e0] ss:$8 sps:$4 sm:$0xff]   ;;  %v25637_v20 = vld [vmem:[%s26369_s19 + $0x22f4] ss:$8 sps:$4 sm:$0xff]  }
 0x923   : > { %18935 = vmatprep.subr.bf16.mxu0 %v25556_v50  ;;  %17407 = vmatprep.mubr.bf16.mxu1 %v29248_v41  ;;  %v25640_v16 = vld [vmem:[%s26369_s19 + $0x48f4] ss:$8 sps:$4 sm:$0xff]   ;;  %v25635_v50 = vld [vmem:[%s26369_s19 + $0x22f0] ss:$8 sps:$4 sm:$0xff]  }
 0x924   : > { %18965 = vmatprep.mubr.bf16.mxu0 %v29251_v22 }
 0x925   : > { %17378 = vmatpush1.bf16.msra.mxu1 %v25551_v55  ;;  %v25638_v55 = vld [vmem:[%s26369_s19 + $0x48f0] ss:$8 sps:$4 sm:$0xff]  }
 0x926   : > { %18936 = vmatpush1.bf16.msra.mxu0 %v25554_v52  ;;  %17379 = vmatprep.subr.bf16.mxu1 %v25559_v43  ;;  %v25644_v52 = vld [vmem:[%s26369_s19 + $0x2304] ss:$8 sps:$4 sm:$0xff]  }
 0x927   : > { %18937 = vmatprep.subr.bf16.mxu0 %v25562_v59  ;;  %v25647_v43 = vld [vmem:[%s26369_s19 + $0x4904] ss:$8 sps:$4 sm:$0xff]   ;;  %v29317_v59 = vrot.slane %v29225_v9, %v26438_v51  ;;  %v3260_v9 = vcombine.high %v29248_v41, %v29248_v41 }
 0x928   : > { %v25656_v41 = vld [vmem:[%s26369_s19 + $0x2324] ss:$8 sps:$4 sm:$0xff]  }
 0x929   : > { %17380 = vmatpush1.bf16.msra.mxu1 %v25557_v39  ;;  %v29321_v39 = vrot.slane %v29229_v33, %v26438_v51  ;;  %v25648_v33 = vld [vmem:[%s26369_s19 + $0x2310] ss:$8 sps:$4 sm:$0xff]  }
 0x92a   : > { %18938 = vmatpush1.bf16.msra.mxu0 %v25560_v36  ;;  %17381 = vmatprep.subr.bf16.mxu1 %v25565_v27  ;;  %v25642_v36 = vld [vmem:[%s26369_s19 + $0x2300] ss:$8 sps:$4 sm:$0xff]  }
 0x92b   : > { %18939 = vmatprep.subr.bf16.mxu0 %v25568_v23  ;;  %v25645_v27 = vld [vmem:[%s26369_s19 + $0x4900] ss:$8 sps:$4 sm:$0xff]   ;;  %v25650_v23 = vld [vmem:[%s26369_s19 + $0x2314] ss:$8 sps:$4 sm:$0xff]  }
 0x92d   : > { %17382 = vmatpush1.bf16.msra.mxu1 %v25563_v17  ;;  %v25653_v17 = vld [vmem:[%s26369_s19 + $0x4914] ss:$8 sps:$4 sm:$0xff]  }
 0x92e   : > { %18940 = vmatpush1.bf16.msra.mxu0 %v25566_v35  ;;  %17383 = vmatprep.subr.bf16.mxu1 %v25571_v31  ;;  %v3749_v35 = vcombine.high %v29251_v22, %v29251_v22  ;;  %v25651_v31 = vld [vmem:[%s26369_s19 + $0x4910] ss:$8 sps:$4 sm:$0xff]   ;;  %v25654_v22 = vld [vmem:[%s26369_s19 + $0x2320] ss:$8 sps:$4 sm:$0xff]  }
 0x92f   : > { %18941 = vmatprep.subr.bf16.mxu0 %v25574_v40  ;;  %v25659_v40 = vld [vmem:[%s26369_s19 + $0x4924] ss:$8 sps:$4 sm:$0xff]  }
 0x931   : > { %17384 = vmatpush1.bf16.msra.mxu1 %v25569_v32  ;;  %v25657_v32 = vld [vmem:[%s26369_s19 + $0x4920] ss:$8 sps:$4 sm:$0xff]  }
 0x932   : > { %18942 = vmatpush1.bf16.msra.mxu0 %v25572_v47  ;;  %17385 = vmatprep.subr.bf16.mxu1 %v25577_v56  ;;  %v25662_v47 = vld [vmem:[%s26369_s19 + $0x2334] ss:$8 sps:$4 sm:$0xff]  }
 0x933   : > { %18943 = vmatprep.subr.bf16.mxu0 %v25580_v25  ;;  %v25665_v56 = vld [vmem:[%s26369_s19 + $0x4934] ss:$8 sps:$4 sm:$0xff]   ;;  %v25660_v25 = vld [vmem:[%s26369_s19 + $0x2330] ss:$8 sps:$4 sm:$0xff]  }
 0x935   : > { %17386 = vmatpush1.bf16.msra.mxu1 %v25575_v19  ;;  %v25663_v19 = vld [vmem:[%s26369_s19 + $0x4930] ss:$8 sps:$4 sm:$0xff]  }
 0x936   : > { %18944 = vmatpush1.bf16.msra.mxu0 %v25578_v5  ;;  %17387 = vmatprep.subr.bf16.mxu1 %v25583_v60  ;;  %v25668_v5 = vld [vmem:[%s26369_s19 + $0x2344] ss:$8 sps:$4 sm:$0xff]  }
 0x937   : > { %18945 = vmatprep.subr.bf16.mxu0 %v25586_v13  ;;  %v25671_v60 = vld [vmem:[%s26369_s19 + $0x4944] ss:$8 sps:$4 sm:$0xff]   ;;  %v25666_v13 = vld [vmem:[%s26369_s19 + $0x2340] ss:$8 sps:$4 sm:$0xff]  }
 0x939   : > { %17388 = vmatpush1.bf16.msra.mxu1 %v25581_v7  ;;  %v25669_v7 = vld [vmem:[%s26369_s19 + $0x4940] ss:$8 sps:$4 sm:$0xff]  }
 0x93a   : > { %18946 = vmatpush1.bf16.msra.mxu0 %v25584_v11  ;;  %17389 = vmatprep.subr.bf16.mxu1 %v25589_v48  ;;  %v25674_v11 = vld [vmem:[%s26369_s19 + $0x2354] ss:$8 sps:$4 sm:$0xff]  }
 0x93b   : > { %18947 = vmatprep.subr.bf16.mxu0 %v25592_v0  ;;  %v25677_v48 = vld [vmem:[%s26369_s19 + $0x4954] ss:$8 sps:$4 sm:$0xff]   ;;  %v25672_v0 = vld [vmem:[%s26369_s19 + $0x2350] ss:$8 sps:$4 sm:$0xff]  }
 0x93d   : > { %17390 = vmatpush1.bf16.msra.mxu1 %v25587_v53  ;;  %v25675_v53 = vld [vmem:[%s26369_s19 + $0x4950] ss:$8 sps:$4 sm:$0xff]  }
 0x93e   : > { %18948 = vmatpush1.bf16.msra.mxu0 %v25590_v37  ;;  %17391 = vmatprep.subr.bf16.mxu1 %v25595_v46  ;;  %v25680_v37 = vld [vmem:[%s26369_s19 + $0x2364] ss:$8 sps:$4 sm:$0xff]  }
 0x93f   : > { %18949 = vmatprep.subr.bf16.mxu0 %v25598_v4  ;;  %v25683_v46 = vld [vmem:[%s26369_s19 + $0x4964] ss:$8 sps:$4 sm:$0xff]   ;;  %v25678_v4 = vld [vmem:[%s26369_s19 + $0x2360] ss:$8 sps:$4 sm:$0xff]  }
 0x941   : > { %17392 = vmatpush1.bf16.msra.mxu1 %v25593_v44  ;;  %v25681_v44 = vld [vmem:[%s26369_s19 + $0x4960] ss:$8 sps:$4 sm:$0xff]  }
 0x942   : > { %18950 = vmatpush1.bf16.msra.mxu0 %v25596_v57  ;;  %17393 = vmatprep.subr.bf16.mxu1 %v25601_v1  ;;  %v25686_v57 = vld [vmem:[%s26369_s19 + $0x2374] ss:$8 sps:$4 sm:$0xff]  }
 0x943   : > { %18951 = vmatprep.subr.bf16.mxu0 %v25604_v10  ;;  %v25689_v1 = vld [vmem:[%s26369_s19 + $0x4974] ss:$8 sps:$4 sm:$0xff]   ;;  %v25684_v10 = vld [vmem:[%s26369_s19 + $0x2370] ss:$8 sps:$4 sm:$0xff]  }
 0x945   : > { %17394 = vmatpush1.bf16.msra.mxu1 %v25599_v42  ;;  %v25687_v42 = vld [vmem:[%s26369_s19 + $0x4970] ss:$8 sps:$4 sm:$0xff]  }
 0x946   : > { %18952 = vmatpush1.bf16.msra.mxu0 %v25602_v58  ;;  %17395 = vmatprep.subr.bf16.mxu1 %v25607_v26  ;;  %v25692_v58 = vld [vmem:[%s26369_s19 + $0x2384] ss:$8 sps:$4 sm:$0xff]  }
 0x947   : > { %18953 = vmatprep.subr.bf16.mxu0 %v25610_v14  ;;  %v25695_v26 = vld [vmem:[%s26369_s19 + $0x4984] ss:$8 sps:$4 sm:$0xff]   ;;  %v25690_v14 = vld [vmem:[%s26369_s19 + $0x2380] ss:$8 sps:$4 sm:$0xff]  }
 0x949   : > { %17396 = vmatpush1.bf16.msra.mxu1 %v25605_v54  ;;  %v25693_v54 = vld [vmem:[%s26369_s19 + $0x4980] ss:$8 sps:$4 sm:$0xff]  }
 0x94a   : > { %18954 = vmatpush1.bf16.msra.mxu0 %v25608_v62  ;;  %17397 = vmatprep.subr.bf16.mxu1 %v25613_v38  ;;  %v25698_v62 = vld [vmem:[%s26369_s19 + $0x2394] ss:$8 sps:$4 sm:$0xff]  }
 0x94b   : > { %18955 = vmatprep.subr.bf16.mxu0 %v25616_v28  ;;  %v25701_v38 = vld [vmem:[%s26369_s19 + $0x4994] ss:$8 sps:$4 sm:$0xff]   ;;  %v25696_v28 = vld [vmem:[%s26369_s19 + $0x2390] ss:$8 sps:$4 sm:$0xff]  }
 0x94d   : > { %17398 = vmatpush1.bf16.msra.mxu1 %v25611_v29  ;;  %v25699_v29 = vld [vmem:[%s26369_s19 + $0x4990] ss:$8 sps:$4 sm:$0xff]  }
 0x94e   : > { %18956 = vmatpush1.bf16.msra.mxu0 %v25614_v3  ;;  %17399 = vmatprep.subr.bf16.mxu1 %v25619_v21  ;;  %v25704_v3 = vld [vmem:[%s26369_s19 + $0x23a4] ss:$8 sps:$4 sm:$0xff]  }
 0x94f   : > { %18957 = vmatprep.subr.bf16.mxu0 %v25622_v30  ;;  %v25707_v21 = vld [vmem:[%s26369_s19 + $0x49a4] ss:$8 sps:$4 sm:$0xff]   ;;  %v25702_v30 = vld [vmem:[%s26369_s19 + $0x23a0] ss:$8 sps:$4 sm:$0xff]  }
 0x951   : > { %17400 = vmatpush1.bf16.msra.mxu1 %v25617_v6  ;;  %v25705_v6 = vld [vmem:[%s26369_s19 + $0x49a0] ss:$8 sps:$4 sm:$0xff]  }
 0x952   : > { %18958 = vmatpush1.bf16.msra.mxu0 %v25620_v61  ;;  %17401 = vmatprep.subr.bf16.mxu1 %v25625_v8  ;;  %v25710_v61 = vld [vmem:[%s26369_s19 + $0x23b4] ss:$8 sps:$4 sm:$0xff]  }
 0x953   : > { %18959 = vmatprep.subr.bf16.mxu0 %v25628_v18  ;;  %v25713_v8 = vld [vmem:[%s26369_s19 + $0x49b4] ss:$8 sps:$4 sm:$0xff]   ;;  %v25708_v18 = vld [vmem:[%s26369_s19 + $0x23b0] ss:$8 sps:$4 sm:$0xff]  }
 0x955   : > { %17402 = vmatpush1.bf16.msra.mxu1 %v25623_v15  ;;  %v25711_v15 = vld [vmem:[%s26369_s19 + $0x49b0] ss:$8 sps:$4 sm:$0xff]  }
 0x956   : > { %18960 = vmatpush1.bf16.msra.mxu0 %v25626_v2  ;;  %17403 = vmatprep.subr.bf16.mxu1 %v25631_v24  ;;  %v25716_v2 = vld [vmem:[%s26369_s19 + $0x23c4] ss:$8 sps:$4 sm:$0xff]  }
 0x957   : > { %18961 = vmatprep.subr.bf16.mxu0 %v25634_v12  ;;  %v25719_v24 = vld [vmem:[%s26369_s19 + $0x49c4] ss:$8 sps:$4 sm:$0xff]   ;;  %v25714_v12 = vld [vmem:[%s26369_s19 + $0x23c0] ss:$8 sps:$4 sm:$0xff]  }
 0x959   : > { %17404 = vmatpush1.bf16.msra.mxu1 %v25629_v49  ;;  %v25717_v49 = vld [vmem:[%s26369_s19 + $0x49c0] ss:$8 sps:$4 sm:$0xff]  }
 0x95a   : > { %18962 = vmatpush1.bf16.msra.mxu0 %v25632_v34  ;;  %17405 = vmatprep.subr.bf16.mxu1 %v25637_v20  ;;  %v25722_v34 = vld [vmem:[%s26369_s19 + $0x23d4] ss:$8 sps:$4 sm:$0xff]  }
 0x95b   : > { %18963 = vmatprep.subr.bf16.mxu0 %v25640_v16  ;;  %v25725_v20 = vld [vmem:[%s26369_s19 + $0x49d4] ss:$8 sps:$4 sm:$0xff]   ;;  %v25720_v16 = vld [vmem:[%s26369_s19 + $0x23d0] ss:$8 sps:$4 sm:$0xff]  }
 0x95d   : > { %17406 = vmatpush1.bf16.msra.mxu1 %v25635_v50  ;;  %v25723_v50 = vld [vmem:[%s26369_s19 + $0x49d0] ss:$8 sps:$4 sm:$0xff]  }
 0x95e   : > { %18964 = vmatpush1.bf16.msra.mxu0 %v25638_v55  ;;  %17416 = vmatprep.subr.bf16.mxu1 %v25644_v52  ;;  %v25728_v55 = vld [vmem:[%s26369_s19 + $0x23e4] ss:$8 sps:$4 sm:$0xff]  }
 0x95f   : > { %18974 = vmatprep.subr.bf16.mxu0 %v25647_v43  ;;  %v25731_v52 = vld [vmem:[%s26369_s19 + $0x49e4] ss:$8 sps:$4 sm:$0xff]   ;;  %v3702_v43 = vcombine.high %v29218_v63, %v29218_v63  ;;  %v25732_v63 = vld [vmem:[%s26369_s19 + $0x23f0] ss:$8 sps:$4 sm:$0xff]  }
 0x960   : > { %17408 = vmatmul.mubr.bf16.vlgmr.msra.gmra.mrb[0].mxu1 %v29317_v59 }
 0x961   : > { %18966 = vmatmul.mubr.bf16.vlgmr.msra.gmra.mrb[0].mxu0 %v29321_v39  ;;  %17417 = vmatpush1.bf16.msra.mxu1 %v25642_v36  ;;  %v25726_v36 = vld [vmem:[%s26369_s19 + $0x23e0] ss:$8 sps:$4 sm:$0xff]  }
 0x962   : > { %18975 = vmatpush1.bf16.msra.mxu0 %v25645_v27  ;;  %17418 = vmatprep.subr.bf16.mxu1 %v25650_v23  ;;  %v25729_v27 = vld [vmem:[%s26369_s19 + $0x49e0] ss:$8 sps:$4 sm:$0xff]   ;;  %v25734_v23 = vld [vmem:[%s26369_s19 + $0x23f4] ss:$8 sps:$4 sm:$0xff]  }
 0x963   : > { %18976 = vmatprep.subr.bf16.mxu0 %v25653_v17  ;;  %17448 = vmatprep.mubr.bf16.mxu1 %v3260_v9  ;;  %v25737_v17 = vld [vmem:[%s26369_s19 + $0x49f4] ss:$8 sps:$4 sm:$0xff]   ;;  %v29392_v9 = vld.sshfl [vmem:[%s26387_s30 + $0x48] sm:$0xff pattern:$0x75316420] }
 0x964   : > { %19006 = vmatprep.mubr.bf16.mxu0 %v3749_v35  ;;  %v29395_v35 = vrot.slane %v3702_v43, %v26438_v51  ;;  %v25807_v43 = vld [vmem:[%s26369_s19 + $0x4ab0] ss:$8 sps:$4 sm:$0xff]  }
 0x965   : > { %17419 = vmatpush1.bf16.msra.mxu1 %v25648_v33  ;;  %v25735_v33 = vld [vmem:[%s26369_s19 + $0x49f0] ss:$8 sps:$4 sm:$0xff]  }
 0x966   : > { %18977 = vmatpush1.bf16.msra.mxu0 %v25651_v31  ;;  %17420 = vmatprep.subr.bf16.mxu1 %v25656_v41  ;;  %v25740_v31 = vld [vmem:[%s26369_s19 + $0x2404] ss:$8 sps:$4 sm:$0xff]  }
 0x967   : > { %18978 = vmatprep.subr.bf16.mxu0 %v25659_v40  ;;  %v25743_v41 = vld [vmem:[%s26369_s19 + $0x4a04] ss:$8 sps:$4 sm:$0xff]   ;;  %v3276_v40 = vcombine.high %v29392_v9, %v29392_v9 }
 0x969   : > { %17421 = vmatpush1.bf16.msra.mxu1 %v25654_v22  ;;  %v3718_v22 = vcombine.high %v29395_v35, %v29395_v35 }
 0x96a   : > { %18979 = vmatpush1.bf16.msra.mxu0 %v25657_v32  ;;  %17422 = vmatprep.subr.bf16.mxu1 %v25662_v47  ;;  %v3258_v32 = vcombine.high %v29317_v59, %v29317_v59  ;;  %v3747_v47 = vcombine.high %v29321_v39, %v29321_v39  ;;  %v25744_v39 = vld [vmem:[%s26369_s19 + $0x2410] ss:$8 sps:$4 sm:$0xff]  }
 0x96b   : > { %18980 = vmatprep.subr.bf16.mxu0 %v25665_v56  ;;  %v25738_v56 = vld [vmem:[%s26369_s19 + $0x2400] ss:$8 sps:$4 sm:$0xff]   ;;  %v3746_v59 = vrot.slane %v3718_v22, %v26438_v51  ;;  %v25827_v22 = vld [vmem:[%s26369_s19 + $0x4ae4] ss:$8 sps:$4 sm:$0xff]  }
 0x96d   : > { %17423 = vmatpush1.bf16.msra.mxu1 %v25660_v25  ;;  %v25741_v25 = vld [vmem:[%s26369_s19 + $0x4a00] ss:$8 sps:$4 sm:$0xff]  }
 0x96e   : > { %18981 = vmatpush1.bf16.msra.mxu0 %v25663_v19  ;;  %17424 = vmatprep.subr.bf16.mxu1 %v25668_v5  ;;  %v25746_v19 = vld [vmem:[%s26369_s19 + $0x2414] ss:$8 sps:$4 sm:$0xff]  }
 0x96f   : > { %18982 = vmatprep.subr.bf16.mxu0 %v25671_v60  ;;  %v25749_v5 = vld [vmem:[%s26369_s19 + $0x4a14] ss:$8 sps:$4 sm:$0xff]   ;;  %v29414_v60 = vrot.slane %v3276_v40, %v26438_v51  ;;  %v25824_v40 = vld [vmem:[%s26369_s19 + $0x24e4] ss:$8 sps:$4 sm:$0xff]  }
 0x971   : > { %17425 = vmatpush1.bf16.msra.mxu1 %v25666_v13  ;;  %v25747_v13 = vld [vmem:[%s26369_s19 + $0x4a10] ss:$8 sps:$4 sm:$0xff]  }
 0x972   : > { %18983 = vmatpush1.bf16.msra.mxu0 %v25669_v7  ;;  %17426 = vmatprep.subr.bf16.mxu1 %v25674_v11  ;;  %v25752_v7 = vld [vmem:[%s26369_s19 + $0x2424] ss:$8 sps:$4 sm:$0xff]  }
 0x973   : > { %18984 = vmatprep.subr.bf16.mxu0 %v25677_v48  ;;  %v25755_v11 = vld [vmem:[%s26369_s19 + $0x4a24] ss:$8 sps:$4 sm:$0xff]   ;;  %v25750_v48 = vld [vmem:[%s26369_s19 + $0x2420] ss:$8 sps:$4 sm:$0xff]  }
 0x975   : > { %17427 = vmatpush1.bf16.msra.mxu1 %v25672_v0  ;;  %v25753_v0 = vld [vmem:[%s26369_s19 + $0x4a20] ss:$8 sps:$4 sm:$0xff]  }
 0x976   : > { %18985 = vmatpush1.bf16.msra.mxu0 %v25675_v53  ;;  %17428 = vmatprep.subr.bf16.mxu1 %v25680_v37  ;;  %v25758_v53 = vld [vmem:[%s26369_s19 + $0x2434] ss:$8 sps:$4 sm:$0xff]  }
 0x977   : > { %18986 = vmatprep.subr.bf16.mxu0 %v25683_v46  ;;  %v25761_v37 = vld [vmem:[%s26369_s19 + $0x4a34] ss:$8 sps:$4 sm:$0xff]   ;;  %v25756_v46 = vld [vmem:[%s26369_s19 + $0x2430] ss:$8 sps:$4 sm:$0xff]  }
 0x979   : > { %17429 = vmatpush1.bf16.msra.mxu1 %v25678_v4  ;;  %v25759_v4 = vld [vmem:[%s26369_s19 + $0x4a30] ss:$8 sps:$4 sm:$0xff]  }
 0x97a   : > { %18987 = vmatpush1.bf16.msra.mxu0 %v25681_v44  ;;  %17430 = vmatprep.subr.bf16.mxu1 %v25686_v57  ;;  %v25764_v44 = vld [vmem:[%s26369_s19 + $0x2444] ss:$8 sps:$4 sm:$0xff]  }
 0x97b   : > { %18988 = vmatprep.subr.bf16.mxu0 %v25689_v1  ;;  %v25767_v57 = vld [vmem:[%s26369_s19 + $0x4a44] ss:$8 sps:$4 sm:$0xff]   ;;  %v25762_v1 = vld [vmem:[%s26369_s19 + $0x2440] ss:$8 sps:$4 sm:$0xff]  }
 0x97d   : > { %17431 = vmatpush1.bf16.msra.mxu1 %v25684_v10  ;;  %v25765_v10 = vld [vmem:[%s26369_s19 + $0x4a40] ss:$8 sps:$4 sm:$0xff]  }
 0x97e   : > { %18989 = vmatpush1.bf16.msra.mxu0 %v25687_v42  ;;  %17432 = vmatprep.subr.bf16.mxu1 %v25692_v58  ;;  %v25770_v42 = vld [vmem:[%s26369_s19 + $0x2454] ss:$8 sps:$4 sm:$0xff]  }
 0x97f   : > { %18990 = vmatprep.subr.bf16.mxu0 %v25695_v26  ;;  %v25773_v58 = vld [vmem:[%s26369_s19 + $0x4a54] ss:$8 sps:$4 sm:$0xff]   ;;  %v25768_v26 = vld [vmem:[%s26369_s19 + $0x2450] ss:$8 sps:$4 sm:$0xff]  }
 0x981   : > { %17433 = vmatpush1.bf16.msra.mxu1 %v25690_v14  ;;  %v25771_v14 = vld [vmem:[%s26369_s19 + $0x4a50] ss:$8 sps:$4 sm:$0xff]  }
 0x982   : > { %18991 = vmatpush1.bf16.msra.mxu0 %v25693_v54  ;;  %17434 = vmatprep.subr.bf16.mxu1 %v25698_v62  ;;  %v25776_v54 = vld [vmem:[%s26369_s19 + $0x2464] ss:$8 sps:$4 sm:$0xff]  }
 0x983   : > { %18992 = vmatprep.subr.bf16.mxu0 %v25701_v38  ;;  %v25779_v62 = vld [vmem:[%s26369_s19 + $0x4a64] ss:$8 sps:$4 sm:$0xff]   ;;  %v25774_v38 = vld [vmem:[%s26369_s19 + $0x2460] ss:$8 sps:$4 sm:$0xff]  }
 0x985   : > { %17435 = vmatpush1.bf16.msra.mxu1 %v25696_v28  ;;  %v25777_v28 = vld [vmem:[%s26369_s19 + $0x4a60] ss:$8 sps:$4 sm:$0xff]  }
 0x986   : > { %18993 = vmatpush1.bf16.msra.mxu0 %v25699_v29  ;;  %17436 = vmatprep.subr.bf16.mxu1 %v25704_v3  ;;  %v25782_v29 = vld [vmem:[%s26369_s19 + $0x2474] ss:$8 sps:$4 sm:$0xff]  }
 0x987   : > { %18994 = vmatprep.subr.bf16.mxu0 %v25707_v21  ;;  %v25785_v3 = vld [vmem:[%s26369_s19 + $0x4a74] ss:$8 sps:$4 sm:$0xff]   ;;  %v25780_v21 = vld [vmem:[%s26369_s19 + $0x2470] ss:$8 sps:$4 sm:$0xff]  }
 0x989   : > { %17437 = vmatpush1.bf16.msra.mxu1 %v25702_v30  ;;  %v25783_v30 = vld [vmem:[%s26369_s19 + $0x4a70] ss:$8 sps:$4 sm:$0xff]  }
 0x98a   : > { %18995 = vmatpush1.bf16.msra.mxu0 %v25705_v6  ;;  %17438 = vmatprep.subr.bf16.mxu1 %v25710_v61  ;;  %v25788_v6 = vld [vmem:[%s26369_s19 + $0x2484] ss:$8 sps:$4 sm:$0xff]  }
 0x98b   : > { %18996 = vmatprep.subr.bf16.mxu0 %v25713_v8  ;;  %v25791_v61 = vld [vmem:[%s26369_s19 + $0x4a84] ss:$8 sps:$4 sm:$0xff]   ;;  %v25786_v8 = vld [vmem:[%s26369_s19 + $0x2480] ss:$8 sps:$4 sm:$0xff]  }
 0x98d   : > { %17439 = vmatpush1.bf16.msra.mxu1 %v25708_v18  ;;  %v25789_v18 = vld [vmem:[%s26369_s19 + $0x4a80] ss:$8 sps:$4 sm:$0xff]  }
 0x98e   : > { %18997 = vmatpush1.bf16.msra.mxu0 %v25711_v15  ;;  %17440 = vmatprep.subr.bf16.mxu1 %v25716_v2  ;;  %v25794_v15 = vld [vmem:[%s26369_s19 + $0x2494] ss:$8 sps:$4 sm:$0xff]  }
 0x98f   : > { %18998 = vmatprep.subr.bf16.mxu0 %v25719_v24  ;;  %v25797_v2 = vld [vmem:[%s26369_s19 + $0x4a94] ss:$8 sps:$4 sm:$0xff]   ;;  %v25792_v24 = vld [vmem:[%s26369_s19 + $0x2490] ss:$8 sps:$4 sm:$0xff]  }
 0x991   : > { %17441 = vmatpush1.bf16.msra.mxu1 %v25714_v12  ;;  %v25795_v12 = vld [vmem:[%s26369_s19 + $0x4a90] ss:$8 sps:$4 sm:$0xff]  }
 0x992   : > { %18999 = vmatpush1.bf16.msra.mxu0 %v25717_v49  ;;  %17442 = vmatprep.subr.bf16.mxu1 %v25722_v34  ;;  %v25800_v49 = vld [vmem:[%s26369_s19 + $0x24a4] ss:$8 sps:$4 sm:$0xff]  }
 0x993   : > { %19000 = vmatprep.subr.bf16.mxu0 %v25725_v20  ;;  %v25803_v34 = vld [vmem:[%s26369_s19 + $0x4aa4] ss:$8 sps:$4 sm:$0xff]   ;;  %v25798_v20 = vld [vmem:[%s26369_s19 + $0x24a0] ss:$8 sps:$4 sm:$0xff]  }
 0x995   : > { %17443 = vmatpush1.bf16.msra.mxu1 %v25720_v16  ;;  %v25801_v16 = vld [vmem:[%s26369_s19 + $0x4aa0] ss:$8 sps:$4 sm:$0xff]  }
 0x996   : > { %19001 = vmatpush1.bf16.msra.mxu0 %v25723_v50  ;;  %17444 = vmatprep.subr.bf16.mxu1 %v25728_v55  ;;  %v25806_v50 = vld [vmem:[%s26369_s19 + $0x24b4] ss:$8 sps:$4 sm:$0xff]  }
 0x997   : > { %19002 = vmatprep.subr.bf16.mxu0 %v25731_v52  ;;  %v25809_v55 = vld [vmem:[%s26369_s19 + $0x4ab4] ss:$8 sps:$4 sm:$0xff]   ;;  %v25804_v52 = vld [vmem:[%s26369_s19 + $0x24b0] ss:$8 sps:$4 sm:$0xff]  }
 0x999   : > { %17445 = vmatpush1.bf16.msra.mxu1 %v25726_v36  ;;  %v25812_v36 = vld [vmem:[%s26369_s19 + $0x24c4] ss:$8 sps:$4 sm:$0xff]  }
 0x99a   : > { %19003 = vmatpush1.bf16.msra.mxu0 %v25729_v27  ;;  %17446 = vmatprep.subr.bf16.mxu1 %v25734_v23  ;;  %v25815_v27 = vld [vmem:[%s26369_s19 + $0x4ac4] ss:$8 sps:$4 sm:$0xff]   ;;  %v25810_v23 = vld [vmem:[%s26369_s19 + $0x24c0] ss:$8 sps:$4 sm:$0xff]  }
 0x99b   : > { %19004 = vmatprep.subr.bf16.mxu0 %v25737_v17  ;;  %v25813_v17 = vld [vmem:[%s26369_s19 + $0x4ac0] ss:$8 sps:$4 sm:$0xff]  }
 0x99d   : > { %17447 = vmatpush1.bf16.msra.mxu1 %v25732_v63  ;;  %v25818_v63 = vld [vmem:[%s26369_s19 + $0x24d4] ss:$8 sps:$4 sm:$0xff]  }
 0x99e   : > { %19005 = vmatpush1.bf16.msra.mxu0 %v25735_v33  ;;  %17457 = vmatprep.subr.bf16.mxu1 %v25740_v31  ;;  %v25821_v33 = vld [vmem:[%s26369_s19 + $0x4ad4] ss:$8 sps:$4 sm:$0xff]   ;;  %v25816_v31 = vld [vmem:[%s26369_s19 + $0x24d0] ss:$8 sps:$4 sm:$0xff]  }
 0x99f   : > { %19015 = vmatprep.subr.bf16.mxu0 %v25743_v41  ;;  %v25819_v41 = vld [vmem:[%s26369_s19 + $0x4ad0] ss:$8 sps:$4 sm:$0xff]  }
 0x9a0   : > { %17449 = vmatmul.mubr.bf16.vlgmr.msra.gmra.mrb[0].mxu1 %v3258_v32  ;;  %v25822_v32 = vld [vmem:[%s26369_s19 + $0x24e0] ss:$8 sps:$4 sm:$0xff]  }
 0x9a1   : > { %19007 = vmatmul.mubr.bf16.vlgmr.msra.gmra.mrb[0].mxu0 %v3747_v47  ;;  %17458 = vmatpush1.bf16.msra.mxu1 %v25738_v56  ;;  %v25825_v47 = vld [vmem:[%s26369_s19 + $0x4ae0] ss:$8 sps:$4 sm:$0xff]   ;;  %v25830_v56 = vld [vmem:[%s26369_s19 + $0x24f4] ss:$8 sps:$4 sm:$0xff]  }
 0x9a2   : > { %19016 = vmatpush1.bf16.msra.mxu0 %v25741_v25  ;;  %17459 = vmatprep.subr.bf16.mxu1 %v25746_v19  ;;  %v25833_v25 = vld [vmem:[%s26369_s19 + $0x4af4] ss:$8 sps:$4 sm:$0xff]   ;;  %v25828_v19 = vld [vmem:[%s26369_s19 + $0x24f0] ss:$8 sps:$4 sm:$0xff]  }
 0x9a3   : > { %19017 = vmatprep.subr.bf16.mxu0 %v25749_v5  ;;  %17489 = vmatprep.mubr.bf16.mxu1 %v29414_v60  ;;  %v25831_v5 = vld [vmem:[%s26369_s19 + $0x4af0] ss:$8 sps:$4 sm:$0xff]  }
 0x9a4   : > { %19047 = vmatprep.mubr.bf16.mxu0 %v3746_v59  ;;  %v25836_v59 = vld [vmem:[%s26369_s19 + $0x2504] ss:$8 sps:$4 sm:$0xff]  }
 0x9a5   : > { %17460 = vmatpush1.bf16.msra.mxu1 %v25744_v39  ;;  %v25840_v39 = vld [vmem:[%s26369_s19 + $0x4b04] ss:$8 sps:$4 sm:$0xff]  }
 0x9a6   : > { %19018 = vmatpush1.bf16.msra.mxu0 %v25747_v13  ;;  %17461 = vmatprep.subr.bf16.mxu1 %v25752_v7  ;;  %v29480_v13 = vrot.slane %v29392_v9, %v26438_v51  ;;  %v29484_v7 = vrot.slane %v29395_v35, %v26438_v51  ;;  %v25841_v51 = vld [vmem:[%s26369_s19 + $0x2510] ss:$8 sps:$4 sm:$0xff]   ;;  %v25849_v35 = vld [vmem:[%s26369_s19 + $0x2524] ss:$8 sps:$4 sm:$0xff]  }
 0x9a7   : > { %19019 = vmatprep.subr.bf16.mxu0 %v25755_v11  ;;  %v25834_v11 = vld [vmem:[%s26369_s19 + $0x2500] ss:$8 sps:$4 sm:$0xff]   ;;  %v25844_v9 = vld [vmem:[%s26369_s19 + $0x4b10] ss:$8 sps:$4 sm:$0xff]  }
 0x9a9   : > { %17462 = vmatpush1.bf16.msra.mxu1 %v25750_v48  ;;  %v25838_v48 = vld [vmem:[%s26369_s19 + $0x4b00] ss:$8 sps:$4 sm:$0xff]  }
 0x9aa   : > { %19020 = vmatpush1.bf16.msra.mxu0 %v25753_v0  ;;  %17463 = vmatprep.subr.bf16.mxu1 %v25758_v53  ;;  %v25843_v0 = vld [vmem:[%s26369_s19 + $0x2514] ss:$8 sps:$4 sm:$0xff]  }
 0x9ab   : > { %19021 = vmatprep.subr.bf16.mxu0 %v25761_v37  ;;  %v25846_v53 = vld [vmem:[%s26369_s19 + $0x4b14] ss:$8 sps:$4 sm:$0xff]   ;;  %v3308_v37 = vcombine.high %v29414_v60, %v29414_v60  ;;  %v25847_v60 = vld [vmem:[%s26369_s19 + $0x2520] ss:$8 sps:$4 sm:$0xff]  }
 0x9ad   : > { %17464 = vmatpush1.bf16.msra.mxu1 %v25756_v46  ;;  %v25852_v46 = vld [vmem:[%s26369_s19 + $0x4b24] ss:$8 sps:$4 sm:$0xff]  }
 0x9ae   : > { %19022 = vmatpush1.bf16.msra.mxu0 %v25759_v4  ;;  %17465 = vmatprep.subr.bf16.mxu1 %v25764_v44  ;;  %v26124_v4 = vmov 0   ;;  %v25850_v44 = vld [vmem:[%s26369_s19 + $0x4b20] ss:$8 sps:$4 sm:$0xff]  }
 0x9af   : > { %19023 = vmatprep.subr.bf16.mxu0 %v25767_v57  ;;  %v25855_v57 = vld [vmem:[%s26369_s19 + $0x2534] ss:$8 sps:$4 sm:$0xff]  }
 0x9b1   : > { %17466 = vmatpush1.bf16.msra.mxu1 %v25762_v1  ;;  %v25858_v1 = vld [vmem:[%s26369_s19 + $0x4b34] ss:$8 sps:$4 sm:$0xff]  }
 0x9b2   : > { %19024 = vmatpush1.bf16.msra.mxu0 %v25765_v10  ;;  %17467 = vmatprep.subr.bf16.mxu1 %v25770_v42  ;;  %v25853_v10 = vld [vmem:[%s26369_s19 + $0x2530] ss:$8 sps:$4 sm:$0xff]  }
 0x9b3   : > { %19025 = vmatprep.subr.bf16.mxu0 %v25773_v58  ;;  %v25856_v42 = vld [vmem:[%s26369_s19 + $0x4b30] ss:$8 sps:$4 sm:$0xff]   ;;  %v25861_v58 = vld [vmem:[%s26369_s19 + $0x2544] ss:$8 sps:$4 sm:$0xff]  }
 0x9b5   : > { %17468 = vmatpush1.bf16.msra.mxu1 %v25768_v26  ;;  %v25864_v26 = vld [vmem:[%s26369_s19 + $0x4b44] ss:$8 sps:$4 sm:$0xff]  }
 0x9b6   : > { %19026 = vmatpush1.bf16.msra.mxu0 %v25771_v14  ;;  %17469 = vmatprep.subr.bf16.mxu1 %v25776_v54  ;;  %v25859_v14 = vld [vmem:[%s26369_s19 + $0x2540] ss:$8 sps:$4 sm:$0xff]  }
 0x9b7   : > { %19027 = vmatprep.subr.bf16.mxu0 %v25779_v62  ;;  %v25862_v54 = vld [vmem:[%s26369_s19 + $0x4b40] ss:$8 sps:$4 sm:$0xff]   ;;  %v25867_v62 = vld [vmem:[%s26369_s19 + $0x2554] ss:$8 sps:$4 sm:$0xff]  }
 0x9b9   : > { %17470 = vmatpush1.bf16.msra.mxu1 %v25774_v38  ;;  %v25870_v38 = vld [vmem:[%s26369_s19 + $0x4b54] ss:$8 sps:$4 sm:$0xff]  }
 0x9ba   : > { %19028 = vmatpush1.bf16.msra.mxu0 %v25777_v28  ;;  %17471 = vmatprep.subr.bf16.mxu1 %v25782_v29  ;;  %v25865_v28 = vld [vmem:[%s26369_s19 + $0x2550] ss:$8 sps:$4 sm:$0xff]  }
 0x9bb   : > { %19029 = vmatprep.subr.bf16.mxu0 %v25785_v3  ;;  %v25868_v29 = vld [vmem:[%s26369_s19 + $0x4b50] ss:$8 sps:$4 sm:$0xff]   ;;  %v25873_v3 = vld [vmem:[%s26369_s19 + $0x2564] ss:$8 sps:$4 sm:$0xff]  }
 0x9bd   : > { %17472 = vmatpush1.bf16.msra.mxu1 %v25780_v21  ;;  %v25876_v21 = vld [vmem:[%s26369_s19 + $0x4b64] ss:$8 sps:$4 sm:$0xff]  }
 0x9be   : > { %19030 = vmatpush1.bf16.msra.mxu0 %v25783_v30  ;;  %17473 = vmatprep.subr.bf16.mxu1 %v25788_v6  ;;  %v25871_v30 = vld [vmem:[%s26369_s19 + $0x2560] ss:$8 sps:$4 sm:$0xff]  }
 0x9bf   : > { %19031 = vmatprep.subr.bf16.mxu0 %v25791_v61  ;;  %v25874_v6 = vld [vmem:[%s26369_s19 + $0x4b60] ss:$8 sps:$4 sm:$0xff]   ;;  %v25879_v61 = vld [vmem:[%s26369_s19 + $0x2574] ss:$8 sps:$4 sm:$0xff]  }
 0x9c1   : > { %17474 = vmatpush1.bf16.msra.mxu1 %v25786_v8  ;;  %v25882_v8 = vld [vmem:[%s26369_s19 + $0x4b74] ss:$8 sps:$4 sm:$0xff]  }
 0x9c2   : > { %19032 = vmatpush1.bf16.msra.mxu0 %v25789_v18  ;;  %17475 = vmatprep.subr.bf16.mxu1 %v25794_v15  ;;  %v25877_v18 = vld [vmem:[%s26369_s19 + $0x2570] ss:$8 sps:$4 sm:$0xff]  }
 0x9c3   : > { %19033 = vmatprep.subr.bf16.mxu0 %v25797_v2  ;;  %v25880_v15 = vld [vmem:[%s26369_s19 + $0x4b70] ss:$8 sps:$4 sm:$0xff]   ;;  %v25885_v2 = vld [vmem:[%s26369_s19 + $0x2584] ss:$8 sps:$4 sm:$0xff]  }
 0x9c5   : > { %17476 = vmatpush1.bf16.msra.mxu1 %v25792_v24  ;;  %v3748_v24 = vcombine.high %v29484_v7, %v29484_v7 }
 0x9c6   : > { %19034 = vmatpush1.bf16.msra.mxu0 %v25795_v12  ;;  %17477 = vmatprep.subr.bf16.mxu1 %v25800_v49  ;;  %v25883_v12 = vld [vmem:[%s26369_s19 + $0x2580] ss:$8 sps:$4 sm:$0xff]   ;;  %v25888_v49 = vld [vmem:[%s26369_s19 + $0x2594] ss:$8 sps:$4 sm:$0xff]  }
 0x9c7   : > { %19035 = vmatprep.subr.bf16.mxu0 %v25803_v34  ;;  %v25886_v34 = vld [vmem:[%s26369_s19 + $0x2590] ss:$8 sps:$4 sm:$0xff]  }
 0x9c9   : > { %17478 = vmatpush1.bf16.msra.mxu1 %v25798_v20  ;;  %v25891_v20 = vld [vmem:[%s26369_s19 + $0x25a4] ss:$8 sps:$4 sm:$0xff]  }
 0x9ca   : > { %19036 = vmatpush1.bf16.msra.mxu0 %v25801_v16  ;;  %17479 = vmatprep.subr.bf16.mxu1 %v25806_v50  ;;  %v25889_v16 = vld [vmem:[%s26369_s19 + $0x25a0] ss:$8 sps:$4 sm:$0xff]   ;;  %v25894_v50 = vld [vmem:[%s26369_s19 + $0x25b4] ss:$8 sps:$4 sm:$0xff]  }
 0x9cb   : > { %19037 = vmatprep.subr.bf16.mxu0 %v25809_v55  ;;  %v25892_v55 = vld [vmem:[%s26369_s19 + $0x25b0] ss:$8 sps:$4 sm:$0xff]  }
 0x9cd   : > { %17480 = vmatpush1.bf16.msra.mxu1 %v25804_v52  ;;  %v25897_v52 = vld [vmem:[%s26369_s19 + $0x25c4] ss:$8 sps:$4 sm:$0xff]  }
 0x9ce   : > { %19038 = vmatpush1.bf16.msra.mxu0 %v25807_v43  ;;  %17481 = vmatprep.subr.bf16.mxu1 %v25812_v36  ;;  %v25895_v43 = vld [vmem:[%s26369_s19 + $0x25c0] ss:$8 sps:$4 sm:$0xff]   ;;  %v25900_v36 = vld [vmem:[%s26369_s19 + $0x25d4] ss:$8 sps:$4 sm:$0xff]  }
 0x9cf   : > { %19039 = vmatprep.subr.bf16.mxu0 %v25815_v27  ;;  %v25898_v27 = vld [vmem:[%s26369_s19 + $0x25d0] ss:$8 sps:$4 sm:$0xff]  }
 0x9d1   : > { %17482 = vmatpush1.bf16.msra.mxu1 %v25810_v23  ;;  %v25903_v23 = vld [vmem:[%s26369_s19 + $0x25e4] ss:$8 sps:$4 sm:$0xff]  }
 0x9d2   : > { %19040 = vmatpush1.bf16.msra.mxu0 %v25813_v17  ;;  %17483 = vmatprep.subr.bf16.mxu1 %v25818_v63  ;;  %v25901_v17 = vld [vmem:[%s26369_s19 + $0x25e0] ss:$8 sps:$4 sm:$0xff]   ;;  %v25906_v63 = vld [vmem:[%s26369_s19 + $0x25f4] ss:$8 sps:$4 sm:$0xff]  }
 0x9d3   : > { %19041 = vmatprep.subr.bf16.mxu0 %v25821_v33  ;;  %v25904_v33 = vld [vmem:[%s26369_s19 + $0x25f0] ss:$8 sps:$4 sm:$0xff]  }
 0x9d5   : > { %17484 = vmatpush1.bf16.msra.mxu1 %v25816_v31  ;;  %v3306_v31 = vcombine.high %v29480_v13, %v29480_v13 }
 0x9d6   : > { %19042 = vmatpush1.bf16.msra.mxu0 %v25819_v41  ;;  %17485 = vmatprep.subr.bf16.mxu1 %v25824_v40 }
 0x9d7   : > { %19043 = vmatprep.subr.bf16.mxu0 %v25827_v22 }
 0x9d9   : > { %17486 = vmatpush1.bf16.msra.mxu1 %v25822_v32 }
 0x9da   : > { %19044 = vmatpush1.bf16.msra.mxu0 %v25825_v47  ;;  %17487 = vmatprep.subr.bf16.mxu1 %v25830_v56  ;;  %v26125_v47 = vmov 1983009808  }
 0x9db   : > { %19045 = vmatprep.subr.bf16.mxu0 %v25833_v25  ;;  %v19101_v56 = vunpack.c.l.s4 %v26125_v47  ;;  %v19149_v47 = vld [vmem:[#allocation8 + $0x68] sm:$0xff] (!%p21802_p1) }
 0x9dd   : > { %17488 = vmatpush1.bf16.msra.mxu1 %v25828_v19  ;;  %v19102_v25 = vunpack.c.0.s8 %v19101_v56  ;;  %v19166_v56 = vld [vmem:[#allocation8 + $0xf0] sm:$0xff] (!%p21802_p1) }
 0x9de   : > { %19046 = vmatpush1.bf16.msra.mxu0 %v25831_v5  ;;  %17498 = vmatprep.subr.bf16.mxu1 %v25836_v59 }
 0x9df   : > { %19056 = vmatprep.subr.bf16.mxu0 %v25840_v39 }
 0x9e0   : > { %17490 = vmatmul.mubr.bf16.vlgmr.msra.gmra.mrb[0].mxu1 %v29480_v13  ;;  %v365_v13 = vld [vmem:[#allocation2] sm:$0xf] }
 0x9e1   : > { %19048 = vmatmul.mubr.bf16.vlgmr.msra.gmra.mrb[0].mxu0 %v29484_v7  ;;  %17499 = vmatpush1.bf16.msra.mxu1 %v25834_v11  ;;  %v29541_v7 = vsub.s32 %v19102_v25, %v26430_v45  ;;  %v19167_v25 = vld [vmem:[#allocation8 + $0xf8] sm:$0xff] (!%p21802_p1) }
 0x9e2   : > { %19057 = vmatpush1.bf16.msra.mxu0 %v25838_v48  ;;  %17500 = vmatprep.subr.bf16.mxu1 %v25843_v0 }
 0x9e3   : > { %19058 = vmatprep.subr.bf16.mxu0 %v25846_v53  ;;  %19088 = vmatprep.mubr.bf16.mxu0 %v26124_v4  ;;  %v19137_v4 = vld [vmem:[#allocation8 + $0x8] sm:$0xff] (!%p21802_p1) }
 0x9e4   : > { %17530 = vmatprep.mubr.bf16.mxu1 %v3308_v37 }
 0x9e5   : > { %17501 = vmatpush1.bf16.msra.mxu1 %v25841_v51  ;;  %v19152_v51 = vld [vmem:[#allocation8 + $0x80] sm:$0xff] (!%p21802_p1) }
 0x9e6   : > { %19059 = vmatpush1.bf16.msra.mxu0 %v25844_v9  ;;  %17502 = vmatprep.subr.bf16.mxu1 %v25849_v35  ;;  %v19153_v9 = vld [vmem:[#allocation8 + $0x88] sm:$0xff] (!%p21802_p1)  ;;  %v19136_v35 = vld [vmem:[#allocation8] sm:$0xff] (!%p21802_p1) }
 0x9e7   : > { %19060 = vmatprep.subr.bf16.mxu0 %v25852_v46  ;;  %v21846_v46 = vpack.c.bf16 (!%p21802_p1), %v19153_v9, %v19152_v51 }
 0x9e9   : > { %17503 = vmatpush1.bf16.msra.mxu1 %v25847_v60  ;;  %v19154_v60 = vld [vmem:[#allocation8 + $0x90] sm:$0xff] (!%p21802_p1) }
 0x9ea   : > { %19061 = vmatpush1.bf16.msra.mxu0 %v25850_v44  ;;  %17504 = vmatprep.subr.bf16.mxu1 %v25855_v57  ;;  %v19155_v44 = vld [vmem:[#allocation8 + $0x98] sm:$0xff] (!%p21802_p1)  ;;  %v21848_v57 = vpack.c.bf16 (!%p21802_p1), %v19137_v4, %v19136_v35  ;;  %v21804_v35 = vld [vmem:[#allocation11] ss:$0 sm:$0xff] (!%p21802_p1) }
 0x9eb   : > { %19062 = vmatprep.subr.bf16.mxu0 %v25858_v1  ;;  %v21850_v1 = vpack.c.bf16 (!%p21802_p1), %v19155_v44, %v19154_v60  ;;  %v21805_v60 = vld [vmem:[#allocation3] ss:$0 sm:$0xff] (!%p21802_p1) }
 0x9ed   : > { %17505 = vmatpush1.bf16.msra.mxu1 %v25853_v10  ;;  %v19138_v10 = vld [vmem:[#allocation8 + $0x10] sm:$0xff] (!%p21802_p1) }
 0x9ee   : > { %19063 = vmatpush1.bf16.msra.mxu0 %v25856_v42  ;;  %17506 = vmatprep.subr.bf16.mxu1 %v25861_v58  ;;  %v19139_v42 = vld [vmem:[#allocation8 + $0x18] sm:$0xff] (!%p21802_p1)  ;;  %v19156_v58 = vld [vmem:[#allocation8 + $0xa0] sm:$0xff] (!%p21802_p1) }
 0x9ef   : > { %19064 = vmatprep.subr.bf16.mxu0 %v25864_v26  ;;  %v19157_v26 = vld [vmem:[#allocation8 + $0xa8] sm:$0xff] (!%p21802_p1) }
 0x9f1   : > { %17507 = vmatpush1.bf16.msra.mxu1 %v25859_v14  ;;  %v21852_v14 = vpack.c.bf16 (!%p21802_p1), %v19139_v42, %v19138_v10 }
 0x9f2   : > { %19065 = vmatpush1.bf16.msra.mxu0 %v25862_v54  ;;  %17508 = vmatprep.subr.bf16.mxu1 %v25867_v62  ;;  %v21854_v54 = vpack.c.bf16 (!%p21802_p1), %v19157_v26, %v19156_v58  ;;  %v19140_v62 = vld [vmem:[#allocation8 + $0x20] sm:$0xff] (!%p21802_p1) }
 0x9f3   : > { %19066 = vmatprep.subr.bf16.mxu0 %v25870_v38  ;;  %v19141_v38 = vld [vmem:[#allocation8 + $0x28] sm:$0xff] (!%p21802_p1) }
 0x9f5   : > { %17509 = vmatpush1.bf16.msra.mxu1 %v25865_v28  ;;  %v19158_v28 = vld [vmem:[#allocation8 + $0xb0] sm:$0xff] (!%p21802_p1) }
 0x9f6   : > { %19067 = vmatpush1.bf16.msra.mxu0 %v25868_v29  ;;  %17510 = vmatprep.subr.bf16.mxu1 %v25873_v3  ;;  %v19159_v29 = vld [vmem:[#allocation8 + $0xb8] sm:$0xff] (!%p21802_p1)  ;;  %v21856_v3 = vpack.c.bf16 (!%p21802_p1), %v19141_v38, %v19140_v62 }
 0x9f7   : > { %19068 = vmatprep.subr.bf16.mxu0 %v25876_v21  ;;  %v19119_v21 = vsub.s32 (!%p21802_p1), 0, %v26430_v45 }
 0x9f9   : > { %17511 = vmatpush1.bf16.msra.mxu1 %v25871_v30  ;;  %v19123_v30 = vsub.s32 (!%p21802_p1), 1, %v26430_v45 }
 0x9fa   : > { %19069 = vmatpush1.bf16.msra.mxu0 %v25874_v6  ;;  %17512 = vmatprep.subr.bf16.mxu1 %v25879_v61  ;;  %v21858_v6 = vpack.c.bf16 (!%p21802_p1), %v19159_v29, %v19158_v28  ;;  %v19142_v61 = vld [vmem:[#allocation8 + $0x30] sm:$0xff] (!%p21802_p1) }
 0x9fb   : > { %19070 = vmatprep.subr.bf16.mxu0 %v25882_v8  ;;  %v19143_v8 = vld [vmem:[#allocation8 + $0x38] sm:$0xff] (!%p21802_p1) }
 0x9fd   : > { %17513 = vmatpush1.bf16.msra.mxu1 %v25877_v18  ;;  %v19160_v18 = vld [vmem:[#allocation8 + $0xc0] sm:$0xff] (!%p21802_p1) }
 0x9fe   : > { %19071 = vmatpush1.bf16.msra.mxu0 %v25880_v15  ;;  %17514 = vmatprep.subr.bf16.mxu1 %v25885_v2  ;;  %v19161_v15 = vld [vmem:[#allocation8 + $0xc8] sm:$0xff] (!%p21802_p1)  ;;  %v19115_v2 = vld [vmem:[#allocation6] sm:$0x3] (!%p21802_p1) }
 0x9ff   : > { %21847 = vmatprep.subr.bf16.mxu0 (!%p21802_p1), %v21846_v46 }
 0xa01   : > { %19089 = vmatmul.mubr.bf16.vlgmr.msra.gmra.mrb[0].mxu0 %v3748_v24  ;;  %17515 = vmatpush1.bf16.msra.mxu1 %v25883_v12  ;;  %v21860_v24 = vpack.c.bf16 (!%p21802_p1), %v19143_v8, %v19142_v61  ;;  %v19120_v12 = vrot.slane (!%p21802_p1), %v19115_v2, %v19119_v21 }
 0xa02   : > { %17516 = vmatprep.subr.bf16.mxu1 %v25888_v49  ;;  %21849 = vmatpush3.bf16.msra.mxu0 (!%p21802_p1), %v21848_v57  ;;  %v19124_v49 = vrot.slane (!%p21802_p1), %v19115_v2, %v19123_v30 }
 0xa03   : > { %21851 = vmatprep.subr.bf16.mxu0 (!%p21802_p1), %v21850_v1 }
 0xa05   : > { %17517 = vmatpush1.bf16.msra.mxu1 %v25886_v34  ;;  %v21862_v34 = vpack.c.bf16 (!%p21802_p1), %v19161_v15, %v19160_v18 }
 0xa06   : > { %17518 = vmatprep.subr.bf16.mxu1 %v25891_v20  ;;  %21853 = vmatpush3.bf16.msra.mxu0 (!%p21802_p1), %v21852_v14  ;;  %v19144_v20 = vld [vmem:[#allocation8 + $0x40] sm:$0xff] (!%p21802_p1) }
 0xa07   : > { %21855 = vmatprep.subr.bf16.mxu0 (!%p21802_p1), %v21854_v54 }
 0xa09   : > { %17519 = vmatpush1.bf16.msra.mxu1 %v25889_v16  ;;  %v19145_v16 = vld [vmem:[#allocation8 + $0x48] sm:$0xff] (!%p21802_p1) }
 0xa0a   : > { %17520 = vmatprep.subr.bf16.mxu1 %v25894_v50  ;;  %21857 = vmatpush3.bf16.msra.mxu0 (!%p21802_p1), %v21856_v3  ;;  %v19162_v50 = vld [vmem:[#allocation8 + $0xd0] sm:$0xff] (!%p21802_p1)  ;;  %v21864_v45 = vpack.c.bf16 (!%p21802_p1), %v19145_v16, %v19144_v20 }
 0xa0b   : > { %21859 = vmatprep.subr.bf16.mxu0 (!%p21802_p1), %v21858_v6 }
 0xa0d   : > { %17521 = vmatpush1.bf16.msra.mxu1 %v25892_v55  ;;  %v19163_v55 = vld [vmem:[#allocation8 + $0xd8] sm:$0xff] (!%p21802_p1) }
 0xa0e   : > { %17522 = vmatprep.subr.bf16.mxu1 %v25897_v52  ;;  %v19125_v52 = vcombine.low (!%p21802_p1), %v19120_v12, %v19124_v49  ;;  %21861 = vmatpush3.bf16.msra.mxu0 (!%p21802_p1), %v21860_v24 }
 0xa0f   : > { %21863 = vmatprep.subr.bf16.mxu0 (!%p21802_p1), %v21862_v34 }
 0xa11   : > { %17523 = vmatpush1.bf16.msra.mxu1 %v25895_v43 }
 0xa12   : > { %17524 = vmatprep.subr.bf16.mxu1 %v25900_v36  ;;  %v19132_v36 = vrot.slane (!%p21802_p1), %v19125_v52, %v29541_v7  ;;  %21865 = vmatpush3.bf16.msra.mxu0 (!%p21802_p1), %v21864_v45 }
 0xa15   : > { %17525 = vmatpush1.bf16.msra.mxu1 %v25898_v27  ;;  %v21866_v27 = vpack.c.bf16 (!%p21802_p1), %v19163_v55, %v19162_v50 }
 0xa16   : > { %17526 = vmatprep.subr.bf16.mxu1 %v25903_v23  ;;  %v19146_v23 = vld [vmem:[#allocation8 + $0x50] sm:$0xff] (!%p21802_p1) }
 0xa17   : > { %21867 = vmatprep.subr.bf16.mxu0 (!%p21802_p1), %v21866_v27 }
 0xa19   : > { %17527 = vmatpush1.bf16.msra.mxu1 %v25901_v17  ;;  %v19147_v17 = vld [vmem:[#allocation8 + $0x58] sm:$0xff] (!%p21802_p1) }
 0xa1a   : > { %17528 = vmatprep.subr.bf16.mxu1 %v25906_v63  ;;  %v19164_v63 = vld [vmem:[#allocation8 + $0xe0] sm:$0xff] (!%p21802_p1) }
 0xa1d   : > { %17529 = vmatpush1.bf16.msra.mxu1 %v25904_v33  ;;  %v19165_v33 = vld [vmem:[#allocation8 + $0xe8] sm:$0xff] (!%p21802_p1) }
 0xa20   : > { %17531 = vmatmul.mubr.bf16.vlgmr.msra.gmra.mrb[0].mxu1 %v3306_v31 }
 0xad4   : > { %v19090_v41 = vpop.f32.mrb[0].mxu0 }
 0xad5   : > { %v19092_v40 = vpop.f32.mrb[1].mxu0 }
 0xad6   : > { %v19094_v22 = vpop.f32.mrb[2].mxu0 }
 0xad7   : > { %v19095_v32 = vpop.f32.mrb[3].mxu0  ;;  %v21870_v22 = vpack.c.bf16 (!%p21802_p1), %v19165_v33, %v19164_v63 }
 0xad8   : > { %v19148_v32 = vld [vmem:[#allocation8 + $0x60] sm:$0xff] (!%p21802_p1) }
 0xaf3   : > { %v17532_v19 = vpop.f32.mrb[0].mxu1 }
 0xaf4   : > { %v21878_v5 = vadd.f32 %v19090_v41, %v17532_v19  ;;  %v17534_v59 = vpop.f32.mrb[1].mxu1  ;;  %v21868_v41 = vpack.c.bf16 (!%p21802_p1), %v19147_v17, %v19146_v23 }
 0xaf5   : > { %v21879_v39 = vadd.f32 %v19092_v40, %v17534_v59  ;;  %v17536_v11 = vpop.f32.mrb[2].mxu1 }
 0xaf6   : > { %v17537_v48 = vpop.f32.mrb[3].mxu1  ;;  %21869 = vmatpush3.bf16.msra.mxu0 (!%p21802_p1), %v21868_v41  ;;  %v19150_v11 = vld [vmem:[#allocation8 + $0x70] sm:$0xff] (!%p21802_p1) }
 0xaf7   : > { %v19099_v0 = vcombine.low %v21878_v5, %v21879_v39  ;;  %19113 = sbr.rel (%p21802_p1) target bundleno = 3225 (0xc99), region = 76  ;;  %v21872_v5 = vpack.c.bf16 (!%p21802_p1), %v19149_v47, %v19148_v32  ;;  %21871 = vmatprep.subr.bf16.mxu0 (!%p21802_p1), %v21870_v22  ;;  %v21874_v39 = vpack.c.bf16 (!%p21802_p1), %v19167_v25, %v19166_v56  ;;  %v19151_v48 = vld [vmem:[#allocation8 + $0x78] sm:$0xff] (!%p21802_p1) }
 0xaf9   : > { %v19106_v53 = vrot.slane %v19099_v0, %v29541_v7  ;;  %v21876_v0 = vpack.c.bf16 (!%p21802_p1), %v19151_v48, %v19150_v11 }
 0xafa   : > { %21873 = vmatpush3.bf16.msra.mxu0 (!%p21802_p1), %v21872_v5 }
 0xafb   : > { %v19108_v37 = vadd.f32 %v19106_v53, %v365_v13  ;;  %21875 = vmatprep.subr.bf16.mxu0 (!%p21802_p1), %v21874_v39  ;;  %v21803_v53 = vld [vmem:[#allocation9] ss:$0 sm:$0xff] (!%p21802_p1) }
 0xafd   : > { %19109 = vst [vmem:[#allocation2] sm:$0xf] %v19108_v37 }
 0xafe   : > { %21877 = vmatpush3.bf16.msra.mxu0 %v21876_v0 }
 0xb04   : > { %v19114_v43 = vld [vmem:[#allocation2] sm:$0xf] }
 0xb05   : > { %v19134_v31 = vadd.f32 %v19132_v36, %v19114_v43 }
 0xb07   : > { %v19135_v40 = vmax.f32 %v19134_v31, 0.0 }
 0xb09   : > { %v19182_v19 = vrot.slane %v19135_v40, %v29541_v7 }
 0xb0b   : > { %v19183_v59 = vcombine.high %v19182_v19, %v19182_v19 }
 0xb0d   : > { %19250 = vmatprep.mubr.f32.mxu0 %v19183_v59 }
 0xb0e   : > { %19251 = vmatmul.mubr.f32.vlgmr.msra.gmra.mrb[0].mxu0 %v19182_v19 }
 0xbe1   : > { %v21843_v13 = vpop.f32.mrb[0].mxu0 }
 0xbe2   : > { %v21844_v37 = vpop.f32.mrb[1].mxu0 }
 0xbe3   : > { %v21845_v51 = vadd.f32 %v21844_v37, %v21843_v13 }
 0xbe5   : > { %v19253_v9 = vadd.f32 %v21845_v51, %v21803_v53 }
 0xbe7   : > { %v19256_v7 = vmax.f32 %v19253_v9, 0.0 }
 0xbe9   : > { %v19264_v46 = vmul.f32 %v21804_v35, %v19256_v7 }
 0xbeb   : > { %v19266_v4 = vsel %vm19265_vm0, %v19264_v46, 0.0 }
 0xbec   : > { %19267 = vadd.xlane.f32.xlu0 %v19266_v4 }
 0xc79   : > { %v19268_v44 = vpop.xlane.xlu0 %19267 }
 0xc7a   : > { %v19276_v57 = vadd.f32 %v21805_v60, %v19268_v44 }
 0xc7c   : > { %v19277_v1 = vsub.f32 0.0, %v19276_v57 }
 0xc7e   : > { %v19278_v10 = vmul.f32 1.442695, %v19277_v1 }
 0xc80   : > { %25916 = vpow2.f32 %v19278_v10 }
 0xc8a   : > { %v25917_v42 = vpop.eup %25916 }
 0xc8b   : > { %v19280_v58 = vadd.f32 1.0, %v25917_v42 }
 0xc8d   : > { %25918 = vrcp.f32 %v19280_v58 }
 0xc97   : > { %v25919_v26 = vpop.eup %25918 }
 0xc98   : > { %19284 = vst.msk [vmem:[%s29572_s7] sm:$0x3] %vm19283_vm1, %v25919_v26 }
 0xc99 PF: > { %p21_p4 = scmp.ge.s32.totalorder %s26310_s21, 6   ;;  %s29588_s26 = smov %s26105_s27 }
 0xc9a   : > { %s29589_s27 = smov %s26109_s28  ;;  %s29590_s28 = smov %s26321_s23 }
 0xc9b   : > { %s29591_s29 = smov %s26310_s21  ;;  %23 = sbr.rel (!%p21_p4) target bundleno = 8 (0x8), region = 111 }
 0xca2   :  { %19296 = vsyncpa [#allocation5], 1 }
 0xca3   :  { %19298 = vsyncpa [#allocation5 + $0x1], 1 }
 0xca4   :  { %19299 = vsyncpa [#allocation7], 1 }
 0xca5   :  { %19300 = vsyncpa [#allocation10], 1 }

</bundles_post_ra>
